<compile_context>
chip_gen: v7x
topology: tpu7x:2x2x1
jax: 0.10.0
libtpu: 0.0.40
codegen_flags: <defaults>
</compile_context>

<pallas_src>
import numpy as np
import jax
import jax.numpy as jnp
from jax import lax
from jax.experimental import pallas as pl
from jax.experimental.pallas import tpu as pltpu


# ----- geometry implied by the PyTorch module (fc1 in-features = 64*10*7) -----
H0, W0 = 40, 28          # input spatial size
Hp1, Wp1 = 20, 14        # after pool 1
Hp2, Wp2 = 10, 7         # after pool 2
Q1 = Hp1 * Wp1           # 280 pooled-once positions
Q2 = Hp2 * Wp2           # 70  pooled-twice positions
C1, C2 = 32, 64          # conv channel counts
K1 = 9                   # conv1 taps (Cin = 1)
K2 = 9 * C1              # 288 = conv2 patch length
FC_IN = C2 * Q2          # 4480
FC_HID = 128


# --------------------------------------------------------------------------- #
#                                Pallas kernel                                #
# --------------------------------------------------------------------------- #

def _shift_lanes(x, delta):
    """out[:, q] = x[:, (q + delta) % Q]   (static circular lane shift)."""
    q = x.shape[-1]
    d = delta % q
    if d == 0:
        return x
    return jnp.concatenate([x[:, d:], x[:, :d]], axis=-1)


def fused_cnn_kernel(p1_ref, w1_ref, b1_ref, w2_ref, b2_ref, m2_ref,
                     bf1_ref, wf2_ref, bf2_ref, wcat_hbm,
                     out_ref,
                     wcat_vmem, dma_sem):
    """Whole CNN forward for one sample; every intermediate stays in VMEM."""
    # Kick off the fc1-weight fetch first so its DMA overlaps the conv work.
    wcat_copy = pltpu.make_async_copy(wcat_hbm, wcat_vmem, dma_sem.at[0])
    wcat_copy.start()

    # ---------- conv1 (1->32, 3x3, pad 1) + ReLU + 2x2 max pool ----------
    # p1_ref[0]: (9, 1120) lane-dense im2col patches, columns ordered
    #            t1*280 + t2*70 + u*7 + v  (t1 = pool-1 member, t2 = pool-2 member).
    y1pre = jnp.dot(w1_ref[...], p1_ref[0],
                    preferred_element_type=jnp.float32)                 # (32, 1120)
    y1 = jnp.maximum(jnp.maximum(y1pre[:, 0:Q1], y1pre[:, Q1:2 * Q1]),
                     jnp.maximum(y1pre[:, 2 * Q1:3 * Q1], y1pre[:, 3 * Q1:4 * Q1]))
    y1 = jnp.maximum(y1 + b1_ref[...], 0.0)                             # (32, 280)
    # Split into the four pool-2 parity blocks (each (32, 70)).
    y1_blk = [y1[:, t * Q2:(t + 1) * Q2] for t in range(4)]

    # ---------- conv2 (32->64, 3x3, pad 1) + ReLU + 2x2 max pool ----------
    # Build im2col patches entirely in VMEM via static lane shifts of the resident
    # y1 (the 9x-expanded patch tensor never touches HBM): one (288, 70) patch
    # matrix per 2x2-pool member -> 4 MXU matmuls -> elementwise max.
    accs = []
    for a2 in range(2):
        for b2 in range(2):
            pieces = []
            for dy in range(3):
                for dx in range(3):
                    alpha, a_src = divmod(a2 + dy - 1, 2)
                    beta, b_src = divmod(b2 + dx - 1, 2)
                    delta = alpha * Wp2 + beta
                    src = y1_blk[2 * a_src + b_src]                     # (32, 70)
                    piece = _shift_lanes(src, delta)
                    midx = (alpha + 1) * 3 + (beta + 1)
                    piece = piece * m2_ref[midx:midx + 1, :]            # zero padding
                    pieces.append(piece)
            patches_t = jnp.concatenate(pieces, axis=0)                 # (288, 70)
            accs.append(jnp.dot(w2_ref[...], patches_t,
                                preferred_element_type=jnp.float32))    # (64, 70)
    y2 = jnp.maximum(jnp.maximum(accs[0], accs[1]),
                     jnp.maximum(accs[2], accs[3]))
    y2 = jnp.maximum(y2 + b2_ref[...], 0.0)                             # (64, 70)
    # y2[c, u*7 + v] is already in PyTorch's x.view(-1, 64*10*7) flatten order.

    # ---------- fc1 + ReLU + fc2 ----------
    wcat_copy.wait()
    # wcat[p, c*128 + h] = fc1_w[c*70 + p, h]  (block-diagonal packing), so this one
    # lane-dense matmul computes every  sum_p y2[c, p] * fc1_w[c*70 + p, h]  and the
    # per-channel contributions sit in vreg-aligned (1, 128) diagonal blocks.
    prods = jnp.dot(y2.astype(jnp.bfloat16), wcat_vmem[...],
                    preferred_element_type=jnp.float32)                 # (64, 64*128)
    fc1 = prods[0:1, 0:FC_HID]
    for c in range(1, C2):
        fc1 = fc1 + prods[c:c + 1, c * FC_HID:(c + 1) * FC_HID]
    fc1 = jnp.maximum(fc1 + bf1_ref[...], 0.0)                          # (1, 128)
    logits = jnp.dot(fc1, wf2_ref[...],
                     preferred_element_type=jnp.float32) + bf2_ref[...]
    out_ref[0] = logits.astype(out_ref.dtype)


# --------------------------------------------------------------------------- #
#                         host glue (tiny tensors only)                        #
# --------------------------------------------------------------------------- #

def _conv1_patches(x):
    """(N,1,40,28) -> (N, 9, 1120) lane-dense conv1 im2col patches.

    Columns are pre-permuted so both 2x2 max-pools in the network reduce to maxima
    of contiguous lane slices:
        pixel (h, w) = (4u + 2*a2 + a1, 4v + 2*b2 + b1)
        column       = (2*a1 + b1)*280 + (2*a2 + b2)*70 + u*7 + v
    """
    n = x.shape[0]
    img = x[:, 0]
    xp = jnp.pad(img, ((0, 0), (1, 1), (1, 1)))
    cols = [xp[:, dy:dy + H0, dx:dx + W0] for dy in range(3) for dx in range(3)]
    p = jnp.stack(cols, axis=1)                               # (N, 9, 40, 28)
    p = p.reshape(n, 9, Hp2, 2, 2, Wp2, 2, 2)                 # h -> (u, a2, a1), w -> (v, b2, b1)
    p = jnp.transpose(p, (0, 1, 4, 7, 3, 6, 2, 5))            # (N, 9, a1, b1, a2, b2, u, v)
    return p.reshape(n, 9, H0 * W0)


def _build_conv2_masks():
    """(9, 70) 0/1 masks, indexed by (alpha+1)*3 + (beta+1), zeroing conv2's
    out-of-range (zero-padded) neighbours on the 10x7 pooled grid."""
    m = np.zeros((9, Q2), np.float32)
    for alpha in (-1, 0, 1):
        for beta in (-1, 0, 1):
            idx = (alpha + 1) * 3 + (beta + 1)
            for u in range(Hp2):
                for v in range(Wp2):
                    if 0 <= u + alpha < Hp2 and 0 <= v + beta < Wp2:
                        m[idx, u * Wp2 + v] = 1.0
    return m


_CONV2_MASKS = _build_conv2_masks()


def cnn_forward(x, params):
    n = x.shape[0]
    num_classes = params["wf2"].shape[1]
    p1 = _conv1_patches(x)                                    # (N, 9, 1120)
    masks = jnp.asarray(_CONV2_MASKS)                         # (9, 70)

    out = pl.pallas_call(
        fused_cnn_kernel,
        out_shape=jax.ShapeDtypeStruct((n, 1, num_classes), jnp.float32),
        grid=(n,),
        in_specs=[
            pl.BlockSpec((1, K1, H0 * W0), lambda i: (i, 0, 0)),   # conv1 patches
            pl.BlockSpec((C1, K1), lambda i: (0, 0)),              # conv1 weight
            pl.BlockSpec((C1, 1), lambda i: (0, 0)),               # conv1 bias
            pl.BlockSpec((C2, K2), lambda i: (0, 0)),              # conv2 weight
            pl.BlockSpec((C2, 1), lambda i: (0, 0)),               # conv2 bias
            pl.BlockSpec((9, Q2), lambda i: (0, 0)),               # conv2 pad masks
            pl.BlockSpec((1, FC_HID), lambda i: (0, 0)),           # fc1 bias
            pl.BlockSpec((FC_HID, num_classes), lambda i: (0, 0)),  # fc2 weight
            pl.BlockSpec((1, num_classes), lambda i: (0, 0)),      # fc2 bias
            pl.BlockSpec(memory_space=pl.ANY),                     # fc1 weight stays in HBM
        ],
        out_specs=pl.BlockSpec((1, 1, num_classes), lambda i: (i, 0, 0)),
        scratch_shapes=[
            pltpu.VMEM((Q2, C2 * FC_HID), jnp.bfloat16),           # fc1 weight landing buffer
            pltpu.SemaphoreType.DMA((1,)),
        ],
        compiler_params=pltpu.CompilerParams(
            dimension_semantics=("parallel",)),                    # batch across cores on v7x
    )(p1, params["w1t"], params["b1"], params["w2t"], params["b2"], masks,
      params["bf1"], params["wf2"], params["bf2"], params["wcat"])
    return out[:, 0, :]


def init_params(key, num_classes):
    """PyTorch-style U(-1/sqrt(fan_in), 1/sqrt(fan_in)) init, stored pre-packed
    in the layouts the kernel consumes."""
    ks = jax.random.split(key, 8)

    def u(k, shape, fan_in):
        bound = 1.0 / np.sqrt(fan_in)
        return jax.random.uniform(k, shape, jnp.float32, -bound, bound)

    w1t = u(ks[0], (C1, K1), K1)           # conv1 weight, packed [co, dy*3 + dx]   (Cin = 1)
    b1 = u(ks[1], (C1, 1), K1)
    w2t = u(ks[2], (C2, K2), K2)           # conv2 weight, packed [co, (dy*3 + dx)*32 + ci]
    b2 = u(ks[3], (C2, 1), K2)
    wf1 = u(ks[4], (FC_IN, FC_HID), FC_IN)  # fc1 weight, logical [c*70 + p, h]
    bf1 = u(ks[5], (1, FC_HID), FC_IN)
    wf2 = u(ks[6], (FC_HID, num_classes), FC_HID)
    bf2 = u(ks[7], (1, num_classes), FC_HID)
    # Block-diagonal packing for the kernel: wcat[p, c*128 + h] = wf1[c*70 + p, h];
    # stored bf16 to halve the model's only large HBM transfer.
    wcat = (wf1.reshape(C2, Q2, FC_HID).transpose(1, 0, 2)
               .reshape(Q2, C2 * FC_HID).astype(jnp.bfloat16))
    return dict(w1t=w1t, b1=b1, w2t=w2t, b2=b2, wcat=wcat,
                bf1=bf1, wf2=wf2, bf2=bf2)


def reference_forward(x, params):
    """Plain-JAX reference with the exact PyTorch forward semantics (self-check only)."""
    n = x.shape[0]
    w1 = params["w1t"].reshape(C1, 1, 3, 3)                              # OIHW
    w2 = params["w2t"].reshape(C2, 3, 3, C1).transpose(0, 3, 1, 2)       # OIHW
    wf1 = (params["wcat"].astype(jnp.float32)
           .reshape(Q2, C2, FC_HID).transpose(1, 0, 2).reshape(FC_IN, FC_HID))
    dn = ("NCHW", "OIHW", "NCHW")
    hi = lax.Precision.HIGHEST
    y = lax.conv_general_dilated(x, w1, (1, 1), "SAME",
                                 dimension_numbers=dn, precision=hi)
    y = jnp.maximum(y + params["b1"].reshape(1, C1, 1, 1), 0.0)
    y = lax.reduce_window(y, -jnp.inf, lax.max, (1, 1, 2, 2), (1, 1, 2, 2), "VALID")
    y = lax.conv_general_dilated(y, w2, (1, 1), "SAME",
                                 dimension_numbers=dn, precision=hi)
    y = jnp.maximum(y + params["b2"].reshape(1, C2, 1, 1), 0.0)
    y = lax.reduce_window(y, -jnp.inf, lax.max, (1, 1, 2, 2), (1, 1, 2, 2), "VALID")
    feat = y.reshape(n, FC_IN)                                           # (C, H, W) flatten order
    h = jnp.maximum(jnp.dot(feat, wf1, precision=hi) + params["bf1"], 0.0)
    return jnp.dot(h, params["wf2"], precision=hi) + params["bf2"]


if __name__ == "__main__":
    num_classes = 10
    key = jax.random.PRNGKey(0)
    kx, kp = jax.random.split(key)

    # Input is NCHW (PyTorch convention); 40x28 is what fc1's 64*10*7 in-features imply.
    x = jax.random.normal(kx, (2, 1, H0, W0), jnp.float32)
    params = init_params(kp, num_classes)

    out = jax.jit(cnn_forward)(x, params)
    out = jax.block_until_ready(out)
    assert out.shape == (2, num_classes) and out.dtype == jnp.float32

    # Numerical self-check against a plain-JAX reference (bf16 fc1 weight => loose tol).
    ref = jax.block_until_ready(jax.jit(reference_forward)(x, params))
    np.testing.assert_allclose(np.asarray(out), np.asarray(ref), rtol=2e-2, atol=2e-2)

    print("KERNEL_OK")
</pallas_src>

<mosaic_0001>
module attributes {stable_mosaic.version = 11 : i64} {
  func.func @fused_cnn_kernel(%arg0: i32, %arg1: memref<1x9x1120xf32, #tpu.memory_space<vmem>>, %arg2: memref<32x9xf32, #tpu.memory_space<vmem>>, %arg3: memref<32x1xf32, #tpu.memory_space<vmem>>, %arg4: memref<64x288xf32, #tpu.memory_space<vmem>>, %arg5: memref<64x1xf32, #tpu.memory_space<vmem>>, %arg6: memref<9x70xf32, #tpu.memory_space<vmem>>, %arg7: memref<1x128xf32, #tpu.memory_space<vmem>>, %arg8: memref<128x10xf32, #tpu.memory_space<vmem>>, %arg9: memref<1x10xf32, #tpu.memory_space<vmem>>, %arg10: memref<70x8192xbf16, #tpu.memory_space<any>>, %arg11: memref<1x1x10xf32, #tpu.memory_space<vmem>>, %arg12: memref<70x8192xbf16, #tpu.memory_space<vmem>>, %arg13: memref<1x!tpu.dma_semaphore, #tpu.memory_space<semaphore_mem>>) attributes {dimension_semantics = [#tpu.dimension_semantics<parallel>], iteration_bounds = array<i64: 2>, scalar_prefetch = 0 : i64, scratch_operands = 2 : i64, tpu.core_type = #tpu.core_type<tc>, window_params = [{transform_indices = @transform_0, window_bounds = array<i64: 1, 9, 1120>}, {pipeline_mode = #tpu.pipeline_mode<synchronous>, transform_indices = @transform_1, window_bounds = array<i64: 32, 9>}, {pipeline_mode = #tpu.pipeline_mode<synchronous>, transform_indices = @transform_2, window_bounds = array<i64: 32, 1>}, {pipeline_mode = #tpu.pipeline_mode<synchronous>, transform_indices = @transform_3, window_bounds = array<i64: 64, 288>}, {pipeline_mode = #tpu.pipeline_mode<synchronous>, transform_indices = @transform_4, window_bounds = array<i64: 64, 1>}, {pipeline_mode = #tpu.pipeline_mode<synchronous>, transform_indices = @transform_5, window_bounds = array<i64: 9, 70>}, {pipeline_mode = #tpu.pipeline_mode<synchronous>, transform_indices = @transform_6, window_bounds = array<i64: 1, 128>}, {pipeline_mode = #tpu.pipeline_mode<synchronous>, transform_indices = @transform_7, window_bounds = array<i64: 128, 10>}, {pipeline_mode = #tpu.pipeline_mode<synchronous>, transform_indices = @transform_8, window_bounds = array<i64: 1, 10>}, {}, {transform_indices = @transform_10, window_bounds = array<i64: 1, 1, 10>}]} {
    %c0_i32 = arith.constant 0 : i32
    %0 = tpu.memref_slice %arg13[%c0_i32] : memref<1x!tpu.dma_semaphore, #tpu.memory_space<semaphore_mem>> -> memref<1x!tpu.dma_semaphore, #tpu.memory_space<semaphore_mem>>
    %1 = tpu.memref_squeeze %0 : memref<1x!tpu.dma_semaphore, #tpu.memory_space<semaphore_mem>> -> memref<!tpu.dma_semaphore, #tpu.memory_space<semaphore_mem>>
    tpu.enqueue_dma source(%arg10 : memref<70x8192xbf16, #tpu.memory_space<any>>) target(%arg12 : memref<70x8192xbf16, #tpu.memory_space<vmem>>) target_semaphore(%1 : memref<!tpu.dma_semaphore, #tpu.memory_space<semaphore_mem>>)
    %c0 = arith.constant 0 : index
    %c0_0 = arith.constant 0 : index
    %2 = vector.load %arg2[%c0, %c0_0] : memref<32x9xf32, #tpu.memory_space<vmem>>, vector<32x9xf32>
    %c0_1 = arith.constant 0 : index
    %c0_2 = arith.constant 0 : index
    %c0_3 = arith.constant 0 : index
    %3 = vector.load %arg1[%c0_1, %c0_2, %c0_3] : memref<1x9x1120xf32, #tpu.memory_space<vmem>>, vector<1x9x1120xf32>
    %4 = vector.shape_cast %3 : vector<1x9x1120xf32> to vector<9x1120xf32>
    %cst = arith.constant dense<0.000000e+00> : vector<32x1120xf32>
    %5 = tpu.matmul %2, %4, %cst {dimension_numbers = #tpu.dot_dimension_numbers<[1], [0], [0], [1], [0, 0, 1, 1], [], []>} : vector<32x9xf32>, vector<9x1120xf32>, vector<32x1120xf32> -> vector<32x1120xf32>
    %6 = vector.extract_strided_slice %5 {offsets = [0, 0], sizes = [32, 280], strides = [1, 1]} : vector<32x1120xf32> to vector<32x280xf32>
    %7 = vector.extract_strided_slice %5 {offsets = [0, 280], sizes = [32, 280], strides = [1, 1]} : vector<32x1120xf32> to vector<32x280xf32>
    %8 = arith.maximumf %6, %7 : vector<32x280xf32>
    %9 = vector.extract_strided_slice %5 {offsets = [0, 560], sizes = [32, 280], strides = [1, 1]} : vector<32x1120xf32> to vector<32x280xf32>
    %10 = vector.extract_strided_slice %5 {offsets = [0, 840], sizes = [32, 280], strides = [1, 1]} : vector<32x1120xf32> to vector<32x280xf32>
    %11 = arith.maximumf %9, %10 : vector<32x280xf32>
    %12 = arith.maximumf %8, %11 : vector<32x280xf32>
    %c0_4 = arith.constant 0 : index
    %c0_5 = arith.constant 0 : index
    %13 = vector.load %arg3[%c0_4, %c0_5] : memref<32x1xf32, #tpu.memory_space<vmem>>, vector<32x1xf32>
    %14 = vector.broadcast %13 : vector<32x1xf32> to vector<32x280xf32>
    %15 = arith.addf %12, %14 : vector<32x280xf32>
    %cst_6 = arith.constant 0.000000e+00 : f32
    %16 = vector.broadcast %cst_6 : f32 to vector<32x280xf32>
    %17 = arith.maximumf %15, %16 : vector<32x280xf32>
    %18 = vector.extract_strided_slice %17 {offsets = [0, 0], sizes = [32, 70], strides = [1, 1]} : vector<32x280xf32> to vector<32x70xf32>
    %19 = vector.extract_strided_slice %17 {offsets = [0, 70], sizes = [32, 70], strides = [1, 1]} : vector<32x280xf32> to vector<32x70xf32>
    %20 = vector.extract_strided_slice %17 {offsets = [0, 140], sizes = [32, 70], strides = [1, 1]} : vector<32x280xf32> to vector<32x70xf32>
    %21 = vector.extract_strided_slice %17 {offsets = [0, 210], sizes = [32, 70], strides = [1, 1]} : vector<32x280xf32> to vector<32x70xf32>
    %22 = vector.extract_strided_slice %21 {offsets = [0, 62], sizes = [32, 8], strides = [1, 1]} : vector<32x70xf32> to vector<32x8xf32>
    %23 = vector.extract_strided_slice %21 {offsets = [0, 0], sizes = [32, 62], strides = [1, 1]} : vector<32x70xf32> to vector<32x62xf32>
    %24 = tpu.concatenate %22, %23 in 1 : vector<32x8xf32>, vector<32x62xf32> -> vector<32x70xf32>
    %c0_7 = arith.constant 0 : index
    %c0_8 = arith.constant 0 : index
    %25 = vector.load %arg6[%c0_7, %c0_8] : memref<9x70xf32, #tpu.memory_space<vmem>>, vector<1x70xf32>
    %26 = vector.broadcast %25 : vector<1x70xf32> to vector<32x70xf32>
    %27 = arith.mulf %24, %26 : vector<32x70xf32>
    %28 = vector.extract_strided_slice %20 {offsets = [0, 63], sizes = [32, 7], strides = [1, 1]} : vector<32x70xf32> to vector<32x7xf32>
    %29 = vector.extract_strided_slice %20 {offsets = [0, 0], sizes = [32, 63], strides = [1, 1]} : vector<32x70xf32> to vector<32x63xf32>
    %30 = tpu.concatenate %28, %29 in 1 : vector<32x7xf32>, vector<32x63xf32> -> vector<32x70xf32>
    %c1 = arith.constant 1 : index
    %c0_9 = arith.constant 0 : index
    %31 = vector.load %arg6[%c1, %c0_9] : memref<9x70xf32, #tpu.memory_space<vmem>>, vector<1x70xf32>
    %32 = vector.broadcast %31 : vector<1x70xf32> to vector<32x70xf32>
    %33 = arith.mulf %30, %32 : vector<32x70xf32>
    %34 = vector.extract_strided_slice %21 {offsets = [0, 63], sizes = [32, 7], strides = [1, 1]} : vector<32x70xf32> to vector<32x7xf32>
    %35 = vector.extract_strided_slice %21 {offsets = [0, 0], sizes = [32, 63], strides = [1, 1]} : vector<32x70xf32> to vector<32x63xf32>
    %36 = tpu.concatenate %34, %35 in 1 : vector<32x7xf32>, vector<32x63xf32> -> vector<32x70xf32>
    %c1_10 = arith.constant 1 : index
    %c0_11 = arith.constant 0 : index
    %37 = vector.load %arg6[%c1_10, %c0_11] : memref<9x70xf32, #tpu.memory_space<vmem>>, vector<1x70xf32>
    %38 = vector.broadcast %37 : vector<1x70xf32> to vector<32x70xf32>
    %39 = arith.mulf %36, %38 : vector<32x70xf32>
    %40 = vector.extract_strided_slice %19 {offsets = [0, 69], sizes = [32, 1], strides = [1, 1]} : vector<32x70xf32> to vector<32x1xf32>
    %41 = vector.extract_strided_slice %19 {offsets = [0, 0], sizes = [32, 69], strides = [1, 1]} : vector<32x70xf32> to vector<32x69xf32>
    %42 = tpu.concatenate %40, %41 in 1 : vector<32x1xf32>, vector<32x69xf32> -> vector<32x70xf32>
    %c3 = arith.constant 3 : index
    %c0_12 = arith.constant 0 : index
    %43 = vector.load %arg6[%c3, %c0_12] : memref<9x70xf32, #tpu.memory_space<vmem>>, vector<1x70xf32>
    %44 = vector.broadcast %43 : vector<1x70xf32> to vector<32x70xf32>
    %45 = arith.mulf %42, %44 : vector<32x70xf32>
    %c4 = arith.constant 4 : index
    %c0_13 = arith.constant 0 : index
    %46 = vector.load %arg6[%c4, %c0_13] : memref<9x70xf32, #tpu.memory_space<vmem>>, vector<1x70xf32>
    %47 = vector.broadcast %46 : vector<1x70xf32> to vector<32x70xf32>
    %48 = arith.mulf %18, %47 : vector<32x70xf32>
    %c4_14 = arith.constant 4 : index
    %c0_15 = arith.constant 0 : index
    %49 = vector.load %arg6[%c4_14, %c0_15] : memref<9x70xf32, #tpu.memory_space<vmem>>, vector<1x70xf32>
    %50 = vector.broadcast %49 : vector<1x70xf32> to vector<32x70xf32>
    %51 = arith.mulf %19, %50 : vector<32x70xf32>
    %52 = vector.extract_strided_slice %21 {offsets = [0, 69], sizes = [32, 1], strides = [1, 1]} : vector<32x70xf32> to vector<32x1xf32>
    %53 = vector.extract_strided_slice %21 {offsets = [0, 0], sizes = [32, 69], strides = [1, 1]} : vector<32x70xf32> to vector<32x69xf32>
    %54 = tpu.concatenate %52, %53 in 1 : vector<32x1xf32>, vector<32x69xf32> -> vector<32x70xf32>
    %c3_16 = arith.constant 3 : index
    %c0_17 = arith.constant 0 : index
    %55 = vector.load %arg6[%c3_16, %c0_17] : memref<9x70xf32, #tpu.memory_space<vmem>>, vector<1x70xf32>
    %56 = vector.broadcast %55 : vector<1x70xf32> to vector<32x70xf32>
    %57 = arith.mulf %54, %56 : vector<32x70xf32>
    %c4_18 = arith.constant 4 : index
    %c0_19 = arith.constant 0 : index
    %58 = vector.load %arg6[%c4_18, %c0_19] : memref<9x70xf32, #tpu.memory_space<vmem>>, vector<1x70xf32>
    %59 = vector.broadcast %58 : vector<1x70xf32> to vector<32x70xf32>
    %60 = arith.mulf %20, %59 : vector<32x70xf32>
    %c4_20 = arith.constant 4 : index
    %c0_21 = arith.constant 0 : index
    %61 = vector.load %arg6[%c4_20, %c0_21] : memref<9x70xf32, #tpu.memory_space<vmem>>, vector<1x70xf32>
    %62 = vector.broadcast %61 : vector<1x70xf32> to vector<32x70xf32>
    %63 = arith.mulf %21, %62 : vector<32x70xf32>
    %64 = tpu.concatenate %27, %33, %39, %45, %48, %51, %57, %60, %63 in 0 : vector<32x70xf32>, vector<32x70xf32>, vector<32x70xf32>, vector<32x70xf32>, vector<32x70xf32>, vector<32x70xf32>, vector<32x70xf32>, vector<32x70xf32>, vector<32x70xf32> -> vector<288x70xf32>
    %c0_22 = arith.constant 0 : index
    %c0_23 = arith.constant 0 : index
    %65 = vector.load %arg4[%c0_22, %c0_23] : memref<64x288xf32, #tpu.memory_space<vmem>>, vector<64x288xf32>
    %cst_24 = arith.constant dense<0.000000e+00> : vector<64x70xf32>
    %66 = tpu.matmul %65, %64, %cst_24 {dimension_numbers = #tpu.dot_dimension_numbers<[1], [0], [0], [1], [0, 0, 1, 1], [], []>} : vector<64x288xf32>, vector<288x70xf32>, vector<64x70xf32> -> vector<64x70xf32>
    %67 = vector.extract_strided_slice %20 {offsets = [0, 63], sizes = [32, 7], strides = [1, 1]} : vector<32x70xf32> to vector<32x7xf32>
    %68 = vector.extract_strided_slice %20 {offsets = [0, 0], sizes = [32, 63], strides = [1, 1]} : vector<32x70xf32> to vector<32x63xf32>
    %69 = tpu.concatenate %67, %68 in 1 : vector<32x7xf32>, vector<32x63xf32> -> vector<32x70xf32>
    %c1_25 = arith.constant 1 : index
    %c0_26 = arith.constant 0 : index
    %70 = vector.load %arg6[%c1_25, %c0_26] : memref<9x70xf32, #tpu.memory_space<vmem>>, vector<1x70xf32>
    %71 = vector.broadcast %70 : vector<1x70xf32> to vector<32x70xf32>
    %72 = arith.mulf %69, %71 : vector<32x70xf32>
    %73 = vector.extract_strided_slice %21 {offsets = [0, 63], sizes = [32, 7], strides = [1, 1]} : vector<32x70xf32> to vector<32x7xf32>
    %74 = vector.extract_strided_slice %21 {offsets = [0, 0], sizes = [32, 63], strides = [1, 1]} : vector<32x70xf32> to vector<32x63xf32>
    %75 = tpu.concatenate %73, %74 in 1 : vector<32x7xf32>, vector<32x63xf32> -> vector<32x70xf32>
    %c1_27 = arith.constant 1 : index
    %c0_28 = arith.constant 0 : index
    %76 = vector.load %arg6[%c1_27, %c0_28] : memref<9x70xf32, #tpu.memory_space<vmem>>, vector<1x70xf32>
    %77 = vector.broadcast %76 : vector<1x70xf32> to vector<32x70xf32>
    %78 = arith.mulf %75, %77 : vector<32x70xf32>
    %79 = vector.extract_strided_slice %20 {offsets = [0, 64], sizes = [32, 6], strides = [1, 1]} : vector<32x70xf32> to vector<32x6xf32>
    %80 = vector.extract_strided_slice %20 {offsets = [0, 0], sizes = [32, 64], strides = [1, 1]} : vector<32x70xf32> to vector<32x64xf32>
    %81 = tpu.concatenate %79, %80 in 1 : vector<32x6xf32>, vector<32x64xf32> -> vector<32x70xf32>
    %c2 = arith.constant 2 : index
    %c0_29 = arith.constant 0 : index
    %82 = vector.load %arg6[%c2, %c0_29] : memref<9x70xf32, #tpu.memory_space<vmem>>, vector<1x70xf32>
    %83 = vector.broadcast %82 : vector<1x70xf32> to vector<32x70xf32>
    %84 = arith.mulf %81, %83 : vector<32x70xf32>
    %c4_30 = arith.constant 4 : index
    %c0_31 = arith.constant 0 : index
    %85 = vector.load %arg6[%c4_30, %c0_31] : memref<9x70xf32, #tpu.memory_space<vmem>>, vector<1x70xf32>
    %86 = vector.broadcast %85 : vector<1x70xf32> to vector<32x70xf32>
    %87 = arith.mulf %18, %86 : vector<32x70xf32>
    %c4_32 = arith.constant 4 : index
    %c0_33 = arith.constant 0 : index
    %88 = vector.load %arg6[%c4_32, %c0_33] : memref<9x70xf32, #tpu.memory_space<vmem>>, vector<1x70xf32>
    %89 = vector.broadcast %88 : vector<1x70xf32> to vector<32x70xf32>
    %90 = arith.mulf %19, %89 : vector<32x70xf32>
    %91 = vector.extract_strided_slice %18 {offsets = [0, 1], sizes = [32, 69], strides = [1, 1]} : vector<32x70xf32> to vector<32x69xf32>
    %92 = vector.extract_strided_slice %18 {offsets = [0, 0], sizes = [32, 1], strides = [1, 1]} : vector<32x70xf32> to vector<32x1xf32>
    %93 = tpu.concatenate %91, %92 in 1 : vector<32x69xf32>, vector<32x1xf32> -> vector<32x70xf32>
    %c5 = arith.constant 5 : index
    %c0_34 = arith.constant 0 : index
    %94 = vector.load %arg6[%c5, %c0_34] : memref<9x70xf32, #tpu.memory_space<vmem>>, vector<1x70xf32>
    %95 = vector.broadcast %94 : vector<1x70xf32> to vector<32x70xf32>
    %96 = arith.mulf %93, %95 : vector<32x70xf32>
    %c4_35 = arith.constant 4 : index
    %c0_36 = arith.constant 0 : index
    %97 = vector.load %arg6[%c4_35, %c0_36] : memref<9x70xf32, #tpu.memory_space<vmem>>, vector<1x70xf32>
    %98 = vector.broadcast %97 : vector<1x70xf32> to vector<32x70xf32>
    %99 = arith.mulf %20, %98 : vector<32x70xf32>
    %c4_37 = arith.constant 4 : index
    %c0_38 = arith.constant 0 : index
    %100 = vector.load %arg6[%c4_37, %c0_38] : memref<9x70xf32, #tpu.memory_space<vmem>>, vector<1x70xf32>
    %101 = vector.broadcast %100 : vector<1x70xf32> to vector<32x70xf32>
    %102 = arith.mulf %21, %101 : vector<32x70xf32>
    %103 = vector.extract_strided_slice %20 {offsets = [0, 1], sizes = [32, 69], strides = [1, 1]} : vector<32x70xf32> to vector<32x69xf32>
    %104 = vector.extract_strided_slice %20 {offsets = [0, 0], sizes = [32, 1], strides = [1, 1]} : vector<32x70xf32> to vector<32x1xf32>
    %105 = tpu.concatenate %103, %104 in 1 : vector<32x69xf32>, vector<32x1xf32> -> vector<32x70xf32>
    %c5_39 = arith.constant 5 : index
    %c0_40 = arith.constant 0 : index
    %106 = vector.load %arg6[%c5_39, %c0_40] : memref<9x70xf32, #tpu.memory_space<vmem>>, vector<1x70xf32>
    %107 = vector.broadcast %106 : vector<1x70xf32> to vector<32x70xf32>
    %108 = arith.mulf %105, %107 : vector<32x70xf32>
    %109 = tpu.concatenate %72, %78, %84, %87, %90, %96, %99, %102, %108 in 0 : vector<32x70xf32>, vector<32x70xf32>, vector<32x70xf32>, vector<32x70xf32>, vector<32x70xf32>, vector<32x70xf32>, vector<32x70xf32>, vector<32x70xf32>, vector<32x70xf32> -> vector<288x70xf32>
    %c0_41 = arith.constant 0 : index
    %c0_42 = arith.constant 0 : index
    %110 = vector.load %arg4[%c0_41, %c0_42] : memref<64x288xf32, #tpu.memory_space<vmem>>, vector<64x288xf32>
    %cst_43 = arith.constant dense<0.000000e+00> : vector<64x70xf32>
    %111 = tpu.matmul %110, %109, %cst_43 {dimension_numbers = #tpu.dot_dimension_numbers<[1], [0], [0], [1], [0, 0, 1, 1], [], []>} : vector<64x288xf32>, vector<288x70xf32>, vector<64x70xf32> -> vector<64x70xf32>
    %112 = vector.extract_strided_slice %19 {offsets = [0, 69], sizes = [32, 1], strides = [1, 1]} : vector<32x70xf32> to vector<32x1xf32>
    %113 = vector.extract_strided_slice %19 {offsets = [0, 0], sizes = [32, 69], strides = [1, 1]} : vector<32x70xf32> to vector<32x69xf32>
    %114 = tpu.concatenate %112, %113 in 1 : vector<32x1xf32>, vector<32x69xf32> -> vector<32x70xf32>
    %c3_44 = arith.constant 3 : index
    %c0_45 = arith.constant 0 : index
    %115 = vector.load %arg6[%c3_44, %c0_45] : memref<9x70xf32, #tpu.memory_space<vmem>>, vector<1x70xf32>
    %116 = vector.broadcast %115 : vector<1x70xf32> to vector<32x70xf32>
    %117 = arith.mulf %114, %116 : vector<32x70xf32>
    %c4_46 = arith.constant 4 : index
    %c0_47 = arith.constant 0 : index
    %118 = vector.load %arg6[%c4_46, %c0_47] : memref<9x70xf32, #tpu.memory_space<vmem>>, vector<1x70xf32>
    %119 = vector.broadcast %118 : vector<1x70xf32> to vector<32x70xf32>
    %120 = arith.mulf %18, %119 : vector<32x70xf32>
    %c4_48 = arith.constant 4 : index
    %c0_49 = arith.constant 0 : index
    %121 = vector.load %arg6[%c4_48, %c0_49] : memref<9x70xf32, #tpu.memory_space<vmem>>, vector<1x70xf32>
    %122 = vector.broadcast %121 : vector<1x70xf32> to vector<32x70xf32>
    %123 = arith.mulf %19, %122 : vector<32x70xf32>
    %124 = vector.extract_strided_slice %21 {offsets = [0, 69], sizes = [32, 1], strides = [1, 1]} : vector<32x70xf32> to vector<32x1xf32>
    %125 = vector.extract_strided_slice %21 {offsets = [0, 0], sizes = [32, 69], strides = [1, 1]} : vector<32x70xf32> to vector<32x69xf32>
    %126 = tpu.concatenate %124, %125 in 1 : vector<32x1xf32>, vector<32x69xf32> -> vector<32x70xf32>
    %c3_50 = arith.constant 3 : index
    %c0_51 = arith.constant 0 : index
    %127 = vector.load %arg6[%c3_50, %c0_51] : memref<9x70xf32, #tpu.memory_space<vmem>>, vector<1x70xf32>
    %128 = vector.broadcast %127 : vector<1x70xf32> to vector<32x70xf32>
    %129 = arith.mulf %126, %128 : vector<32x70xf32>
    %c4_52 = arith.constant 4 : index
    %c0_53 = arith.constant 0 : index
    %130 = vector.load %arg6[%c4_52, %c0_53] : memref<9x70xf32, #tpu.memory_space<vmem>>, vector<1x70xf32>
    %131 = vector.broadcast %130 : vector<1x70xf32> to vector<32x70xf32>
    %132 = arith.mulf %20, %131 : vector<32x70xf32>
    %c4_54 = arith.constant 4 : index
    %c0_55 = arith.constant 0 : index
    %133 = vector.load %arg6[%c4_54, %c0_55] : memref<9x70xf32, #tpu.memory_space<vmem>>, vector<1x70xf32>
    %134 = vector.broadcast %133 : vector<1x70xf32> to vector<32x70xf32>
    %135 = arith.mulf %21, %134 : vector<32x70xf32>
    %136 = vector.extract_strided_slice %19 {offsets = [0, 6], sizes = [32, 64], strides = [1, 1]} : vector<32x70xf32> to vector<32x64xf32>
    %137 = vector.extract_strided_slice %19 {offsets = [0, 0], sizes = [32, 6], strides = [1, 1]} : vector<32x70xf32> to vector<32x6xf32>
    %138 = tpu.concatenate %136, %137 in 1 : vector<32x64xf32>, vector<32x6xf32> -> vector<32x70xf32>
    %c6 = arith.constant 6 : index
    %c0_56 = arith.constant 0 : index
    %139 = vector.load %arg6[%c6, %c0_56] : memref<9x70xf32, #tpu.memory_space<vmem>>, vector<1x70xf32>
    %140 = vector.broadcast %139 : vector<1x70xf32> to vector<32x70xf32>
    %141 = arith.mulf %138, %140 : vector<32x70xf32>
    %142 = vector.extract_strided_slice %18 {offsets = [0, 7], sizes = [32, 63], strides = [1, 1]} : vector<32x70xf32> to vector<32x63xf32>
    %143 = vector.extract_strided_slice %18 {offsets = [0, 0], sizes = [32, 7], strides = [1, 1]} : vector<32x70xf32> to vector<32x7xf32>
    %144 = tpu.concatenate %142, %143 in 1 : vector<32x63xf32>, vector<32x7xf32> -> vector<32x70xf32>
    %c7 = arith.constant 7 : index
    %c0_57 = arith.constant 0 : index
    %145 = vector.load %arg6[%c7, %c0_57] : memref<9x70xf32, #tpu.memory_space<vmem>>, vector<1x70xf32>
    %146 = vector.broadcast %145 : vector<1x70xf32> to vector<32x70xf32>
    %147 = arith.mulf %144, %146 : vector<32x70xf32>
    %148 = vector.extract_strided_slice %19 {offsets = [0, 7], sizes = [32, 63], strides = [1, 1]} : vector<32x70xf32> to vector<32x63xf32>
    %149 = vector.extract_strided_slice %19 {offsets = [0, 0], sizes = [32, 7], strides = [1, 1]} : vector<32x70xf32> to vector<32x7xf32>
    %150 = tpu.concatenate %148, %149 in 1 : vector<32x63xf32>, vector<32x7xf32> -> vector<32x70xf32>
    %c7_58 = arith.constant 7 : index
    %c0_59 = arith.constant 0 : index
    %151 = vector.load %arg6[%c7_58, %c0_59] : memref<9x70xf32, #tpu.memory_space<vmem>>, vector<1x70xf32>
    %152 = vector.broadcast %151 : vector<1x70xf32> to vector<32x70xf32>
    %153 = arith.mulf %150, %152 : vector<32x70xf32>
    %154 = tpu.concatenate %117, %120, %123, %129, %132, %135, %141, %147, %153 in 0 : vector<32x70xf32>, vector<32x70xf32>, vector<32x70xf32>, vector<32x70xf32>, vector<32x70xf32>, vector<32x70xf32>, vector<32x70xf32>, vector<32x70xf32>, vector<32x70xf32> -> vector<288x70xf32>
    %c0_60 = arith.constant 0 : index
    %c0_61 = arith.constant 0 : index
    %155 = vector.load %arg4[%c0_60, %c0_61] : memref<64x288xf32, #tpu.memory_space<vmem>>, vector<64x288xf32>
    %cst_62 = arith.constant dense<0.000000e+00> : vector<64x70xf32>
    %156 = tpu.matmul %155, %154, %cst_62 {dimension_numbers = #tpu.dot_dimension_numbers<[1], [0], [0], [1], [0, 0, 1, 1], [], []>} : vector<64x288xf32>, vector<288x70xf32>, vector<64x70xf32> -> vector<64x70xf32>
    %c4_63 = arith.constant 4 : index
    %c0_64 = arith.constant 0 : index
    %157 = vector.load %arg6[%c4_63, %c0_64] : memref<9x70xf32, #tpu.memory_space<vmem>>, vector<1x70xf32>
    %158 = vector.broadcast %157 : vector<1x70xf32> to vector<32x70xf32>
    %159 = arith.mulf %18, %158 : vector<32x70xf32>
    %c4_65 = arith.constant 4 : index
    %c0_66 = arith.constant 0 : index
    %160 = vector.load %arg6[%c4_65, %c0_66] : memref<9x70xf32, #tpu.memory_space<vmem>>, vector<1x70xf32>
    %161 = vector.broadcast %160 : vector<1x70xf32> to vector<32x70xf32>
    %162 = arith.mulf %19, %161 : vector<32x70xf32>
    %163 = vector.extract_strided_slice %18 {offsets = [0, 1], sizes = [32, 69], strides = [1, 1]} : vector<32x70xf32> to vector<32x69xf32>
    %164 = vector.extract_strided_slice %18 {offsets = [0, 0], sizes = [32, 1], strides = [1, 1]} : vector<32x70xf32> to vector<32x1xf32>
    %165 = tpu.concatenate %163, %164 in 1 : vector<32x69xf32>, vector<32x1xf32> -> vector<32x70xf32>
    %c5_67 = arith.constant 5 : index
    %c0_68 = arith.constant 0 : index
    %166 = vector.load %arg6[%c5_67, %c0_68] : memref<9x70xf32, #tpu.memory_space<vmem>>, vector<1x70xf32>
    %167 = vector.broadcast %166 : vector<1x70xf32> to vector<32x70xf32>
    %168 = arith.mulf %165, %167 : vector<32x70xf32>
    %c4_69 = arith.constant 4 : index
    %c0_70 = arith.constant 0 : index
    %169 = vector.load %arg6[%c4_69, %c0_70] : memref<9x70xf32, #tpu.memory_space<vmem>>, vector<1x70xf32>
    %170 = vector.broadcast %169 : vector<1x70xf32> to vector<32x70xf32>
    %171 = arith.mulf %20, %170 : vector<32x70xf32>
    %c4_71 = arith.constant 4 : index
    %c0_72 = arith.constant 0 : index
    %172 = vector.load %arg6[%c4_71, %c0_72] : memref<9x70xf32, #tpu.memory_space<vmem>>, vector<1x70xf32>
    %173 = vector.broadcast %172 : vector<1x70xf32> to vector<32x70xf32>
    %174 = arith.mulf %21, %173 : vector<32x70xf32>
    %175 = vector.extract_strided_slice %20 {offsets = [0, 1], sizes = [32, 69], strides = [1, 1]} : vector<32x70xf32> to vector<32x69xf32>
    %176 = vector.extract_strided_slice %20 {offsets = [0, 0], sizes = [32, 1], strides = [1, 1]} : vector<32x70xf32> to vector<32x1xf32>
    %177 = tpu.concatenate %175, %176 in 1 : vector<32x69xf32>, vector<32x1xf32> -> vector<32x70xf32>
    %c5_73 = arith.constant 5 : index
    %c0_74 = arith.constant 0 : index
    %178 = vector.load %arg6[%c5_73, %c0_74] : memref<9x70xf32, #tpu.memory_space<vmem>>, vector<1x70xf32>
    %179 = vector.broadcast %178 : vector<1x70xf32> to vector<32x70xf32>
    %180 = arith.mulf %177, %179 : vector<32x70xf32>
    %181 = vector.extract_strided_slice %18 {offsets = [0, 7], sizes = [32, 63], strides = [1, 1]} : vector<32x70xf32> to vector<32x63xf32>
    %182 = vector.extract_strided_slice %18 {offsets = [0, 0], sizes = [32, 7], strides = [1, 1]} : vector<32x70xf32> to vector<32x7xf32>
    %183 = tpu.concatenate %181, %182 in 1 : vector<32x63xf32>, vector<32x7xf32> -> vector<32x70xf32>
    %c7_75 = arith.constant 7 : index
    %c0_76 = arith.constant 0 : index
    %184 = vector.load %arg6[%c7_75, %c0_76] : memref<9x70xf32, #tpu.memory_space<vmem>>, vector<1x70xf32>
    %185 = vector.broadcast %184 : vector<1x70xf32> to vector<32x70xf32>
    %186 = arith.mulf %183, %185 : vector<32x70xf32>
    %187 = vector.extract_strided_slice %19 {offsets = [0, 7], sizes = [32, 63], strides = [1, 1]} : vector<32x70xf32> to vector<32x63xf32>
    %188 = vector.extract_strided_slice %19 {offsets = [0, 0], sizes = [32, 7], strides = [1, 1]} : vector<32x70xf32> to vector<32x7xf32>
    %189 = tpu.concatenate %187, %188 in 1 : vector<32x63xf32>, vector<32x7xf32> -> vector<32x70xf32>
    %c7_77 = arith.constant 7 : index
    %c0_78 = arith.constant 0 : index
    %190 = vector.load %arg6[%c7_77, %c0_78] : memref<9x70xf32, #tpu.memory_space<vmem>>, vector<1x70xf32>
    %191 = vector.broadcast %190 : vector<1x70xf32> to vector<32x70xf32>
    %192 = arith.mulf %189, %191 : vector<32x70xf32>
    %193 = vector.extract_strided_slice %18 {offsets = [0, 8], sizes = [32, 62], strides = [1, 1]} : vector<32x70xf32> to vector<32x62xf32>
    %194 = vector.extract_strided_slice %18 {offsets = [0, 0], sizes = [32, 8], strides = [1, 1]} : vector<32x70xf32> to vector<32x8xf32>
    %195 = tpu.concatenate %193, %194 in 1 : vector<32x62xf32>, vector<32x8xf32> -> vector<32x70xf32>
    %c8 = arith.constant 8 : index
    %c0_79 = arith.constant 0 : index
    %196 = vector.load %arg6[%c8, %c0_79] : memref<9x70xf32, #tpu.memory_space<vmem>>, vector<1x70xf32>
    %197 = vector.broadcast %196 : vector<1x70xf32> to vector<32x70xf32>
    %198 = arith.mulf %195, %197 : vector<32x70xf32>
    %199 = tpu.concatenate %159, %162, %168, %171, %174, %180, %186, %192, %198 in 0 : vector<32x70xf32>, vector<32x70xf32>, vector<32x70xf32>, vector<32x70xf32>, vector<32x70xf32>, vector<32x70xf32>, vector<32x70xf32>, vector<32x70xf32>, vector<32x70xf32> -> vector<288x70xf32>
    %c0_80 = arith.constant 0 : index
    %c0_81 = arith.constant 0 : index
    %200 = vector.load %arg4[%c0_80, %c0_81] : memref<64x288xf32, #tpu.memory_space<vmem>>, vector<64x288xf32>
    %cst_82 = arith.constant dense<0.000000e+00> : vector<64x70xf32>
    %201 = tpu.matmul %200, %199, %cst_82 {dimension_numbers = #tpu.dot_dimension_numbers<[1], [0], [0], [1], [0, 0, 1, 1], [], []>} : vector<64x288xf32>, vector<288x70xf32>, vector<64x70xf32> -> vector<64x70xf32>
    %202 = arith.maximumf %66, %111 : vector<64x70xf32>
    %203 = arith.maximumf %156, %201 : vector<64x70xf32>
    %204 = arith.maximumf %202, %203 : vector<64x70xf32>
    %c0_83 = arith.constant 0 : index
    %c0_84 = arith.constant 0 : index
    %205 = vector.load %arg5[%c0_83, %c0_84] : memref<64x1xf32, #tpu.memory_space<vmem>>, vector<64x1xf32>
    %206 = vector.broadcast %205 : vector<64x1xf32> to vector<64x70xf32>
    %207 = arith.addf %204, %206 : vector<64x70xf32>
    %cst_85 = arith.constant 0.000000e+00 : f32
    %208 = vector.broadcast %cst_85 : f32 to vector<64x70xf32>
    %209 = arith.maximumf %207, %208 : vector<64x70xf32>
    %c0_i32_86 = arith.constant 0 : i32
    %210 = tpu.memref_slice %arg13[%c0_i32_86] : memref<1x!tpu.dma_semaphore, #tpu.memory_space<semaphore_mem>> -> memref<1x!tpu.dma_semaphore, #tpu.memory_space<semaphore_mem>>
    %211 = tpu.memref_squeeze %210 : memref<1x!tpu.dma_semaphore, #tpu.memory_space<semaphore_mem>> -> memref<!tpu.dma_semaphore, #tpu.memory_space<semaphore_mem>>
    tpu.wait_dma2 semaphore(%211 : memref<!tpu.dma_semaphore, #tpu.memory_space<semaphore_mem>>) src(%arg10 : memref<70x8192xbf16, #tpu.memory_space<any>>) dst(%arg12 : memref<70x8192xbf16, #tpu.memory_space<vmem>>)
    %212 = arith.truncf %209 : vector<64x70xf32> to vector<64x70xbf16>
    %c0_87 = arith.constant 0 : index
    %c0_88 = arith.constant 0 : index
    %213 = vector.load %arg12[%c0_87, %c0_88] : memref<70x8192xbf16, #tpu.memory_space<vmem>>, vector<70x8192xbf16>
    %cst_89 = arith.constant dense<0.000000e+00> : vector<64x8192xf32>
    %214 = tpu.matmul %212, %213, %cst_89 {dimension_numbers = #tpu.dot_dimension_numbers<[1], [0], [0], [1], [0, 0, 1, 1], [], []>} : vector<64x70xbf16>, vector<70x8192xbf16>, vector<64x8192xf32> -> vector<64x8192xf32>
    %215 = vector.extract_strided_slice %214 {offsets = [0, 0], sizes = [1, 128], strides = [1, 1]} : vector<64x8192xf32> to vector<1x128xf32>
    %216 = vector.extract_strided_slice %214 {offsets = [1, 128], sizes = [1, 128], strides = [1, 1]} : vector<64x8192xf32> to vector<1x128xf32>
    %217 = arith.addf %215, %216 : vector<1x128xf32>
    %218 = vector.extract_strided_slice %214 {offsets = [2, 256], sizes = [1, 128], strides = [1, 1]} : vector<64x8192xf32> to vector<1x128xf32>
    %219 = arith.addf %217, %218 : vector<1x128xf32>
    %220 = vector.extract_strided_slice %214 {offsets = [3, 384], sizes = [1, 128], strides = [1, 1]} : vector<64x8192xf32> to vector<1x128xf32>
    %221 = arith.addf %219, %220 : vector<1x128xf32>
    %222 = vector.extract_strided_slice %214 {offsets = [4, 512], sizes = [1, 128], strides = [1, 1]} : vector<64x8192xf32> to vector<1x128xf32>
    %223 = arith.addf %221, %222 : vector<1x128xf32>
    %224 = vector.extract_strided_slice %214 {offsets = [5, 640], sizes = [1, 128], strides = [1, 1]} : vector<64x8192xf32> to vector<1x128xf32>
    %225 = arith.addf %223, %224 : vector<1x128xf32>
    %226 = vector.extract_strided_slice %214 {offsets = [6, 768], sizes = [1, 128], strides = [1, 1]} : vector<64x8192xf32> to vector<1x128xf32>
    %227 = arith.addf %225, %226 : vector<1x128xf32>
    %228 = vector.extract_strided_slice %214 {offsets = [7, 896], sizes = [1, 128], strides = [1, 1]} : vector<64x8192xf32> to vector<1x128xf32>
    %229 = arith.addf %227, %228 : vector<1x128xf32>
    %230 = vector.extract_strided_slice %214 {offsets = [8, 1024], sizes = [1, 128], strides = [1, 1]} : vector<64x8192xf32> to vector<1x128xf32>
    %231 = arith.addf %229, %230 : vector<1x128xf32>
    %232 = vector.extract_strided_slice %214 {offsets = [9, 1152], sizes = [1, 128], strides = [1, 1]} : vector<64x8192xf32> to vector<1x128xf32>
    %233 = arith.addf %231, %232 : vector<1x128xf32>
    %234 = vector.extract_strided_slice %214 {offsets = [10, 1280], sizes = [1, 128], strides = [1, 1]} : vector<64x8192xf32> to vector<1x128xf32>
    %235 = arith.addf %233, %234 : vector<1x128xf32>
    %236 = vector.extract_strided_slice %214 {offsets = [11, 1408], sizes = [1, 128], strides = [1, 1]} : vector<64x8192xf32> to vector<1x128xf32>
    %237 = arith.addf %235, %236 : vector<1x128xf32>
    %238 = vector.extract_strided_slice %214 {offsets = [12, 1536], sizes = [1, 128], strides = [1, 1]} : vector<64x8192xf32> to vector<1x128xf32>
    %239 = arith.addf %237, %238 : vector<1x128xf32>
    %240 = vector.extract_strided_slice %214 {offsets = [13, 1664], sizes = [1, 128], strides = [1, 1]} : vector<64x8192xf32> to vector<1x128xf32>
    %241 = arith.addf %239, %240 : vector<1x128xf32>
    %242 = vector.extract_strided_slice %214 {offsets = [14, 1792], sizes = [1, 128], strides = [1, 1]} : vector<64x8192xf32> to vector<1x128xf32>
    %243 = arith.addf %241, %242 : vector<1x128xf32>
    %244 = vector.extract_strided_slice %214 {offsets = [15, 1920], sizes = [1, 128], strides = [1, 1]} : vector<64x8192xf32> to vector<1x128xf32>
    %245 = arith.addf %243, %244 : vector<1x128xf32>
    %246 = vector.extract_strided_slice %214 {offsets = [16, 2048], sizes = [1, 128], strides = [1, 1]} : vector<64x8192xf32> to vector<1x128xf32>
    %247 = arith.addf %245, %246 : vector<1x128xf32>
    %248 = vector.extract_strided_slice %214 {offsets = [17, 2176], sizes = [1, 128], strides = [1, 1]} : vector<64x8192xf32> to vector<1x128xf32>
    %249 = arith.addf %247, %248 : vector<1x128xf32>
    %250 = vector.extract_strided_slice %214 {offsets = [18, 2304], sizes = [1, 128], strides = [1, 1]} : vector<64x8192xf32> to vector<1x128xf32>
    %251 = arith.addf %249, %250 : vector<1x128xf32>
    %252 = vector.extract_strided_slice %214 {offsets = [19, 2432], sizes = [1, 128], strides = [1, 1]} : vector<64x8192xf32> to vector<1x128xf32>
    %253 = arith.addf %251, %252 : vector<1x128xf32>
    %254 = vector.extract_strided_slice %214 {offsets = [20, 2560], sizes = [1, 128], strides = [1, 1]} : vector<64x8192xf32> to vector<1x128xf32>
    %255 = arith.addf %253, %254 : vector<1x128xf32>
    %256 = vector.extract_strided_slice %214 {offsets = [21, 2688], sizes = [1, 128], strides = [1, 1]} : vector<64x8192xf32> to vector<1x128xf32>
    %257 = arith.addf %255, %256 : vector<1x128xf32>
    %258 = vector.extract_strided_slice %214 {offsets = [22, 2816], sizes = [1, 128], strides = [1, 1]} : vector<64x8192xf32> to vector<1x128xf32>
    %259 = arith.addf %257, %258 : vector<1x128xf32>
    %260 = vector.extract_strided_slice %214 {offsets = [23, 2944], sizes = [1, 128], strides = [1, 1]} : vector<64x8192xf32> to vector<1x128xf32>
    %261 = arith.addf %259, %260 : vector<1x128xf32>
    %262 = vector.extract_strided_slice %214 {offsets = [24, 3072], sizes = [1, 128], strides = [1, 1]} : vector<64x8192xf32> to vector<1x128xf32>
    %263 = arith.addf %261, %262 : vector<1x128xf32>
    %264 = vector.extract_strided_slice %214 {offsets = [25, 3200], sizes = [1, 128], strides = [1, 1]} : vector<64x8192xf32> to vector<1x128xf32>
    %265 = arith.addf %263, %264 : vector<1x128xf32>
    %266 = vector.extract_strided_slice %214 {offsets = [26, 3328], sizes = [1, 128], strides = [1, 1]} : vector<64x8192xf32> to vector<1x128xf32>
    %267 = arith.addf %265, %266 : vector<1x128xf32>
    %268 = vector.extract_strided_slice %214 {offsets = [27, 3456], sizes = [1, 128], strides = [1, 1]} : vector<64x8192xf32> to vector<1x128xf32>
    %269 = arith.addf %267, %268 : vector<1x128xf32>
    %270 = vector.extract_strided_slice %214 {offsets = [28, 3584], sizes = [1, 128], strides = [1, 1]} : vector<64x8192xf32> to vector<1x128xf32>
    %271 = arith.addf %269, %270 : vector<1x128xf32>
    %272 = vector.extract_strided_slice %214 {offsets = [29, 3712], sizes = [1, 128], strides = [1, 1]} : vector<64x8192xf32> to vector<1x128xf32>
    %273 = arith.addf %271, %272 : vector<1x128xf32>
    %274 = vector.extract_strided_slice %214 {offsets = [30, 3840], sizes = [1, 128], strides = [1, 1]} : vector<64x8192xf32> to vector<1x128xf32>
    %275 = arith.addf %273, %274 : vector<1x128xf32>
    %276 = vector.extract_strided_slice %214 {offsets = [31, 3968], sizes = [1, 128], strides = [1, 1]} : vector<64x8192xf32> to vector<1x128xf32>
    %277 = arith.addf %275, %276 : vector<1x128xf32>
    %278 = vector.extract_strided_slice %214 {offsets = [32, 4096], sizes = [1, 128], strides = [1, 1]} : vector<64x8192xf32> to vector<1x128xf32>
    %279 = arith.addf %277, %278 : vector<1x128xf32>
    %280 = vector.extract_strided_slice %214 {offsets = [33, 4224], sizes = [1, 128], strides = [1, 1]} : vector<64x8192xf32> to vector<1x128xf32>
    %281 = arith.addf %279, %280 : vector<1x128xf32>
    %282 = vector.extract_strided_slice %214 {offsets = [34, 4352], sizes = [1, 128], strides = [1, 1]} : vector<64x8192xf32> to vector<1x128xf32>
    %283 = arith.addf %281, %282 : vector<1x128xf32>
    %284 = vector.extract_strided_slice %214 {offsets = [35, 4480], sizes = [1, 128], strides = [1, 1]} : vector<64x8192xf32> to vector<1x128xf32>
    %285 = arith.addf %283, %284 : vector<1x128xf32>
    %286 = vector.extract_strided_slice %214 {offsets = [36, 4608], sizes = [1, 128], strides = [1, 1]} : vector<64x8192xf32> to vector<1x128xf32>
    %287 = arith.addf %285, %286 : vector<1x128xf32>
    %288 = vector.extract_strided_slice %214 {offsets = [37, 4736], sizes = [1, 128], strides = [1, 1]} : vector<64x8192xf32> to vector<1x128xf32>
    %289 = arith.addf %287, %288 : vector<1x128xf32>
    %290 = vector.extract_strided_slice %214 {offsets = [38, 4864], sizes = [1, 128], strides = [1, 1]} : vector<64x8192xf32> to vector<1x128xf32>
    %291 = arith.addf %289, %290 : vector<1x128xf32>
    %292 = vector.extract_strided_slice %214 {offsets = [39, 4992], sizes = [1, 128], strides = [1, 1]} : vector<64x8192xf32> to vector<1x128xf32>
    %293 = arith.addf %291, %292 : vector<1x128xf32>
    %294 = vector.extract_strided_slice %214 {offsets = [40, 5120], sizes = [1, 128], strides = [1, 1]} : vector<64x8192xf32> to vector<1x128xf32>
    %295 = arith.addf %293, %294 : vector<1x128xf32>
    %296 = vector.extract_strided_slice %214 {offsets = [41, 5248], sizes = [1, 128], strides = [1, 1]} : vector<64x8192xf32> to vector<1x128xf32>
    %297 = arith.addf %295, %296 : vector<1x128xf32>
    %298 = vector.extract_strided_slice %214 {offsets = [42, 5376], sizes = [1, 128], strides = [1, 1]} : vector<64x8192xf32> to vector<1x128xf32>
    %299 = arith.addf %297, %298 : vector<1x128xf32>
    %300 = vector.extract_strided_slice %214 {offsets = [43, 5504], sizes = [1, 128], strides = [1, 1]} : vector<64x8192xf32> to vector<1x128xf32>
    %301 = arith.addf %299, %300 : vector<1x128xf32>
    %302 = vector.extract_strided_slice %214 {offsets = [44, 5632], sizes = [1, 128], strides = [1, 1]} : vector<64x8192xf32> to vector<1x128xf32>
    %303 = arith.addf %301, %302 : vector<1x128xf32>
    %304 = vector.extract_strided_slice %214 {offsets = [45, 5760], sizes = [1, 128], strides = [1, 1]} : vector<64x8192xf32> to vector<1x128xf32>
    %305 = arith.addf %303, %304 : vector<1x128xf32>
    %306 = vector.extract_strided_slice %214 {offsets = [46, 5888], sizes = [1, 128], strides = [1, 1]} : vector<64x8192xf32> to vector<1x128xf32>
    %307 = arith.addf %305, %306 : vector<1x128xf32>
    %308 = vector.extract_strided_slice %214 {offsets = [47, 6016], sizes = [1, 128], strides = [1, 1]} : vector<64x8192xf32> to vector<1x128xf32>
    %309 = arith.addf %307, %308 : vector<1x128xf32>
    %310 = vector.extract_strided_slice %214 {offsets = [48, 6144], sizes = [1, 128], strides = [1, 1]} : vector<64x8192xf32> to vector<1x128xf32>
    %311 = arith.addf %309, %310 : vector<1x128xf32>
    %312 = vector.extract_strided_slice %214 {offsets = [49, 6272], sizes = [1, 128], strides = [1, 1]} : vector<64x8192xf32> to vector<1x128xf32>
    %313 = arith.addf %311, %312 : vector<1x128xf32>
    %314 = vector.extract_strided_slice %214 {offsets = [50, 6400], sizes = [1, 128], strides = [1, 1]} : vector<64x8192xf32> to vector<1x128xf32>
    %315 = arith.addf %313, %314 : vector<1x128xf32>
    %316 = vector.extract_strided_slice %214 {offsets = [51, 6528], sizes = [1, 128], strides = [1, 1]} : vector<64x8192xf32> to vector<1x128xf32>
    %317 = arith.addf %315, %316 : vector<1x128xf32>
    %318 = vector.extract_strided_slice %214 {offsets = [52, 6656], sizes = [1, 128], strides = [1, 1]} : vector<64x8192xf32> to vector<1x128xf32>
    %319 = arith.addf %317, %318 : vector<1x128xf32>
    %320 = vector.extract_strided_slice %214 {offsets = [53, 6784], sizes = [1, 128], strides = [1, 1]} : vector<64x8192xf32> to vector<1x128xf32>
    %321 = arith.addf %319, %320 : vector<1x128xf32>
    %322 = vector.extract_strided_slice %214 {offsets = [54, 6912], sizes = [1, 128], strides = [1, 1]} : vector<64x8192xf32> to vector<1x128xf32>
    %323 = arith.addf %321, %322 : vector<1x128xf32>
    %324 = vector.extract_strided_slice %214 {offsets = [55, 7040], sizes = [1, 128], strides = [1, 1]} : vector<64x8192xf32> to vector<1x128xf32>
    %325 = arith.addf %323, %324 : vector<1x128xf32>
    %326 = vector.extract_strided_slice %214 {offsets = [56, 7168], sizes = [1, 128], strides = [1, 1]} : vector<64x8192xf32> to vector<1x128xf32>
    %327 = arith.addf %325, %326 : vector<1x128xf32>
    %328 = vector.extract_strided_slice %214 {offsets = [57, 7296], sizes = [1, 128], strides = [1, 1]} : vector<64x8192xf32> to vector<1x128xf32>
    %329 = arith.addf %327, %328 : vector<1x128xf32>
    %330 = vector.extract_strided_slice %214 {offsets = [58, 7424], sizes = [1, 128], strides = [1, 1]} : vector<64x8192xf32> to vector<1x128xf32>
    %331 = arith.addf %329, %330 : vector<1x128xf32>
    %332 = vector.extract_strided_slice %214 {offsets = [59, 7552], sizes = [1, 128], strides = [1, 1]} : vector<64x8192xf32> to vector<1x128xf32>
    %333 = arith.addf %331, %332 : vector<1x128xf32>
    %334 = vector.extract_strided_slice %214 {offsets = [60, 7680], sizes = [1, 128], strides = [1, 1]} : vector<64x8192xf32> to vector<1x128xf32>
    %335 = arith.addf %333, %334 : vector<1x128xf32>
    %336 = vector.extract_strided_slice %214 {offsets = [61, 7808], sizes = [1, 128], strides = [1, 1]} : vector<64x8192xf32> to vector<1x128xf32>
    %337 = arith.addf %335, %336 : vector<1x128xf32>
    %338 = vector.extract_strided_slice %214 {offsets = [62, 7936], sizes = [1, 128], strides = [1, 1]} : vector<64x8192xf32> to vector<1x128xf32>
    %339 = arith.addf %337, %338 : vector<1x128xf32>
    %340 = vector.extract_strided_slice %214 {offsets = [63, 8064], sizes = [1, 128], strides = [1, 1]} : vector<64x8192xf32> to vector<1x128xf32>
    %341 = arith.addf %339, %340 : vector<1x128xf32>
    %c0_90 = arith.constant 0 : index
    %c0_91 = arith.constant 0 : index
    %342 = vector.load %arg7[%c0_90, %c0_91] : memref<1x128xf32, #tpu.memory_space<vmem>>, vector<1x128xf32>
    %343 = arith.addf %341, %342 : vector<1x128xf32>
    %cst_92 = arith.constant 0.000000e+00 : f32
    %344 = vector.broadcast %cst_92 : f32 to vector<1x128xf32>
    %345 = arith.maximumf %343, %344 : vector<1x128xf32>
    %c0_93 = arith.constant 0 : index
    %c0_94 = arith.constant 0 : index
    %346 = vector.load %arg8[%c0_93, %c0_94] : memref<128x10xf32, #tpu.memory_space<vmem>>, vector<128x10xf32>
    %cst_95 = arith.constant dense<0.000000e+00> : vector<1x10xf32>
    %347 = tpu.matmul %345, %346, %cst_95 {dimension_numbers = #tpu.dot_dimension_numbers<[1], [0], [0], [1], [0, 0, 1, 1], [], []>} : vector<1x128xf32>, vector<128x10xf32>, vector<1x10xf32> -> vector<1x10xf32>
    %c0_96 = arith.constant 0 : index
    %c0_97 = arith.constant 0 : index
    %348 = vector.load %arg9[%c0_96, %c0_97] : memref<1x10xf32, #tpu.memory_space<vmem>>, vector<1x10xf32>
    %349 = arith.addf %347, %348 : vector<1x10xf32>
    %c0_98 = arith.constant 0 : index
    %c0_99 = arith.constant 0 : index
    %c0_100 = arith.constant 0 : index
    %350 = vector.load %arg11[%c0_98, %c0_99, %c0_100] : memref<1x1x10xf32, #tpu.memory_space<vmem>>, vector<1x1x10xf32>
    %351 = vector.shape_cast %350 : vector<1x1x10xf32> to vector<1x10xf32>
    %352 = vector.shape_cast %349 : vector<1x10xf32> to vector<1x1x10xf32>
    tpu.vector_store %arg11[%c0_98, %c0_99, %c0_100], %352 {strides = array<i32>} : memref<1x1x10xf32, #tpu.memory_space<vmem>>, vector<1x1x10xf32>,
    return
  }
  func.func @transform_0(%arg0: i32) -> (i32, i32, i32) {
    %c0_i32 = arith.constant 0 : i32
    %c0_i32_0 = arith.constant 0 : i32
    %c0_i32_1 = arith.constant 0 : i32
    return %arg0, %c0_i32, %c0_i32_0 : i32, i32, i32
  }
  func.func @transform_1(%arg0: i32) -> (i32, i32) {
    %c0_i32 = arith.constant 0 : i32
    %c0_i32_0 = arith.constant 0 : i32
    %c0_i32_1 = arith.constant 0 : i32
    return %c0_i32, %c0_i32_0 : i32, i32
  }
  func.func @transform_2(%arg0: i32) -> (i32, i32) {
    %c0_i32 = arith.constant 0 : i32
    %c0_i32_0 = arith.constant 0 : i32
    %c0_i32_1 = arith.constant 0 : i32
    return %c0_i32, %c0_i32_0 : i32, i32
  }
  func.func @transform_3(%arg0: i32) -> (i32, i32) {
    %c0_i32 = arith.constant 0 : i32
    %c0_i32_0 = arith.constant 0 : i32
    %c0_i32_1 = arith.constant 0 : i32
    return %c0_i32, %c0_i32_0 : i32, i32
  }
  func.func @transform_4(%arg0: i32) -> (i32, i32) {
    %c0_i32 = arith.constant 0 : i32
    %c0_i32_0 = arith.constant 0 : i32
    %c0_i32_1 = arith.constant 0 : i32
    return %c0_i32, %c0_i32_0 : i32, i32
  }
  func.func @transform_5(%arg0: i32) -> (i32, i32) {
    %c0_i32 = arith.constant 0 : i32
    %c0_i32_0 = arith.constant 0 : i32
    %c0_i32_1 = arith.constant 0 : i32
    return %c0_i32, %c0_i32_0 : i32, i32
  }
  func.func @transform_6(%arg0: i32) -> (i32, i32) {
    %c0_i32 = arith.constant 0 : i32
    %c0_i32_0 = arith.constant 0 : i32
    %c0_i32_1 = arith.constant 0 : i32
    return %c0_i32, %c0_i32_0 : i32, i32
  }
  func.func @transform_7(%arg0: i32) -> (i32, i32) {
    %c0_i32 = arith.constant 0 : i32
    %c0_i32_0 = arith.constant 0 : i32
    %c0_i32_1 = arith.constant 0 : i32
    return %c0_i32, %c0_i32_0 : i32, i32
  }
  func.func @transform_8(%arg0: i32) -> (i32, i32) {
    %c0_i32 = arith.constant 0 : i32
    %c0_i32_0 = arith.constant 0 : i32
    %c0_i32_1 = arith.constant 0 : i32
    return %c0_i32, %c0_i32_0 : i32, i32
  }
  func.func @transform_10(%arg0: i32) -> (i32, i32, i32) {
    %c0_i32 = arith.constant 0 : i32
    %c0_i32_0 = arith.constant 0 : i32
    %c0_i32_1 = arith.constant 0 : i32
    return %arg0, %c0_i32, %c0_i32_0 : i32, i32, i32
  }
}

</mosaic_0001>

<bundles_post_ra>
// kernel: cnn_forward.1
= control target key start
LH: loop header
LB: loop body
LE: loop exit
PB: predicated region body
PF: predicated region fallthrough
CT: control target
= control target key end

     0   :  { %15 = vsyncpa [#allocation5], 0  ;;  %s12116_s0 = inlined_call_operand.vmem [shape: f32[2,9,1120], index: 0, kind: input, shape index: {}]   ;;  %s12117_s1 = inlined_call_operand.vmem [shape: f32[32,9], index: 1, kind: input, shape index: {}]   ;;  %s12118_s2 = inlined_call_operand.vmem [shape: f32[32,1], index: 2, kind: input, shape index: {}]   ;;  %s12119_s3 = inlined_call_operand.vmem [shape: f32[64,288], index: 3, kind: input, shape index: {}]   ;;  %s12120_s4 = inlined_call_operand.vmem [shape: f32[64,1], index: 4, kind: input, shape index: {}]   ;;  %s12121_s5 = inlined_call_operand.vmem [shape: f32[9,70], index: 5, kind: input, shape index: {}]   ;;  %s12122_s6 = inlined_call_operand.vmem [shape: f32[1,128], index: 6, kind: input, shape index: {}]   ;;  %s12123_s7 = inlined_call_operand.vmem [shape: f32[128,10], index: 7, kind: input, shape index: {}]   ;;  %s12124_s8 = inlined_call_operand.vmem [shape: f32[1,10], index: 8, kind: input, shape index: {}]   ;;  %s12125_s9 = inlined_call_operand.vmem [shape: bf16[70,8192], index: 9, kind: input, shape index: {}]   ;;  %s12126_s10 = inlined_call_operand.hbm [shape: f32[2,1,10], index: 10, kind: output, shape index: {}]  }
   0x1   :  { %17 = vsyncpa [#allocation5 + $0x1], 0  ;;  %s9071_s13 = smov 0   ;;  %s9073_s14 = smov 0  }
   0x2   :  { %s9075_s15 = smov 0   ;;  %s9077_s16 = smov 0  }
   0x3 LB: > { %s9092_s17 = sadd.s32 4294967295, %s8980_s16   ;;  %s7533_s18 = sadd.s32 4294967294, %s8980_s16   ;;  %s8980_s16 = sphi %s9077_s16, %s12152_s16   ;;  %s8976_s15 = sphi %s9075_s15, %s12151_s15   ;;  %s8972_s14 = sphi %s9073_s14, %s12150_s14   ;;  %s8968_s13 = sphi %s9071_s13, %s12149_s13  }
   0x4   : > { %s9096_s19 = sadd.s32 1, %s8980_s16   ;;  %s224_s20 = sadd.s32 1, %s8976_s15 }
   0x5   : > { %s221_s21 = ssub.s32 %s8980_s16, %s9096_s19  ;;  %p234_p0 = scmp.ne.s32.totalorder %s8976_s15, %s8972_s14 }
   0x6   : > { %p222_p1 = scmp.eq.s32.totalorder %s221_s21, 0  ;;  %p235_p2 = scmp.eq.s32.totalorder %s9092_s17, 1 }
   0x7   : > { %p240_p3 = scmp.ne.s32.totalorder %s8972_s14, %s8968_s13  ;;  %p241_p4 = scmp.eq.s32.totalorder %s7533_s18, 1 }
   0x8   : > { %s9107_s22 = scalar_select %p222_p1, %s8976_s15, %s224_s20  }
   0x9   : > { %p9109_p5 = por %p235_p2, %p234_p0  ;;  %p9113_p6 = por %p241_p4, %p240_p3 }
   0xa   : > { %12136 = sst [smem:[#allocation9_spill]] %s9107_s22  ;;  %p7536_p7 = scmp.ge.s32.totalorder %s8980_s16, 1 }
   0xb   : > { %p291_p8 = scmp.lt.s32.totalorder %s8980_s16, 3 }
   0xd   : > { %p292_p9 = pnand %p7536_p7, %p291_p8 }
   0xe   : > { %p326_p10 = scmp.lt.s32.totalorder (!%p292_p9), %s9092_s17, 1  ;;  %v364_v0 = vld [vmem:[%s12125_s9] sm:$0xff] (!%p292_p9)  ;;  %v366_v1 = vld [vmem:[%s12125_s9 + $0x8] sm:$0xff] (!%p292_p9)  ;;  %v368_v2 = vld [vmem:[%s12125_s9 + $0x10] sm:$0xff] (!%p292_p9)  ;;  %s12139_s21 = sand.u32 (!%p292_p9), 1, %s8972_s14   ;;  %vm983_vm0 = vcmask (!%p292_p9), 1040384  }
   0xf   : > { %295 = sbr.rel (%p292_p9) target bundleno = 2267 (0x8db), region = 56  ;;  %365 = vst [vmem:[#allocation2] sm:$0xff] (!%p292_p9), %v364_v0  ;;  %367 = vst [vmem:[#allocation2 + $0x8] sm:$0xff] (!%p292_p9), %v366_v1  ;;  %v370_v3 = vld [vmem:[%s12125_s9 + $0x18] sm:$0xff] (!%p292_p9)  ;;  %v372_v4 = vld [vmem:[%s12125_s9 + $0x20] sm:$0xff] (!%p292_p9)  ;;  %s9993_s26 = scalar_lea.vmem (!%p292_p9), [#allocation4], %s12139_s21 }
  0x10   : > { %369 = vst [vmem:[#allocation2 + $0x10] sm:$0xff] (!%p292_p9), %v368_v2  ;;  %v374_v5 = vld [vmem:[%s12125_s9 + $0x28] sm:$0xff] (!%p292_p9)  ;;  %371 = vst [vmem:[#allocation2 + $0x18] sm:$0xff] (!%p292_p9), %v370_v3  ;;  %v376_v6 = vld [vmem:[%s12125_s9 + $0x30] sm:$0xff] (!%p292_p9)  ;;  %vm8982_vm1 = vmmov (!%p292_p9), 1  }
  0x11   : > { %373 = vst [vmem:[#allocation2 + $0x20] sm:$0xff] (!%p292_p9), %v372_v4  ;;  %375 = vst [vmem:[#allocation2 + $0x28] sm:$0xff] (!%p292_p9), %v374_v5  ;;  %v378_v7 = vld [vmem:[%s12125_s9 + $0x38] sm:$0xff] (!%p292_p9)  ;;  %v380_v8 = vld [vmem:[%s12125_s9 + $0x40] sm:$0xff] (!%p292_p9) }
  0x12   : > { %377 = vst [vmem:[#allocation2 + $0x30] sm:$0xff] (!%p292_p9), %v376_v6  ;;  %379 = vst [vmem:[#allocation2 + $0x38] sm:$0xff] (!%p292_p9), %v378_v7  ;;  %v382_v9 = vld [vmem:[%s12125_s9 + $0x48] sm:$0xff] (!%p292_p9)  ;;  %v384_v10 = vld [vmem:[%s12125_s9 + $0x50] sm:$0xff] (!%p292_p9) }
  0x13   : > { %381 = vst [vmem:[#allocation2 + $0x40] sm:$0xff] (!%p292_p9), %v380_v8  ;;  %v386_v11 = vld [vmem:[%s12125_s9 + $0x58] sm:$0xff] (!%p292_p9)  ;;  %383 = vst [vmem:[#allocation2 + $0x48] sm:$0xff] (!%p292_p9), %v382_v9  ;;  %v388_v12 = vld [vmem:[%s12125_s9 + $0x60] sm:$0xff] (!%p292_p9) }
  0x14   : > { %385 = vst [vmem:[#allocation2 + $0x50] sm:$0xff] (!%p292_p9), %v384_v10  ;;  %387 = vst [vmem:[#allocation2 + $0x58] sm:$0xff] (!%p292_p9), %v386_v11  ;;  %v390_v13 = vld [vmem:[%s12125_s9 + $0x68] sm:$0xff] (!%p292_p9)  ;;  %v392_v14 = vld [vmem:[%s12125_s9 + $0x70] sm:$0xff] (!%p292_p9) }
  0x15   : > { %389 = vst [vmem:[#allocation2 + $0x60] sm:$0xff] (!%p292_p9), %v388_v12  ;;  %391 = vst [vmem:[#allocation2 + $0x68] sm:$0xff] (!%p292_p9), %v390_v13  ;;  %v394_v15 = vld [vmem:[%s12125_s9 + $0x78] sm:$0xff] (!%p292_p9)  ;;  %v396_v16 = vld [vmem:[%s12125_s9 + $0x80] sm:$0xff] (!%p292_p9) }
  0x16   : > { %s327_s28 = scalar_select %p326_p10, %s9092_s17, 1  ;;  %393 = vst [vmem:[#allocation2 + $0x70] sm:$0xff] %v392_v14  ;;  %v398_v17 = vld [vmem:[%s12125_s9 + $0x88] sm:$0xff]  ;;  %395 = vst [vmem:[#allocation2 + $0x78] sm:$0xff] %v394_v15  ;;  %v400_v18 = vld [vmem:[%s12125_s9 + $0x90] sm:$0xff] }
  0x17   : > { %397 = vst [vmem:[#allocation2 + $0x80] sm:$0xff] %v396_v16  ;;  %399 = vst [vmem:[#allocation2 + $0x88] sm:$0xff] %v398_v17  ;;  %v402_v19 = vld [vmem:[%s12125_s9 + $0x98] sm:$0xff]  ;;  %v404_v20 = vld [vmem:[%s12125_s9 + $0xa0] sm:$0xff] }
  0x18   : > { %s8726_s25 = smul.u32 144, %s327_s28  ;;  %401 = vst [vmem:[#allocation2 + $0x90] sm:$0xff] %v400_v18  ;;  %403 = vst [vmem:[#allocation2 + $0x98] sm:$0xff] %v402_v19  ;;  %v406_v21 = vld [vmem:[%s12125_s9 + $0xa8] sm:$0xff]  ;;  %v408_v22 = vld [vmem:[%s12125_s9 + $0xb0] sm:$0xff] }
  0x19   : > { %405 = vst [vmem:[#allocation2 + $0xa0] sm:$0xff] %v404_v20  ;;  %v410_v23 = vld [vmem:[%s12125_s9 + $0xb8] sm:$0xff]  ;;  %407 = vst [vmem:[#allocation2 + $0xa8] sm:$0xff] %v406_v21  ;;  %v412_v24 = vld [vmem:[%s12125_s9 + $0xc0] sm:$0xff] }
  0x1a   : > { %s9179_s18 = scalar_lea.vmem %s12116_s0, %s8726_s25  ;;  %409 = vst [vmem:[#allocation2 + $0xb0] sm:$0xff] %v408_v22  ;;  %411 = vst [vmem:[#allocation2 + $0xb8] sm:$0xff] %v410_v23  ;;  %v414_v25 = vld [vmem:[%s12125_s9 + $0xc8] sm:$0xff]  ;;  %v416_v26 = vld [vmem:[%s12125_s9 + $0xd0] sm:$0xff] }
  0x1b   : > { %413 = vst [vmem:[#allocation2 + $0xc0] sm:$0xff] %v412_v24  ;;  %415 = vst [vmem:[#allocation2 + $0xc8] sm:$0xff] %v414_v25  ;;  %v418_v27 = vld [vmem:[%s12125_s9 + $0xd8] sm:$0xff]  ;;  %v420_v28 = vld [vmem:[%s12125_s9 + $0xe0] sm:$0xff] }
  0x1c   : > { %417 = vst [vmem:[#allocation2 + $0xd0] sm:$0xff] %v416_v26  ;;  %v422_v29 = vld [vmem:[%s12125_s9 + $0xe8] sm:$0xff]  ;;  %419 = vst [vmem:[#allocation2 + $0xd8] sm:$0xff] %v418_v27  ;;  %v424_v30 = vld [vmem:[%s12125_s9 + $0xf0] sm:$0xff] }
  0x1d   : > { %421 = vst [vmem:[#allocation2 + $0xe0] sm:$0xff] %v420_v28  ;;  %423 = vst [vmem:[#allocation2 + $0xe8] sm:$0xff] %v422_v29  ;;  %v426_v31 = vld [vmem:[%s12125_s9 + $0xf8] sm:$0xff]  ;;  %v428_v32 = vld [vmem:[%s12125_s9 + $0x100] sm:$0xff] }
  0x1e   : > { %425 = vst [vmem:[#allocation2 + $0xf0] sm:$0xff] %v424_v30  ;;  %427 = vst [vmem:[#allocation2 + $0xf8] sm:$0xff] %v426_v31  ;;  %v430_v33 = vld [vmem:[%s12125_s9 + $0x108] sm:$0xff]  ;;  %v432_v34 = vld [vmem:[%s12125_s9 + $0x110] sm:$0xff] }
  0x1f   : > { %429 = vst [vmem:[#allocation2 + $0x100] sm:$0xff] %v428_v32  ;;  %v434_v35 = vld [vmem:[%s12125_s9 + $0x118] sm:$0xff]  ;;  %431 = vst [vmem:[#allocation2 + $0x108] sm:$0xff] %v430_v33  ;;  %v436_v36 = vld [vmem:[%s12125_s9 + $0x120] sm:$0xff] }
  0x20   : > { %433 = vst [vmem:[#allocation2 + $0x110] sm:$0xff] %v432_v34  ;;  %435 = vst [vmem:[#allocation2 + $0x118] sm:$0xff] %v434_v35  ;;  %v438_v37 = vld [vmem:[%s12125_s9 + $0x128] sm:$0xff]  ;;  %v440_v38 = vld [vmem:[%s12125_s9 + $0x130] sm:$0xff] }
  0x21   : > { %437 = vst [vmem:[#allocation2 + $0x120] sm:$0xff] %v436_v36  ;;  %439 = vst [vmem:[#allocation2 + $0x128] sm:$0xff] %v438_v37  ;;  %v442_v39 = vld [vmem:[%s12125_s9 + $0x138] sm:$0xff]  ;;  %v444_v40 = vld [vmem:[%s12125_s9 + $0x140] sm:$0xff] }
  0x22   : > { %441 = vst [vmem:[#allocation2 + $0x130] sm:$0xff] %v440_v38  ;;  %v446_v41 = vld [vmem:[%s12125_s9 + $0x148] sm:$0xff]  ;;  %443 = vst [vmem:[#allocation2 + $0x138] sm:$0xff] %v442_v39  ;;  %v448_v42 = vld [vmem:[%s12125_s9 + $0x150] sm:$0xff] }
  0x23   : > { %445 = vst [vmem:[#allocation2 + $0x140] sm:$0xff] %v444_v40  ;;  %447 = vst [vmem:[#allocation2 + $0x148] sm:$0xff] %v446_v41  ;;  %v450_v43 = vld [vmem:[%s12125_s9 + $0x158] sm:$0xff]  ;;  %v452_v44 = vld [vmem:[%s12125_s9 + $0x160] sm:$0xff] }
  0x24   : > { %449 = vst [vmem:[#allocation2 + $0x150] sm:$0xff] %v448_v42  ;;  %451 = vst [vmem:[#allocation2 + $0x158] sm:$0xff] %v450_v43  ;;  %v454_v45 = vld [vmem:[%s12125_s9 + $0x168] sm:$0xff]  ;;  %v456_v46 = vld [vmem:[%s12125_s9 + $0x170] sm:$0xff] }
  0x25   : > { %453 = vst [vmem:[#allocation2 + $0x160] sm:$0xff] %v452_v44  ;;  %v458_v47 = vld [vmem:[%s12125_s9 + $0x178] sm:$0xff]  ;;  %455 = vst [vmem:[#allocation2 + $0x168] sm:$0xff] %v454_v45  ;;  %v460_v48 = vld [vmem:[%s12125_s9 + $0x180] sm:$0xff] }
  0x26   : > { %457 = vst [vmem:[#allocation2 + $0x170] sm:$0xff] %v456_v46  ;;  %459 = vst [vmem:[#allocation2 + $0x178] sm:$0xff] %v458_v47  ;;  %v462_v49 = vld [vmem:[%s12125_s9 + $0x188] sm:$0xff]  ;;  %v464_v50 = vld [vmem:[%s12125_s9 + $0x190] sm:$0xff] }
  0x27   : > { %461 = vst [vmem:[#allocation2 + $0x180] sm:$0xff] %v460_v48  ;;  %463 = vst [vmem:[#allocation2 + $0x188] sm:$0xff] %v462_v49  ;;  %v466_v51 = vld [vmem:[%s12125_s9 + $0x198] sm:$0xff]  ;;  %v468_v52 = vld [vmem:[%s12125_s9 + $0x1a0] sm:$0xff] }
  0x28   : > { %465 = vst [vmem:[#allocation2 + $0x190] sm:$0xff] %v464_v50  ;;  %v470_v53 = vld [vmem:[%s12125_s9 + $0x1a8] sm:$0xff]  ;;  %467 = vst [vmem:[#allocation2 + $0x198] sm:$0xff] %v466_v51  ;;  %v472_v54 = vld [vmem:[%s12125_s9 + $0x1b0] sm:$0xff] }
  0x29   : > { %469 = vst [vmem:[#allocation2 + $0x1a0] sm:$0xff] %v468_v52  ;;  %471 = vst [vmem:[#allocation2 + $0x1a8] sm:$0xff] %v470_v53  ;;  %v474_v55 = vld [vmem:[%s12125_s9 + $0x1b8] sm:$0xff]  ;;  %v476_v56 = vld [vmem:[%s12125_s9 + $0x1c0] sm:$0xff] }
  0x2a   : > { %473 = vst [vmem:[#allocation2 + $0x1b0] sm:$0xff] %v472_v54  ;;  %475 = vst [vmem:[#allocation2 + $0x1b8] sm:$0xff] %v474_v55  ;;  %v478_v57 = vld [vmem:[%s12125_s9 + $0x1c8] sm:$0xff]  ;;  %v480_v58 = vld [vmem:[%s12125_s9 + $0x1d0] sm:$0xff] }
  0x2b   : > { %477 = vst [vmem:[#allocation2 + $0x1c0] sm:$0xff] %v476_v56  ;;  %v482_v59 = vld [vmem:[%s12125_s9 + $0x1d8] sm:$0xff]  ;;  %479 = vst [vmem:[#allocation2 + $0x1c8] sm:$0xff] %v478_v57  ;;  %v484_v60 = vld [vmem:[%s12125_s9 + $0x1e0] sm:$0xff] }
  0x2c   : > { %481 = vst [vmem:[#allocation2 + $0x1d0] sm:$0xff] %v480_v58  ;;  %483 = vst [vmem:[#allocation2 + $0x1d8] sm:$0xff] %v482_v59  ;;  %v486_v61 = vld [vmem:[%s12125_s9 + $0x1e8] sm:$0xff]  ;;  %v488_v62 = vld [vmem:[%s12125_s9 + $0x1f0] sm:$0xff] }
  0x2d   : > { %485 = vst [vmem:[#allocation2 + $0x1e0] sm:$0xff] %v484_v60  ;;  %487 = vst [vmem:[#allocation2 + $0x1e8] sm:$0xff] %v486_v61  ;;  %v490_v63 = vld [vmem:[%s12125_s9 + $0x1f8] sm:$0xff]  ;;  %v492_v0 = vld [vmem:[%s12125_s9 + $0x200] sm:$0xff] }
  0x2e   : > { %489 = vst [vmem:[#allocation2 + $0x1f0] sm:$0xff] %v488_v62  ;;  %v494_v1 = vld [vmem:[%s12125_s9 + $0x208] sm:$0xff]  ;;  %491 = vst [vmem:[#allocation2 + $0x1f8] sm:$0xff] %v490_v63  ;;  %v496_v2 = vld [vmem:[%s12125_s9 + $0x210] sm:$0xff] }
  0x2f   : > { %493 = vst [vmem:[#allocation2 + $0x200] sm:$0xff] %v492_v0  ;;  %495 = vst [vmem:[#allocation2 + $0x208] sm:$0xff] %v494_v1  ;;  %v498_v3 = vld [vmem:[%s12125_s9 + $0x218] sm:$0xff]  ;;  %v500_v4 = vld [vmem:[%s12125_s9 + $0x220] sm:$0xff] }
  0x30   : > { %497 = vst [vmem:[#allocation2 + $0x210] sm:$0xff] %v496_v2  ;;  %499 = vst [vmem:[#allocation2 + $0x218] sm:$0xff] %v498_v3  ;;  %v502_v5 = vld [vmem:[%s12125_s9 + $0x228] sm:$0xff]  ;;  %v504_v6 = vld [vmem:[%s12125_s9 + $0x230] sm:$0xff] }
  0x31   : > { %501 = vst [vmem:[#allocation2 + $0x220] sm:$0xff] %v500_v4  ;;  %v506_v7 = vld [vmem:[%s12125_s9 + $0x238] sm:$0xff]  ;;  %503 = vst [vmem:[#allocation2 + $0x228] sm:$0xff] %v502_v5  ;;  %v508_v8 = vld [vmem:[%s12125_s9 + $0x240] sm:$0xff] }
  0x32   : > { %505 = vst [vmem:[#allocation2 + $0x230] sm:$0xff] %v504_v6  ;;  %507 = vst [vmem:[#allocation2 + $0x238] sm:$0xff] %v506_v7  ;;  %v510_v9 = vld [vmem:[%s12125_s9 + $0x248] sm:$0xff]  ;;  %v512_v10 = vld [vmem:[%s12125_s9 + $0x250] sm:$0xff] }
  0x33   : > { %509 = vst [vmem:[#allocation2 + $0x240] sm:$0xff] %v508_v8  ;;  %511 = vst [vmem:[#allocation2 + $0x248] sm:$0xff] %v510_v9  ;;  %v514_v11 = vld [vmem:[%s12125_s9 + $0x258] sm:$0xff]  ;;  %v516_v12 = vld [vmem:[%s12125_s9 + $0x260] sm:$0xff] }
  0x34   : > { %513 = vst [vmem:[#allocation2 + $0x250] sm:$0xff] %v512_v10  ;;  %v518_v13 = vld [vmem:[%s12125_s9 + $0x268] sm:$0xff]  ;;  %515 = vst [vmem:[#allocation2 + $0x258] sm:$0xff] %v514_v11  ;;  %v520_v14 = vld [vmem:[%s12125_s9 + $0x270] sm:$0xff] }
  0x35   : > { %517 = vst [vmem:[#allocation2 + $0x260] sm:$0xff] %v516_v12  ;;  %519 = vst [vmem:[#allocation2 + $0x268] sm:$0xff] %v518_v13  ;;  %v522_v15 = vld [vmem:[%s12125_s9 + $0x278] sm:$0xff]  ;;  %v524_v16 = vld [vmem:[%s12125_s9 + $0x280] sm:$0xff] }
  0x36   : > { %521 = vst [vmem:[#allocation2 + $0x270] sm:$0xff] %v520_v14  ;;  %523 = vst [vmem:[#allocation2 + $0x278] sm:$0xff] %v522_v15  ;;  %v526_v17 = vld [vmem:[%s12125_s9 + $0x288] sm:$0xff]  ;;  %v528_v18 = vld [vmem:[%s12125_s9 + $0x290] sm:$0xff] }
  0x37   : > { %525 = vst [vmem:[#allocation2 + $0x280] sm:$0xff] %v524_v16  ;;  %v530_v19 = vld [vmem:[%s12125_s9 + $0x298] sm:$0xff]  ;;  %527 = vst [vmem:[#allocation2 + $0x288] sm:$0xff] %v526_v17  ;;  %v532_v20 = vld [vmem:[%s12125_s9 + $0x2a0] sm:$0xff] }
  0x38   : > { %529 = vst [vmem:[#allocation2 + $0x290] sm:$0xff] %v528_v18  ;;  %531 = vst [vmem:[#allocation2 + $0x298] sm:$0xff] %v530_v19  ;;  %v534_v21 = vld [vmem:[%s12125_s9 + $0x2a8] sm:$0xff]  ;;  %v536_v22 = vld [vmem:[%s12125_s9 + $0x2b0] sm:$0xff] }
  0x39   : > { %533 = vst [vmem:[#allocation2 + $0x2a0] sm:$0xff] %v532_v20  ;;  %535 = vst [vmem:[#allocation2 + $0x2a8] sm:$0xff] %v534_v21  ;;  %v538_v23 = vld [vmem:[%s12125_s9 + $0x2b8] sm:$0xff]  ;;  %v540_v24 = vld [vmem:[%s12125_s9 + $0x2c0] sm:$0xff] }
  0x3a   : > { %537 = vst [vmem:[#allocation2 + $0x2b0] sm:$0xff] %v536_v22  ;;  %v542_v25 = vld [vmem:[%s12125_s9 + $0x2c8] sm:$0xff]  ;;  %539 = vst [vmem:[#allocation2 + $0x2b8] sm:$0xff] %v538_v23  ;;  %v544_v26 = vld [vmem:[%s12125_s9 + $0x2d0] sm:$0xff] }
  0x3b   : > { %541 = vst [vmem:[#allocation2 + $0x2c0] sm:$0xff] %v540_v24  ;;  %543 = vst [vmem:[#allocation2 + $0x2c8] sm:$0xff] %v542_v25  ;;  %v546_v27 = vld [vmem:[%s12125_s9 + $0x2d8] sm:$0xff]  ;;  %v548_v28 = vld [vmem:[%s12125_s9 + $0x2e0] sm:$0xff] }
  0x3c   : > { %545 = vst [vmem:[#allocation2 + $0x2d0] sm:$0xff] %v544_v26  ;;  %547 = vst [vmem:[#allocation2 + $0x2d8] sm:$0xff] %v546_v27  ;;  %v550_v29 = vld [vmem:[%s12125_s9 + $0x2e8] sm:$0xff]  ;;  %v552_v30 = vld [vmem:[%s12125_s9 + $0x2f0] sm:$0xff] }
  0x3d   : > { %549 = vst [vmem:[#allocation2 + $0x2e0] sm:$0xff] %v548_v28  ;;  %v554_v31 = vld [vmem:[%s12125_s9 + $0x2f8] sm:$0xff]  ;;  %551 = vst [vmem:[#allocation2 + $0x2e8] sm:$0xff] %v550_v29  ;;  %v556_v32 = vld [vmem:[%s12125_s9 + $0x300] sm:$0xff] }
  0x3e   : > { %553 = vst [vmem:[#allocation2 + $0x2f0] sm:$0xff] %v552_v30  ;;  %555 = vst [vmem:[#allocation2 + $0x2f8] sm:$0xff] %v554_v31  ;;  %v558_v33 = vld [vmem:[%s12125_s9 + $0x308] sm:$0xff]  ;;  %v560_v34 = vld [vmem:[%s12125_s9 + $0x310] sm:$0xff] }
  0x3f   : > { %557 = vst [vmem:[#allocation2 + $0x300] sm:$0xff] %v556_v32  ;;  %559 = vst [vmem:[#allocation2 + $0x308] sm:$0xff] %v558_v33  ;;  %v562_v35 = vld [vmem:[%s12125_s9 + $0x318] sm:$0xff]  ;;  %v564_v36 = vld [vmem:[%s12125_s9 + $0x320] sm:$0xff] }
  0x40   : > { %561 = vst [vmem:[#allocation2 + $0x310] sm:$0xff] %v560_v34  ;;  %v566_v37 = vld [vmem:[%s12125_s9 + $0x328] sm:$0xff]  ;;  %563 = vst [vmem:[#allocation2 + $0x318] sm:$0xff] %v562_v35  ;;  %v568_v38 = vld [vmem:[%s12125_s9 + $0x330] sm:$0xff] }
  0x41   : > { %565 = vst [vmem:[#allocation2 + $0x320] sm:$0xff] %v564_v36  ;;  %567 = vst [vmem:[#allocation2 + $0x328] sm:$0xff] %v566_v37  ;;  %v570_v39 = vld [vmem:[%s12125_s9 + $0x338] sm:$0xff]  ;;  %v572_v40 = vld [vmem:[%s12125_s9 + $0x340] sm:$0xff] }
  0x42   : > { %569 = vst [vmem:[#allocation2 + $0x330] sm:$0xff] %v568_v38  ;;  %571 = vst [vmem:[#allocation2 + $0x338] sm:$0xff] %v570_v39  ;;  %v574_v41 = vld [vmem:[%s12125_s9 + $0x348] sm:$0xff]  ;;  %v576_v42 = vld [vmem:[%s12125_s9 + $0x350] sm:$0xff] }
  0x43   : > { %573 = vst [vmem:[#allocation2 + $0x340] sm:$0xff] %v572_v40  ;;  %v578_v43 = vld [vmem:[%s12125_s9 + $0x358] sm:$0xff]  ;;  %575 = vst [vmem:[#allocation2 + $0x348] sm:$0xff] %v574_v41  ;;  %v580_v44 = vld [vmem:[%s12125_s9 + $0x360] sm:$0xff] }
  0x44   : > { %577 = vst [vmem:[#allocation2 + $0x350] sm:$0xff] %v576_v42  ;;  %579 = vst [vmem:[#allocation2 + $0x358] sm:$0xff] %v578_v43  ;;  %v582_v45 = vld [vmem:[%s12125_s9 + $0x368] sm:$0xff]  ;;  %v584_v46 = vld [vmem:[%s12125_s9 + $0x370] sm:$0xff] }
  0x45   : > { %581 = vst [vmem:[#allocation2 + $0x360] sm:$0xff] %v580_v44  ;;  %583 = vst [vmem:[#allocation2 + $0x368] sm:$0xff] %v582_v45  ;;  %v586_v47 = vld [vmem:[%s12125_s9 + $0x378] sm:$0xff]  ;;  %v588_v48 = vld [vmem:[%s12125_s9 + $0x380] sm:$0xff] }
  0x46   : > { %585 = vst [vmem:[#allocation2 + $0x370] sm:$0xff] %v584_v46  ;;  %v590_v49 = vld [vmem:[%s12125_s9 + $0x388] sm:$0xff]  ;;  %587 = vst [vmem:[#allocation2 + $0x378] sm:$0xff] %v586_v47  ;;  %v592_v50 = vld [vmem:[%s12125_s9 + $0x390] sm:$0xff] }
  0x47   : > { %589 = vst [vmem:[#allocation2 + $0x380] sm:$0xff] %v588_v48  ;;  %591 = vst [vmem:[#allocation2 + $0x388] sm:$0xff] %v590_v49  ;;  %v594_v51 = vld [vmem:[%s12125_s9 + $0x398] sm:$0xff]  ;;  %v596_v52 = vld [vmem:[%s12125_s9 + $0x3a0] sm:$0xff] }
  0x48   : > { %593 = vst [vmem:[#allocation2 + $0x390] sm:$0xff] %v592_v50  ;;  %595 = vst [vmem:[#allocation2 + $0x398] sm:$0xff] %v594_v51  ;;  %v598_v53 = vld [vmem:[%s12125_s9 + $0x3a8] sm:$0xff]  ;;  %v600_v54 = vld [vmem:[%s12125_s9 + $0x3b0] sm:$0xff] }
  0x49   : > { %597 = vst [vmem:[#allocation2 + $0x3a0] sm:$0xff] %v596_v52  ;;  %v602_v55 = vld [vmem:[%s12125_s9 + $0x3b8] sm:$0xff]  ;;  %599 = vst [vmem:[#allocation2 + $0x3a8] sm:$0xff] %v598_v53  ;;  %v604_v56 = vld [vmem:[%s12125_s9 + $0x3c0] sm:$0xff] }
  0x4a   : > { %601 = vst [vmem:[#allocation2 + $0x3b0] sm:$0xff] %v600_v54  ;;  %603 = vst [vmem:[#allocation2 + $0x3b8] sm:$0xff] %v602_v55  ;;  %v606_v57 = vld [vmem:[%s12125_s9 + $0x3c8] sm:$0xff]  ;;  %v608_v58 = vld [vmem:[%s12125_s9 + $0x3d0] sm:$0xff] }
  0x4b   : > { %605 = vst [vmem:[#allocation2 + $0x3c0] sm:$0xff] %v604_v56  ;;  %607 = vst [vmem:[#allocation2 + $0x3c8] sm:$0xff] %v606_v57  ;;  %v610_v59 = vld [vmem:[%s12125_s9 + $0x3d8] sm:$0xff]  ;;  %v612_v60 = vld [vmem:[%s12125_s9 + $0x3e0] sm:$0xff] }
  0x4c   : > { %609 = vst [vmem:[#allocation2 + $0x3d0] sm:$0xff] %v608_v58  ;;  %v614_v61 = vld [vmem:[%s12125_s9 + $0x3e8] sm:$0xff]  ;;  %611 = vst [vmem:[#allocation2 + $0x3d8] sm:$0xff] %v610_v59  ;;  %v616_v62 = vld [vmem:[%s12125_s9 + $0x3f0] sm:$0xff] }
  0x4d   : > { %613 = vst [vmem:[#allocation2 + $0x3e0] sm:$0xff] %v612_v60  ;;  %615 = vst [vmem:[#allocation2 + $0x3e8] sm:$0xff] %v614_v61  ;;  %v618_v63 = vld [vmem:[%s12125_s9 + $0x3f8] sm:$0xff]  ;;  %v620_v0 = vld [vmem:[%s12125_s9 + $0x400] sm:$0xff] }
  0x4e   : > { %617 = vst [vmem:[#allocation2 + $0x3f0] sm:$0xff] %v616_v62  ;;  %619 = vst [vmem:[#allocation2 + $0x3f8] sm:$0xff] %v618_v63  ;;  %v622_v1 = vld [vmem:[%s12125_s9 + $0x408] sm:$0xff]  ;;  %v624_v2 = vld [vmem:[%s12125_s9 + $0x410] sm:$0xff] }
  0x4f   : > { %621 = vst [vmem:[#allocation2 + $0x400] sm:$0xff] %v620_v0  ;;  %v626_v3 = vld [vmem:[%s12125_s9 + $0x418] sm:$0xff]  ;;  %623 = vst [vmem:[#allocation2 + $0x408] sm:$0xff] %v622_v1  ;;  %v628_v4 = vld [vmem:[%s12125_s9 + $0x420] sm:$0xff] }
  0x50   : > { %625 = vst [vmem:[#allocation2 + $0x410] sm:$0xff] %v624_v2  ;;  %627 = vst [vmem:[#allocation2 + $0x418] sm:$0xff] %v626_v3  ;;  %v630_v5 = vld [vmem:[%s12125_s9 + $0x428] sm:$0xff]  ;;  %v632_v6 = vld [vmem:[%s12125_s9 + $0x430] sm:$0xff] }
  0x51   : > { %629 = vst [vmem:[#allocation2 + $0x420] sm:$0xff] %v628_v4  ;;  %631 = vst [vmem:[#allocation2 + $0x428] sm:$0xff] %v630_v5  ;;  %v634_v7 = vld [vmem:[%s12125_s9 + $0x438] sm:$0xff]  ;;  %v636_v8 = vld [vmem:[%s12125_s9 + $0x440] sm:$0xff] }
  0x52   : > { %633 = vst [vmem:[#allocation2 + $0x430] sm:$0xff] %v632_v6  ;;  %v638_v9 = vld [vmem:[%s12125_s9 + $0x448] sm:$0xff]  ;;  %635 = vst [vmem:[#allocation2 + $0x438] sm:$0xff] %v634_v7  ;;  %v640_v10 = vld [vmem:[%s12125_s9 + $0x450] sm:$0xff] }
  0x53   : > { %637 = vst [vmem:[#allocation2 + $0x440] sm:$0xff] %v636_v8  ;;  %639 = vst [vmem:[#allocation2 + $0x448] sm:$0xff] %v638_v9  ;;  %v642_v11 = vld [vmem:[%s12125_s9 + $0x458] sm:$0xff]  ;;  %v644_v12 = vld [vmem:[%s12125_s9 + $0x460] sm:$0xff] }
  0x54   : > { %641 = vst [vmem:[#allocation2 + $0x450] sm:$0xff] %v640_v10  ;;  %643 = vst [vmem:[#allocation2 + $0x458] sm:$0xff] %v642_v11  ;;  %v646_v13 = vld [vmem:[%s12125_s9 + $0x468] sm:$0xff]  ;;  %v648_v14 = vld [vmem:[%s12125_s9 + $0x470] sm:$0xff] }
  0x55   : > { %645 = vst [vmem:[#allocation2 + $0x460] sm:$0xff] %v644_v12  ;;  %v650_v15 = vld [vmem:[%s12125_s9 + $0x478] sm:$0xff]  ;;  %647 = vst [vmem:[#allocation2 + $0x468] sm:$0xff] %v646_v13  ;;  %v652_v16 = vld [vmem:[%s12125_s9 + $0x480] sm:$0xff] }
  0x56   : > { %649 = vst [vmem:[#allocation2 + $0x470] sm:$0xff] %v648_v14  ;;  %651 = vst [vmem:[#allocation2 + $0x478] sm:$0xff] %v650_v15  ;;  %v654_v17 = vld [vmem:[%s12125_s9 + $0x488] sm:$0xff]  ;;  %v656_v18 = vld [vmem:[%s12125_s9 + $0x490] sm:$0xff] }
  0x57   : > { %653 = vst [vmem:[#allocation2 + $0x480] sm:$0xff] %v652_v16  ;;  %655 = vst [vmem:[#allocation2 + $0x488] sm:$0xff] %v654_v17  ;;  %v658_v19 = vld [vmem:[%s12125_s9 + $0x498] sm:$0xff]  ;;  %v660_v20 = vld [vmem:[%s12125_s9 + $0x4a0] sm:$0xff] }
  0x58   : > { %657 = vst [vmem:[#allocation2 + $0x490] sm:$0xff] %v656_v18  ;;  %v662_v21 = vld [vmem:[%s12125_s9 + $0x4a8] sm:$0xff]  ;;  %659 = vst [vmem:[#allocation2 + $0x498] sm:$0xff] %v658_v19  ;;  %v664_v22 = vld [vmem:[%s12125_s9 + $0x4b0] sm:$0xff] }
  0x59   : > { %661 = vst [vmem:[#allocation2 + $0x4a0] sm:$0xff] %v660_v20  ;;  %663 = vst [vmem:[#allocation2 + $0x4a8] sm:$0xff] %v662_v21  ;;  %v666_v23 = vld [vmem:[%s12125_s9 + $0x4b8] sm:$0xff]  ;;  %v668_v24 = vld [vmem:[%s12125_s9 + $0x4c0] sm:$0xff] }
  0x5a   : > { %665 = vst [vmem:[#allocation2 + $0x4b0] sm:$0xff] %v664_v22  ;;  %667 = vst [vmem:[#allocation2 + $0x4b8] sm:$0xff] %v666_v23  ;;  %v670_v25 = vld [vmem:[%s12125_s9 + $0x4c8] sm:$0xff]  ;;  %v672_v26 = vld [vmem:[%s12125_s9 + $0x4d0] sm:$0xff] }
  0x5b   : > { %669 = vst [vmem:[#allocation2 + $0x4c0] sm:$0xff] %v668_v24  ;;  %v674_v27 = vld [vmem:[%s12125_s9 + $0x4d8] sm:$0xff]  ;;  %671 = vst [vmem:[#allocation2 + $0x4c8] sm:$0xff] %v670_v25  ;;  %v676_v28 = vld [vmem:[%s12125_s9 + $0x4e0] sm:$0xff] }
  0x5c   : > { %673 = vst [vmem:[#allocation2 + $0x4d0] sm:$0xff] %v672_v26  ;;  %675 = vst [vmem:[#allocation2 + $0x4d8] sm:$0xff] %v674_v27  ;;  %v678_v29 = vld [vmem:[%s12125_s9 + $0x4e8] sm:$0xff]  ;;  %v680_v30 = vld [vmem:[%s12125_s9 + $0x4f0] sm:$0xff] }
  0x5d   : > { %677 = vst [vmem:[#allocation2 + $0x4e0] sm:$0xff] %v676_v28  ;;  %679 = vst [vmem:[#allocation2 + $0x4e8] sm:$0xff] %v678_v29  ;;  %v682_v31 = vld [vmem:[%s12125_s9 + $0x4f8] sm:$0xff]  ;;  %v684_v32 = vld [vmem:[%s12125_s9 + $0x500] sm:$0xff] }
  0x5e   : > { %681 = vst [vmem:[#allocation2 + $0x4f0] sm:$0xff] %v680_v30  ;;  %v686_v33 = vld [vmem:[%s12125_s9 + $0x508] sm:$0xff]  ;;  %683 = vst [vmem:[#allocation2 + $0x4f8] sm:$0xff] %v682_v31  ;;  %v688_v34 = vld [vmem:[%s12125_s9 + $0x510] sm:$0xff] }
  0x5f   : > { %685 = vst [vmem:[#allocation2 + $0x500] sm:$0xff] %v684_v32  ;;  %687 = vst [vmem:[#allocation2 + $0x508] sm:$0xff] %v686_v33  ;;  %v690_v35 = vld [vmem:[%s12125_s9 + $0x518] sm:$0xff]  ;;  %v692_v36 = vld [vmem:[%s12125_s9 + $0x520] sm:$0xff] }
  0x60   : > { %689 = vst [vmem:[#allocation2 + $0x510] sm:$0xff] %v688_v34  ;;  %691 = vst [vmem:[#allocation2 + $0x518] sm:$0xff] %v690_v35  ;;  %v694_v37 = vld [vmem:[%s12125_s9 + $0x528] sm:$0xff]  ;;  %v696_v38 = vld [vmem:[%s12125_s9 + $0x530] sm:$0xff] }
  0x61   : > { %693 = vst [vmem:[#allocation2 + $0x520] sm:$0xff] %v692_v36  ;;  %v698_v39 = vld [vmem:[%s12125_s9 + $0x538] sm:$0xff]  ;;  %695 = vst [vmem:[#allocation2 + $0x528] sm:$0xff] %v694_v37  ;;  %v700_v40 = vld [vmem:[%s12125_s9 + $0x540] sm:$0xff] }
  0x62   : > { %697 = vst [vmem:[#allocation2 + $0x530] sm:$0xff] %v696_v38  ;;  %699 = vst [vmem:[#allocation2 + $0x538] sm:$0xff] %v698_v39  ;;  %v702_v41 = vld [vmem:[%s12125_s9 + $0x548] sm:$0xff]  ;;  %v704_v42 = vld [vmem:[%s12125_s9 + $0x550] sm:$0xff] }
  0x63   : > { %701 = vst [vmem:[#allocation2 + $0x540] sm:$0xff] %v700_v40  ;;  %703 = vst [vmem:[#allocation2 + $0x548] sm:$0xff] %v702_v41  ;;  %v706_v43 = vld [vmem:[%s12125_s9 + $0x558] sm:$0xff]  ;;  %v708_v44 = vld [vmem:[%s12125_s9 + $0x560] sm:$0xff] }
  0x64   : > { %705 = vst [vmem:[#allocation2 + $0x550] sm:$0xff] %v704_v42  ;;  %v710_v45 = vld [vmem:[%s12125_s9 + $0x568] sm:$0xff]  ;;  %707 = vst [vmem:[#allocation2 + $0x558] sm:$0xff] %v706_v43  ;;  %v712_v46 = vld [vmem:[%s12125_s9 + $0x570] sm:$0xff] }
  0x65   : > { %709 = vst [vmem:[#allocation2 + $0x560] sm:$0xff] %v708_v44  ;;  %711 = vst [vmem:[#allocation2 + $0x568] sm:$0xff] %v710_v45  ;;  %v714_v47 = vld [vmem:[%s12125_s9 + $0x578] sm:$0xff]  ;;  %v716_v48 = vld [vmem:[%s12125_s9 + $0x580] sm:$0xff] }
  0x66   : > { %713 = vst [vmem:[#allocation2 + $0x570] sm:$0xff] %v712_v46  ;;  %715 = vst [vmem:[#allocation2 + $0x578] sm:$0xff] %v714_v47  ;;  %v718_v49 = vld [vmem:[%s12125_s9 + $0x588] sm:$0xff]  ;;  %v720_v50 = vld [vmem:[%s12125_s9 + $0x590] sm:$0xff] }
  0x67   : > { %717 = vst [vmem:[#allocation2 + $0x580] sm:$0xff] %v716_v48  ;;  %v722_v51 = vld [vmem:[%s12125_s9 + $0x598] sm:$0xff]  ;;  %719 = vst [vmem:[#allocation2 + $0x588] sm:$0xff] %v718_v49  ;;  %v724_v52 = vld [vmem:[%s12125_s9 + $0x5a0] sm:$0xff] }
  0x68   : > { %721 = vst [vmem:[#allocation2 + $0x590] sm:$0xff] %v720_v50  ;;  %723 = vst [vmem:[#allocation2 + $0x598] sm:$0xff] %v722_v51  ;;  %v726_v53 = vld [vmem:[%s12125_s9 + $0x5a8] sm:$0xff]  ;;  %v728_v54 = vld [vmem:[%s12125_s9 + $0x5b0] sm:$0xff] }
  0x69   : > { %725 = vst [vmem:[#allocation2 + $0x5a0] sm:$0xff] %v724_v52  ;;  %727 = vst [vmem:[#allocation2 + $0x5a8] sm:$0xff] %v726_v53  ;;  %v730_v55 = vld [vmem:[%s12125_s9 + $0x5b8] sm:$0xff]  ;;  %v732_v56 = vld [vmem:[%s12125_s9 + $0x5c0] sm:$0xff] }
  0x6a   : > { %729 = vst [vmem:[#allocation2 + $0x5b0] sm:$0xff] %v728_v54  ;;  %v734_v57 = vld [vmem:[%s12125_s9 + $0x5c8] sm:$0xff]  ;;  %731 = vst [vmem:[#allocation2 + $0x5b8] sm:$0xff] %v730_v55  ;;  %v736_v58 = vld [vmem:[%s12125_s9 + $0x5d0] sm:$0xff] }
  0x6b   : > { %733 = vst [vmem:[#allocation2 + $0x5c0] sm:$0xff] %v732_v56  ;;  %735 = vst [vmem:[#allocation2 + $0x5c8] sm:$0xff] %v734_v57  ;;  %v738_v59 = vld [vmem:[%s12125_s9 + $0x5d8] sm:$0xff]  ;;  %v740_v60 = vld [vmem:[%s12125_s9 + $0x5e0] sm:$0xff] }
  0x6c   : > { %737 = vst [vmem:[#allocation2 + $0x5d0] sm:$0xff] %v736_v58  ;;  %739 = vst [vmem:[#allocation2 + $0x5d8] sm:$0xff] %v738_v59  ;;  %v742_v61 = vld [vmem:[%s12125_s9 + $0x5e8] sm:$0xff]  ;;  %v744_v62 = vld [vmem:[%s12125_s9 + $0x5f0] sm:$0xff] }
  0x6d   : > { %741 = vst [vmem:[#allocation2 + $0x5e0] sm:$0xff] %v740_v60  ;;  %v746_v63 = vld [vmem:[%s12125_s9 + $0x5f8] sm:$0xff]  ;;  %743 = vst [vmem:[#allocation2 + $0x5e8] sm:$0xff] %v742_v61  ;;  %v748_v0 = vld [vmem:[%s12125_s9 + $0x600] sm:$0xff] }
  0x6e   : > { %745 = vst [vmem:[#allocation2 + $0x5f0] sm:$0xff] %v744_v62  ;;  %747 = vst [vmem:[#allocation2 + $0x5f8] sm:$0xff] %v746_v63  ;;  %v750_v1 = vld [vmem:[%s12125_s9 + $0x608] sm:$0xff]  ;;  %v752_v2 = vld [vmem:[%s12125_s9 + $0x610] sm:$0xff] }
  0x6f   : > { %749 = vst [vmem:[#allocation2 + $0x600] sm:$0xff] %v748_v0  ;;  %751 = vst [vmem:[#allocation2 + $0x608] sm:$0xff] %v750_v1  ;;  %v754_v3 = vld [vmem:[%s12125_s9 + $0x618] sm:$0xff]  ;;  %v756_v4 = vld [vmem:[%s12125_s9 + $0x620] sm:$0xff] }
  0x70   : > { %753 = vst [vmem:[#allocation2 + $0x610] sm:$0xff] %v752_v2  ;;  %v758_v5 = vld [vmem:[%s12125_s9 + $0x628] sm:$0xff]  ;;  %755 = vst [vmem:[#allocation2 + $0x618] sm:$0xff] %v754_v3  ;;  %v760_v6 = vld [vmem:[%s12125_s9 + $0x630] sm:$0xff] }
  0x71   : > { %757 = vst [vmem:[#allocation2 + $0x620] sm:$0xff] %v756_v4  ;;  %759 = vst [vmem:[#allocation2 + $0x628] sm:$0xff] %v758_v5  ;;  %v762_v7 = vld [vmem:[%s12125_s9 + $0x638] sm:$0xff]  ;;  %v764_v8 = vld [vmem:[%s12125_s9 + $0x640] sm:$0xff] }
  0x72   : > { %761 = vst [vmem:[#allocation2 + $0x630] sm:$0xff] %v760_v6  ;;  %763 = vst [vmem:[#allocation2 + $0x638] sm:$0xff] %v762_v7  ;;  %v766_v9 = vld [vmem:[%s12125_s9 + $0x648] sm:$0xff]  ;;  %v768_v10 = vld [vmem:[%s12125_s9 + $0x650] sm:$0xff] }
  0x73   : > { %765 = vst [vmem:[#allocation2 + $0x640] sm:$0xff] %v764_v8  ;;  %v770_v11 = vld [vmem:[%s12125_s9 + $0x658] sm:$0xff]  ;;  %767 = vst [vmem:[#allocation2 + $0x648] sm:$0xff] %v766_v9  ;;  %v772_v12 = vld [vmem:[%s12125_s9 + $0x660] sm:$0xff] }
  0x74   : > { %769 = vst [vmem:[#allocation2 + $0x650] sm:$0xff] %v768_v10  ;;  %771 = vst [vmem:[#allocation2 + $0x658] sm:$0xff] %v770_v11  ;;  %v774_v13 = vld [vmem:[%s12125_s9 + $0x668] sm:$0xff]  ;;  %v776_v14 = vld [vmem:[%s12125_s9 + $0x670] sm:$0xff] }
  0x75   : > { %773 = vst [vmem:[#allocation2 + $0x660] sm:$0xff] %v772_v12  ;;  %775 = vst [vmem:[#allocation2 + $0x668] sm:$0xff] %v774_v13  ;;  %v778_v15 = vld [vmem:[%s12125_s9 + $0x678] sm:$0xff]  ;;  %v780_v16 = vld [vmem:[%s12125_s9 + $0x680] sm:$0xff] }
  0x76   : > { %777 = vst [vmem:[#allocation2 + $0x670] sm:$0xff] %v776_v14  ;;  %v782_v17 = vld [vmem:[%s12125_s9 + $0x688] sm:$0xff]  ;;  %779 = vst [vmem:[#allocation2 + $0x678] sm:$0xff] %v778_v15  ;;  %v784_v18 = vld [vmem:[%s12125_s9 + $0x690] sm:$0xff] }
  0x77   : > { %781 = vst [vmem:[#allocation2 + $0x680] sm:$0xff] %v780_v16  ;;  %783 = vst [vmem:[#allocation2 + $0x688] sm:$0xff] %v782_v17  ;;  %v786_v19 = vld [vmem:[%s12125_s9 + $0x698] sm:$0xff]  ;;  %v788_v20 = vld [vmem:[%s12125_s9 + $0x6a0] sm:$0xff] }
  0x78   : > { %785 = vst [vmem:[#allocation2 + $0x690] sm:$0xff] %v784_v18  ;;  %787 = vst [vmem:[#allocation2 + $0x698] sm:$0xff] %v786_v19  ;;  %v790_v21 = vld [vmem:[%s12125_s9 + $0x6a8] sm:$0xff]  ;;  %v792_v22 = vld [vmem:[%s12125_s9 + $0x6b0] sm:$0xff] }
  0x79   : > { %789 = vst [vmem:[#allocation2 + $0x6a0] sm:$0xff] %v788_v20  ;;  %v794_v23 = vld [vmem:[%s12125_s9 + $0x6b8] sm:$0xff]  ;;  %791 = vst [vmem:[#allocation2 + $0x6a8] sm:$0xff] %v790_v21  ;;  %v796_v24 = vld [vmem:[%s12125_s9 + $0x6c0] sm:$0xff] }
  0x7a   : > { %793 = vst [vmem:[#allocation2 + $0x6b0] sm:$0xff] %v792_v22  ;;  %795 = vst [vmem:[#allocation2 + $0x6b8] sm:$0xff] %v794_v23  ;;  %v798_v25 = vld [vmem:[%s12125_s9 + $0x6c8] sm:$0xff]  ;;  %v800_v26 = vld [vmem:[%s12125_s9 + $0x6d0] sm:$0xff] }
  0x7b   : > { %797 = vst [vmem:[#allocation2 + $0x6c0] sm:$0xff] %v796_v24  ;;  %799 = vst [vmem:[#allocation2 + $0x6c8] sm:$0xff] %v798_v25  ;;  %v802_v27 = vld [vmem:[%s12125_s9 + $0x6d8] sm:$0xff]  ;;  %v804_v28 = vld [vmem:[%s12125_s9 + $0x6e0] sm:$0xff] }
  0x7c   : > { %801 = vst [vmem:[#allocation2 + $0x6d0] sm:$0xff] %v800_v26  ;;  %v806_v29 = vld [vmem:[%s12125_s9 + $0x6e8] sm:$0xff]  ;;  %803 = vst [vmem:[#allocation2 + $0x6d8] sm:$0xff] %v802_v27  ;;  %v808_v30 = vld [vmem:[%s12125_s9 + $0x6f0] sm:$0xff] }
  0x7d   : > { %805 = vst [vmem:[#allocation2 + $0x6e0] sm:$0xff] %v804_v28  ;;  %807 = vst [vmem:[#allocation2 + $0x6e8] sm:$0xff] %v806_v29  ;;  %v810_v31 = vld [vmem:[%s12125_s9 + $0x6f8] sm:$0xff]  ;;  %v812_v32 = vld [vmem:[%s12125_s9 + $0x700] sm:$0xff] }
  0x7e   : > { %809 = vst [vmem:[#allocation2 + $0x6f0] sm:$0xff] %v808_v30  ;;  %811 = vst [vmem:[#allocation2 + $0x6f8] sm:$0xff] %v810_v31  ;;  %v814_v33 = vld [vmem:[%s12125_s9 + $0x708] sm:$0xff]  ;;  %v816_v34 = vld [vmem:[%s12125_s9 + $0x710] sm:$0xff] }
  0x7f   : > { %813 = vst [vmem:[#allocation2 + $0x700] sm:$0xff] %v812_v32  ;;  %v818_v35 = vld [vmem:[%s12125_s9 + $0x718] sm:$0xff]  ;;  %815 = vst [vmem:[#allocation2 + $0x708] sm:$0xff] %v814_v33  ;;  %v820_v36 = vld [vmem:[%s12125_s9 + $0x720] sm:$0xff] }
  0x80   : > { %817 = vst [vmem:[#allocation2 + $0x710] sm:$0xff] %v816_v34  ;;  %819 = vst [vmem:[#allocation2 + $0x718] sm:$0xff] %v818_v35  ;;  %v822_v37 = vld [vmem:[%s12125_s9 + $0x728] sm:$0xff]  ;;  %v824_v38 = vld [vmem:[%s12125_s9 + $0x730] sm:$0xff] }
  0x81   : > { %821 = vst [vmem:[#allocation2 + $0x720] sm:$0xff] %v820_v36  ;;  %823 = vst [vmem:[#allocation2 + $0x728] sm:$0xff] %v822_v37  ;;  %v826_v39 = vld [vmem:[%s12125_s9 + $0x738] sm:$0xff]  ;;  %v828_v40 = vld [vmem:[%s12125_s9 + $0x740] sm:$0xff] }
  0x82   : > { %825 = vst [vmem:[#allocation2 + $0x730] sm:$0xff] %v824_v38  ;;  %v830_v41 = vld [vmem:[%s12125_s9 + $0x748] sm:$0xff]  ;;  %827 = vst [vmem:[#allocation2 + $0x738] sm:$0xff] %v826_v39  ;;  %v832_v42 = vld [vmem:[%s12125_s9 + $0x750] sm:$0xff] }
  0x83   : > { %829 = vst [vmem:[#allocation2 + $0x740] sm:$0xff] %v828_v40  ;;  %831 = vst [vmem:[#allocation2 + $0x748] sm:$0xff] %v830_v41  ;;  %v834_v43 = vld [vmem:[%s12125_s9 + $0x758] sm:$0xff]  ;;  %v836_v44 = vld [vmem:[%s12125_s9 + $0x760] sm:$0xff] }
  0x84   : > { %833 = vst [vmem:[#allocation2 + $0x750] sm:$0xff] %v832_v42  ;;  %835 = vst [vmem:[#allocation2 + $0x758] sm:$0xff] %v834_v43  ;;  %v838_v45 = vld [vmem:[%s12125_s9 + $0x768] sm:$0xff]  ;;  %v840_v46 = vld [vmem:[%s12125_s9 + $0x770] sm:$0xff] }
  0x85   : > { %837 = vst [vmem:[#allocation2 + $0x760] sm:$0xff] %v836_v44  ;;  %v842_v47 = vld [vmem:[%s12125_s9 + $0x778] sm:$0xff]  ;;  %839 = vst [vmem:[#allocation2 + $0x768] sm:$0xff] %v838_v45  ;;  %v844_v48 = vld [vmem:[%s12125_s9 + $0x780] sm:$0xff] }
  0x86   : > { %841 = vst [vmem:[#allocation2 + $0x770] sm:$0xff] %v840_v46  ;;  %843 = vst [vmem:[#allocation2 + $0x778] sm:$0xff] %v842_v47  ;;  %v846_v49 = vld [vmem:[%s12125_s9 + $0x788] sm:$0xff]  ;;  %v848_v50 = vld [vmem:[%s12125_s9 + $0x790] sm:$0xff] }
  0x87   : > { %845 = vst [vmem:[#allocation2 + $0x780] sm:$0xff] %v844_v48  ;;  %847 = vst [vmem:[#allocation2 + $0x788] sm:$0xff] %v846_v49  ;;  %v850_v51 = vld [vmem:[%s12125_s9 + $0x798] sm:$0xff]  ;;  %v852_v52 = vld [vmem:[%s12125_s9 + $0x7a0] sm:$0xff] }
  0x88   : > { %849 = vst [vmem:[#allocation2 + $0x790] sm:$0xff] %v848_v50  ;;  %v854_v53 = vld [vmem:[%s12125_s9 + $0x7a8] sm:$0xff]  ;;  %851 = vst [vmem:[#allocation2 + $0x798] sm:$0xff] %v850_v51  ;;  %v856_v54 = vld [vmem:[%s12125_s9 + $0x7b0] sm:$0xff] }
  0x89   : > { %853 = vst [vmem:[#allocation2 + $0x7a0] sm:$0xff] %v852_v52  ;;  %855 = vst [vmem:[#allocation2 + $0x7a8] sm:$0xff] %v854_v53  ;;  %v858_v55 = vld [vmem:[%s12125_s9 + $0x7b8] sm:$0xff]  ;;  %v860_v56 = vld [vmem:[%s12125_s9 + $0x7c0] sm:$0xff] }
  0x8a   : > { %857 = vst [vmem:[#allocation2 + $0x7b0] sm:$0xff] %v856_v54  ;;  %859 = vst [vmem:[#allocation2 + $0x7b8] sm:$0xff] %v858_v55  ;;  %v862_v57 = vld [vmem:[%s12125_s9 + $0x7c8] sm:$0xff]  ;;  %v864_v58 = vld [vmem:[%s12125_s9 + $0x7d0] sm:$0xff] }
  0x8b   : > { %861 = vst [vmem:[#allocation2 + $0x7c0] sm:$0xff] %v860_v56  ;;  %v866_v59 = vld [vmem:[%s12125_s9 + $0x7d8] sm:$0xff]  ;;  %863 = vst [vmem:[#allocation2 + $0x7c8] sm:$0xff] %v862_v57  ;;  %v868_v60 = vld [vmem:[%s12125_s9 + $0x7e0] sm:$0xff] }
  0x8c   : > { %865 = vst [vmem:[#allocation2 + $0x7d0] sm:$0xff] %v864_v58  ;;  %867 = vst [vmem:[#allocation2 + $0x7d8] sm:$0xff] %v866_v59  ;;  %v870_v61 = vld [vmem:[%s12125_s9 + $0x7e8] sm:$0xff]  ;;  %v872_v62 = vld [vmem:[%s12125_s9 + $0x7f0] sm:$0xff] }
  0x8d   : > { %869 = vst [vmem:[#allocation2 + $0x7e0] sm:$0xff] %v868_v60  ;;  %871 = vst [vmem:[#allocation2 + $0x7e8] sm:$0xff] %v870_v61  ;;  %v874_v63 = vld [vmem:[%s12125_s9 + $0x7f8] sm:$0xff]  ;;  %v876_v0 = vld [vmem:[%s12125_s9 + $0x800] sm:$0xff] }
  0x8e   : > { %873 = vst [vmem:[#allocation2 + $0x7f0] sm:$0xff] %v872_v62  ;;  %v878_v1 = vld [vmem:[%s12125_s9 + $0x808] sm:$0xff]  ;;  %875 = vst [vmem:[#allocation2 + $0x7f8] sm:$0xff] %v874_v63  ;;  %v880_v2 = vld [vmem:[%s12125_s9 + $0x810] sm:$0xff] }
  0x8f   : > { %877 = vst [vmem:[#allocation2 + $0x800] sm:$0xff] %v876_v0  ;;  %879 = vst [vmem:[#allocation2 + $0x808] sm:$0xff] %v878_v1  ;;  %v882_v3 = vld [vmem:[%s12125_s9 + $0x818] sm:$0xff]  ;;  %v884_v4 = vld [vmem:[%s12125_s9 + $0x820] sm:$0xff] }
  0x90   : > { %881 = vst [vmem:[#allocation2 + $0x810] sm:$0xff] %v880_v2  ;;  %883 = vst [vmem:[#allocation2 + $0x818] sm:$0xff] %v882_v3  ;;  %v886_v5 = vld [vmem:[%s12125_s9 + $0x828] sm:$0xff]  ;;  %v888_v6 = vld [vmem:[%s12125_s9 + $0x830] sm:$0xff] }
  0x91   : > { %885 = vst [vmem:[#allocation2 + $0x820] sm:$0xff] %v884_v4  ;;  %v890_v7 = vld [vmem:[%s12125_s9 + $0x838] sm:$0xff]  ;;  %887 = vst [vmem:[#allocation2 + $0x828] sm:$0xff] %v886_v5  ;;  %v892_v8 = vld [vmem:[%s12125_s9 + $0x840] sm:$0xff] }
  0x92   : > { %889 = vst [vmem:[#allocation2 + $0x830] sm:$0xff] %v888_v6  ;;  %891 = vst [vmem:[#allocation2 + $0x838] sm:$0xff] %v890_v7  ;;  %v894_v9 = vld [vmem:[%s12125_s9 + $0x848] sm:$0xff]  ;;  %v896_v10 = vld [vmem:[%s12125_s9 + $0x850] sm:$0xff] }
  0x93   : > { %893 = vst [vmem:[#allocation2 + $0x840] sm:$0xff] %v892_v8  ;;  %895 = vst [vmem:[#allocation2 + $0x848] sm:$0xff] %v894_v9  ;;  %v898_v11 = vld [vmem:[%s12125_s9 + $0x858] sm:$0xff]  ;;  %v900_v12 = vld [vmem:[%s12125_s9 + $0x860] sm:$0xff] }
  0x94   : > { %897 = vst [vmem:[#allocation2 + $0x850] sm:$0xff] %v896_v10  ;;  %v902_v13 = vld [vmem:[%s12125_s9 + $0x868] sm:$0xff]  ;;  %899 = vst [vmem:[#allocation2 + $0x858] sm:$0xff] %v898_v11  ;;  %v904_v14 = vld [vmem:[%s12125_s9 + $0x870] sm:$0xff] }
  0x95   : > { %901 = vst [vmem:[#allocation2 + $0x860] sm:$0xff] %v900_v12  ;;  %903 = vst [vmem:[#allocation2 + $0x868] sm:$0xff] %v902_v13  ;;  %v906_v15 = vld [vmem:[%s12125_s9 + $0x878] sm:$0xff]  ;;  %v908_v16 = vld [vmem:[%s12125_s9 + $0x880] sm:$0xff] }
  0x96   : > { %905 = vst [vmem:[#allocation2 + $0x870] sm:$0xff] %v904_v14  ;;  %907 = vst [vmem:[#allocation2 + $0x878] sm:$0xff] %v906_v15  ;;  %v910_v17 = vld [vmem:[%s12125_s9 + $0x888] sm:$0xff]  ;;  %v912_v18 = vld [vmem:[%s12125_s9 + $0x890] sm:$0xff] }
  0x97   : > { %909 = vst [vmem:[#allocation2 + $0x880] sm:$0xff] %v908_v16  ;;  %v914_v19 = vld [vmem:[%s12125_s9 + $0x898] sm:$0xff]  ;;  %911 = vst [vmem:[#allocation2 + $0x888] sm:$0xff] %v910_v17  ;;  %v916_v20 = vld [vmem:[%s12125_s9 + $0x8a0] sm:$0xff] }
  0x98   : > { %913 = vst [vmem:[#allocation2 + $0x890] sm:$0xff] %v912_v18  ;;  %915 = vst [vmem:[#allocation2 + $0x898] sm:$0xff] %v914_v19  ;;  %v918_v21 = vld [vmem:[%s12125_s9 + $0x8a8] sm:$0xff]  ;;  %v920_v22 = vld [vmem:[%s12125_s9 + $0x8b0] sm:$0xff] }
  0x99   : > { %917 = vst [vmem:[#allocation2 + $0x8a0] sm:$0xff] %v916_v20  ;;  %919 = vst [vmem:[#allocation2 + $0x8a8] sm:$0xff] %v918_v21  ;;  %v922_v23 = vld [vmem:[%s12125_s9 + $0x8b8] sm:$0xff]  ;;  %v924_v24 = vld [vmem:[%s12125_s9 + $0x8c0] sm:$0xff] }
  0x9a   : > { %921 = vst [vmem:[#allocation2 + $0x8b0] sm:$0xff] %v920_v22  ;;  %v926_v25 = vld [vmem:[%s12125_s9 + $0x8c8] sm:$0xff]  ;;  %923 = vst [vmem:[#allocation2 + $0x8b8] sm:$0xff] %v922_v23  ;;  %v928_v26 = vld [vmem:[%s12125_s9 + $0x8d0] sm:$0xff] }
  0x9b   : > { %925 = vst [vmem:[#allocation2 + $0x8c0] sm:$0xff] %v924_v24  ;;  %927 = vst [vmem:[#allocation2 + $0x8c8] sm:$0xff] %v926_v25  ;;  %v930_v27 = vld [vmem:[%s12125_s9 + $0x8d8] sm:$0xff]  ;;  %v932_v28 = vld [vmem:[%s12125_s9 + $0x8e0] sm:$0xff] }
  0x9c   : > { %929 = vst [vmem:[#allocation2 + $0x8d0] sm:$0xff] %v928_v26  ;;  %931 = vst [vmem:[#allocation2 + $0x8d8] sm:$0xff] %v930_v27  ;;  %v934_v29 = vld [vmem:[%s12125_s9 + $0x8e8] sm:$0xff]  ;;  %v936_v30 = vld [vmem:[%s12125_s9 + $0x8f0] sm:$0xff] }
  0x9d   : > { %933 = vst [vmem:[#allocation2 + $0x8e0] sm:$0xff] %v932_v28  ;;  %v938_v31 = vld [vmem:[%s12125_s9 + $0x8f8] sm:$0xff]  ;;  %935 = vst [vmem:[#allocation2 + $0x8e8] sm:$0xff] %v934_v29  ;;  %v964_v33 = vld [vmem:[%s9179_s18 + $0x60] sm:$0x1] }
  0x9e   : > { %937 = vst [vmem:[#allocation2 + $0x8f0] sm:$0xff] %v936_v30  ;;  %939 = vst [vmem:[#allocation2 + $0x8f8] sm:$0xff] %v938_v31  ;;  %v955_v32 = vld [vmem:[%s9179_s18 + $0x18] sm:$0xff]  ;;  %v954_v34 = vld [vmem:[%s9179_s18 + $0x10] sm:$0xff] }
  0x9f   : > { %vm9998_vm2 = vmpackc.low %vm983_vm0, %vm8982_vm1  ;;  %v8518_v36 = vpack.c.bf16 %v964_v33, %v955_v32  ;;  %v963_v37 = vld [vmem:[%s9179_s18 + $0x58] sm:$0x1]  ;;  %v953_v38 = vld [vmem:[%s9179_s18 + $0x8] sm:$0xff] }
  0xa0   : > { %v8521_v39 = vpack.c.bf16 %v963_v37, %v954_v34 }
  0xa1   : > { %947 = vsyncadd [#allocation3], 36864  ;;  %v962_v40 = vld [vmem:[%s9179_s18 + $0x50] sm:$0x1]  ;;  %v12127_v41 = vmov 0.0   ;;  %v952_v42 = vld [vmem:[%s9179_s18] sm:$0xff]  ;;  %8520 = vmatprep.subr.msk.bf16.mxu1 %vm9998_vm2, %v8518_v36 }
  0xa2   : > { %1164 = vmatprep.mubr.f32.mxu1 %v12127_v41  ;;  %1075 = vmatprep.mubr.f32.mxu0 %v12127_v41  ;;  %v8512_v43 = vpack.c.bf16 %v962_v40, %v953_v38  ;;  %v961_v44 = vld [vmem:[%s9179_s18 + $0x48] sm:$0x1]  ;;  %v10014_v45 = vld [vmem:[%s12117_s1] sm:$0xff]  ;;  %v12128_v46 = vmov 0   ;;  %vm970_vm3 = vcmask 72704   ;;  %v959_v48 = vld [vmem:[%s9179_s18 + $0x38] sm:$0xff] }
  0xa3   : > { %8800 = vset.pattern.permute.xlu1 %v12128_v46  ;;  %8523 = vmatpush1.bf16.msk.msra.mxu1 %vm9998_vm2, %v8521_v39  ;;  %v8515_v47 = vpack.c.bf16 %v961_v44, %v952_v42  ;;  %v968_v49 = vld [vmem:[%s9179_s18 + $0x80] sm:$0x1]  ;;  %v958_v50 = vld [vmem:[%s9179_s18 + $0x30] sm:$0xff]  ;;  %v967_v52 = vld [vmem:[%s9179_s18 + $0x78] sm:$0x1]  ;;  %s8985_s22 = smov 70  }
  0xa4   : > { %8799 = vset.pattern.permute.xlu0 %v12128_v46  ;;  %8514 = vmatprep.subr.msk.bf16.mxu0 %vm9998_vm2, %v8512_v43  ;;  %v8530_v51 = vpack.c.bf16 %v968_v49, %v959_v48  ;;  %v957_v53 = vld [vmem:[%s9179_s18 + $0x28] sm:$0xff]  ;;  %v8533_v54 = vpack.c.bf16 %v967_v52, %v958_v50  ;;  %v966_v55 = vld [vmem:[%s9179_s18 + $0x70] sm:$0x1]  ;;  %v956_v56 = vld [vmem:[%s9179_s18 + $0x20] sm:$0xff]  ;;  %s8986_s12 = smov 82   ;;  %s8987_s20 = smov 12  }
  0xa5   : > { %8517 = vmatpush1.bf16.msk.msra.mxu0 %vm9998_vm2, %v8515_v47  ;;  %v965_v57 = vld [vmem:[%s9179_s18 + $0x68] sm:$0x1]  ;;  %v8524_v58 = vpack.c.bf16 %v966_v55, %v957_v53  ;;  %v960_v60 = vld [vmem:[%s9179_s18 + $0x40] sm:$0xff]  ;;  %v950_v2 = vld [vmem:[%s12117_s1 + $0x10] sm:$0xff]  ;;  %s8988_s21 = smov 104   ;;  %vm1488_vm4 = vcmask 850944  }
  0xa6   : > { %7546 = vmatmul.mubr.msk.f32.vlgmr.msra.gmra.mrb[0].mxu1 %vm970_vm3, %v10014_v45  ;;  %8532 = vmatprep.subr.msk.bf16.mxu1 %vm9998_vm2, %v8530_v51  ;;  %v8527_v59 = vpack.c.bf16 %v965_v57, %v956_v56  ;;  %v969_v61 = vld [vmem:[%s9179_s18 + $0x88] sm:$0x1]  ;;  %v1658_v1 = vld [vmem:[%s12118_s2] sm:$0xff]  ;;  %v1660_v3 = vld [vmem:[%s12118_s2 + $0x10] sm:$0xff]  ;;  %s8989_s28 = smov 80   ;;  %vm1625_vm5 = vcmask 654336  }
  0xa7   : > { %1170 = vmatprep.mubr.f32.mxu1 %v12127_v41  ;;  %v949_v62 = vld [vmem:[%s12117_s1 + $0x8] sm:$0xff]  ;;  %8535 = vmatpush1.bf16.msk.msra.mxu1 %vm9998_vm2, %v8533_v54  ;;  %v8536_v63 = vpack.c.bf16 %v969_v61, %v960_v60  ;;  %v1661_v4 = vld [vmem:[%s12118_s2 + $0x18] sm:$0xff]  ;;  %v10081_v6 = vld [vmem:[%s12121_s5 + $0x4] ss:$0 sm:$0xff]  ;;  %s8990_s27 = smov 54   ;;  %s8991_s29 = smov 112  }
  0xa8   : > { %7540 = vmatmul.mubr.msk.f32.vlgmr.msra.gmra.mrb[0].mxu0 %vm970_vm3, %v10014_v45  ;;  %8526 = vmatprep.subr.msk.bf16.mxu0 %vm9998_vm2, %v8524_v58  ;;  %v1659_v0 = vld [vmem:[%s12118_s2 + $0x8] sm:$0xff]  ;;  %v951_v5 = vld [vmem:[%s12117_s1 + $0x18] sm:$0xff]  ;;  %s8992_s25 = smov 53   ;;  %s8993_s30 = smov 47   ;;  %vm1742_vm6 = vcmask 441344   ;;  %vm1751_vm7 = vcmask 64512  }
  0xa9   : > { %1081 = vmatprep.mubr.f32.mxu0 %v12127_v41  ;;  %8529 = vmatpush1.bf16.msk.msra.mxu0 %vm9998_vm2, %v8527_v59  ;;  %s8994_s11 = smov 105   ;;  %s8995_s18 = smov 111   ;;  %vm2085_vm8 = vcmask 261120   ;;  %vm2052_vm9 = vcmask 375808   ;;  %vm1789_vm10 = vcmask 56320   ;;  %vm1823_vm11 = vcmask 433152  }
  0xaa   : > { %7547 = vmatmul.mubr.msk.f32.gmra.mrb[2].mxu1 %vm970_vm3, %v949_v62  ;;  %8538 = vmatprep.subr.msk.bf16.mxu0 %vm9998_vm2, %v8536_v63  ;;  %vm2003_vm12 = vcmask 474112   ;;  %vm1944_vm13 = vcmask 384000   ;;  %vm1881_vm14 = vcmask 7168   ;;  %vm1872_vm15 = vcmask 482304  }
  0xab   : > { %1176 = vmatprep.mubr.f32.mxu1 %v12127_v41  ;;  %1669 = vperm.xlu1 %8800, %v1659_v0   ;;  %vm2382_vm0 = vcmask 564224   ;;  %vm2344_vm1 = vcmask 48128  }
  0xac   : > { %7541 = vmatmul.mubr.msk.f32.gmra.mrb[2].mxu0 %vm970_vm3, %v949_v62  ;;  %1664 = vperm.xlu0 %8799, %v1658_v1  }
  0xad   : > { %1087 = vmatprep.mubr.f32.mxu0 %v12127_v41 }
  0xae   : > { %7548 = vmatmul.mubr.msk.f32.gmra.mrb[4].mxu1 %vm970_vm3, %v950_v2 }
  0xaf   : > { %1182 = vmatprep.mubr.f32.mxu1 %v12127_v41  ;;  %1674 = vperm.xlu1 %8800, %v1660_v3  }
  0xb0   : > { %7542 = vmatmul.mubr.msk.f32.gmra.mrb[4].mxu0 %vm970_vm3, %v950_v2  ;;  %1679 = vperm.xlu0 %8799, %v1661_v4  }
  0xb1   : > { %1093 = vmatprep.mubr.f32.mxu0 %v12127_v41 }
  0xb2   : > { %7549 = vmatmul.mubr.msk.f32.gmra.mrb[6].mxu1 %vm970_vm3, %v951_v5 }
  0xb3   : > { %1342 = vmatprep.mubr.f32.mxu1 %v12127_v41  ;;  %1905 = vrot.lane.b32.xlu1 %v10081_v6, %s8985_s22  ;;  %s8996_s22 = smov 59  }
  0xb4   : > { %7543 = vmatmul.mubr.msk.f32.gmra.mrb[6].mxu0 %vm970_vm3, %v951_v5  ;;  %1961 = vrot.lane.b32.xlu0 %v10081_v6, %s8987_s20  ;;  %s8998_s20 = smov 117  }
  0xb5   : > { %1253 = vmatprep.mubr.f32.mxu0 %v12127_v41 }
  0xb6   : > { %7558 = vmatmul.mubr.msk.f32.vlgmr.msra.gmra.mrb[8].mxu1 %vm970_vm3, %v10014_v45 }
  0xb7   : > { %1348 = vmatprep.mubr.f32.mxu1 %v12127_v41  ;;  %1968 = vrot.lane.b32.xlu1 %v10081_v6, %s8986_s12  ;;  %s12130_s12 = smov 123  }
  0xb8   : > { %7552 = vmatmul.mubr.msk.f32.vlgmr.msra.gmra.mrb[8].mxu0 %vm970_vm3, %v10014_v45 }
  0xb9   : > { %1259 = vmatprep.mubr.f32.mxu0 %v12127_v41  ;;  %8541 = vmatpush3.bf16.msk.msra.mxu0 %vm9998_vm2, %v8536_v63  ;;  %vm2735_vm2 = vcmask 416768  }
  0xba   : > { %7559 = vmatmul.mubr.msk.f32.gmra.mrb[10].mxu1 %vm970_vm3, %v949_v62 }
  0xbb   : > { %1354 = vmatprep.mubr.f32.mxu1 %v12127_v41 }
  0xbc   : > { %7553 = vmatmul.mubr.msk.f32.gmra.mrb[10].mxu0 %vm970_vm3, %v949_v62 }
  0xbd   : > { %1265 = vmatprep.mubr.f32.mxu0 %v12127_v41 }
  0xbe   : > { %7560 = vmatmul.mubr.msk.f32.gmra.mrb[12].mxu1 %vm970_vm3, %v950_v2 }
  0xbf   : > { %1360 = vmatprep.mubr.f32.mxu1 %v12127_v41 }
  0xc0   : > { %7554 = vmatmul.mubr.msk.f32.gmra.mrb[12].mxu0 %vm970_vm3, %v950_v2 }
  0xc1   : > { %1271 = vmatprep.mubr.f32.mxu0 %v12127_v41 }
  0xc2   : > { %7561 = vmatmul.mubr.msk.f32.gmra.mrb[14].mxu1 %vm970_vm3, %v951_v5 }
  0xc4   : > { %7555 = vmatmul.mubr.msk.f32.gmra.mrb[14].mxu0 %vm970_vm3, %v951_v5 }
  0xc5   : > { %8391 = vmatprep.mubr.msk.f32.mxu0 %vm970_vm3, %v10014_v45 }
  0xc8   : > { %8392 = vmatmul.mubr.msk.f32.vlgmr.msra.gmra.mrb[16].mxu0 %vm970_vm3, %v949_v62 }
  0xc9   : > { %8394 = vmatprep.mubr.msk.f32.mxu0 %vm970_vm3, %v950_v2 }
  0xcc   : > { %8395 = vmatmul.mubr.msk.f32.gmra.mrb[18].mxu0 %vm970_vm3, %v951_v5  ;;  %vm2705_vm3 = vcmask 515072  }
 0x12a   : > { %v10198_v44 = vpop.permute.xlu1 %1669 }
 0x12b   : > { %v10204_v48 = vpop.permute.xlu0 %1664 }
 0x12e   : > { %v10200_v45 = vpop.permute.xlu1 %1674 }
 0x12f   : > { %v10208_v50 = vpop.permute.xlu0 %1679 }
 0x132   : > { %v10202_v47 = vpop.permute.xlu1 %1905 }
 0x133   : > { %v10210_v52 = vpop.permute.xlu0 %1961 }
 0x136   : > { %v10206_v49 = vpop.permute.xlu1 %1968 }
 0x179   : > { %v10114_v7 = vpop.f32.mrb[0].mxu1 }
 0x17a   : > { %1464 = vrot.lane.b32.xlu1 %v10114_v7, %s8988_s21  ;;  %v1168_v8 = vpop.f32.mrb[1].mxu1 }
 0x17b   : > { %v10118_v9 = vpop.f32.mrb[0].mxu0 }
 0x17c   : > { %v10120_v10 = vpop.f32.mrb[1].mxu0 }
 0x17d   : > { %v10122_v11 = vpop.f32.mrb[2].mxu1 }
 0x17e   : > { %1466 = vrot.lane.b32.xlu1 %v1168_v8, %s8988_s21  ;;  %1470 = vrot.lane.b32.xlu0 %v10122_v11, %s8988_s21  ;;  %v1174_v12 = vpop.f32.mrb[3].mxu1 }
 0x17f   : > { %v10127_v13 = vpop.f32.mrb[2].mxu0 }
 0x180   : > { %v10129_v14 = vpop.f32.mrb[3].mxu0 }
 0x181   : > { %v10131_v15 = vpop.f32.mrb[4].mxu1 }
 0x182   : > { %1472 = vrot.lane.b32.xlu1 %v1174_v12, %s8988_s21  ;;  %v1180_v16 = vpop.f32.mrb[5].mxu1 }
 0x183   : > { %v10134_v17 = vpop.f32.mrb[4].mxu0 }
 0x184   : > { %v10136_v18 = vpop.f32.mrb[5].mxu0 }
 0x185   : > { %v10138_v19 = vpop.f32.mrb[6].mxu1 }
 0x186   : > { %1476 = vrot.lane.b32.xlu1 %v10131_v15, %s8988_s21  ;;  %1482 = vrot.lane.b32.xlu0 %v10138_v19, %s8988_s21  ;;  %v1186_v20 = vpop.f32.mrb[7].mxu1 }
 0x187   : > { %v10144_v21 = vpop.f32.mrb[6].mxu0 }
 0x188   : > { %v10146_v22 = vpop.f32.mrb[7].mxu0 }
 0x189   : > { %v10148_v23 = vpop.f32.mrb[8].mxu1 }
 0x18a   : > { %1478 = vrot.lane.b32.xlu1 %v1180_v16, %s8988_s21  ;;  %1533 = vrot.lane.b32.xlu0 %v10148_v23, %s8988_s21  ;;  %v1346_v24 = vpop.f32.mrb[9].mxu1 }
 0x18b   : > { %v10153_v25 = vpop.f32.mrb[8].mxu0 }
 0x18c   : > { %v10155_v26 = vpop.f32.mrb[9].mxu0 }
 0x18d   : > { %v10157_v27 = vpop.f32.mrb[10].mxu1 }
 0x18e   : > { %1484 = vrot.lane.b32.xlu1 %v1186_v20, %s8988_s21  ;;  %1468 = vrot.lane.b32.xlu0 %v10153_v25, %s8988_s21  ;;  %v1352_v28 = vpop.f32.mrb[11].mxu1 }
 0x18f   : > { %v10162_v29 = vpop.f32.mrb[10].mxu0 }
 0x190   : > { %v10164_v30 = vpop.f32.mrb[11].mxu0 }
 0x191   : > { %v10166_v31 = vpop.f32.mrb[12].mxu1 }
 0x192   : > { %1539 = vrot.lane.b32.xlu1 %v10157_v27, %s8988_s21  ;;  %1535 = vrot.lane.b32.xlu0 %v1346_v24, %s8988_s21  ;;  %v1358_v32 = vpop.f32.mrb[13].mxu1 }
 0x193   : > { %v10171_v33 = vpop.f32.mrb[12].mxu0 }
 0x194   : > { %v10173_v34 = vpop.f32.mrb[13].mxu0 }
 0x195   : > { %v10175_v35 = vpop.f32.mrb[14].mxu1 }
 0x196   : > { %1541 = vrot.lane.b32.xlu1 %v1352_v28, %s8988_s21  ;;  %1474 = vrot.lane.b32.xlu0 %v10162_v29, %s8988_s21  ;;  %v1364_v36 = vpop.f32.mrb[15].mxu1 }
 0x197   : > { %v10180_v37 = vpop.f32.mrb[14].mxu0 }
 0x198   : > { %v10182_v38 = vpop.f32.mrb[15].mxu0 }
 0x19a   : > { %1551 = vrot.lane.b32.xlu1 %v10175_v35, %s8988_s21  ;;  %1545 = vrot.lane.b32.xlu0 %v10166_v31, %s8988_s21 }
 0x19b   : > { %v8393_v39 = vpop.f32.mrb[16].mxu0 }
 0x19c   : > { %v1433_v40 = vpop.f32.mrb[17].mxu0 }
 0x19e   : > { %1480 = vrot.lane.b32.xlu0 %v10171_v33, %s8988_s21  ;;  %1543 = vrot.lane.b32.xlu1 %v8393_v39, %s8988_s21 }
 0x19f   : > { %v8396_v42 = vpop.f32.mrb[18].mxu0 }
 0x1a0   : > { %v1443_v43 = vpop.f32.mrb[19].mxu0 }
 0x1a2   : > { %1547 = vrot.lane.b32.xlu0 %v1358_v32, %s8988_s21  ;;  %1555 = vrot.lane.b32.xlu1 %v8396_v42, %s8988_s21 }
 0x1a6   : > { %1486 = vrot.lane.b32.xlu0 %v10180_v37, %s8988_s21  ;;  %1549 = vrot.lane.b32.xlu1 %v1443_v43, %s8988_s21 }
 0x1aa   : > { %1553 = vrot.lane.b32.xlu0 %v1364_v36, %s8988_s21 }
 0x1ae   : > { %1537 = vrot.lane.b32.xlu0 %v1433_v40, %s8988_s21  ;;  %s8999_s21 = smov 127  }
 0x1ec   : > { %v1465_v51 = vpop.permute.xlu1 %1464 }
 0x1f0   : > { %v1467_v53 = vpop.permute.xlu1 %1466  ;;  %v1471_v56 = vpop.permute.xlu0 %1470 }
 0x1f1   : > { %v10213_v54 = vsel %vm1488_vm4, %v1465_v51, %v1467_v53 }
 0x1f2   : > { %v1509_v55 = vmax.f32 %v10118_v9, %v10213_v54 }
 0x1f4   : > { %v1473_v57 = vpop.permute.xlu1 %1472 }
 0x1f5   : > { %v10218_v58 = vsel %vm1488_vm4, %v1471_v56, %v1473_v57 }
 0x1f6   : > { %v1512_v59 = vmax.f32 %v10127_v13, %v10218_v58 }
 0x1f8   : > { %v1477_v60 = vpop.permute.xlu1 %1476  ;;  %v1483_v61 = vpop.permute.xlu0 %1482 }
 0x1fc   : > { %v1479_v62 = vpop.permute.xlu1 %1478  ;;  %v1534_v63 = vpop.permute.xlu0 %1533 }
 0x1fd   : > { %v10223_v0 = vsel %vm1488_vm4, %v1477_v60, %v1479_v62 }
 0x1fe   : > { %v1515_v1 = vmax.f32 %v10134_v17, %v10223_v0 }
 0x200   : > { %v1485_v2 = vpop.permute.xlu1 %1484  ;;  %v10227_v3 = vpop.permute.xlu0 %1468 }
 0x201   : > { %v10230_v4 = vsel %vm1488_vm4, %v1483_v61, %v1485_v2  ;;  %v10234_v5 = vsel %vm1488_vm4, %v1467_v53, %v10227_v3 }
 0x202   : > { %v1518_v8 = vmax.f32 %v10144_v21, %v10230_v4  ;;  %v1510_v12 = vmax.f32 %v10120_v10, %v10234_v5 }
 0x204   : > { %v1540_v16 = vpop.permute.xlu1 %1539  ;;  %v1536_v20 = vpop.permute.xlu0 %1535 }
 0x205   : > { %v1557_v24 = vsel %vm1488_vm4, %v1534_v63, %v1536_v20 }
 0x206   : > { %v1577_v28 = vmax.f32 %v10153_v25, %v1557_v24 }
 0x208   : > { %v1542_v32 = vpop.permute.xlu1 %1541  ;;  %v1475_v36 = vpop.permute.xlu0 %1474  ;;  %1601 = vrot.lane.b32.xlu1 %v1577_v28, %s8989_s28 }
 0x209   : > { %v1559_v39 = vsel %vm1488_vm4, %v1540_v16, %v1542_v32  ;;  %v10245_v40 = vsel %vm1488_vm4, %v1473_v57, %v1475_v36 }
 0x20a   : > { %v1513_v42 = vmax.f32 %v10129_v14, %v10245_v40  ;;  %v1580_v43 = vmax.f32 %v10162_v29, %v1559_v39 }
 0x20c   : > { %v1546_v51 = vpop.permute.xlu0 %1545  ;;  %1607 = vrot.lane.b32.xlu0 %v1580_v43, %s8989_s28  ;;  %v1552_v53 = vpop.permute.xlu1 %1551 }
 0x210   : > { %v10251_v25 = vpop.permute.xlu0 %1480  ;;  %v1544_v57 = vpop.permute.xlu1 %1543 }
 0x211   : > { %v10255_v56 = vsel %vm1488_vm4, %v1479_v62, %v10251_v25  ;;  %v1560_v29 = vsel %vm1488_vm4, %v1542_v32, %v1544_v57 }
 0x212   : > { %v1516_v60 = vmax.f32 %v10136_v18, %v10255_v56  ;;  %v1581_v39 = vmax.f32 %v10164_v30, %v1560_v29 }
 0x214   : > { %v1548_v61 = vpop.permute.xlu0 %1547 }
 0x215   : > { %v1561_v63 = vsel %vm1488_vm4, %v1546_v51, %v1548_v61  ;;  %v1556_v51 = vpop.permute.xlu1 %1555 }
 0x216   : > { %v1583_v16 = vmax.f32 %v10171_v33, %v1561_v63 }
 0x218   : > { %v10262_v24 = vpop.permute.xlu0 %1486  ;;  %1613 = vrot.lane.b32.xlu1 %v1583_v16, %s8989_s28 }
 0x219   : > { %v10267_v28 = vsel %vm1488_vm4, %v1485_v2, %v10262_v24  ;;  %v1582_v2 = vmax.f32 %v10157_v27, %v1544_v57  ;;  %v1550_v30 = vpop.permute.xlu1 %1549  ;;  %v1588_v27 = vmax.f32 %v10175_v35, %v1556_v51  ;;  %v1514_v35 = vmax.f32 %v10122_v11, %v1475_v36 }
 0x21a   : > { %v1519_v62 = vmax.f32 %v10146_v22, %v10267_v28  ;;  %v1562_v29 = vsel %vm1488_vm4, %v1548_v61, %v1550_v30  ;;  %v1520_v10 = vmax.f32 %v10138_v19, %v10262_v24  ;;  %v1517_v19 = vmax.f32 %v10131_v15, %v10251_v25 }
 0x21c   : > { %v1554_v43 = vpop.permute.xlu0 %1553  ;;  %1609 = vrot.lane.b32.xlu1 %v1581_v39, %s8989_s28 }
 0x21d   : > { %v1563_v33 = vsel %vm1488_vm4, %v1552_v53, %v1554_v43  ;;  %v1564_v46 = vsel %vm1488_vm4, %v1554_v43, %v1556_v51 }
 0x21e   : > { %v1586_v32 = vmax.f32 %v10180_v37, %v1563_v33  ;;  %v1587_v37 = vmax.f32 %v10182_v38, %v1564_v46 }
 0x220   : > { %1619 = vrot.lane.b32.xlu0 %v1586_v32, %s8989_s28  ;;  %v1538_v63 = vpop.permute.xlu0 %1537 }
 0x221   : > { %v1558_v16 = vsel %vm1488_vm4, %v1536_v20, %v1538_v63  ;;  %v1579_v53 = vmax.f32 %v10148_v23, %v1538_v63  ;;  %v1511_v63 = vmax.f32 %v10114_v7, %v10227_v3  ;;  %vm2646_vm4 = vcmask 424960  }
 0x222   : > { %v1578_v41 = vmax.f32 %v10155_v26, %v1558_v16  ;;  %v1584_v26 = vmax.f32 %v10173_v34, %v1562_v29 }
 0x224   : > { %1611 = vrot.lane.b32.xlu0 %v1582_v2, %s8989_s28  ;;  %1603 = vrot.lane.b32.xlu1 %v1578_v41, %s8989_s28  ;;  %v1585_v41 = vmax.f32 %v10166_v31, %v1550_v30 }
 0x228   : > { %1605 = vrot.lane.b32.xlu0 %v1579_v53, %s8989_s28  ;;  %1621 = vrot.lane.b32.xlu1 %v1587_v37, %s8989_s28 }
 0x22c   : > { %1623 = vrot.lane.b32.xlu0 %v1588_v27, %s8989_s28  ;;  %1615 = vrot.lane.b32.xlu1 %v1584_v26, %s8989_s28 }
 0x230   : > { %1617 = vrot.lane.b32.xlu0 %v1585_v41, %s8989_s28  ;;  %s12132_s28 = smov 69  }
 0x27a   : > { %v1602_v23 = vpop.permute.xlu1 %1601 }
 0x27e   : > { %v1608_v38 = vpop.permute.xlu0 %1607 }
 0x28a   : > { %v1614_v46 = vpop.permute.xlu1 %1613 }
 0x28e   : > { %v1610_v20 = vpop.permute.xlu1 %1609 }
 0x28f   : > { %v1628_v57 = vsel %vm1625_vm5, %v1608_v38, %v1610_v20 }
 0x290   : > { %v1649_v34 = vmax.f32 %v1512_v59, %v1628_v57 }
 0x292   : > { %v1620_v61 = vpop.permute.xlu0 %1619  ;;  %v1685_v31 = vadd.f32 %v10198_v44, %v1649_v34 }
 0x294   : > { %v10307_v59 = vmax.f32 %v1685_v31, 0.0 }
 0x296   : > { %v1612_v39 = vpop.permute.xlu0 %1611  ;;  %v1604_v43 = vpop.permute.xlu1 %1603  ;;  %v1901_v21 = vmul.f32 %v10081_v6, %v10307_v59 }
 0x297   : > { %v1651_v33 = vmax.f32 %v1514_v35, %v1612_v39  ;;  %v1626_v51 = vsel %vm1625_vm5, %v1602_v23, %v1604_v43  ;;  %v1629_v22 = vsel %vm1625_vm5, %v1610_v20, %v1612_v39 }
 0x298   : > { %v1646_v32 = vmax.f32 %v1509_v55, %v1626_v51  ;;  %v1650_v0 = vmax.f32 %v1513_v42, %v1629_v22 }
 0x299   : > { %v1687_v16 = vadd.f32 %v10198_v44, %v1651_v33 }
 0x29a   : > { %v1682_v13 = vadd.f32 %v10204_v48, %v1646_v32  ;;  %v1606_v58 = vpop.permute.xlu0 %1605  ;;  %v1622_v11 = vpop.permute.xlu1 %1621  ;;  %v1686_v18 = vadd.f32 %v10198_v44, %v1650_v0 }
 0x29b   : > { %v10309_v36 = vmax.f32 %v1687_v16, 0.0  ;;  %v1648_v2 = vmax.f32 %v1511_v63, %v1606_v58  ;;  %v1632_v30 = vsel %vm1625_vm5, %v1620_v61, %v1622_v11  ;;  %v1627_v14 = vsel %vm1625_vm5, %v1604_v43, %v1606_v58 }
 0x29c   : > { %v10312_v53 = vmax.f32 %v1682_v13, 0.0  ;;  %v10317_v9 = vmax.f32 %v1518_v8, %v1632_v30  ;;  %v1647_v44 = vmax.f32 %v1510_v12, %v1627_v14 }
 0x29d   : > { %v1684_v7 = vadd.f32 %v10204_v48, %v1648_v2  ;;  %1732 = vrot.lane.b32.xlu1 %v10309_v36, %s8990_s27  ;;  %v1974_v24 = vmul.f32 %v10206_v49, %v10309_v36 }
 0x29e   : > { %v1624_v54 = vpop.permute.xlu0 %1623  ;;  %v1616_v55 = vpop.permute.xlu1 %1615  ;;  %v1900_v3 = vmul.f32 %v10081_v6, %v10312_v53  ;;  %v1683_v40 = vadd.f32 %v10204_v48, %v1647_v44  ;;  %v1908_v57 = vmul.f32 %v10202_v47, %v10312_v53  ;;  %v1691_v63 = vadd.f32 %v10208_v50, %v10317_v9 }
 0x29f   : > { %v10324_v37 = vmax.f32 %v1684_v7, 0.0  ;;  %v1633_v29 = vsel %vm1625_vm5, %v1622_v11, %v1624_v54  ;;  %v1630_v27 = vsel %vm1625_vm5, %v1614_v46, %v1616_v55  ;;  %v1657_v48 = vmax.f32 %v1520_v10, %v1624_v54 }
 0x2a0   : > { %v10333_v4 = vmax.f32 %v1519_v62, %v1633_v29  ;;  %v10338_v8 = vmax.f32 %v1515_v1, %v1630_v27  ;;  %v10344_v26 = vpack.c.bf16 %v1901_v21, %v1900_v3  ;;  %v10370_v1 = vmax.f32 %v1686_v18, 0.0 }
 0x2a1   : > { %1710 = vrot.lane.b32.xlu0 %v10324_v37, %s8991_s29  ;;  %1712 = vrot.lane.b32.xlu1 %v10309_v36, %s8991_s29  ;;  %v10389_v42 = vmax.f32 %v1683_v40, 0.0  ;;  %v1693_v5 = vadd.f32 %v10208_v50, %v1657_v48  ;;  %v1910_v62 = vmul.f32 %v10202_v47, %v10307_v59  ;;  %v1972_v51 = vmul.f32 %v10206_v49, %v10324_v37 }
 0x2a2   : > { %v1618_v41 = vpop.permute.xlu0 %1617  ;;  %8543 = vmatprep.subr.bf16.mxu1 %v10344_v26  ;;  %v1911_v28 = vmul.f32 %v10202_v47, %v10370_v1  ;;  %v1965_v35 = vmul.f32 %v10210_v52, %v10370_v1  ;;  %v1692_v39 = vadd.f32 %v10208_v50, %v10333_v4  ;;  %v10504_v13 = vmax.f32 %v1691_v63, 0.0 }
 0x2a3   : > { %v1631_v23 = vsel %vm1625_vm5, %v1616_v55, %v1618_v41  ;;  %v10428_v12 = vmax.f32 %v1693_v5, 0.0  ;;  %v1654_v56 = vmax.f32 %v1517_v19, %v1618_v41  ;;  %v1909_v20 = vmul.f32 %v10202_v47, %v10389_v42 }
 0x2a4   : > { %v10352_v17 = vmax.f32 %v1516_v60, %v1631_v23  ;;  %v1973_v60 = vmul.f32 %v10206_v49, %v10370_v1  ;;  %v8801_v38 = vpack.i.bf16 %v1911_v28, %v1910_v62  ;;  %v1964_v34 = vmul.f32 %v10210_v52, %v10389_v42 }
 0x2a5   : > { %1815 = vrot.lane.b32.xlu0 %v10324_v37, %s8992_s25  ;;  %1934 = vrot.lane.b32.xlu1 %v10309_v36, %s8993_s30  ;;  %v1690_v15 = vadd.f32 %v10200_v45, %v1654_v56  ;;  %v8811_v61 = vpack.i.bf16 %v1909_v20, %v1908_v57  ;;  %v10479_v31 = vmax.f32 %v1692_v39, 0.0  ;;  %v1971_v33 = vmul.f32 %v10206_v49, %v10389_v42  ;;  %v10618_v39 = vld [vmem:[%s12119_s3 + $0x8] sm:$0xff] }
 0x2a6   : > { %v8806_v25 = vpack.i.bf16 %v1974_v24, %v1973_v60  ;;  %v8816_v43 = vpack.i.bf16 %v1965_v35, %v1964_v34  ;;  %v1689_v16 = vadd.f32 %v10200_v45, %v10352_v17  ;;  %v1688_v11 = vadd.f32 %v10200_v45, %v10338_v8  ;;  %2174 = vmatprep.mubr.f32.mxu1 %v10618_v39 }
 0x2a7   : > { %v10446_v46 = vmax.f32 %v1690_v15, 0.0  ;;  %v8821_v32 = vpack.i.bf16 %v1972_v51, %v1971_v33  ;;  %v1915_v55 = vmul.f32 %v10202_v47, %v10479_v31  ;;  %v1914_v3 = vmul.f32 %v10202_v47, %v10504_v13 }
 0x2a8   : > { %v10506_v58 = vmax.f32 %v1689_v16, 0.0  ;;  %v10522_v30 = vmax.f32 %v1688_v11, 0.0  ;;  %v1977_v21 = vmul.f32 %v10206_v49, %v10479_v31  ;;  %v1978_v4 = vmul.f32 %v10206_v49, %v10428_v12 }
 0x2a9   : > { %1916 = vrot.lane.b32.xlu0 %v10324_v37, %s8994_s11  ;;  %1817 = vrot.lane.b32.xlu1 %v10309_v36, %s8992_s25  ;;  %v8826_v27 = vpack.i.bf16 %v1915_v55, %v1914_v3  ;;  %v1967_v24 = vmul.f32 %v10210_v52, %v10479_v31  ;;  %v1903_v57 = vmul.f32 %v10081_v6, %v10504_v13  ;;  %vm2667_vm5 = vcmask 523264  }
 0x2aa   : > { %v8831_v23 = vpack.i.bf16 %v1978_v4, %v1977_v21  ;;  %v1913_v22 = vmul.f32 %v10202_v47, %v10506_v58  ;;  %v1912_v17 = vmul.f32 %v10202_v47, %v10522_v30  ;;  %v10581_v47 = vld [vmem:[%s12121_s5] ss:$0 sm:$0xff]  ;;  %v1902_v15 = vmul.f32 %v10081_v6, %v10522_v30  ;;  %v10624_v6 = vld [vmem:[%s12119_s3 + $0x10] sm:$0xff] }
 0x2ab   : > { %8405 = vmatprep.mubr.msk.f32.mxu0 %vm2085_vm8, %v10624_v6 }
 0x2ac   : > { %v8836_v14 = vpack.i.bf16 %v1913_v22, %v1912_v17  ;;  %v10613_v35 = vpack.c.bf16 %v1903_v57, %v1902_v15 }
 0x2ad   : > { %1803 = vrot.lane.b32.xlu0 %v10324_v37, %s8995_s18  ;;  %1918 = vrot.lane.b32.xlu1 %v10309_v36, %s8994_s11 }
 0x2b1   : > { %1805 = vrot.lane.b32.xlu1 %v10309_v36, %s8995_s18  ;;  %1730 = vrot.lane.b32.xlu0 %v10370_v1, %s8990_s27 }
 0x2b5   : > { %1728 = vrot.lane.b32.xlu1 %v10324_v37, %s8990_s27  ;;  %1932 = vrot.lane.b32.xlu0 %v10370_v1, %s8993_s30 }
 0x2b9   : > { %1930 = vrot.lane.b32.xlu1 %v10324_v37, %s8993_s30  ;;  %1860 = vrot.lane.b32.xlu0 %v10307_v59, %s8996_s22 }
 0x2bd   : > { %1767 = vrot.lane.b32.xlu1 %v10370_v1, %s8992_s25  ;;  %1726 = vrot.lane.b32.xlu0 %v10389_v42, %s8990_s27 }
 0x2c1   : > { %1779 = vrot.lane.b32.xlu1 %v10370_v1, %s12130_s12  ;;  %1765 = vrot.lane.b32.xlu0 %v10389_v42, %s8992_s25 }
 0x2c5   : > { %1862 = vrot.lane.b32.xlu1 %v10370_v1, %s8996_s22  ;;  %1777 = vrot.lane.b32.xlu0 %v10389_v42, %s12130_s12  ;;  %s12134_s12 = smov 52  }
 0x2c9   : > { %1842 = vrot.lane.b32.xlu1 %v10370_v1, %s8998_s20  ;;  %1928 = vrot.lane.b32.xlu0 %v10389_v42, %s8993_s30 }
 0x2cd   : > { %2360 = vrot.lane.b32.xlu1 %v10307_v59, %s8999_s21  ;;  %1856 = vrot.lane.b32.xlu0 %v10312_v53, %s8996_s22 }
 0x2d1   : > { %2372 = vrot.lane.b32.xlu1 %v10307_v59, %s12132_s28  ;;  %1840 = vrot.lane.b32.xlu0 %v10389_v42, %s8998_s20 }
 0x2d5   : > { %2322 = vrot.lane.b32.xlu1 %v10370_v1, %s12134_s12  ;;  %2358 = vrot.lane.b32.xlu0 %v10312_v53, %s8999_s21 }
 0x2d9   : > { %1858 = vrot.lane.b32.xlu1 %v10389_v42, %s8996_s22  ;;  %2370 = vrot.lane.b32.xlu0 %v10312_v53, %s12132_s28  ;;  %s9002_s28 = smov 46  }
 0x2dd   : > { %1740 = vrot.lane.b32.xlu1 %v10428_v12, %s8990_s27  ;;  %2320 = vrot.lane.b32.xlu0 %v10389_v42, %s12134_s12  ;;  %s9003_s12 = smov 58  }
 0x2e1   : > { %1716 = vrot.lane.b32.xlu1 %v10428_v12, %s8991_s29  ;;  %8807 = vrot.lane.b32.xlu0 %v8806_v25, %s9002_s28 }
 0x2e5   : > { %8802 = vrot.lane.b32.xlu1 %v8801_v38, %s9003_s12  ;;  %1714 = vrot.lane.b32.xlu0 %v10446_v46, %s8991_s29  ;;  %s9004_s29 = smov 116  }
 0x2e9   : > { %1942 = vrot.lane.b32.xlu1 %v10428_v12, %s8993_s30  ;;  %8812 = vrot.lane.b32.xlu0 %v8811_v61, %s9003_s12  ;;  %v1975_v61 = vmul.f32 %v10206_v49, %v10506_v58 }
 0x2ed   : > { %1821 = vrot.lane.b32.xlu1 %v10428_v12, %s8992_s25  ;;  %1819 = vrot.lane.b32.xlu0 %v10446_v46, %s8992_s25 }
 0x2f1   : > { %1922 = vrot.lane.b32.xlu1 %v10428_v12, %s8994_s11  ;;  %1920 = vrot.lane.b32.xlu0 %v10446_v46, %s8994_s11  ;;  %s12142_s11 = smov 123  }
 0x2f5   : > { %1809 = vrot.lane.b32.xlu1 %v10428_v12, %s8995_s18  ;;  %1807 = vrot.lane.b32.xlu0 %v10446_v46, %s8995_s18  ;;  %s12143_s18 = smov 69   ;;  %v1966_v12 = vmul.f32 %v10210_v52, %v10506_v58  ;;  %v1976_v52 = vmul.f32 %v10206_v49, %v10446_v46 }
 0x2f7   : > { %v8841_v20 = vpack.i.bf16 %v1967_v24, %v1966_v12 }
 0x2f9   : > { %1736 = vrot.lane.b32.xlu1 %v10446_v46, %s8990_s27  ;;  %8817 = vrot.lane.b32.xlu0 %v8816_v43, %s9004_s29  ;;  %v8846_v43 = vpack.i.bf16 %v1976_v52, %v1975_v61 }
 0x2fd   : > { %1938 = vrot.lane.b32.xlu1 %v10446_v46, %s8993_s30  ;;  %1738 = vrot.lane.b32.xlu0 %v10479_v31, %s8990_s27 }
 0x301   : > { %8822 = vrot.lane.b32.xlu1 %v8821_v32, %s9002_s28  ;;  %1940 = vrot.lane.b32.xlu0 %v10479_v31, %s8993_s30 }
 0x305   : > { %1771 = vrot.lane.b32.xlu1 %v10479_v31, %s8992_s25  ;;  %1870 = vrot.lane.b32.xlu0 %v10479_v31, %s8996_s22 }
 0x309   : > { %1783 = vrot.lane.b32.xlu1 %v10479_v31, %s12142_s11  ;;  %1846 = vrot.lane.b32.xlu0 %v10479_v31, %s8998_s20 }
 0x30d   : > { %1868 = vrot.lane.b32.xlu1 %v10504_v13, %s8996_s22  ;;  %1734 = vrot.lane.b32.xlu0 %v10506_v58, %s8990_s27  ;;  %s9005_s27 = smov 122  }
 0x30f   : > { %v1733_v50 = vpop.permute.xlu1 %1732 }
 0x311   : > { %2364 = vrot.lane.b32.xlu1 %v10504_v13, %s8999_s21  ;;  %1769 = vrot.lane.b32.xlu0 %v10506_v58, %s8992_s25  ;;  %s12144_s25 = smov 52  }
 0x313   : > { %v1711_v36 = vpop.permute.xlu0 %1710  ;;  %v1713_v2 = vpop.permute.xlu1 %1712 }
 0x315   : > { %2376 = vrot.lane.b32.xlu1 %v10504_v13, %s12143_s18  ;;  %1781 = vrot.lane.b32.xlu0 %v10506_v58, %s12142_s11 }
 0x317   : > { %v10524_v9 = vpop.permute.xlu0 %1815  ;;  %v10526_v7 = vpop.permute.xlu1 %1934 }
 0x319   : > { %1936 = vrot.lane.b32.xlu0 %v10506_v58, %s8993_s30  ;;  %1864 = vrot.lane.b32.xlu1 %v10522_v30, %s8996_s22  ;;  %s9009_s30 = smov 121  }
 0x31b   : > { %v10532_v45 = vpop.permute.xlu0 %1916  ;;  %v10534_v54 = vpop.permute.xlu1 %1817 }
 0x31d   : > { %1866 = vrot.lane.b32.xlu0 %v10506_v58, %s8996_s22  ;;  %1844 = vrot.lane.b32.xlu1 %v10506_v58, %s8998_s20  ;;  %s9010_s22 = smov 63  }
 0x31f   : > { %v10544_v37 = vpop.permute.xlu0 %1803  ;;  %v10546_v29 = vpop.permute.xlu1 %1918 }
 0x321   : > { %2362 = vrot.lane.b32.xlu0 %v10522_v30, %s8999_s21  ;;  %8827 = vrot.lane.b32.xlu1 %v8826_v27, %s9003_s12 }
 0x323   : > { %v1731_v8 = vpop.permute.xlu0 %1730  ;;  %v10555_v41 = vpop.permute.xlu1 %1805 }
 0x324   : > { %v1744_v10 = vsel %vm1742_vm6, %v1731_v8, %v1733_v50 }
 0x325   : > { %2374 = vrot.lane.b32.xlu0 %v10522_v30, %s12143_s18  ;;  %8832 = vrot.lane.b32.xlu1 %v8831_v23, %s9002_s28  ;;  %v1753_v48 = vsel %vm1751_vm7, %v1713_v2, %v1744_v10  ;;  %s9007_s18 = smov 57  }
 0x326   : > { %v1762_v25 = vmul.f32 %v10581_v47, %v1753_v48 }
 0x327   : > { %v10564_v0 = vpop.permute.xlu0 %1932  ;;  %v1729_v18 = vpop.permute.xlu1 %1728 }
 0x329   : > { %2334 = vrot.lane.b32.xlu1 %v10370_v1, %s9005_s27  ;;  %8837 = vrot.lane.b32.xlu0 %v8836_v14, %s9003_s12 }
 0x32b   : > { %v10569_v44 = vpop.permute.xlu0 %1860  ;;  %v10571_v40 = vpop.permute.xlu1 %1930 }
 0x32d   : > { %2326 = vrot.lane.b32.xlu1 %v10479_v31, %s12144_s25  ;;  %2332 = vrot.lane.b32.xlu0 %v10389_v42, %s9005_s27 }
 0x32f   : > { %v1727_v5 = vpop.permute.xlu0 %1726  ;;  %v10584_v19 = vpop.permute.xlu1 %1767 }
 0x330   : > { %v1743_v56 = vsel %vm1742_vm6, %v1727_v5, %v1729_v18 }
 0x331   : > { %v1752_v60 = vsel %vm1751_vm7, %v1711_v36, %v1743_v56  ;;  %2338 = vrot.lane.b32.xlu1 %v10479_v31, %s9005_s27  ;;  %2324 = vrot.lane.b32.xlu0 %v10506_v58, %s12144_s25 }
 0x332   : > { %v1761_v28 = vmul.f32 %v10581_v47, %v1752_v60 }
 0x333   : > { %v10600_v62 = vpop.permute.xlu0 %1765  ;;  %v10602_v38 = vpop.permute.xlu1 %1779 }
 0x334   : > { %v8544_v34 = vpack.c.bf16 %v1762_v25, %v1761_v28 }
 0x335   : > { %8842 = vrot.lane.b32.xlu1 %v8841_v20, %s9004_s29  ;;  %2336 = vrot.lane.b32.xlu0 %v10506_v58, %s9005_s27  ;;  %s9006_s29 = smov 115  }
 0x336   : > { %8545 = vmatpush3.bf16.msra.mxu1 %v8544_v34 }
 0x337   : > { %v10626_v49 = vpop.permute.xlu0 %1777  ;;  %8547 = vmatprep.subr.bf16.mxu1 %v10613_v35  ;;  %v10629_v46 = vpop.permute.xlu1 %1862 }
 0x339   : > { %2398 = vrot.lane.b32.xlu1 %v10370_v1, %s9006_s29  ;;  %8847 = vrot.lane.b32.xlu0 %v8846_v43, %s9002_s28  ;;  %s9008_s28 = smov 51  }
 0x33b   : > { %v10635_v33 = vpop.permute.xlu0 %1928  ;;  %v10637_v51 = vpop.permute.xlu1 %1842 }
 0x33d   : > { %2410 = vrot.lane.b32.xlu1 %v10370_v1, %s9007_s18  ;;  %2396 = vrot.lane.b32.xlu0 %v10389_v42, %s9006_s29 }
 0x33f   : > { %v10641_v32 = vpop.permute.xlu0 %1856  ;;  %v10643_v63 = vpop.permute.xlu1 %2360 }
 0x341   : > { %2402 = vrot.lane.b32.xlu1 %v10479_v31, %s9006_s29  ;;  %2408 = vrot.lane.b32.xlu0 %v10389_v42, %s9007_s18 }
 0x343   : > { %v10647_v16 = vpop.permute.xlu0 %1840  ;;  %v10649_v50 = vpop.permute.xlu1 %2372 }
 0x345   : > { %2414 = vrot.lane.b32.xlu1 %v10479_v31, %s9007_s18  ;;  %2400 = vrot.lane.b32.xlu0 %v10506_v58, %s9006_s29 }
 0x347   : > { %v10653_v11 = vpop.permute.xlu0 %2358  ;;  %v10655_v36 = vpop.permute.xlu1 %2322 }
 0x349   : > { %2721 = vrot.lane.b32.xlu1 %v10389_v42, %s9008_s28  ;;  %2412 = vrot.lane.b32.xlu0 %v10506_v58, %s9007_s18 }
 0x34b   : > { %v10659_v2 = vpop.permute.xlu0 %2370  ;;  %v10661_v55 = vpop.permute.xlu1 %1858 }
 0x34d   : > { %2725 = vrot.lane.b32.xlu1 %v10370_v1, %s9008_s28  ;;  %2719 = vrot.lane.b32.xlu0 %v10312_v53, %s9008_s28 }
 0x34f   : > { %v10665_v3 = vpop.permute.xlu0 %2320  ;;  %v1741_v27 = vpop.permute.xlu1 %1740 }
 0x351   : > { %2683 = vrot.lane.b32.xlu1 %v10307_v59, %s9009_s30  ;;  %2723 = vrot.lane.b32.xlu0 %v10307_v59, %s9008_s28 }
 0x353   : > { %v8808_v21 = vpop.permute.xlu0 %8807  ;;  %v1717_v42 = vpop.permute.xlu1 %1716 }
 0x354   : > { %v8810_v56 = vunpack.i.h.bf16 %v8808_v21  ;;  %v8809_v60 = vunpack.i.l.bf16 %v8808_v21 }
 0x355   : > { %2729 = vrot.lane.b32.xlu1 %v10506_v58, %s9008_s28  ;;  %2681 = vrot.lane.b32.xlu0 %v10312_v53, %s9009_s30 }
 0x356   : > { %v2054_v20 = vsel %vm2052_vm9, %v8809_v60, %v8810_v56 }
 0x357   : > { %v10671_v4 = vpop.permute.xlu0 %1714  ;;  %v10673_v8 = vpop.permute.xlu1 %8802 }
 0x359   : > { %2733 = vrot.lane.b32.xlu1 %v10479_v31, %s9008_s28  ;;  %2727 = vrot.lane.b32.xlu0 %v10522_v30, %s9008_s28 }
 0x35b   : > { %v10677_v1 = vpop.permute.xlu0 %8812  ;;  %v10679_v23 = vpop.permute.xlu1 %1942 }
 0x35c   : > { %v8815_v60 = vunpack.i.h.bf16 %v10677_v1 }
 0x35d   : > { %2687 = vrot.lane.b32.xlu1 %v10504_v13, %s9009_s30  ;;  %2731 = vrot.lane.b32.xlu0 %v10504_v13, %s9008_s28 }
 0x35f   : > { %v10683_v22 = vpop.permute.xlu0 %1819  ;;  %v1822_v58 = vpop.permute.xlu1 %1821 }
 0x361   : > { %2685 = vrot.lane.b32.xlu0 %v10522_v30, %s9009_s30  ;;  %2640 = vrot.lane.b32.xlu1 %v10307_v59, %s12144_s25 }
 0x363   : > { %v10688_v17 = vpop.permute.xlu0 %1920  ;;  %v10690_v31 = vpop.permute.xlu1 %1922 }
 0x365   : > { %2638 = vrot.lane.b32.xlu0 %v10312_v53, %s12144_s25  ;;  %2657 = vrot.lane.b32.xlu1 %v10307_v59, %s9005_s27 }
 0x367   : > { %v10696_v18 = vpop.permute.xlu0 %1807  ;;  %v1810_v14 = vpop.permute.xlu1 %1809 }
 0x369   : > { %2655 = vrot.lane.b32.xlu0 %v10312_v53, %s9005_s27  ;;  %2644 = vrot.lane.b32.xlu1 %v10504_v13, %s12144_s25 }
 0x36b   : > { %v10702_v10 = vpop.permute.xlu0 %8817  ;;  %v1737_v48 = vpop.permute.xlu1 %1736 }
 0x36d   : > { %2642 = vrot.lane.b32.xlu0 %v10522_v30, %s12144_s25  ;;  %2661 = vrot.lane.b32.xlu1 %v10504_v13, %s9005_s27  ;;  %s9012_s25 = smov 62  }
 0x36f   : > { %v1739_v5 = vpop.permute.xlu0 %1738  ;;  %v10708_v12 = vpop.permute.xlu1 %1938 }
 0x370   : > { %v1746_v56 = vsel %vm1742_vm6, %v1739_v5, %v1741_v27  ;;  %v8805_v27 = vunpack.i.h.bf16 %v10673_v8  ;;  %v8804_v5 = vunpack.i.l.bf16 %v10673_v8 }
 0x371   : > { %2659 = vrot.lane.b32.xlu0 %v10522_v30, %s9005_s27  ;;  %2695 = vrot.lane.b32.xlu1 %v10307_v59, %s9010_s22  ;;  %s9011_s27 = smov 120  }
 0x373   : > { %v10713_v24 = vpop.permute.xlu0 %1940  ;;  %v8823_v15 = vpop.permute.xlu1 %8822 }
 0x374   : > { %v8825_v25 = vunpack.i.h.bf16 %v8823_v15  ;;  %v8824_v28 = vunpack.i.l.bf16 %v8823_v15  ;;  %v8814_v15 = vunpack.i.l.bf16 %v10677_v1  ;;  %v1790_v1 = vsel %vm1789_vm10, %v10600_v62, %v10626_v49  ;;  %v10764_v49 = vld [vmem:[%s12121_s5 + $0x1] ss:$0 sm:$0xff] }
 0x375   : > { %2693 = vrot.lane.b32.xlu0 %v10312_v53, %s9010_s22  ;;  %2699 = vrot.lane.b32.xlu1 %v10504_v13, %s9010_s22 }
 0x376   : > { %v2053_v57 = vsel %vm2052_vm9, %v8824_v28, %v8825_v25  ;;  %v1755_v25 = vsel %vm1751_vm7, %v1717_v42, %v1746_v56  ;;  %v2004_v8 = vsel %vm2003_vm12, %v8814_v15, %v8815_v60  ;;  %v1799_v60 = vmul.f32 %v10764_v49, %v1790_v1 }
 0x377   : > { %v10719_v61 = vpack.c.bf16 %v2054_v20, %v2053_v57  ;;  %v10721_v52 = vpop.permute.xlu0 %1870  ;;  %v10723_v34 = vpop.permute.xlu1 %1771  ;;  %v2005_v15 = vsel %vm2003_vm12, %v8804_v5, %v8805_v27 }
 0x378   : > { %v1827_v57 = vsel %vm1823_vm11, %v10723_v34, %v1822_v58  ;;  %v1764_v58 = vmul.f32 %v10581_v47, %v1755_v25 }
 0x379   : > { %2697 = vrot.lane.b32.xlu0 %v10522_v30, %s9010_s22  ;;  %2964 = vrot.lane.b32.xlu1 %v10307_v59, %s9011_s27 }
 0x37a   : > { %8575 = vmatprep.subr.bf16.mxu0 %v10719_v61 }
 0x37b   : > { %8577 = vmatpush3.bf16.msra.mxu0 %v10719_v61  ;;  %v10730_v43 = vpop.permute.xlu0 %1846  ;;  %v10732_v21 = vpop.permute.xlu1 %1783 }
 0x37d   : > { %2962 = vrot.lane.b32.xlu0 %v10312_v53, %s9011_s27  ;;  %2976 = vrot.lane.b32.xlu1 %v10307_v59, %s9012_s25 }
 0x37f   : > { %v1735_v28 = vpop.permute.xlu0 %1734  ;;  %v10742_v20 = vpop.permute.xlu1 %1868 }
 0x380   : > { %v1745_v59 = vsel %vm1742_vm6, %v1735_v28, %v1737_v48  ;;  %vm2986_vm6 = vcmask 506880  }
 0x381   : > { %v1754_v42 = vsel %vm1751_vm7, %v10671_v4, %v1745_v59  ;;  %2974 = vrot.lane.b32.xlu0 %v10312_v53, %s9012_s25  ;;  %2968 = vrot.lane.b32.xlu1 %v10504_v13, %s9011_s27  ;;  %v1791_v4 = vsel %vm1789_vm10, %v10584_v19, %v10602_v38  ;;  %v1835_v53 = vsel %vm1789_vm10, %v1810_v14, %v1827_v57 }
 0x382   : > { %v1763_v48 = vmul.f32 %v10581_v47, %v1754_v42  ;;  %v10776_v59 = vpack.c.bf16 %v2005_v15, %v2004_v8  ;;  %v1800_v38 = vmul.f32 %v10764_v49, %v1791_v4  ;;  %v1839_v14 = vmul.f32 %v10764_v49, %v1835_v53  ;;  %v3237_v8 = vld [vmem:[%s12120_s4 + $0x18] sm:$0xff]  ;;  %v3239_v4 = vld [vmem:[%s12120_s4 + $0x28] sm:$0xff]  ;;  %v3238_v15 = vld [vmem:[%s12120_s4 + $0x20] sm:$0xff] }
 0x383   : > { %v1770_v56 = vpop.permute.xlu0 %1769  ;;  %v10770_v28 = vpop.permute.xlu1 %2364 }
 0x384   : > { %v8548_v25 = vpack.c.bf16 %v1764_v58, %v1763_v48  ;;  %v1826_v47 = vsel %vm1823_vm11, %v1770_v56, %v10683_v22  ;;  %v3235_v22 = vld [vmem:[%s12120_s4 + $0x8] sm:$0xff] }
 0x385   : > { %v1834_v42 = vsel %vm1789_vm10, %v10696_v18, %v1826_v47  ;;  %2966 = vrot.lane.b32.xlu0 %v10522_v30, %s9011_s27  ;;  %2980 = vrot.lane.b32.xlu1 %v10504_v13, %s9012_s25  ;;  %v10793_v18 = vpack.c.bf16 %v1800_v38, %v1799_v60  ;;  %v3234_v13 = vld [vmem:[%s12120_s4] sm:$0xff]  ;;  %v3240_v38 = vld [vmem:[%s12120_s4 + $0x30] sm:$0xff] }
 0x386   : > { %v1838_v27 = vmul.f32 %v10764_v49, %v1834_v42  ;;  %8549 = vmatpush3.bf16.msra.mxu1 %v8548_v25  ;;  %v3241_v25 = vld [vmem:[%s12120_s4 + $0x38] sm:$0xff] }
 0x387   : > { %v1782_v5 = vpop.permute.xlu0 %1781  ;;  %v10790_v57 = vpop.permute.xlu1 %2376  ;;  %8551 = vmatprep.subr.bf16.mxu1 %v10776_v59 }
 0x388   : > { %v10795_v1 = vpack.c.bf16 %v1839_v14, %v1838_v27  ;;  %v1945_v14 = vsel %vm1944_vm13, %v10635_v33, %v10571_v40 }
 0x389   : > { %2978 = vrot.lane.b32.xlu0 %v10522_v30, %s9012_s25  ;;  %3249 = vperm.xlu1 %8800, %v3235_v22   ;;  %v3236_v30 = vld [vmem:[%s12120_s4 + $0x10] sm:$0xff] }
 0x38a   : > { %8553 = vmatpush3.bf16.msra.mxu1 %v10793_v18 }
 0x38b   : > { %v1937_v58 = vpop.permute.xlu0 %1936  ;;  %v10806_v48 = vpop.permute.xlu1 %1864 }
 0x38d   : > { %3244 = vperm.xlu0 %8799, %v3234_v13   ;;  %3259 = vperm.xlu1 %8800, %v3237_v8   ;;  %v1946_v13 = vsel %vm1944_vm13, %v10564_v0, %v10526_v7  ;;  %v1792_v8 = vsel %vm1789_vm10, %v1770_v56, %v1782_v5  ;;  %v1947_v7 = vsel %vm1944_vm13, %v1937_v58, %v10708_v12 }
 0x38e   : > { %v1948_v12 = vsel %vm1944_vm13, %v10713_v24, %v10679_v23 }
 0x38f   : > { %v10814_v53 = vpop.permute.xlu0 %1866  ;;  %v10816_v60 = vpop.permute.xlu1 %1844  ;;  %v1956_v24 = vsel %vm1881_vm14, %v10690_v31, %v1948_v12 }
 0x391   : > { %3254 = vperm.xlu0 %8799, %v3236_v30   ;;  %3269 = vperm.xlu1 %8800, %v3239_v4   ;;  %v1824_v30 = vsel %vm1823_vm11, %v10600_v62, %v10524_v9  ;;  %v1953_v4 = vsel %vm1881_vm14, %v10532_v45, %v1945_v14  ;;  %v7569_v9 = vld [vmem:[%s12121_s5 + $0x3] ss:$0 sm:$0xff]  ;;  %v1825_v45 = vsel %vm1823_vm11, %v10584_v19, %v10534_v54 }
 0x392   : > { %v1833_v14 = vsel %vm1789_vm10, %v10555_v41, %v1825_v45 }
 0x393   : > { %v10824_v47 = vpop.permute.xlu0 %2362  ;;  %v8828_v42 = vpop.permute.xlu1 %8827  ;;  %v1837_v41 = vmul.f32 %v10764_v49, %v1833_v14 }
 0x394   : > { %v8830_v40 = vunpack.i.h.bf16 %v8828_v42  ;;  %v8829_v33 = vunpack.i.l.bf16 %v8828_v42  ;;  %v1955_v42 = vsel %vm1881_vm14, %v10688_v17, %v1947_v7 }
 0x395   : > { %3264 = vperm.xlu0 %8799, %v3238_v15   ;;  %3279 = vperm.xlu1 %8800, %v3241_v25   ;;  %v1954_v15 = vsel %vm1881_vm14, %v10546_v29, %v1946_v13  ;;  %v1793_v25 = vsel %vm1789_vm10, %v10723_v34, %v10732_v21  ;;  %v1801_v29 = vmul.f32 %v10764_v49, %v1792_v8 }
 0x396   : > { %v1832_v34 = vsel %vm1789_vm10, %v10544_v37, %v1824_v30  ;;  %v1957_v21 = vmul.f32 %v7569_v9, %v1953_v4  ;;  %v1802_v58 = vmul.f32 %v10764_v49, %v1793_v25  ;;  %v1958_v19 = vmul.f32 %v7569_v9, %v1954_v15 }
 0x397   : > { %v10832_v27 = vpop.permute.xlu0 %2374  ;;  %v10834_v22 = vpop.permute.xlu1 %8832  ;;  %v1836_v23 = vmul.f32 %v10764_v49, %v1832_v34  ;;  %v1959_v30 = vmul.f32 %v7569_v9, %v1955_v42  ;;  %v8820_v49 = vunpack.i.h.bf16 %v10702_v10 }
 0x398   : > { %v10882_v17 = vpack.c.bf16 %v1802_v58, %v1801_v29  ;;  %v10885_v4 = vpack.c.bf16 %v1958_v19, %v1957_v21  ;;  %v8834_v21 = vunpack.i.l.bf16 %v10834_v22 }
 0x399   : > { %3274 = vperm.xlu0 %8799, %v3240_v38   ;;  %v2007_v38 = vsel %vm2003_vm12, %v8829_v33, %v8830_v40  ;;  %v1873_v40 = vsel %vm1872_vm15, %v10641_v32, %v10661_v55  ;;  %v1960_v33 = vmul.f32 %v7569_v9, %v1956_v24  ;;  %v10897_v25 = vpack.c.bf16 %v1837_v41, %v1836_v23 }
 0x39a   : > { %v1882_v7 = vsel %vm1881_vm14, %v10647_v16, %v1873_v40  ;;  %v1874_v32 = vsel %vm1872_vm15, %v10569_v44, %v10629_v46  ;;  %v1875_v55 = vsel %vm1872_vm15, %v10806_v48, %v10814_v53  ;;  %v2383_v41 = vsel %vm2382_vm0, %v10653_v11, %v10659_v2  ;;  %v10952_v40 = vld [vmem:[%s12119_s3] sm:$0xff] }
 0x39b   : > { %v8838_v0 = vpop.permute.xlu0 %8837  ;;  %v10852_v56 = vpop.permute.xlu1 %2334  ;;  %v10903_v45 = vpack.c.bf16 %v1960_v33, %v1959_v30  ;;  %v1883_v29 = vsel %vm1881_vm14, %v10637_v51, %v1874_v32  ;;  %v1884_v46 = vsel %vm1881_vm14, %v10816_v60, %v1875_v55  ;;  %v8835_v51 = vunpack.i.h.bf16 %v10834_v22  ;;  %v10957_v33 = vld [vmem:[%s12119_s3 + $0x28] sm:$0xff]  ;;  %v7580_v11 = vld [vmem:[%s12121_s5 + $0x5] ss:$0 sm:$0xff] }
 0x39c   : > { %v8840_v62 = vunpack.i.h.bf16 %v8838_v0  ;;  %v8839_v5 = vunpack.i.l.bf16 %v8838_v0  ;;  %v8819_v0 = vunpack.i.l.bf16 %v10702_v10  ;;  %v1891_v10 = vmul.f32 %v7569_v9, %v1882_v7 }
 0x39d   : > { %v1892_v34 = vmul.f32 %v7569_v9, %v1883_v29  ;;  %v2056_v14 = vsel %vm2052_vm9, %v8834_v21, %v8835_v51  ;;  %v2392_v32 = vmul.f32 %v7580_v11, %v2383_v41  ;;  %v10975_v29 = vld [vmem:[%s12119_s3 + $0x40] sm:$0xff]  ;;  %v11018_v21 = vld [vmem:[%s12119_s3 + $0x30] sm:$0xff] }
 0x39e   : > { %v2006_v54 = vsel %vm2003_vm12, %v8839_v5, %v8840_v62  ;;  %v1876_v5 = vsel %vm1872_vm15, %v10742_v20, %v10721_v52  ;;  %v10920_v44 = vpack.c.bf16 %v8820_v49, %v8819_v0  ;;  %v1893_v20 = vmul.f32 %v7569_v9, %v1884_v46  ;;  %v10966_v49 = vld [vmem:[%s12119_s3 + $0x20] sm:$0xff] }
 0x39f   : > { %v10873_v13 = vpack.c.bf16 %v2007_v38, %v2006_v54  ;;  %v10875_v37 = vpop.permute.xlu0 %2332  ;;  %v10877_v8 = vpop.permute.xlu1 %2326  ;;  %v1885_v12 = vsel %vm1881_vm14, %v10730_v43, %v1876_v5  ;;  %v10930_v52 = vpack.c.bf16 %v1892_v34, %v1891_v10  ;;  %v2384_v0 = vsel %vm2382_vm0, %v10643_v63, %v10649_v50  ;;  %v10988_v63 = vld [vmem:[%s12119_s3 + $0x18] sm:$0xff] }
 0x3a0   : > { %v1894_v19 = vmul.f32 %v7569_v9, %v1885_v12  ;;  %v2393_v50 = vmul.f32 %v7580_v11, %v2384_v0  ;;  %v11023_v12 = vld [vmem:[%s12119_s3 + $0x70] sm:$0xff] }
 0x3a1   : > { %8555 = vmatprep.subr.bf16.mxu1 %v10873_v13 }
 0x3a2   : > { %8557 = vmatpush3.bf16.msra.mxu1 %v10882_v17  ;;  %v10940_v30 = vpack.c.bf16 %v1894_v19, %v1893_v20 }
 0x3a3   : > { %v10892_v15 = vpop.permute.xlu0 %2324  ;;  %v10894_v31 = vpop.permute.xlu1 %2338  ;;  %8559 = vmatprep.subr.bf16.mxu1 %v10885_v4 }
 0x3a6   : > { %8561 = vmatpush3.bf16.msra.mxu1 %v10897_v25 }
 0x3a7   : > { %v10914_v16 = vpop.permute.xlu0 %2336  ;;  %v8843_v62 = vpop.permute.xlu1 %8842  ;;  %8563 = vmatprep.subr.bf16.mxu1 %v10903_v45 }
 0x3a8   : > { %v8845_v48 = vunpack.i.h.bf16 %v8843_v62  ;;  %v8844_v53 = vunpack.i.l.bf16 %v8843_v62  ;;  %v2385_v62 = vsel %vm2382_vm0, %v10824_v47, %v10832_v27  ;;  %v2386_v47 = vsel %vm2382_vm0, %v10770_v28, %v10790_v57  ;;  %v11010_v57 = vld [vmem:[%s12119_s3 + $0x58] sm:$0xff] }
 0x3a9   : > { %v11005_v28 = vpack.c.bf16 %v2393_v50, %v2392_v32  ;;  %v2395_v34 = vmul.f32 %v7580_v11, %v2386_v47  ;;  %v11086_v32 = vld [vmem:[%s12119_s3 + $0x60] sm:$0xff] }
 0x3aa   : > { %8565 = vmatpush3.bf16.msra.mxu1 %v10795_v1  ;;  %v10932_v54 = vpack.c.bf16 %v8845_v48, %v8844_v53  ;;  %v11001_v53 = vld [vmem:[%s12119_s3 + $0x38] sm:$0xff] }
 0x3ab   : > { %v8848_v58 = vpop.permute.xlu0 %8847  ;;  %v2399_v42 = vpop.permute.xlu1 %2398  ;;  %8567 = vmatprep.subr.bf16.mxu1 %v10920_v44 }
 0x3ac   : > { %v8850_v60 = vunpack.i.h.bf16 %v8848_v58  ;;  %v8849_v38 = vunpack.i.l.bf16 %v8848_v58 }
 0x3ae   : > { %v2055_v22 = vsel %vm2052_vm9, %v8849_v38, %v8850_v60  ;;  %8569 = vmatpush3.bf16.msra.mxu1 %v10930_v52  ;;  %v2345_v38 = vsel %vm2344_vm1, %v10665_v3, %v10875_v37  ;;  %v11053_v37 = vld [vmem:[%s12119_s3 + $0x48] sm:$0xff] }
 0x3af   : > { %v10937_v23 = vpack.c.bf16 %v2056_v14, %v2055_v22  ;;  %v2397_v43 = vpop.permute.xlu0 %2396  ;;  %v2411_v24 = vpop.permute.xlu1 %2410  ;;  %8571 = vmatprep.subr.bf16.mxu1 %v10932_v54  ;;  %v11046_v22 = vld [vmem:[%s12119_s3 + $0x88] sm:$0xff] }
 0x3b0   : > { %v2421_v9 = vsel %vm2382_vm0, %v2399_v42, %v2411_v24  ;;  %v2346_v24 = vsel %vm2344_vm1, %v10655_v36, %v10852_v56  ;;  %v11079_v56 = vld [vmem:[%s12119_s3 + $0xa0] sm:$0xff] }
 0x3b1   : > { %8579 = vmatprep.subr.bf16.mxu0 %v10937_v23  ;;  %v2425_v10 = vmul.f32 %v7580_v11, %v2421_v9 }
 0x3b2   : > { %8573 = vmatpush3.bf16.msra.mxu1 %v10940_v30  ;;  %8581 = vmatpush3.bf16.msra.mxu0 %v10937_v23 }
 0x3b3   : > { %v2409_v2 = vpop.permute.xlu0 %2408  ;;  %v2403_v7 = vpop.permute.xlu1 %2402  ;;  %8583 = vmatprep.subr.bf16.mxu0 %v10776_v59 }
 0x3b4   : > { %v2420_v55 = vsel %vm2382_vm0, %v2397_v43, %v2409_v2  ;;  %v7579_v43 = vld [vmem:[%s12121_s5 + $0x2] ss:$0 sm:$0xff]  ;;  %v11067_v2 = vld [vmem:[%s12119_s3 + $0x68] sm:$0xff] }
 0x3b5   : > { %v2424_v5 = vmul.f32 %v7580_v11, %v2420_v55  ;;  %2175 = vmatmul.mubr.f32.vlgmr.msra.gmra.mrb[16].mxu1 %v10952_v40  ;;  %8406 = vmatmul.mubr.msk.f32.vlgmr.msra.gmra.mrb[20].mxu0 %vm2085_vm8, %v10957_v33  ;;  %v2355_v0 = vmul.f32 %v7579_v43, %v2346_v24  ;;  %v2348_v55 = vsel %vm2344_vm1, %v10877_v8, %v10894_v31 }
 0x3b6   : > { %8585 = vmatpush3.bf16.msra.mxu0 %v10793_v18  ;;  %2179 = vmatprep.mubr.f32.mxu1 %v10966_v49  ;;  %v2394_v18 = vmul.f32 %v7580_v11, %v2385_v62  ;;  %v2357_v31 = vmul.f32 %v7579_v43, %v2348_v55 }
 0x3b7   : > { %v2401_v27 = vpop.permute.xlu0 %2400  ;;  %v2415_v46 = vpop.permute.xlu1 %2414  ;;  %8587 = vmatprep.subr.bf16.mxu0 %v10873_v13  ;;  %v10994_v48 = vpack.c.bf16 %v2425_v10, %v2424_v5  ;;  %8408 = vmatprep.mubr.msk.f32.mxu0 %vm2085_vm8, %v10975_v29  ;;  %v11103_v10 = vld [vmem:[%s12119_s3 + $0x80] sm:$0xff] }
 0x3b8   : > { %v2423_v51 = vsel %vm2382_vm0, %v2403_v7, %v2415_v46  ;;  %v11033_v60 = vpack.c.bf16 %v2395_v34, %v2394_v18  ;;  %v2347_v7 = vsel %vm2344_vm1, %v10892_v15, %v10914_v16  ;;  %v11091_v16 = vld [vmem:[%s12119_s3 + $0xb8] sm:$0xff] }
 0x3b9   : > { %2180 = vmatmul.mubr.f32.gmra.mrb[18].mxu1 %v10988_v63  ;;  %8615 = vmatprep.subr.bf16.mxu1 %v10994_v48  ;;  %v2427_v19 = vmul.f32 %v7580_v11, %v2423_v51  ;;  %v2356_v50 = vmul.f32 %v7579_v43, %v2347_v7  ;;  %v11122_v18 = vld [vmem:[%s12119_s3 + $0x78] sm:$0xff]  ;;  %v11160_v7 = vld [vmem:[%s12119_s3 + $0xa8] sm:$0xff] }
 0x3ba   : > { %8589 = vmatpush3.bf16.msra.mxu0 %v10882_v17  ;;  %8617 = vmatpush3.bf16.msra.mxu1 %v10994_v48  ;;  %v11030_v17 = vld [vmem:[%s12119_s3 + $0x50] sm:$0xff] }
 0x3bb   : > { %v2413_v58 = vpop.permute.xlu0 %2412  ;;  %v2722_v42 = vpop.permute.xlu1 %2721  ;;  %8591 = vmatprep.subr.bf16.mxu0 %v11005_v28  ;;  %2184 = vmatprep.mubr.f32.mxu1 %v11001_v53 }
 0x3bc   : > { %v2422_v20 = vsel %vm2382_vm0, %v2401_v27, %v2413_v58  ;;  %8409 = vmatmul.mubr.msk.f32.gmra.mrb[22].mxu0 %vm2085_vm8, %v11010_v57  ;;  %v11114_v27 = vld [vmem:[%s12121_s5 + $0x7] ss:$0 sm:$0xff] }
 0x3bd   : > { %v2426_v14 = vmul.f32 %v7580_v11, %v2422_v20  ;;  %2185 = vmatmul.mubr.f32.gmra.mrb[20].mxu1 %v11018_v21  ;;  %8411 = vmatprep.mubr.msk.f32.mxu0 %vm2085_vm8, %v11023_v12  ;;  %v2354_v11 = vmul.f32 %v7579_v43, %v2345_v38  ;;  %v11131_v20 = vld [vmem:[%s12119_s3 + $0x98] sm:$0xff]  ;;  %v8604_v38 = vpack.c.bf16 %v2357_v31, %v2356_v50  ;;  %v11143_v43 = vld [vmem:[%s12119_s3 + $0x90] sm:$0xff] }
 0x3be   : > { %8593 = vmatpush3.bf16.msra.mxu0 %v10897_v25  ;;  %2189 = vmatprep.mubr.f32.mxu1 %v11030_v17 }
 0x3bf   : > { %v2720_v41 = vpop.permute.xlu0 %2719  ;;  %v2726_v9 = vpop.permute.xlu1 %2725  ;;  %8595 = vmatprep.subr.bf16.mxu0 %v11033_v60  ;;  %v11062_v25 = vpack.c.bf16 %v2427_v19, %v2426_v14  ;;  %v8600_v5 = vpack.c.bf16 %v2355_v0, %v2354_v11  ;;  %v11151_v11 = vld [vmem:[%s12119_s3 + $0xb0] sm:$0xff] }
 0x3c0   : > { %8412 = vmatmul.mubr.msk.f32.gmra.mrb[24].mxu0 %vm2085_vm8, %v11046_v22  ;;  %v2736_v34 = vsel %vm2735_vm2, %v2720_v41, %v2722_v42 }
 0x3c1   : > { %2190 = vmatmul.mubr.f32.gmra.mrb[22].mxu1 %v11053_v37  ;;  %8619 = vmatprep.subr.bf16.mxu1 %v11062_v25 }
 0x3c2   : > { %8597 = vmatpush3.bf16.msra.mxu0 %v10795_v1  ;;  %8621 = vmatpush3.bf16.msra.mxu1 %v11062_v25 }
 0x3c3   : > { %v2724_v62 = vpop.permute.xlu0 %2723  ;;  %v11096_v1 = vpop.permute.xlu1 %2683  ;;  %8599 = vmatprep.subr.bf16.mxu0 %v10920_v44  ;;  %2194 = vmatprep.mubr.f32.mxu1 %v11067_v2 }
 0x3c4   : > { %v2737_v47 = vsel %vm2735_vm2, %v2724_v62, %v2726_v9  ;;  %8414 = vmatprep.mubr.msk.f32.mxu0 %vm2085_vm8, %v11079_v56 }
 0x3c5   : > { %2195 = vmatmul.mubr.f32.gmra.mrb[24].mxu1 %v11086_v32  ;;  %8415 = vmatmul.mubr.msk.f32.gmra.mrb[26].mxu0 %vm2085_vm8, %v11091_v16  ;;  %v2745_v46 = vsel %vm2705_vm3, %v2737_v47, %v11096_v1 }
 0x3c6   : > { %8601 = vmatpush3.bf16.msra.mxu0 %v8600_v5  ;;  %2199 = vmatprep.mubr.f32.mxu1 %v11103_v10  ;;  %v2749_v14 = vmul.f32 %v11114_v27, %v2745_v46 }
 0x3c7   : > { %v11125_v51 = vpop.permute.xlu0 %2681  ;;  %v2730_v58 = vpop.permute.xlu1 %2729  ;;  %8603 = vmatprep.subr.bf16.mxu0 %v10932_v54  ;;  %2492 = vmatprep.mubr.f32.mxu0 %v10618_v39 }
 0x3c8   : > { %v2744_v19 = vsel %vm2705_vm3, %v2736_v34, %v11125_v51 }
 0x3c9   : > { %v2748_v42 = vmul.f32 %v11114_v27, %v2744_v19  ;;  %2200 = vmatmul.mubr.f32.gmra.mrb[26].mxu1 %v11122_v18 }
 0x3ca   : > { %8605 = vmatpush3.bf16.msra.mxu0 %v8604_v38  ;;  %2204 = vmatprep.mubr.f32.mxu1 %v11131_v20 }
 0x3cb   : > { %v2728_v24 = vpop.permute.xlu0 %2727  ;;  %v2734_v41 = vpop.permute.xlu1 %2733  ;;  %8607 = vmatprep.subr.bf16.mxu0 %v10719_v61  ;;  %v11146_v9 = vpack.c.bf16 %v2749_v14, %v2748_v42 }
 0x3cc   : > { %v2738_v50 = vsel %vm2735_vm2, %v2728_v24, %v2730_v58 }
 0x3cd   : > { %2205 = vmatmul.mubr.f32.gmra.mrb[28].mxu1 %v11143_v43  ;;  %8655 = vmatprep.subr.bf16.mxu1 %v11146_v9 }
 0x3ce   : > { %8609 = vmatpush3.bf16.msra.mxu0 %v10344_v26  ;;  %2209 = vmatprep.mubr.f32.mxu1 %v11151_v11 }
 0x3cf   : > { %v2732_v0 = vpop.permute.xlu0 %2731  ;;  %v11162_v55 = vpop.permute.xlu1 %2687  ;;  %8611 = vmatprep.subr.bf16.mxu0 %v10937_v23 }
 0x3d0   : > { %v2739_v62 = vsel %vm2735_vm2, %v2732_v0, %v2734_v41  ;;  %v7589_v0 = vld [vmem:[%s12121_s5 + $0x6] ss:$0 sm:$0xff] }
 0x3d1   : > { %2210 = vmatmul.mubr.f32.gmra.mrb[30].mxu1 %v11160_v7  ;;  %v2747_v5 = vsel %vm2705_vm3, %v2739_v62, %v11162_v55 }
 0x3d2   : > { %8613 = vmatpush3.bf16.msra.mxu0 %v10613_v35  ;;  %8425 = vmatprep.mubr.msk.f32.mxu1 %vm2085_vm8, %v10624_v6  ;;  %v2751_v34 = vmul.f32 %v11114_v27, %v2747_v5 }
 0x3d3   : > { %v11173_v47 = vpop.permute.xlu0 %2685  ;;  %v2641_v31 = vpop.permute.xlu1 %2640  ;;  %8623 = vmatprep.subr.bf16.mxu0 %v10920_v44 }
 0x3d4   : > { %v2746_v46 = vsel %vm2705_vm3, %v2738_v50, %v11173_v47 }
 0x3d5   : > { %v2750_v38 = vmul.f32 %v11114_v27, %v2746_v46  ;;  %2493 = vmatmul.mubr.f32.vlgmr.msra.gmra.mrb[28].mxu0 %v10952_v40  ;;  %8426 = vmatmul.mubr.msk.f32.vlgmr.msra.gmra.mrb[32].mxu1 %vm2085_vm8, %v10957_v33 }
 0x3d6   : > { %8657 = vmatpush3.bf16.msra.mxu1 %v11146_v9  ;;  %8625 = vmatpush3.bf16.msra.mxu0 %v10930_v52  ;;  %v2648_v52 = vsel %vm2646_vm4, %v2641_v31, %v10655_v36 }
 0x3d7   : > { %v2639_v58 = vpop.permute.xlu0 %2638  ;;  %v2658_v19 = vpop.permute.xlu1 %2657  ;;  %8627 = vmatprep.subr.bf16.mxu0 %v10932_v54  ;;  %2497 = vmatprep.mubr.f32.mxu0 %v10966_v49  ;;  %v11187_v14 = vpack.c.bf16 %v2751_v34, %v2750_v38 }
 0x3d8   : > { %8428 = vmatprep.mubr.msk.f32.mxu1 %vm2085_vm8, %v10975_v29  ;;  %v2647_v42 = vsel %vm2646_vm4, %v2639_v58, %v10665_v3  ;;  %v2669_v62 = vsel %vm2667_vm5, %v2648_v52, %v2658_v19 }
 0x3d9   : > { %2498 = vmatmul.mubr.f32.gmra.mrb[30].mxu0 %v10988_v63  ;;  %8429 = vmatmul.mubr.msk.f32.gmra.mrb[34].mxu1 %vm2085_vm8, %v11010_v57  ;;  %v2678_v3 = vmul.f32 %v7589_v0, %v2669_v62 }
 0x3da   : > { %8659 = vmatprep.subr.bf16.mxu1 %v11187_v14  ;;  %8629 = vmatpush3.bf16.msra.mxu0 %v10940_v30 }
 0x3db   : > { %8661 = vmatpush3.bf16.msra.mxu1 %v11187_v14  ;;  %v2656_v24 = vpop.permute.xlu0 %2655  ;;  %v2645_v41 = vpop.permute.xlu1 %2644  ;;  %8631 = vmatprep.subr.bf16.mxu0 %v10719_v61 }
 0x3dc   : > { %v2668_v30 = vsel %vm2667_vm5, %v2647_v42, %v2656_v24  ;;  %8663 = vmatprep.subr.bf16.mxu1 %v10719_v61  ;;  %2502 = vmatprep.mubr.f32.mxu0 %v11001_v53  ;;  %v2650_v61 = vsel %vm2646_vm4, %v2645_v41, %v10877_v8 }
 0x3dd   : > { %v2677_v36 = vmul.f32 %v7589_v0, %v2668_v30  ;;  %8431 = vmatprep.mubr.msk.f32.mxu1 %vm2085_vm8, %v11023_v12  ;;  %2503 = vmatmul.mubr.f32.gmra.mrb[32].mxu0 %v11018_v21 }
 0x3de   : > { %8432 = vmatmul.mubr.msk.f32.gmra.mrb[36].mxu1 %vm2085_vm8, %v11046_v22  ;;  %8633 = vmatpush3.bf16.msra.mxu0 %v10344_v26 }
 0x3df   : > { %v2643_v5 = vpop.permute.xlu0 %2642  ;;  %v2662_v50 = vpop.permute.xlu1 %2661  ;;  %8635 = vmatprep.subr.bf16.mxu0 %v10937_v23  ;;  %2507 = vmatprep.mubr.f32.mxu0 %v11030_v17  ;;  %v8638_v31 = vpack.c.bf16 %v2678_v3, %v2677_v36 }
 0x3e0   : > { %8434 = vmatprep.mubr.msk.f32.mxu1 %vm2085_vm8, %v11079_v56  ;;  %v2671_v46 = vsel %vm2667_vm5, %v2650_v61, %v2662_v50  ;;  %v2649_v34 = vsel %vm2646_vm4, %v2643_v5, %v10892_v15 }
 0x3e1   : > { %2508 = vmatmul.mubr.f32.gmra.mrb[34].mxu0 %v11053_v37  ;;  %v2680_v19 = vmul.f32 %v7589_v0, %v2671_v46 }
 0x3e2   : > { %8435 = vmatmul.mubr.msk.f32.gmra.mrb[38].mxu1 %vm2085_vm8, %v11091_v16  ;;  %8637 = vmatpush3.bf16.msra.mxu0 %v10613_v35 }
 0x3e3   : > { %v2660_v38 = vpop.permute.xlu0 %2659  ;;  %v2696_v58 = vpop.permute.xlu1 %2695  ;;  %8639 = vmatprep.subr.bf16.mxu0 %v8638_v31  ;;  %2512 = vmatprep.mubr.f32.mxu0 %v11067_v2 }
 0x3e4   : > { %v2670_v8 = vsel %vm2667_vm5, %v2649_v34, %v2660_v38  ;;  %8445 = vmatprep.mubr.msk.f32.mxu1 %vm2085_vm8, %v10624_v6  ;;  %v2707_v42 = vsel %vm2705_vm3, %v11096_v1, %v2696_v58 }
 0x3e5   : > { %v2679_v52 = vmul.f32 %v7589_v0, %v2670_v8  ;;  %2513 = vmatmul.mubr.f32.gmra.mrb[36].mxu0 %v11086_v32  ;;  %v2716_v1 = vmul.f32 %v11114_v27, %v2707_v42 }
 0x3e6   : > { %8446 = vmatmul.mubr.msk.f32.vlgmr.msra.gmra.mrb[40].mxu1 %vm2085_vm8, %v10957_v33  ;;  %8641 = vmatpush3.bf16.msra.mxu0 %v10776_v59 }
 0x3e7   : > { %8665 = vmatpush3.bf16.msra.mxu1 %v10344_v26  ;;  %v2694_v15 = vpop.permute.xlu0 %2693  ;;  %v2700_v24 = vpop.permute.xlu1 %2699  ;;  %2517 = vmatprep.mubr.f32.mxu0 %v11103_v10  ;;  %v8642_v41 = vpack.c.bf16 %v2680_v19, %v2679_v52 }
 0x3e8   : > { %8667 = vmatprep.subr.bf16.mxu1 %v10937_v23  ;;  %v2706_v6 = vsel %vm2705_vm3, %v11125_v51, %v2694_v15  ;;  %8448 = vmatprep.mubr.msk.f32.mxu1 %vm2085_vm8, %v10975_v29  ;;  %v2709_v26 = vsel %vm2705_vm3, %v11162_v55, %v2700_v24 }
 0x3e9   : > { %v2715_v0 = vmul.f32 %v11114_v27, %v2706_v6  ;;  %2518 = vmatmul.mubr.f32.gmra.mrb[38].mxu0 %v11122_v18  ;;  %8643 = vmatprep.subr.bf16.mxu0 %v8642_v41  ;;  %v2718_v36 = vmul.f32 %v11114_v27, %v2709_v26 }
 0x3ea   : > { %8645 = vmatpush3.bf16.msra.mxu0 %v10873_v13  ;;  %2522 = vmatprep.mubr.f32.mxu0 %v11131_v20 }
 0x3eb   : > { %8669 = vmatpush3.bf16.msra.mxu1 %v10613_v35  ;;  %v2698_v23 = vpop.permute.xlu0 %2697  ;;  %v2965_v51 = vpop.permute.xlu1 %2964  ;;  %v8646_v62 = vpack.c.bf16 %v2716_v1, %v2715_v0 }
 0x3ec   : > { %8671 = vmatprep.subr.bf16.mxu1 %v10994_v48  ;;  %v2708_v30 = vsel %vm2705_vm3, %v11173_v47, %v2698_v23  ;;  %8449 = vmatmul.mubr.msk.f32.gmra.mrb[42].mxu1 %vm2085_vm8, %v11010_v57 }
 0x3ed   : > { %v2717_v55 = vmul.f32 %v11114_v27, %v2708_v30  ;;  %2523 = vmatmul.mubr.f32.gmra.mrb[40].mxu0 %v11143_v43  ;;  %8647 = vmatprep.subr.bf16.mxu0 %v8646_v62 }
 0x3ee   : > { %8649 = vmatpush3.bf16.msra.mxu0 %v10885_v4  ;;  %2527 = vmatprep.mubr.f32.mxu0 %v11151_v11  ;;  %v7599_v4 = vld [vmem:[%s12121_s5 + $0x8] ss:$0 sm:$0xff] }
 0x3ef   : > { %8673 = vmatpush3.bf16.msra.mxu1 %v10776_v59  ;;  %v2963_v35 = vpop.permute.xlu0 %2962  ;;  %v2977_v48 = vpop.permute.xlu1 %2976  ;;  %v8650_v47 = vpack.c.bf16 %v2718_v36, %v2717_v55  ;;  %8451 = vmatprep.mubr.msk.f32.mxu1 %vm2085_vm8, %v11023_v12 }
 0x3f0   : > { %8675 = vmatprep.subr.bf16.mxu1 %v11062_v25  ;;  %8452 = vmatmul.mubr.msk.f32.gmra.mrb[44].mxu1 %vm2085_vm8, %v11046_v22  ;;  %v2988_v59 = vsel %vm2986_vm6, %v2965_v51, %v2977_v48 }
 0x3f1   : > { %2528 = vmatmul.mubr.f32.gmra.mrb[42].mxu0 %v11160_v7  ;;  %8651 = vmatprep.subr.bf16.mxu0 %v8650_v47  ;;  %v2997_v5 = vmul.f32 %v7599_v4, %v2988_v59 }
 0x3f2   : > { %8653 = vmatpush3.bf16.msra.mxu0 %v10903_v45  ;;  %2816 = vmatprep.mubr.f32.mxu0 %v10618_v39 }
 0x3f3   : > { %8677 = vmatpush3.bf16.msra.mxu1 %v10873_v13  ;;  %v2975_v27 = vpop.permute.xlu0 %2974  ;;  %v2969_v25 = vpop.permute.xlu1 %2968  ;;  %8454 = vmatprep.mubr.msk.f32.mxu1 %vm2085_vm8, %v11079_v56 }
 0x3f4   : > { %8679 = vmatprep.subr.bf16.mxu1 %v8646_v62  ;;  %v2987_v3 = vsel %vm2986_vm6, %v2963_v35, %v2975_v27  ;;  %8455 = vmatmul.mubr.msk.f32.gmra.mrb[46].mxu1 %vm2085_vm8, %v11091_v16 }
 0x3f5   : > { %v2996_v50 = vmul.f32 %v7599_v4, %v2987_v3  ;;  %2817 = vmatmul.mubr.f32.vlgmr.msra.gmra.mrb[44].mxu0 %v10952_v40  ;;  %3064 = vmatprep.mubr.f32.mxu1 %v10618_v39 }
 0x3f6   : > { %2821 = vmatprep.mubr.f32.mxu0 %v10966_v49 }
 0x3f7   : > { %8681 = vmatpush3.bf16.msra.mxu1 %v11005_v28  ;;  %v2967_v13 = vpop.permute.xlu0 %2966  ;;  %v2981_v45 = vpop.permute.xlu1 %2980  ;;  %v8694_v61 = vpack.c.bf16 %v2997_v5, %v2996_v50 }
 0x3f8   : > { %8683 = vmatprep.subr.bf16.mxu1 %v8650_v47  ;;  %v2990_v31 = vsel %vm2986_vm6, %v2969_v25, %v2981_v45 }
 0x3f9   : > { %2822 = vmatmul.mubr.f32.gmra.mrb[46].mxu0 %v10988_v63  ;;  %8695 = vmatprep.subr.bf16.mxu0 %v8694_v61  ;;  %v2999_v28 = vmul.f32 %v7599_v4, %v2990_v31 }
 0x3fa   : > { %8697 = vmatpush3.bf16.msra.mxu0 %v8694_v61  ;;  %2826 = vmatprep.mubr.f32.mxu0 %v11001_v53 }
 0x3fb   : > { %8685 = vmatpush3.bf16.msra.mxu1 %v11033_v60  ;;  %v2979_v46 = vpop.permute.xlu0 %2978 }
 0x3fc   : > { %8687 = vmatprep.subr.bf16.mxu1 %v11146_v9  ;;  %v2989_v39 = vsel %vm2986_vm6, %v2967_v13, %v2979_v46 }
 0x3fd   : > { %v2998_v34 = vmul.f32 %v7599_v4, %v2989_v39  ;;  %2827 = vmatmul.mubr.f32.gmra.mrb[48].mxu0 %v11018_v21 }
 0x3fe   : > { %2831 = vmatprep.mubr.f32.mxu0 %v11030_v17 }
 0x3ff   : > { %8689 = vmatpush3.bf16.msra.mxu1 %v10920_v44  ;;  %v8698_v38 = vpack.c.bf16 %v2999_v28, %v2998_v34  ;;  %v8851_v44 = vld [vmem:[%s12119_s3 + $0x10] sm:$0xff] }
 0x400   : > { %8691 = vmatprep.subr.bf16.mxu1 %v11187_v14 }
 0x401   : > { %2832 = vmatmul.mubr.f32.gmra.mrb[50].mxu0 %v11053_v37  ;;  %8699 = vmatprep.subr.bf16.mxu0 %v8698_v38 }
 0x402   : > { %8701 = vmatpush3.bf16.msra.mxu0 %v8698_v38  ;;  %2836 = vmatprep.mubr.f32.mxu0 %v11067_v2 }
 0x403   : > { %8693 = vmatpush3.bf16.msra.mxu1 %v10932_v54 }
 0x405   : > { %2837 = vmatmul.mubr.f32.gmra.mrb[52].mxu0 %v11086_v32 }
 0x406   : > { %3065 = vmatmul.mubr.f32.vlgmr.msra.gmra.mrb[48].mxu1 %v10952_v40  ;;  %2841 = vmatprep.mubr.f32.mxu0 %v11103_v10 }
 0x407   : > { %3069 = vmatprep.mubr.f32.mxu1 %v10966_v49 }
 0x409   : > { %2842 = vmatmul.mubr.f32.gmra.mrb[54].mxu0 %v11122_v18 }
 0x40a   : > { %3070 = vmatmul.mubr.f32.gmra.mrb[50].mxu1 %v10988_v63  ;;  %2846 = vmatprep.mubr.f32.mxu0 %v11131_v20 }
 0x40b   : > { %3074 = vmatprep.mubr.f32.mxu1 %v11001_v53 }
 0x40d   : > { %2847 = vmatmul.mubr.f32.gmra.mrb[56].mxu0 %v11143_v43 }
 0x40e   : > { %3075 = vmatmul.mubr.f32.gmra.mrb[52].mxu1 %v11018_v21  ;;  %2851 = vmatprep.mubr.f32.mxu0 %v11151_v11 }
 0x40f   : > { %3079 = vmatprep.mubr.f32.mxu1 %v11030_v17 }
 0x411   : > { %2852 = vmatmul.mubr.f32.gmra.mrb[58].mxu0 %v11160_v7 }
 0x412   : > { %3080 = vmatmul.mubr.f32.gmra.mrb[54].mxu1 %v11053_v37  ;;  %8465 = vmatprep.mubr.msk.f32.mxu0 %vm2085_vm8, %v8851_v44 }
 0x413   : > { %3084 = vmatprep.mubr.f32.mxu1 %v11067_v2 }
 0x415   : > { %8466 = vmatmul.mubr.msk.f32.vlgmr.msra.gmra.mrb[60].mxu0 %vm2085_vm8, %v10957_v33 }
 0x416   : > { %3085 = vmatmul.mubr.f32.gmra.mrb[56].mxu1 %v11086_v32  ;;  %8468 = vmatprep.mubr.msk.f32.mxu0 %vm2085_vm8, %v10975_v29 }
 0x417   : > { %3089 = vmatprep.mubr.f32.mxu1 %v11103_v10 }
 0x419   : > { %8469 = vmatmul.mubr.msk.f32.gmra.mrb[62].mxu0 %vm2085_vm8, %v11010_v57 }
 0x41a   : > { %3090 = vmatmul.mubr.f32.gmra.mrb[58].mxu1 %v11122_v18  ;;  %8471 = vmatprep.mubr.msk.f32.mxu0 %vm2085_vm8, %v11023_v12 }
 0x41b   : > { %3094 = vmatprep.mubr.f32.mxu1 %v11131_v20 }
 0x41d   : > { %8472 = vmatmul.mubr.msk.f32.gmra.mrb[64].mxu0 %vm2085_vm8, %v11046_v22 }
 0x41e   : > { %3095 = vmatmul.mubr.f32.gmra.mrb[60].mxu1 %v11143_v43  ;;  %8474 = vmatprep.mubr.msk.f32.mxu0 %vm2085_vm8, %v11079_v56 }
 0x41f   : > { %3099 = vmatprep.mubr.f32.mxu1 %v11151_v11 }
 0x421   : > { %8475 = vmatmul.mubr.msk.f32.gmra.mrb[66].mxu0 %vm2085_vm8, %v11091_v16 }
 0x422   : > { %3100 = vmatmul.mubr.f32.gmra.mrb[62].mxu1 %v11160_v7 }
 0x488   : > { %v8130_v54 = vpop.f32.mrb[16].mxu1  ;;  %v8407_v40 = vpop.f32.mrb[20].mxu0 }
 0x489   : > { %v8131_v33 = vpop.f32.mrb[17].mxu1  ;;  %v2281_v49 = vpop.f32.mrb[21].mxu0 }
 0x48a   : > { %v8132_v29 = vadd.f32 %v8131_v33, %v8130_v54 }
 0x48c   : > { %v8133_v63 = vpop.f32.mrb[18].mxu1  ;;  %v11339_v53 = vadd.f32 %v8132_v29, %v2281_v49 }
 0x48d   : > { %v8134_v57 = vpop.f32.mrb[19].mxu1 }
 0x48e   : > { %v8135_v21 = vadd.f32 %v8134_v57, %v8133_v63 }
 0x48f   : > { %v8410_v12 = vpop.f32.mrb[22].mxu0 }
 0x490   : > { %v11341_v17 = vadd.f32 %v8407_v40, %v8135_v21  ;;  %v8136_v60 = vpop.f32.mrb[20].mxu1  ;;  %v2291_v22 = vpop.f32.mrb[23].mxu0 }
 0x491   : > { %v8137_v37 = vpop.f32.mrb[21].mxu1 }
 0x492   : > { %v8138_v2 = vadd.f32 %v8137_v37, %v8136_v60 }
 0x493   : > { %v8413_v56 = vpop.f32.mrb[24].mxu0 }
 0x494   : > { %v11343_v32 = vadd.f32 %v8138_v2, %v2291_v22  ;;  %v8139_v16 = vpop.f32.mrb[22].mxu1  ;;  %v2301_v10 = vpop.f32.mrb[25].mxu0 }
 0x495   : > { %v8140_v18 = vpop.f32.mrb[23].mxu1 }
 0x496   : > { %v8141_v20 = vadd.f32 %v8140_v18, %v8139_v16 }
 0x498   : > { %v11345_v43 = vadd.f32 %v8410_v12, %v8141_v20  ;;  %v8142_v9 = vpop.f32.mrb[24].mxu1  ;;  %v8416_v11 = vpop.f32.mrb[26].mxu0 }
 0x499   : > { %v8143_v7 = vpop.f32.mrb[25].mxu1  ;;  %v2311_v14 = vpop.f32.mrb[27].mxu0 }
 0x49a   : > { %v8144_v58 = vadd.f32 %v8143_v7, %v8142_v9 }
 0x49c   : > { %v11347_v8 = vadd.f32 %v8144_v58, %v2301_v10  ;;  %v8145_v19 = vpop.f32.mrb[26].mxu1 }
 0x49d   : > { %v8146_v52 = vpop.f32.mrb[27].mxu1 }
 0x49e   : > { %v8147_v42 = vadd.f32 %v8146_v52, %v8145_v19 }
 0x4a0   : > { %v11349_v15 = vadd.f32 %v8413_v56, %v8147_v42  ;;  %v8148_v24 = vpop.f32.mrb[28].mxu1 }
 0x4a1   : > { %v8149_v41 = vpop.f32.mrb[29].mxu1 }
 0x4a2   : > { %v8150_v6 = vadd.f32 %v8149_v41, %v8148_v24 }
 0x4a4   : > { %v8151_v1 = vpop.f32.mrb[30].mxu1  ;;  %v11351_v0 = vadd.f32 %v8150_v6, %v2311_v14 }
 0x4a5   : > { %v8152_v26 = vpop.f32.mrb[31].mxu1 }
 0x4a6   : > { %v8153_v23 = vadd.f32 %v8152_v26, %v8151_v1 }
 0x4a8   : > { %v11353_v51 = vadd.f32 %v8416_v11, %v8153_v23  ;;  %v8198_v62 = vpop.f32.mrb[28].mxu0  ;;  %v8427_v30 = vpop.f32.mrb[32].mxu1 }
 0x4a9   : > { %v8199_v36 = vpop.f32.mrb[29].mxu0  ;;  %v2599_v55 = vpop.f32.mrb[33].mxu1 }
 0x4aa   : > { %v8200_v35 = vadd.f32 %v8199_v36, %v8198_v62 }
 0x4ac   : > { %v11355_v48 = vadd.f32 %v8200_v35, %v2599_v55  ;;  %v8201_v47 = vpop.f32.mrb[30].mxu0  ;;  %v8430_v4 = vpop.f32.mrb[34].mxu1 }
 0x4ad   : > { %v8202_v59 = vpop.f32.mrb[31].mxu0  ;;  %v2609_v27 = vpop.f32.mrb[35].mxu1 }
 0x4ae   : > { %v3210_v25 = vmax.f32 %v11339_v53, %v11355_v48  ;;  %v8203_v3 = vadd.f32 %v8202_v59, %v8201_v47 }
 0x4b0   : > { %v11359_v5 = vadd.f32 %v8427_v30, %v8203_v3  ;;  %v8204_v50 = vpop.f32.mrb[32].mxu0 }
 0x4b1   : > { %v8205_v13 = vpop.f32.mrb[33].mxu0  ;;  %v8433_v45 = vpop.f32.mrb[36].mxu1 }
 0x4b2   : > { %v3211_v61 = vmax.f32 %v11341_v17, %v11359_v5  ;;  %v8206_v31 = vadd.f32 %v8205_v13, %v8204_v50  ;;  %v2619_v46 = vpop.f32.mrb[37].mxu1 }
 0x4b4   : > { %v11363_v39 = vadd.f32 %v8206_v31, %v2609_v27  ;;  %v8207_v28 = vpop.f32.mrb[34].mxu0 }
 0x4b5   : > { %v8208_v34 = vpop.f32.mrb[35].mxu0  ;;  %v8436_v38 = vpop.f32.mrb[38].mxu1 }
 0x4b6   : > { %v3212_v44 = vmax.f32 %v11343_v32, %v11363_v39  ;;  %v8209_v54 = vadd.f32 %v8208_v34, %v8207_v28  ;;  %v2629_v40 = vpop.f32.mrb[39].mxu1 }
 0x4b8   : > { %v11367_v33 = vadd.f32 %v8430_v4, %v8209_v54  ;;  %v8210_v49 = vpop.f32.mrb[36].mxu0 }
 0x4b9   : > { %v8211_v29 = vpop.f32.mrb[37].mxu0  ;;  %v8447_v63 = vpop.f32.mrb[40].mxu1 }
 0x4ba   : > { %v3213_v57 = vmax.f32 %v11345_v43, %v11367_v33  ;;  %v8212_v21 = vadd.f32 %v8211_v29, %v8210_v49  ;;  %v2923_v12 = vpop.f32.mrb[41].mxu1 }
 0x4bc   : > { %v11371_v60 = vadd.f32 %v8212_v21, %v2619_v46  ;;  %v8213_v22 = vpop.f32.mrb[38].mxu0 }
 0x4bd   : > { %v8214_v37 = vpop.f32.mrb[39].mxu0 }
 0x4be   : > { %v3214_v2 = vmax.f32 %v11347_v8, %v11371_v60  ;;  %v8215_v56 = vadd.f32 %v8214_v37, %v8213_v22 }
 0x4bf   : > { %v8450_v16 = vpop.f32.mrb[42].mxu1 }
 0x4c0   : > { %v11375_v10 = vadd.f32 %v8433_v45, %v8215_v56  ;;  %v8216_v18 = vpop.f32.mrb[40].mxu0  ;;  %v2933_v20 = vpop.f32.mrb[43].mxu1 }
 0x4c1   : > { %v8217_v9 = vpop.f32.mrb[41].mxu0 }
 0x4c2   : > { %v3215_v11 = vmax.f32 %v11349_v15, %v11375_v10  ;;  %v8218_v7 = vadd.f32 %v8217_v9, %v8216_v18 }
 0x4c3   : > { %v8453_v14 = vpop.f32.mrb[44].mxu1 }
 0x4c4   : > { %v11379_v58 = vadd.f32 %v8218_v7, %v2629_v40  ;;  %v8219_v19 = vpop.f32.mrb[42].mxu0  ;;  %v2943_v52 = vpop.f32.mrb[45].mxu1 }
 0x4c5   : > { %v8220_v42 = vpop.f32.mrb[43].mxu0 }
 0x4c6   : > { %v3216_v24 = vmax.f32 %v11351_v0, %v11379_v58  ;;  %v8221_v41 = vadd.f32 %v8220_v42, %v8219_v19 }
 0x4c7   : > { %v8456_v6 = vpop.f32.mrb[46].mxu1 }
 0x4c8   : > { %v11383_v1 = vadd.f32 %v8436_v38, %v8221_v41  ;;  %v8266_v26 = vpop.f32.mrb[44].mxu0  ;;  %v2953_v23 = vpop.f32.mrb[47].mxu1 }
 0x4c9   : > { %v8267_v62 = vpop.f32.mrb[45].mxu0 }
 0x4ca   : > { %v3217_v30 = vmax.f32 %v11353_v51, %v11383_v1  ;;  %v8268_v36 = vadd.f32 %v8267_v62, %v8266_v26 }
 0x4cc   : > { %v2924_v55 = vadd.f32 %v8268_v36, %v2923_v12  ;;  %v8269_v35 = vpop.f32.mrb[46].mxu0 }
 0x4cd   : > { %v8270_v47 = vpop.f32.mrb[47].mxu0 }
 0x4ce   : > { %v8271_v4 = vadd.f32 %v8270_v47, %v8269_v35 }
 0x4d0   : > { %v2929_v59 = vadd.f32 %v8447_v63, %v8271_v4  ;;  %v8272_v27 = vpop.f32.mrb[48].mxu0 }
 0x4d1   : > { %v8273_v3 = vpop.f32.mrb[49].mxu0 }
 0x4d2   : > { %v8274_v50 = vadd.f32 %v8273_v3, %v8272_v27  ;;  %v3245_v27 = vpop.permute.xlu0 %3244 }
 0x4d4   : > { %v11387_v13 = vadd.f32 %v8274_v50, %v2933_v20  ;;  %v8275_v45 = vpop.f32.mrb[50].mxu0 }
 0x4d5   : > { %v8276_v31 = vpop.f32.mrb[51].mxu0 }
 0x4d6   : > { %v8277_v46 = vadd.f32 %v8276_v31, %v8275_v45 }
 0x4d8   : > { %v2939_v28 = vadd.f32 %v8450_v16, %v8277_v46  ;;  %v8278_v34 = vpop.f32.mrb[52].mxu0  ;;  %v3250_v46 = vpop.permute.xlu1 %3249 }
 0x4d9   : > { %v8279_v38 = vpop.f32.mrb[53].mxu0  ;;  %v8334_v54 = vpop.f32.mrb[48].mxu1 }
 0x4da   : > { %v8280_v40 = vadd.f32 %v8279_v38, %v8278_v34  ;;  %v8335_v49 = vpop.f32.mrb[49].mxu1 }
 0x4db   : > { %v8336_v29 = vadd.f32 %v8335_v49, %v8334_v54 }
 0x4dc   : > { %v11389_v21 = vadd.f32 %v8280_v40, %v2943_v52  ;;  %v8281_v12 = vpop.f32.mrb[54].mxu0 }
 0x4dd   : > { %v8282_v22 = vpop.f32.mrb[55].mxu0  ;;  %v8337_v63 = vpop.f32.mrb[50].mxu1 }
 0x4de   : > { %v8283_v37 = vadd.f32 %v8282_v22, %v8281_v12  ;;  %v8338_v56 = vpop.f32.mrb[51].mxu1 }
 0x4df   : > { %v8339_v18 = vadd.f32 %v8338_v56, %v8337_v63 }
 0x4e0   : > { %v2949_v20 = vadd.f32 %v8453_v14, %v8283_v37  ;;  %v8284_v9 = vpop.f32.mrb[56].mxu0 }
 0x4e1   : > { %v8285_v7 = vpop.f32.mrb[57].mxu0  ;;  %v8340_v19 = vpop.f32.mrb[52].mxu1 }
 0x4e2   : > { %v8286_v42 = vadd.f32 %v8285_v7, %v8284_v9  ;;  %v8341_v16 = vpop.f32.mrb[53].mxu1 }
 0x4e3   : > { %v8342_v41 = vadd.f32 %v8341_v16, %v8340_v19 }
 0x4e4   : > { %v11391_v26 = vadd.f32 %v8286_v42, %v2953_v23  ;;  %v8287_v62 = vpop.f32.mrb[58].mxu0 }
 0x4e5   : > { %v8288_v36 = vpop.f32.mrb[59].mxu0  ;;  %v8343_v35 = vpop.f32.mrb[54].mxu1 }
 0x4e6   : > { %v8289_v52 = vadd.f32 %v8288_v36, %v8287_v62  ;;  %v8344_v47 = vpop.f32.mrb[55].mxu1 }
 0x4e7   : > { %v8345_v4 = vadd.f32 %v8344_v47, %v8343_v35 }
 0x4e8   : > { %v11393_v3 = vadd.f32 %v8456_v6, %v8289_v52  ;;  %v8467_v50 = vpop.f32.mrb[60].mxu0  ;;  %v3255_v6 = vpop.permute.xlu0 %3254 }
 0x4e9   : > { %v3177_v45 = vadd.f32 %v8467_v50, %v8339_v18  ;;  %v3171_v14 = vpop.f32.mrb[61].mxu0  ;;  %v8346_v31 = vpop.f32.mrb[56].mxu1 }
 0x4ea   : > { %v3172_v34 = vadd.f32 %v8336_v29, %v3171_v14  ;;  %v8347_v38 = vpop.f32.mrb[57].mxu1 }
 0x4eb   : > { %v3219_v54 = vmax.f32 %v2929_v59, %v3177_v45  ;;  %v8348_v40 = vadd.f32 %v8347_v38, %v8346_v31 }
 0x4ec   : > { %v3218_v23 = vmax.f32 %v2924_v55, %v3172_v34  ;;  %v8470_v49 = vpop.f32.mrb[62].mxu0  ;;  %v3260_v55 = vpop.permute.xlu1 %3259 }
 0x4ed   : > { %v3227_v12 = vmax.f32 %v3211_v61, %v3219_v54  ;;  %v3187_v22 = vadd.f32 %v8470_v49, %v8345_v4  ;;  %v8349_v63 = vpop.f32.mrb[58].mxu1  ;;  %v3181_v37 = vpop.f32.mrb[63].mxu0 }
 0x4ee   : > { %v3226_v56 = vmax.f32 %v3210_v25, %v3218_v23  ;;  %v3182_v18 = vadd.f32 %v8342_v41, %v3181_v37  ;;  %v8350_v9 = vpop.f32.mrb[59].mxu1  ;;  %v3265_v52 = vpop.permute.xlu0 %3264 }
 0x4ef   : > { %v11401_v29 = vadd.f32 %v3250_v46, %v3227_v12  ;;  %v3221_v59 = vmax.f32 %v2939_v28, %v3187_v22  ;;  %v8351_v7 = vadd.f32 %v8350_v9, %v8349_v63 }
 0x4f0   : > { %v11403_v19 = vadd.f32 %v3245_v27, %v3226_v56  ;;  %v3220_v17 = vmax.f32 %v11387_v13, %v3182_v18  ;;  %v8473_v5 = vpop.f32.mrb[64].mxu0 }
 0x4f1   : > { %v3291_v61 = vmax.f32 %v11401_v29, 0.0  ;;  %v3229_v42 = vmax.f32 %v3213_v57, %v3221_v59  ;;  %v3197_v53 = vadd.f32 %v8473_v5, %v8351_v7  ;;  %v8352_v48 = vpop.f32.mrb[60].mxu1  ;;  %v3191_v25 = vpop.f32.mrb[65].mxu0 }
 0x4f2   : > { %v3290_v16 = vmax.f32 %v11403_v19, 0.0  ;;  %v3228_v28 = vmax.f32 %v3212_v44, %v3220_v17  ;;  %v3192_v41 = vadd.f32 %v8348_v40, %v3191_v25  ;;  %v8353_v62 = vpop.f32.mrb[61].mxu1  ;;  %v3270_v44 = vpop.permute.xlu1 %3269 }
 0x4f3   : > { %v11414_v36 = vadd.f32 %v3260_v55, %v3229_v42  ;;  %v3223_v13 = vmax.f32 %v2949_v20, %v3197_v53  ;;  %v8354_v35 = vadd.f32 %v8353_v62, %v8352_v48  ;;  %v3275_v8 = vpop.permute.xlu0 %3274 }
 0x4f4   : > { %v11416_v47 = vadd.f32 %v3255_v6, %v3228_v28  ;;  %v3222_v43 = vmax.f32 %v11389_v21, %v3192_v41  ;;  %v8476_v33 = vpop.f32.mrb[66].mxu0 }
 0x4f5   : > { %v3293_v57 = vmax.f32 %v11414_v36, 0.0  ;;  %v3231_v4 = vmax.f32 %v3215_v11, %v3223_v13  ;;  %v8355_v32 = vpop.f32.mrb[62].mxu1  ;;  %v3201_v39 = vpop.f32.mrb[67].mxu0 }
 0x4f6   : > { %v3292_v27 = vmax.f32 %v11416_v47, 0.0  ;;  %v3230_v20 = vmax.f32 %v3214_v2, %v3222_v43  ;;  %v8356_v50 = vpop.f32.mrb[63].mxu1  ;;  %v3202_v45 = vadd.f32 %v8354_v35, %v3201_v39  ;;  %v3280_v54 = vpop.permute.xlu1 %3279 }
 0x4f7   : > { %v11427_v14 = vadd.f32 %v3270_v44, %v3231_v4  ;;  %v8357_v21 = vadd.f32 %v8356_v50, %v8355_v32 }
 0x4f8   : > { %v11429_v31 = vadd.f32 %v3265_v52, %v3230_v20  ;;  %v3224_v46 = vmax.f32 %v11391_v26, %v3202_v45 }
 0x4f9   : > { %v3295_v15 = vmax.f32 %v11427_v14, 0.0  ;;  %v3207_v10 = vadd.f32 %v8476_v33, %v8357_v21 }
 0x4fa   : > { %v3294_v11 = vmax.f32 %v11429_v31, 0.0  ;;  %v3232_v34 = vmax.f32 %v3216_v24, %v3224_v46 }
 0x4fb   : > { %v3225_v60 = vmax.f32 %v11393_v3, %v3207_v10 }
 0x4fc   : > { %v11438_v2 = vadd.f32 %v3275_v8, %v3232_v34 }
 0x4fd   : > { %v3233_v38 = vmax.f32 %v3217_v30, %v3225_v60 }
 0x4fe   : > { %v3296_v26 = vmax.f32 %v11438_v2, 0.0 }
 0x4ff   : > { %v11444_v40 = vadd.f32 %v3280_v54, %v3233_v38 }
 0x501   : > { %v3297_v23 = vmax.f32 %v11444_v40, 0.0 }
 0x502   : > { %8960 = dma.done.wait [#allocation3], 36864 }
 0x503   : > { %8961 = vsyncadd [#allocation3], 4294930432  ;;  %v12145_v0 = vmov 0   ;;  %v3306_v58 = vld [vmem:[#allocation2] sm:$0xff]  ;;  %v3307_v3 = vld [vmem:[#allocation2 + $0x8] sm:$0xff]  ;;  %vm5047_vm7 = vcmask 1042432   ;;  %v11457_v54 = vpack.c.bf16 %v3291_v61, %v3290_v16 }
 0x504   : > { %5272 = vmatprep.mubr.bf16.mxu0 %v12145_v0  ;;  %5331 = vmatprep.mubr.bf16.mxu1 %v12145_v0  ;;  %v3338_v24 = vld [vmem:[#allocation2 + $0x100] sm:$0xff]  ;;  %v3339_v51 = vld [vmem:[#allocation2 + $0x108] sm:$0xff]  ;;  %v3308_v45 = vld [vmem:[#allocation2 + $0x10] sm:$0xff]  ;;  %vm5034_vm8 = vcmask 572416   ;;  %vm9014_vm9 = vmmov 0   ;;  %s8088_s21 = sshll.u32 %s9092_s17, 4 }
 0x505   : > { %v7609_v49 = vcombine.high %v3306_v58, %v3338_v24  ;;  %v7608_v12 = vcombine.low %v3306_v58, %v3338_v24  ;;  %v3370_v1 = vld [vmem:[#allocation2 + $0x200] sm:$0xff]  ;;  %v7611_v22 = vcombine.high %v3307_v3, %v3339_v51  ;;  %v7610_v63 = vcombine.low %v3307_v3, %v3339_v51  ;;  %v3371_v6 = vld [vmem:[#allocation2 + $0x208] sm:$0xff]  ;;  %v3340_v21 = vld [vmem:[#allocation2 + $0x110] sm:$0xff]  ;;  %s7464_s11 = sshll.u32 %s9993_s26, 4  ;;  %s12071_s28 = scalar_lea.hbm %s12126_s10, %s8088_s21  ;;  %s12073_s11 = int_to_ptr.vmem [resolvable:$true] %s7464_s11 }
 0x506   : > { %v3402_v30 = vld [vmem:[#allocation2 + $0x300] sm:$0xff]  ;;  %v3403_v56 = vld [vmem:[#allocation2 + $0x308] sm:$0xff]  ;;  %v3309_v46 = vld [vmem:[#allocation2 + $0x18] sm:$0xff]  ;;  %v7613_v8 = vcombine.high %v3308_v45, %v3340_v21  ;;  %v7612_v3 = vcombine.low %v3308_v45, %v3340_v21  ;;  %vm7449_vm10 = vcmask 73728   ;;  %s12147_s30 = sand.u32 1, %s8972_s14   ;;  %s8916_s27 = scalar_lea.vmem %s12073_s11, 16 }
 0x507   : > { %v7673_v37 = vcombine.high %v3370_v1, %v3402_v30  ;;  %v3434_v18 = vld [vmem:[#allocation2 + $0x400] sm:$0xff]  ;;  %5240 = vmatprep.subr.bf16.mxu0 %v7609_v49  ;;  %v7675_v9 = vcombine.high %v3371_v6, %v3403_v56  ;;  %v3435_v7 = vld [vmem:[#allocation2 + $0x408] sm:$0xff]  ;;  %5299 = vmatprep.subr.bf16.mxu1 %v7611_v22  ;;  %v7672_v17 = vcombine.low %v3370_v1, %v3402_v30  ;;  %v3341_v10 = vld [vmem:[#allocation2 + $0x118] sm:$0xff]  ;;  %s7452_s22 = scalar_lea.sflag [#allocation5], %s12147_s30  ;;  %p8917_p11 = scmp.ne.s32.totalorder %s12073_s11, %s8916_s27 }
 0x508   : > { %v3466_v59 = vld [vmem:[#allocation2 + $0x500] sm:$0xff]  ;;  %v3467_v55 = vld [vmem:[#allocation2 + $0x508] sm:$0xff]  ;;  %5241 = vmatpush1.bf16.msra.mxu0 %v7608_v12  ;;  %5300 = vmatpush1.bf16.msra.mxu1 %v7610_v63  ;;  %v7674_v5 = vcombine.low %v3371_v6, %v3403_v56  ;;  %v7615_v38 = vcombine.high %v3309_v46, %v3341_v10  ;;  %v3372_v58 = vld [vmem:[#allocation2 + $0x210] sm:$0xff]  ;;  %v7614_v51 = vcombine.low %v3309_v46, %v3341_v10  ;;  %s9015_s17 = smov [#allocation4]  }
 0x509   : > { %5242 = vmatprep.subr.bf16.mxu0 %v7673_v37  ;;  %v7737_v42 = vcombine.high %v3434_v18, %v3466_v59  ;;  %5301 = vmatprep.subr.bf16.mxu1 %v7675_v9  ;;  %v7739_v53 = vcombine.high %v3435_v7, %v3467_v55  ;;  %v3498_v48 = vld [vmem:[#allocation2 + $0x600] sm:$0xff]  ;;  %v3499_v28 = vld [vmem:[#allocation2 + $0x608] sm:$0xff]  ;;  %v7736_v62 = vcombine.low %v3434_v18, %v3466_v59  ;;  %v3404_v24 = vld [vmem:[#allocation2 + $0x310] sm:$0xff]  ;;  %p8918_p12 = pnand %p8917_p11, %p9109_p5  ;;  %s8920_s25 = sshll.u32 %s9015_s17, 4  ;;  %s8921_s25 = int_to_ptr.vmem [resolvable:$false] %s8920_s25 }
 0x50a   : > { %v3530_v25 = vld [vmem:[#allocation2 + $0x700] sm:$0xff]  ;;  %v3531_v41 = vld [vmem:[#allocation2 + $0x708] sm:$0xff]  ;;  %v7738_v13 = vcombine.low %v3435_v7, %v3467_v55  ;;  %v3373_v49 = vld [vmem:[#allocation2 + $0x218] sm:$0xff]  ;;  %v7677_v1 = vcombine.high %v3372_v58, %v3404_v24  ;;  %v7676_v16 = vcombine.low %v3372_v58, %v3404_v24  ;;  %v11469_v56 = vpack.c.bf16 %v3293_v57, %v3292_v27  ;;  %s8922_s12 = scalar_lea.vmem %s8921_s25, 32  ;;  %p8923_p0 = scmp.lt.s32.totalorder %s12073_s11, %s8921_s25 }
 0x50b   : > { %v7801_v35 = vcombine.high %v3498_v48, %v3530_v25  ;;  %v7803_v52 = vcombine.high %v3499_v28, %v3531_v41  ;;  %v3562_v43 = vld [vmem:[#allocation2 + $0x800] sm:$0x77]  ;;  %v3563_v33 = vld [vmem:[#allocation2 + $0x808] sm:$0x77]  ;;  %v7800_v4 = vcombine.low %v3498_v48, %v3530_v25  ;;  %v7802_v32 = vcombine.low %v3499_v28, %v3531_v41  ;;  %v3405_v12 = vld [vmem:[#allocation2 + $0x318] sm:$0xff]  ;;  %p8919_p13 = pneg %p8918_p12  ;;  %p8924_p1 = scmp.lt.s32.totalorder %s8922_s12, %s8916_s27 }
 0x50c   : > { %5243 = vmatpush1.bf16.msra.mxu0 %v7672_v17  ;;  %5302 = vmatpush1.bf16.msra.mxu1 %v7674_v5  ;;  %v7865_v39 = vcombine.high %v3562_v43, %v3562_v43  ;;  %v7864_v44 = vcombine.low %v3562_v43, %v3562_v43  ;;  %v7867_v20 = vcombine.high %v3563_v33, %v3563_v33  ;;  %v3436_v30 = vld [vmem:[#allocation2 + $0x410] sm:$0xff]  ;;  %v3437_v19 = vld [vmem:[#allocation2 + $0x418] sm:$0xff]  ;;  %v3407_v2 = vld [vmem:[#allocation2 + $0x328] sm:$0xff] }
 0x50d   : > { %5244 = vmatprep.subr.bf16.mxu0 %v7737_v42  ;;  %5303 = vmatprep.subr.bf16.mxu1 %v7739_v53  ;;  %v7866_v50 = vcombine.low %v3563_v33, %v3563_v33  ;;  %v3468_v22 = vld [vmem:[#allocation2 + $0x510] sm:$0xff]  ;;  %v7679_v29 = vcombine.high %v3373_v49, %v3405_v12  ;;  %v3469_v61 = vld [vmem:[#allocation2 + $0x518] sm:$0xff]  ;;  %v7678_v63 = vcombine.low %v3373_v49, %v3405_v12  ;;  %v3471_v45 = vld [vmem:[#allocation2 + $0x528] sm:$0xff]  ;;  %p8925_p2 = por %p8924_p1, %p8923_p0 }
 0x50e   : > { %v5049_v34 = vsel %vm5047_vm7, %v7864_v44, 0  ;;  %v7741_v37 = vcombine.high %v3436_v30, %v3468_v22  ;;  %v7743_v6 = vcombine.high %v3437_v19, %v3469_v61  ;;  %v3500_v18 = vld [vmem:[#allocation2 + $0x610] sm:$0xff]  ;;  %v7740_v59 = vcombine.low %v3436_v30, %v3468_v22  ;;  %v3501_v7 = vld [vmem:[#allocation2 + $0x618] sm:$0xff]  ;;  %v3503_v58 = vld [vmem:[#allocation2 + $0x628] sm:$0xff] }
 0x50f   : > { %v5055_v60 = vsel %vm5047_vm7, %v7866_v50, 0  ;;  %v3532_v9 = vld [vmem:[#allocation2 + $0x710] sm:$0xff]  ;;  %v3533_v55 = vld [vmem:[#allocation2 + $0x718] sm:$0xff]  ;;  %v7742_v17 = vcombine.low %v3437_v19, %v3469_v61  ;;  %v11481_v25 = vpack.c.bf16 %v3295_v15, %v3294_v11  ;;  %v11497_v15 = vpack.c.bf16 %v3297_v23, %v3296_v26  ;;  %v3374_v11 = vld [vmem:[#allocation2 + $0x220] sm:$0xff]  ;;  %p8926_p3 = pnand %p8925_p2, %p8919_p13 }
 0x510   : > { %5245 = vmatpush1.bf16.msra.mxu0 %v7736_v62  ;;  %5304 = vmatpush1.bf16.msra.mxu1 %v7738_v13  ;;  %v7805_v5 = vcombine.high %v3500_v18, %v3532_v9  ;;  %v3564_v42 = vld [vmem:[#allocation2 + $0x810] sm:$0x77]  ;;  %v7807_v47 = vcombine.high %v3501_v7, %v3533_v55  ;;  %v7804_v36 = vcombine.low %v3500_v18, %v3532_v9  ;;  %v3565_v57 = vld [vmem:[#allocation2 + $0x818] sm:$0x77]  ;;  %v3310_v62 = vld [vmem:[#allocation2 + $0x20] sm:$0xff] }
 0x511   : > { %5246 = vmatprep.subr.bf16.mxu0 %v7801_v35  ;;  %5305 = vmatprep.subr.bf16.mxu1 %v7803_v52  ;;  %v7869_v27 = vcombine.high %v3564_v42, %v3564_v42  ;;  %v7806_v53 = vcombine.low %v3501_v7, %v3533_v55  ;;  %v7868_v48 = vcombine.low %v3564_v42, %v3564_v42  ;;  %v3342_v13 = vld [vmem:[#allocation2 + $0x120] sm:$0xff]  ;;  %v3311_v35 = vld [vmem:[#allocation2 + $0x28] sm:$0xff]  ;;  %v3345_v18 = vld [vmem:[#allocation2 + $0x138] sm:$0xff] }
 0x512   : > { %v7871_v28 = vcombine.high %v3565_v57, %v3565_v57  ;;  %v7870_v41 = vcombine.low %v3565_v57, %v3565_v57  ;;  %v3343_v52 = vld [vmem:[#allocation2 + $0x128] sm:$0xff]  ;;  %v7617_v33 = vcombine.high %v3310_v62, %v3342_v13  ;;  %v3438_v26 = vld [vmem:[#allocation2 + $0x420] sm:$0xff] }
 0x513   : > { %v5061_v43 = vsel %vm5047_vm7, %v7868_v48, 0  ;;  %v7619_v31 = vcombine.high %v3311_v35, %v3343_v52  ;;  %v7618_v44 = vcombine.low %v3311_v35, %v3343_v52  ;;  %v3470_v23 = vld [vmem:[#allocation2 + $0x520] sm:$0xff]  ;;  %v3439_v50 = vld [vmem:[#allocation2 + $0x428] sm:$0xff]  ;;  %v3472_v48 = vld [vmem:[#allocation2 + $0x530] sm:$0xff] }
 0x514   : > { %5247 = vmatpush1.bf16.msra.mxu0 %v7800_v4  ;;  %5306 = vmatpush1.bf16.msra.mxu1 %v7802_v32  ;;  %v5067_v14 = vsel %vm5047_vm7, %v7870_v41, 0  ;;  %v3406_v4 = vld [vmem:[#allocation2 + $0x320] sm:$0xff]  ;;  %v7616_v32 = vcombine.low %v3310_v62, %v3342_v13  ;;  %v7745_v10 = vcombine.high %v3438_v26, %v3470_v23  ;;  %v3535_v24 = vld [vmem:[#allocation2 + $0x728] sm:$0xff]  ;;  %v3441_v41 = vld [vmem:[#allocation2 + $0x438] sm:$0xff] }
 0x515   : > { %7928 = vmatprep.subr.msk.bf16.mxu0 %vm5047_vm7, %v7865_v39  ;;  %7933 = vmatprep.subr.msk.bf16.mxu1 %vm5047_vm7, %v7867_v20  ;;  %v3375_v39 = vld [vmem:[#allocation2 + $0x228] sm:$0xff]  ;;  %v7681_v40 = vcombine.high %v3374_v11, %v3406_v4  ;;  %v7680_v21 = vcombine.low %v3374_v11, %v3406_v4  ;;  %v3566_v12 = vld [vmem:[#allocation2 + $0x820] sm:$0x77]  ;;  %v3473_v62 = vld [vmem:[#allocation2 + $0x538] sm:$0xff] }
 0x516   : > { %v7683_v20 = vcombine.high %v3375_v39, %v3407_v2  ;;  %v7682_v46 = vcombine.low %v3375_v39, %v3407_v2  ;;  %v3567_v30 = vld [vmem:[#allocation2 + $0x828] sm:$0x77]  ;;  %v7873_v22 = vcombine.high %v3566_v12, %v3566_v12  ;;  %v7872_v19 = vcombine.low %v3566_v12, %v3566_v12  ;;  %v3505_v11 = vld [vmem:[#allocation2 + $0x638] sm:$0xff]  ;;  %v3568_v2 = vld [vmem:[#allocation2 + $0x830] sm:$0x77] }
 0x517   : > { %v7875_v61 = vcombine.high %v3567_v30, %v3567_v30  ;;  %v3537_v4 = vld [vmem:[#allocation2 + $0x738] sm:$0xff] }
 0x518   : > { %5249 = vmatpush1.bf16.msra.mxu0 %v5049_v34  ;;  %5308 = vmatpush1.bf16.msra.mxu1 %v5055_v60  ;;  %v7747_v34 = vcombine.high %v3439_v50, %v3471_v45  ;;  %v3534_v60 = vld [vmem:[#allocation2 + $0x720] sm:$0xff]  ;;  %v5073_v9 = vsel %vm5047_vm7, %v7872_v19, 0 }
 0x519   : > { %5358 = vmatprep.subr.bf16.mxu0 %v7613_v8  ;;  %5417 = vmatprep.subr.bf16.mxu1 %v7615_v38  ;;  %v3502_v8 = vld [vmem:[#allocation2 + $0x620] sm:$0xff]  ;;  %v7744_v38 = vcombine.low %v3438_v26, %v3470_v23  ;;  %v3569_v26 = vld [vmem:[#allocation2 + $0x838] sm:$0x77]  ;;  %v7877_v23 = vcombine.high %v3568_v2, %v3568_v2 }
 0x51a   : > { %v7809_v49 = vcombine.high %v3502_v8, %v3534_v60  ;;  %v3474_v19 = vld [vmem:[#allocation2 + $0x540] sm:$0xff] }
 0x51b   : > { %7929 = vmatmul.mubr.msk.bf16.vlgmr.msra.gmra.mrb[68].mxu0 %vm5034_vm8, %v11457_v54  ;;  %7934 = vmatmul.mubr.msk.bf16.vlgmr.msra.gmra.mrb[64].mxu1 %vm5034_vm8, %v11457_v54 }
 0x51c   : > { %5359 = vmatpush1.bf16.msra.mxu0 %v7612_v3  ;;  %5418 = vmatpush1.bf16.msra.mxu1 %v7614_v51  ;;  %v7746_v3 = vcombine.low %v3439_v50, %v3471_v45  ;;  %v7811_v51 = vcombine.high %v3503_v58, %v3535_v24  ;;  %v7876_v50 = vcombine.low %v3568_v2, %v3568_v2 }
 0x51d   : > { %5280 = vmatprep.mubr.bf16.mxu0 %v12145_v0  ;;  %5360 = vmatprep.subr.bf16.mxu0 %v7677_v1  ;;  %v7808_v1 = vcombine.low %v3502_v8, %v3534_v60  ;;  %v7879_v45 = vcombine.high %v3569_v26, %v3569_v26  ;;  %v3347_v8 = vld [vmem:[#allocation2 + $0x148] sm:$0xff] }
 0x51e   : > { %5339 = vmatprep.mubr.bf16.mxu1 %v12145_v0  ;;  %5419 = vmatprep.subr.bf16.mxu1 %v7679_v29  ;;  %v7810_v29 = vcombine.low %v3503_v58, %v3535_v24  ;;  %v5085_v60 = vsel %vm5047_vm7, %v7876_v50, 0  ;;  %v3476_v50 = vld [vmem:[#allocation2 + $0x550] sm:$0xff] }
 0x520   : > { %5361 = vmatpush1.bf16.msra.mxu0 %v7676_v16  ;;  %5420 = vmatpush1.bf16.msra.mxu1 %v7678_v63  ;;  %v7874_v16 = vcombine.low %v3567_v30, %v3567_v30  ;;  %v3312_v63 = vld [vmem:[#allocation2 + $0x30] sm:$0xff] }
 0x521   : > { %5362 = vmatprep.subr.bf16.mxu0 %v7741_v37  ;;  %5421 = vmatprep.subr.bf16.mxu1 %v7743_v6  ;;  %v3344_v37 = vld [vmem:[#allocation2 + $0x130] sm:$0xff]  ;;  %v3313_v6 = vld [vmem:[#allocation2 + $0x38] sm:$0xff] }
 0x522   : > { %v5079_v7 = vsel %vm5047_vm7, %v7874_v16, 0  ;;  %v7623_v55 = vcombine.high %v3313_v6, %v3345_v18  ;;  %v7620_v42 = vcombine.low %v3312_v63, %v3344_v37  ;;  %v7622_v57 = vcombine.low %v3313_v6, %v3345_v18  ;;  %v3443_v16 = vld [vmem:[#allocation2 + $0x448] sm:$0xff] }
 0x523   : > { %7930 = vmatmul.mubr.msk.bf16.gmra.mrb[72].mxu0 %vm5034_vm8, %v11469_v56  ;;  %7935 = vmatmul.mubr.msk.bf16.gmra.mrb[68].mxu1 %vm5034_vm8, %v11469_v56 }
 0x524   : > { %5363 = vmatpush1.bf16.msra.mxu0 %v7740_v59  ;;  %5286 = vmatprep.mubr.bf16.mxu0 %v12145_v0  ;;  %v7621_v59 = vcombine.high %v3312_v63, %v3344_v37  ;;  %v3475_v63 = vld [vmem:[#allocation2 + $0x548] sm:$0xff] }
 0x525   : > { %5345 = vmatprep.mubr.bf16.mxu1 %v12145_v0  ;;  %5422 = vmatpush1.bf16.msra.mxu1 %v7742_v17  ;;  %v3376_v17 = vld [vmem:[#allocation2 + $0x230] sm:$0xff] }
 0x526   : > { %5364 = vmatprep.subr.bf16.mxu0 %v7805_v5  ;;  %5423 = vmatprep.subr.bf16.mxu1 %v7807_v47  ;;  %v3408_v5 = vld [vmem:[#allocation2 + $0x330] sm:$0xff]  ;;  %v3377_v47 = vld [vmem:[#allocation2 + $0x238] sm:$0xff] }
 0x527   : > { %v7684_v13 = vcombine.low %v3376_v17, %v3408_v5 }
 0x528   : > { %5365 = vmatpush1.bf16.msra.mxu0 %v7804_v36  ;;  %v3409_v36 = vld [vmem:[#allocation2 + $0x338] sm:$0xff] }
 0x529   : > { %7938 = vmatprep.subr.msk.bf16.mxu0 %vm5047_vm7, %v7869_v27  ;;  %5424 = vmatpush1.bf16.msra.mxu1 %v7806_v53  ;;  %v7685_v27 = vcombine.high %v3376_v17, %v3408_v5  ;;  %v3440_v53 = vld [vmem:[#allocation2 + $0x430] sm:$0xff]  ;;  %v7686_v35 = vcombine.low %v3377_v47, %v3409_v36  ;;  %v3507_v17 = vld [vmem:[#allocation2 + $0x648] sm:$0xff] }
 0x52a   : > { %7943 = vmatprep.subr.msk.bf16.mxu1 %vm5047_vm7, %v7871_v28  ;;  %v7687_v28 = vcombine.high %v3377_v47, %v3409_v36  ;;  %v7749_v52 = vcombine.high %v3440_v53, %v3472_v48  ;;  %v3539_v5 = vld [vmem:[#allocation2 + $0x748] sm:$0xff]  ;;  %v3570_v36 = vld [vmem:[#allocation2 + $0x840] sm:$0x77] }
 0x52b   : > { %7931 = vmatmul.mubr.msk.bf16.gmra.mrb[76].mxu0 %vm5034_vm8, %v11481_v25  ;;  %7936 = vmatmul.mubr.msk.bf16.gmra.mrb[72].mxu1 %vm5034_vm8, %v11481_v25 }
 0x52c   : > { %5292 = vmatprep.mubr.bf16.mxu0 %v12145_v0  ;;  %5351 = vmatprep.mubr.bf16.mxu1 %v12145_v0 }
 0x52d   : > { %5367 = vmatpush1.bf16.msra.mxu0 %v5061_v43  ;;  %5426 = vmatpush1.bf16.msra.mxu1 %v5067_v14  ;;  %v7751_v43 = vcombine.high %v3441_v41, %v3473_v62  ;;  %v3536_v14 = vld [vmem:[#allocation2 + $0x730] sm:$0xff] }
 0x52e   : > { %5476 = vmatprep.subr.bf16.mxu0 %v7617_v33  ;;  %5535 = vmatprep.subr.bf16.mxu1 %v7619_v31  ;;  %v3504_v33 = vld [vmem:[#allocation2 + $0x630] sm:$0xff]  ;;  %v7748_v31 = vcombine.low %v3440_v53, %v3472_v48  ;;  %v3571_v53 = vld [vmem:[#allocation2 + $0x848] sm:$0x77]  ;;  %v7881_v48 = vcombine.high %v3570_v36, %v3570_v36 }
 0x52f   : > { %v7813_v39 = vcombine.high %v3504_v33, %v3536_v14 }
 0x533   : > { %7932 = vmatmul.mubr.msk.bf16.gmra.mrb[80].mxu0 %vm5034_vm8, %v11497_v15  ;;  %7937 = vmatmul.mubr.msk.bf16.gmra.mrb[76].mxu1 %vm5034_vm8, %v11497_v15 }
 0x534   : > { %5390 = vmatprep.mubr.bf16.mxu0 %v12145_v0  ;;  %5449 = vmatprep.mubr.bf16.mxu1 %v12145_v0 }
 0x53b   : > { %7939 = vmatmul.mubr.msk.bf16.vlgmr.msra.gmra.mrb[84].mxu0 %vm5034_vm8, %v11457_v54  ;;  %7944 = vmatmul.mubr.msk.bf16.vlgmr.msra.gmra.mrb[80].mxu1 %vm5034_vm8, %v11457_v54 }
 0x53c   : > { %5477 = vmatpush1.bf16.msra.mxu0 %v7616_v32  ;;  %5536 = vmatpush1.bf16.msra.mxu1 %v7618_v44  ;;  %v7750_v32 = vcombine.low %v3441_v41, %v3473_v62  ;;  %v7815_v44 = vcombine.high %v3505_v11, %v3537_v4  ;;  %v7880_v41 = vcombine.low %v3570_v36, %v3570_v36 }
 0x53d   : > { %5398 = vmatprep.mubr.bf16.mxu0 %v12145_v0  ;;  %5478 = vmatprep.subr.bf16.mxu0 %v7681_v40  ;;  %v7812_v40 = vcombine.low %v3504_v33, %v3536_v14  ;;  %v7883_v62 = vcombine.high %v3571_v53, %v3571_v53  ;;  %v3349_v33 = vld [vmem:[#allocation2 + $0x158] sm:$0xff] }
 0x53e   : > { %5457 = vmatprep.mubr.bf16.mxu1 %v12145_v0  ;;  %5537 = vmatprep.subr.bf16.mxu1 %v7683_v20  ;;  %v7814_v20 = vcombine.low %v3505_v11, %v3537_v4  ;;  %v5097_v14 = vsel %vm5047_vm7, %v7880_v41, 0  ;;  %v3478_v41 = vld [vmem:[#allocation2 + $0x560] sm:$0xff] }
 0x540   : > { %5479 = vmatpush1.bf16.msra.mxu0 %v7680_v21  ;;  %5538 = vmatpush1.bf16.msra.mxu1 %v7682_v46  ;;  %v7878_v21 = vcombine.low %v3569_v26, %v3569_v26  ;;  %v3314_v46 = vld [vmem:[#allocation2 + $0x40] sm:$0xff] }
 0x541   : > { %5480 = vmatprep.subr.bf16.mxu0 %v7745_v10  ;;  %5539 = vmatprep.subr.bf16.mxu1 %v7747_v34  ;;  %v3346_v10 = vld [vmem:[#allocation2 + $0x140] sm:$0xff]  ;;  %v3315_v34 = vld [vmem:[#allocation2 + $0x48] sm:$0xff] }
 0x542   : > { %v5091_v58 = vsel %vm5047_vm7, %v7878_v21, 0  ;;  %v7627_v24 = vcombine.high %v3315_v34, %v3347_v8  ;;  %v7624_v12 = vcombine.low %v3314_v46, %v3346_v10  ;;  %v7626_v30 = vcombine.low %v3315_v34, %v3347_v8  ;;  %v3445_v21 = vld [vmem:[#allocation2 + $0x458] sm:$0xff] }
 0x543   : > { %7940 = vmatmul.mubr.msk.bf16.gmra.mrb[88].mxu0 %vm5034_vm8, %v11469_v56  ;;  %7945 = vmatmul.mubr.msk.bf16.gmra.mrb[84].mxu1 %vm5034_vm8, %v11469_v56 }
 0x544   : > { %5481 = vmatpush1.bf16.msra.mxu0 %v7744_v38  ;;  %5404 = vmatprep.mubr.bf16.mxu0 %v12145_v0  ;;  %v7625_v38 = vcombine.high %v3314_v46, %v3346_v10  ;;  %v3477_v46 = vld [vmem:[#allocation2 + $0x558] sm:$0xff] }
 0x545   : > { %5463 = vmatprep.mubr.bf16.mxu1 %v12145_v0  ;;  %5540 = vmatpush1.bf16.msra.mxu1 %v7746_v3  ;;  %v3378_v3 = vld [vmem:[#allocation2 + $0x240] sm:$0xff] }
 0x546   : > { %5482 = vmatprep.subr.bf16.mxu0 %v7809_v49  ;;  %5541 = vmatprep.subr.bf16.mxu1 %v7811_v51  ;;  %v3410_v49 = vld [vmem:[#allocation2 + $0x340] sm:$0xff]  ;;  %v3379_v51 = vld [vmem:[#allocation2 + $0x248] sm:$0xff] }
 0x547   : > { %v7688_v37 = vcombine.low %v3378_v3, %v3410_v49 }
 0x548   : > { %5483 = vmatpush1.bf16.msra.mxu0 %v7808_v1  ;;  %v3411_v1 = vld [vmem:[#allocation2 + $0x348] sm:$0xff] }
 0x549   : > { %7948 = vmatprep.subr.msk.bf16.mxu0 %vm5047_vm7, %v7873_v22  ;;  %5542 = vmatpush1.bf16.msra.mxu1 %v7810_v29  ;;  %v7689_v22 = vcombine.high %v3378_v3, %v3410_v49  ;;  %v3442_v29 = vld [vmem:[#allocation2 + $0x440] sm:$0xff]  ;;  %v7690_v6 = vcombine.low %v3379_v51, %v3411_v1  ;;  %v3509_v3 = vld [vmem:[#allocation2 + $0x658] sm:$0xff] }
 0x54a   : > { %7953 = vmatprep.subr.msk.bf16.mxu1 %vm5047_vm7, %v7875_v61  ;;  %v7691_v61 = vcombine.high %v3379_v51, %v3411_v1  ;;  %v7753_v18 = vcombine.high %v3442_v29, %v3474_v19  ;;  %v3541_v49 = vld [vmem:[#allocation2 + $0x758] sm:$0xff]  ;;  %v3572_v1 = vld [vmem:[#allocation2 + $0x850] sm:$0x77] }
 0x54b   : > { %7941 = vmatmul.mubr.msk.bf16.gmra.mrb[92].mxu0 %vm5034_vm8, %v11481_v25  ;;  %7946 = vmatmul.mubr.msk.bf16.gmra.mrb[88].mxu1 %vm5034_vm8, %v11481_v25 }
 0x54c   : > { %5410 = vmatprep.mubr.bf16.mxu0 %v12145_v0  ;;  %5469 = vmatprep.mubr.bf16.mxu1 %v12145_v0 }
 0x54d   : > { %5485 = vmatpush1.bf16.msra.mxu0 %v5073_v9  ;;  %5544 = vmatpush1.bf16.msra.mxu1 %v5079_v7  ;;  %v7755_v9 = vcombine.high %v3443_v16, %v3475_v63  ;;  %v3538_v7 = vld [vmem:[#allocation2 + $0x740] sm:$0xff] }
 0x54e   : > { %5594 = vmatprep.subr.bf16.mxu0 %v7621_v59  ;;  %5653 = vmatprep.subr.bf16.mxu1 %v7623_v55  ;;  %v3506_v59 = vld [vmem:[#allocation2 + $0x640] sm:$0xff]  ;;  %v7752_v55 = vcombine.low %v3442_v29, %v3474_v19  ;;  %v3573_v29 = vld [vmem:[#allocation2 + $0x858] sm:$0x77]  ;;  %v7885_v19 = vcombine.high %v3572_v1, %v3572_v1 }
 0x54f   : > { %v7817_v47 = vcombine.high %v3506_v59, %v3538_v7 }
 0x553   : > { %7942 = vmatmul.mubr.msk.bf16.gmra.mrb[96].mxu0 %vm5034_vm8, %v11497_v15  ;;  %7947 = vmatmul.mubr.msk.bf16.gmra.mrb[92].mxu1 %vm5034_vm8, %v11497_v15 }
 0x554   : > { %5508 = vmatprep.mubr.bf16.mxu0 %v12145_v0  ;;  %5567 = vmatprep.mubr.bf16.mxu1 %v12145_v0 }
 0x55b   : > { %7949 = vmatmul.mubr.msk.bf16.vlgmr.msra.gmra.mrb[100].mxu0 %vm5034_vm8, %v11457_v54  ;;  %7954 = vmatmul.mubr.msk.bf16.vlgmr.msra.gmra.mrb[96].mxu1 %vm5034_vm8, %v11457_v54 }
 0x55c   : > { %5595 = vmatpush1.bf16.msra.mxu0 %v7620_v42  ;;  %5654 = vmatpush1.bf16.msra.mxu1 %v7622_v57  ;;  %v7754_v42 = vcombine.low %v3443_v16, %v3475_v63  ;;  %v7819_v57 = vcombine.high %v3507_v17, %v3539_v5  ;;  %v7884_v16 = vcombine.low %v3572_v1, %v3572_v1 }
 0x55d   : > { %5516 = vmatprep.mubr.bf16.mxu0 %v12145_v0  ;;  %5596 = vmatprep.subr.bf16.mxu0 %v7685_v27  ;;  %v7816_v27 = vcombine.low %v3506_v59, %v3538_v7  ;;  %v7887_v63 = vcombine.high %v3573_v29, %v3573_v29  ;;  %v3351_v59 = vld [vmem:[#allocation2 + $0x168] sm:$0xff] }
 0x55e   : > { %5575 = vmatprep.mubr.bf16.mxu1 %v12145_v0  ;;  %5655 = vmatprep.subr.bf16.mxu1 %v7687_v28  ;;  %v7818_v28 = vcombine.low %v3507_v17, %v3539_v5  ;;  %v5109_v7 = vsel %vm5047_vm7, %v7884_v16, 0  ;;  %v3480_v16 = vld [vmem:[#allocation2 + $0x570] sm:$0xff] }
 0x560   : > { %5597 = vmatpush1.bf16.msra.mxu0 %v7684_v13  ;;  %5656 = vmatpush1.bf16.msra.mxu1 %v7686_v35  ;;  %v7882_v13 = vcombine.low %v3571_v53, %v3571_v53  ;;  %v3316_v35 = vld [vmem:[#allocation2 + $0x50] sm:$0xff] }
 0x561   : > { %5598 = vmatprep.subr.bf16.mxu0 %v7749_v52  ;;  %5657 = vmatprep.subr.bf16.mxu1 %v7751_v43  ;;  %v3348_v52 = vld [vmem:[#allocation2 + $0x150] sm:$0xff]  ;;  %v3317_v43 = vld [vmem:[#allocation2 + $0x58] sm:$0xff] }
 0x562   : > { %v5103_v11 = vsel %vm5047_vm7, %v7882_v13, 0  ;;  %v7631_v4 = vcombine.high %v3317_v43, %v3349_v33  ;;  %v7628_v2 = vcombine.low %v3316_v35, %v3348_v52  ;;  %v7630_v26 = vcombine.low %v3317_v43, %v3349_v33  ;;  %v3447_v13 = vld [vmem:[#allocation2 + $0x468] sm:$0xff] }
 0x563   : > { %7950 = vmatmul.mubr.msk.bf16.gmra.mrb[104].mxu0 %vm5034_vm8, %v11469_v56  ;;  %7955 = vmatmul.mubr.msk.bf16.gmra.mrb[100].mxu1 %vm5034_vm8, %v11469_v56 }
 0x564   : > { %5599 = vmatpush1.bf16.msra.mxu0 %v7748_v31  ;;  %5522 = vmatprep.mubr.bf16.mxu0 %v12145_v0  ;;  %v7629_v31 = vcombine.high %v3316_v35, %v3348_v52  ;;  %v3479_v35 = vld [vmem:[#allocation2 + $0x568] sm:$0xff] }
 0x565   : > { %5581 = vmatprep.mubr.bf16.mxu1 %v12145_v0  ;;  %5658 = vmatpush1.bf16.msra.mxu1 %v7750_v32  ;;  %v3380_v32 = vld [vmem:[#allocation2 + $0x250] sm:$0xff] }
 0x566   : > { %5600 = vmatprep.subr.bf16.mxu0 %v7813_v39  ;;  %5659 = vmatprep.subr.bf16.mxu1 %v7815_v44  ;;  %v3412_v39 = vld [vmem:[#allocation2 + $0x350] sm:$0xff]  ;;  %v3381_v44 = vld [vmem:[#allocation2 + $0x258] sm:$0xff] }
 0x567   : > { %v7692_v10 = vcombine.low %v3380_v32, %v3412_v39 }
 0x568   : > { %5601 = vmatpush1.bf16.msra.mxu0 %v7812_v40  ;;  %v3413_v40 = vld [vmem:[#allocation2 + $0x358] sm:$0xff] }
 0x569   : > { %7958 = vmatprep.subr.msk.bf16.mxu0 %vm5047_vm7, %v7877_v23  ;;  %5660 = vmatpush1.bf16.msra.mxu1 %v7814_v20  ;;  %v7693_v23 = vcombine.high %v3380_v32, %v3412_v39  ;;  %v3444_v20 = vld [vmem:[#allocation2 + $0x450] sm:$0xff]  ;;  %v7694_v34 = vcombine.low %v3381_v44, %v3413_v40  ;;  %v3511_v32 = vld [vmem:[#allocation2 + $0x668] sm:$0xff] }
 0x56a   : > { %7963 = vmatprep.subr.msk.bf16.mxu1 %vm5047_vm7, %v7879_v45  ;;  %v7695_v45 = vcombine.high %v3381_v44, %v3413_v40  ;;  %v7757_v8 = vcombine.high %v3444_v20, %v3476_v50  ;;  %v3543_v39 = vld [vmem:[#allocation2 + $0x768] sm:$0xff]  ;;  %v3574_v40 = vld [vmem:[#allocation2 + $0x860] sm:$0x77] }
 0x56b   : > { %7951 = vmatmul.mubr.msk.bf16.gmra.mrb[108].mxu0 %vm5034_vm8, %v11481_v25  ;;  %7956 = vmatmul.mubr.msk.bf16.gmra.mrb[104].mxu1 %vm5034_vm8, %v11481_v25 }
 0x56c   : > { %5528 = vmatprep.mubr.bf16.mxu0 %v12145_v0  ;;  %5587 = vmatprep.mubr.bf16.mxu1 %v12145_v0 }
 0x56d   : > { %5603 = vmatpush1.bf16.msra.mxu0 %v5085_v60  ;;  %5662 = vmatpush1.bf16.msra.mxu1 %v5091_v58  ;;  %v7759_v60 = vcombine.high %v3445_v21, %v3477_v46  ;;  %v3540_v58 = vld [vmem:[#allocation2 + $0x750] sm:$0xff] }
 0x56e   : > { %5712 = vmatprep.subr.bf16.mxu0 %v7625_v38  ;;  %5771 = vmatprep.subr.bf16.mxu1 %v7627_v24  ;;  %v3508_v38 = vld [vmem:[#allocation2 + $0x650] sm:$0xff]  ;;  %v7756_v24 = vcombine.low %v3444_v20, %v3476_v50  ;;  %v3575_v20 = vld [vmem:[#allocation2 + $0x868] sm:$0x77]  ;;  %v7889_v50 = vcombine.high %v3574_v40, %v3574_v40 }
 0x56f   : > { %v7821_v51 = vcombine.high %v3508_v38, %v3540_v58 }
 0x573   : > { %7952 = vmatmul.mubr.msk.bf16.gmra.mrb[112].mxu0 %vm5034_vm8, %v11497_v15  ;;  %7957 = vmatmul.mubr.msk.bf16.gmra.mrb[108].mxu1 %vm5034_vm8, %v11497_v15 }
 0x574   : > { %5626 = vmatprep.mubr.bf16.mxu0 %v12145_v0  ;;  %5685 = vmatprep.mubr.bf16.mxu1 %v12145_v0 }
 0x57b   : > { %7959 = vmatmul.mubr.msk.bf16.vlgmr.msra.gmra.mrb[116].mxu0 %vm5034_vm8, %v11457_v54  ;;  %7964 = vmatmul.mubr.msk.bf16.vlgmr.msra.gmra.mrb[112].mxu1 %vm5034_vm8, %v11457_v54 }
 0x57c   : > { %5713 = vmatpush1.bf16.msra.mxu0 %v7624_v12  ;;  %5772 = vmatpush1.bf16.msra.mxu1 %v7626_v30  ;;  %v7758_v12 = vcombine.low %v3445_v21, %v3477_v46  ;;  %v7823_v30 = vcombine.high %v3509_v3, %v3541_v49  ;;  %v7888_v21 = vcombine.low %v3574_v40, %v3574_v40 }
 0x57d   : > { %5634 = vmatprep.mubr.bf16.mxu0 %v12145_v0  ;;  %5714 = vmatprep.subr.bf16.mxu0 %v7689_v22  ;;  %v7820_v22 = vcombine.low %v3508_v38, %v3540_v58  ;;  %v7891_v46 = vcombine.high %v3575_v20, %v3575_v20  ;;  %v3353_v38 = vld [vmem:[#allocation2 + $0x178] sm:$0xff] }
 0x57e   : > { %5693 = vmatprep.mubr.bf16.mxu1 %v12145_v0  ;;  %5773 = vmatprep.subr.bf16.mxu1 %v7691_v61  ;;  %v7822_v61 = vcombine.low %v3509_v3, %v3541_v49  ;;  %v5121_v58 = vsel %vm5047_vm7, %v7888_v21, 0 }
 0x580   : > { %5715 = vmatpush1.bf16.msra.mxu0 %v7688_v37  ;;  %5774 = vmatpush1.bf16.msra.mxu1 %v7690_v6  ;;  %v7886_v37 = vcombine.low %v3573_v29, %v3573_v29  ;;  %v3318_v6 = vld [vmem:[#allocation2 + $0x60] sm:$0xff] }
 0x581   : > { %5716 = vmatprep.subr.bf16.mxu0 %v7753_v18  ;;  %5775 = vmatprep.subr.bf16.mxu1 %v7755_v9  ;;  %v3350_v18 = vld [vmem:[#allocation2 + $0x160] sm:$0xff]  ;;  %v3319_v9 = vld [vmem:[#allocation2 + $0x68] sm:$0xff] }
 0x582   : > { %v5115_v17 = vsel %vm5047_vm7, %v7886_v37, 0  ;;  %v7635_v5 = vcombine.high %v3319_v9, %v3351_v59  ;;  %v7632_v36 = vcombine.low %v3318_v6, %v3350_v18  ;;  %v7634_v53 = vcombine.low %v3319_v9, %v3351_v59  ;;  %v3449_v37 = vld [vmem:[#allocation2 + $0x478] sm:$0xff] }
 0x583   : > { %7960 = vmatmul.mubr.msk.bf16.gmra.mrb[120].mxu0 %vm5034_vm8, %v11469_v56  ;;  %7965 = vmatmul.mubr.msk.bf16.gmra.mrb[116].mxu1 %vm5034_vm8, %v11469_v56 }
 0x584   : > { %5717 = vmatpush1.bf16.msra.mxu0 %v7752_v55  ;;  %5640 = vmatprep.mubr.bf16.mxu0 %v12145_v0  ;;  %v7633_v55 = vcombine.high %v3318_v6, %v3350_v18  ;;  %v3481_v6 = vld [vmem:[#allocation2 + $0x578] sm:$0xff] }
 0x585   : > { %5699 = vmatprep.mubr.bf16.mxu1 %v12145_v0  ;;  %5776 = vmatpush1.bf16.msra.mxu1 %v7754_v42  ;;  %v3382_v42 = vld [vmem:[#allocation2 + $0x260] sm:$0xff] }
 0x586   : > { %5718 = vmatprep.subr.bf16.mxu0 %v7817_v47  ;;  %5777 = vmatprep.subr.bf16.mxu1 %v7819_v57  ;;  %v3414_v47 = vld [vmem:[#allocation2 + $0x360] sm:$0xff]  ;;  %v3383_v57 = vld [vmem:[#allocation2 + $0x268] sm:$0xff] }
 0x587   : > { %v7696_v52 = vcombine.low %v3382_v42, %v3414_v47 }
 0x588   : > { %5719 = vmatpush1.bf16.msra.mxu0 %v7816_v27  ;;  %v3415_v27 = vld [vmem:[#allocation2 + $0x368] sm:$0xff] }
 0x589   : > { %7968 = vmatprep.subr.msk.bf16.mxu0 %vm5047_vm7, %v7881_v48  ;;  %5778 = vmatpush1.bf16.msra.mxu1 %v7818_v28  ;;  %v7697_v48 = vcombine.high %v3382_v42, %v3414_v47  ;;  %v3446_v28 = vld [vmem:[#allocation2 + $0x460] sm:$0xff]  ;;  %v7698_v43 = vcombine.low %v3383_v57, %v3415_v27  ;;  %v3513_v42 = vld [vmem:[#allocation2 + $0x678] sm:$0xff] }
 0x58a   : > { %7973 = vmatprep.subr.msk.bf16.mxu1 %vm5047_vm7, %v7883_v62  ;;  %v7699_v62 = vcombine.high %v3383_v57, %v3415_v27  ;;  %v7761_v33 = vcombine.high %v3446_v28, %v3478_v41  ;;  %v3545_v47 = vld [vmem:[#allocation2 + $0x778] sm:$0xff]  ;;  %v3576_v27 = vld [vmem:[#allocation2 + $0x870] sm:$0x77] }
 0x58b   : > { %7961 = vmatmul.mubr.msk.bf16.gmra.mrb[124].mxu0 %vm5034_vm8, %v11481_v25  ;;  %7966 = vmatmul.mubr.msk.bf16.gmra.mrb[120].mxu1 %vm5034_vm8, %v11481_v25 }
 0x58c   : > { %5646 = vmatprep.mubr.bf16.mxu0 %v12145_v0  ;;  %5705 = vmatprep.mubr.bf16.mxu1 %v12145_v0 }
 0x58d   : > { %5721 = vmatpush1.bf16.msra.mxu0 %v5097_v14  ;;  %5780 = vmatpush1.bf16.msra.mxu1 %v5103_v11  ;;  %v7763_v14 = vcombine.high %v3447_v13, %v3479_v35  ;;  %v3542_v11 = vld [vmem:[#allocation2 + $0x760] sm:$0xff] }
 0x58e   : > { %5830 = vmatprep.subr.bf16.mxu0 %v7629_v31  ;;  %5889 = vmatprep.subr.bf16.mxu1 %v7631_v4  ;;  %v3510_v31 = vld [vmem:[#allocation2 + $0x660] sm:$0xff]  ;;  %v7760_v4 = vcombine.low %v3446_v28, %v3478_v41  ;;  %v3577_v28 = vld [vmem:[#allocation2 + $0x878] sm:$0x77]  ;;  %v7893_v41 = vcombine.high %v3576_v27, %v3576_v27 }
 0x58f   : > { %v7825_v44 = vcombine.high %v3510_v31, %v3542_v11 }
 0x593   : > { %7962 = vmatmul.mubr.msk.bf16.gmra.mrb[128].mxu0 %vm5034_vm8, %v11497_v15  ;;  %7967 = vmatmul.mubr.msk.bf16.gmra.mrb[124].mxu1 %vm5034_vm8, %v11497_v15 }
 0x594   : > { %5744 = vmatprep.mubr.bf16.mxu0 %v12145_v0  ;;  %5803 = vmatprep.mubr.bf16.mxu1 %v12145_v0 }
 0x59b   : > { %7969 = vmatmul.mubr.msk.bf16.vlgmr.msra.gmra.mrb[132].mxu0 %vm5034_vm8, %v11457_v54  ;;  %7974 = vmatmul.mubr.msk.bf16.vlgmr.msra.gmra.mrb[128].mxu1 %vm5034_vm8, %v11457_v54 }
 0x59c   : > { %5831 = vmatpush1.bf16.msra.mxu0 %v7628_v2  ;;  %5890 = vmatpush1.bf16.msra.mxu1 %v7630_v26  ;;  %v7762_v2 = vcombine.low %v3447_v13, %v3479_v35  ;;  %v7827_v26 = vcombine.high %v3511_v32, %v3543_v39  ;;  %v7892_v13 = vcombine.low %v3576_v27, %v3576_v27  ;;  %v3546_v27 = vld [vmem:[#allocation2 + $0x780] sm:$0xff] }
 0x59d   : > { %5750 = vmatprep.mubr.bf16.mxu0 %v12145_v0  ;;  %5832 = vmatprep.subr.bf16.mxu0 %v7693_v23  ;;  %v7824_v23 = vcombine.low %v3510_v31, %v3542_v11  ;;  %v7895_v35 = vcombine.high %v3577_v28, %v3577_v28  ;;  %v3355_v31 = vld [vmem:[#allocation2 + $0x188] sm:$0xff] }
 0x59e   : > { %5809 = vmatprep.mubr.bf16.mxu1 %v12145_v0  ;;  %5891 = vmatprep.subr.bf16.mxu1 %v7695_v45  ;;  %v7826_v45 = vcombine.low %v3511_v32, %v3543_v39  ;;  %v5133_v11 = vsel %vm5047_vm7, %v7892_v13, 0 }
 0x5a0   : > { %5833 = vmatpush1.bf16.msra.mxu0 %v7692_v10  ;;  %5892 = vmatpush1.bf16.msra.mxu1 %v7694_v34  ;;  %v7890_v10 = vcombine.low %v3575_v20, %v3575_v20  ;;  %v3320_v34 = vld [vmem:[#allocation2 + $0x70] sm:$0xff] }
 0x5a1   : > { %5834 = vmatprep.subr.bf16.mxu0 %v7757_v8  ;;  %5893 = vmatprep.subr.bf16.mxu1 %v7759_v60  ;;  %v3352_v8 = vld [vmem:[#allocation2 + $0x170] sm:$0xff]  ;;  %v3321_v60 = vld [vmem:[#allocation2 + $0x78] sm:$0xff] }
 0x5a2   : > { %v5127_v3 = vsel %vm5047_vm7, %v7890_v10, 0  ;;  %v7639_v49 = vcombine.high %v3321_v60, %v3353_v38  ;;  %v7636_v1 = vcombine.low %v3320_v34, %v3352_v8  ;;  %v7638_v29 = vcombine.low %v3321_v60, %v3353_v38 }
 0x5a3   : > { %7970 = vmatmul.mubr.msk.bf16.gmra.mrb[136].mxu0 %vm5034_vm8, %v11469_v56  ;;  %7975 = vmatmul.mubr.msk.bf16.gmra.mrb[132].mxu1 %vm5034_vm8, %v11469_v56 }
 0x5a4   : > { %5835 = vmatpush1.bf16.msra.mxu0 %v7756_v24  ;;  %5758 = vmatprep.mubr.bf16.mxu0 %v12145_v0  ;;  %v7637_v24 = vcombine.high %v3320_v34, %v3352_v8 }
 0x5a5   : > { %5817 = vmatprep.mubr.bf16.mxu1 %v12145_v0  ;;  %5894 = vmatpush1.bf16.msra.mxu1 %v7758_v12  ;;  %v3384_v12 = vld [vmem:[#allocation2 + $0x270] sm:$0xff] }
 0x5a6   : > { %5836 = vmatprep.subr.bf16.mxu0 %v7821_v51  ;;  %5895 = vmatprep.subr.bf16.mxu1 %v7823_v30  ;;  %v3416_v51 = vld [vmem:[#allocation2 + $0x370] sm:$0xff]  ;;  %v3385_v30 = vld [vmem:[#allocation2 + $0x278] sm:$0xff] }
 0x5a7   : > { %v7700_v18 = vcombine.low %v3384_v12, %v3416_v51 }
 0x5a8   : > { %5837 = vmatpush1.bf16.msra.mxu0 %v7820_v22  ;;  %v3417_v22 = vld [vmem:[#allocation2 + $0x378] sm:$0xff] }
 0x5a9   : > { %7978 = vmatprep.subr.msk.bf16.mxu0 %vm5047_vm7, %v7885_v19  ;;  %5896 = vmatpush1.bf16.msra.mxu1 %v7822_v61  ;;  %v7701_v19 = vcombine.high %v3384_v12, %v3416_v51  ;;  %v3448_v61 = vld [vmem:[#allocation2 + $0x470] sm:$0xff]  ;;  %v7702_v9 = vcombine.low %v3385_v30, %v3417_v22 }
 0x5aa   : > { %7983 = vmatprep.subr.msk.bf16.mxu1 %vm5047_vm7, %v7887_v63  ;;  %v7703_v63 = vcombine.high %v3385_v30, %v3417_v22  ;;  %v7765_v59 = vcombine.high %v3448_v61, %v3480_v16  ;;  %v3387_v30 = vld [vmem:[#allocation2 + $0x288] sm:$0xff] }
 0x5ab   : > { %7971 = vmatmul.mubr.msk.bf16.gmra.mrb[140].mxu0 %vm5034_vm8, %v11481_v25  ;;  %7976 = vmatmul.mubr.msk.bf16.gmra.mrb[136].mxu1 %vm5034_vm8, %v11481_v25  ;;  %v3419_v22 = vld [vmem:[#allocation2 + $0x388] sm:$0xff] }
 0x5ac   : > { %5764 = vmatprep.mubr.bf16.mxu0 %v12145_v0  ;;  %5823 = vmatprep.mubr.bf16.mxu1 %v12145_v0 }
 0x5ad   : > { %5839 = vmatpush1.bf16.msra.mxu0 %v5109_v7  ;;  %5898 = vmatpush1.bf16.msra.mxu1 %v5115_v17  ;;  %v7767_v7 = vcombine.high %v3449_v37, %v3481_v6  ;;  %v3544_v17 = vld [vmem:[#allocation2 + $0x770] sm:$0xff] }
 0x5ae   : > { %5948 = vmatprep.subr.bf16.mxu0 %v7633_v55  ;;  %6007 = vmatprep.subr.bf16.mxu1 %v7635_v5  ;;  %v3512_v55 = vld [vmem:[#allocation2 + $0x670] sm:$0xff]  ;;  %v7764_v5 = vcombine.low %v3448_v61, %v3480_v16 }
 0x5af   : > { %v7829_v57 = vcombine.high %v3512_v55, %v3544_v17 }
 0x5b3   : > { %7972 = vmatmul.mubr.msk.bf16.gmra.mrb[144].mxu0 %vm5034_vm8, %v11497_v15  ;;  %7977 = vmatmul.mubr.msk.bf16.gmra.mrb[140].mxu1 %vm5034_vm8, %v11497_v15 }
 0x5b4   : > { %5862 = vmatprep.mubr.bf16.mxu0 %v12145_v0  ;;  %5921 = vmatprep.mubr.bf16.mxu1 %v12145_v0 }
 0x5bb   : > { %7979 = vmatmul.mubr.msk.bf16.vlgmr.msra.gmra.mrb[148].mxu0 %vm5034_vm8, %v11457_v54  ;;  %7984 = vmatmul.mubr.msk.bf16.vlgmr.msra.gmra.mrb[144].mxu1 %vm5034_vm8, %v11457_v54 }
 0x5bc   : > { %5949 = vmatpush1.bf16.msra.mxu0 %v7632_v36  ;;  %6008 = vmatpush1.bf16.msra.mxu1 %v7634_v53  ;;  %v7766_v36 = vcombine.low %v3449_v37, %v3481_v6  ;;  %v7831_v53 = vcombine.high %v3513_v42, %v3545_v47  ;;  %v3450_v37 = vld [vmem:[#allocation2 + $0x480] sm:$0xff] }
 0x5bd   : > { %5868 = vmatprep.mubr.bf16.mxu0 %v12145_v0  ;;  %5950 = vmatprep.subr.bf16.mxu0 %v7697_v48  ;;  %v7828_v48 = vcombine.low %v3512_v55, %v3544_v17  ;;  %v3482_v6 = vld [vmem:[#allocation2 + $0x580] sm:$0xff]  ;;  %v7706_v55 = vcombine.low %v3387_v30, %v3419_v22 }
 0x5be   : > { %5927 = vmatprep.mubr.bf16.mxu1 %v12145_v0  ;;  %6009 = vmatprep.subr.bf16.mxu1 %v7699_v62  ;;  %v7830_v62 = vcombine.low %v3513_v42, %v3545_v47  ;;  %v7769_v17 = vcombine.high %v3450_v37, %v3482_v6 }
 0x5c0   : > { %5951 = vmatpush1.bf16.msra.mxu0 %v7696_v52  ;;  %6010 = vmatpush1.bf16.msra.mxu1 %v7698_v43  ;;  %v7894_v52 = vcombine.low %v3577_v28, %v3577_v28  ;;  %v3322_v43 = vld [vmem:[#allocation2 + $0x80] sm:$0xff]  ;;  %v7768_v28 = vcombine.low %v3450_v37, %v3482_v6 }
 0x5c1   : > { %5952 = vmatprep.subr.bf16.mxu0 %v7761_v33  ;;  %6011 = vmatprep.subr.bf16.mxu1 %v7763_v14  ;;  %v3354_v33 = vld [vmem:[#allocation2 + $0x180] sm:$0xff]  ;;  %v3323_v14 = vld [vmem:[#allocation2 + $0x88] sm:$0xff] }
 0x5c2   : > { %v5139_v32 = vsel %vm5047_vm7, %v7894_v52, 0  ;;  %v7643_v39 = vcombine.high %v3323_v14, %v3355_v31  ;;  %v7642_v61 = vcombine.low %v3323_v14, %v3355_v31  ;;  %v3578_v14 = vld [vmem:[#allocation2 + $0x880] sm:$0x77] }
 0x5c3   : > { %7980 = vmatmul.mubr.msk.bf16.gmra.mrb[152].mxu0 %vm5034_vm8, %v11469_v56  ;;  %7985 = vmatmul.mubr.msk.bf16.gmra.mrb[148].mxu1 %vm5034_vm8, %v11469_v56 }
 0x5c4   : > { %5953 = vmatpush1.bf16.msra.mxu0 %v7760_v4  ;;  %5876 = vmatprep.mubr.bf16.mxu0 %v12145_v0  ;;  %v7641_v4 = vcombine.high %v3322_v43, %v3354_v33 }
 0x5c5   : > { %5935 = vmatprep.mubr.bf16.mxu1 %v12145_v0  ;;  %6012 = vmatpush1.bf16.msra.mxu1 %v7762_v2 }
 0x5c6   : > { %5954 = vmatprep.subr.bf16.mxu0 %v7825_v44  ;;  %6013 = vmatprep.subr.bf16.mxu1 %v7827_v26 }
 0x5c8   : > { %5955 = vmatpush1.bf16.msra.mxu0 %v7824_v23 }
 0x5c9   : > { %7988 = vmatprep.subr.msk.bf16.mxu0 %vm5047_vm7, %v7889_v50  ;;  %6014 = vmatpush1.bf16.msra.mxu1 %v7826_v45 }
 0x5ca   : > { %7993 = vmatprep.subr.msk.bf16.mxu1 %vm5047_vm7, %v7891_v46 }
 0x5cb   : > { %7981 = vmatmul.mubr.msk.bf16.gmra.mrb[156].mxu0 %vm5034_vm8, %v11481_v25  ;;  %7986 = vmatmul.mubr.msk.bf16.gmra.mrb[152].mxu1 %vm5034_vm8, %v11481_v25 }
 0x5cc   : > { %5882 = vmatprep.mubr.bf16.mxu0 %v12145_v0  ;;  %5941 = vmatprep.mubr.bf16.mxu1 %v12145_v0 }
 0x5cd   : > { %5957 = vmatpush1.bf16.msra.mxu0 %v5121_v58  ;;  %6016 = vmatpush1.bf16.msra.mxu1 %v5127_v3  ;;  %v3386_v3 = vld [vmem:[#allocation2 + $0x280] sm:$0xff] }
 0x5ce   : > { %6066 = vmatprep.subr.bf16.mxu0 %v7637_v24  ;;  %6125 = vmatprep.subr.bf16.mxu1 %v7639_v49  ;;  %v3418_v49 = vld [vmem:[#allocation2 + $0x380] sm:$0xff] }
 0x5d3   : > { %7982 = vmatmul.mubr.msk.bf16.gmra.mrb[160].mxu0 %vm5034_vm8, %v11497_v15  ;;  %7987 = vmatmul.mubr.msk.bf16.gmra.mrb[156].mxu1 %vm5034_vm8, %v11497_v15 }
 0x5d4   : > { %5980 = vmatprep.mubr.bf16.mxu0 %v12145_v0  ;;  %6039 = vmatprep.mubr.bf16.mxu1 %v12145_v0 }
 0x5db   : > { %7989 = vmatmul.mubr.msk.bf16.vlgmr.msra.gmra.mrb[164].mxu0 %vm5034_vm8, %v11457_v54  ;;  %7994 = vmatmul.mubr.msk.bf16.vlgmr.msra.gmra.mrb[160].mxu1 %vm5034_vm8, %v11457_v54 }
 0x5dc   : > { %6067 = vmatpush1.bf16.msra.mxu0 %v7636_v1  ;;  %6126 = vmatpush1.bf16.msra.mxu1 %v7638_v29  ;;  %v7640_v1 = vcombine.low %v3322_v43, %v3354_v33 }
 0x5dd   : > { %5986 = vmatprep.mubr.bf16.mxu0 %v12145_v0  ;;  %6068 = vmatprep.subr.bf16.mxu0 %v7701_v19 }
 0x5de   : > { %6045 = vmatprep.mubr.bf16.mxu1 %v12145_v0  ;;  %6127 = vmatprep.subr.bf16.mxu1 %v7703_v63  ;;  %v7705_v63 = vcombine.high %v3386_v3, %v3418_v49 }
 0x5e0   : > { %6069 = vmatpush1.bf16.msra.mxu0 %v7700_v18  ;;  %6128 = vmatpush1.bf16.msra.mxu1 %v7702_v9  ;;  %v7707_v18 = vcombine.high %v3387_v30, %v3419_v22  ;;  %v3451_v9 = vld [vmem:[#allocation2 + $0x488] sm:$0xff] }
 0x5e1   : > { %6070 = vmatprep.subr.bf16.mxu0 %v7765_v59  ;;  %6129 = vmatprep.subr.bf16.mxu1 %v7767_v7  ;;  %v3483_v59 = vld [vmem:[#allocation2 + $0x588] sm:$0xff]  ;;  %v7704_v7 = vcombine.low %v3386_v3, %v3418_v49 }
 0x5e2   : > { %v7771_v42 = vcombine.high %v3451_v9, %v3483_v59  ;;  %v7770_v43 = vcombine.low %v3451_v9, %v3483_v59 }
 0x5e3   : > { %7990 = vmatmul.mubr.msk.bf16.gmra.mrb[168].mxu0 %vm5034_vm8, %v11469_v56  ;;  %7995 = vmatmul.mubr.msk.bf16.gmra.mrb[164].mxu1 %vm5034_vm8, %v11469_v56 }
 0x5e4   : > { %6071 = vmatpush1.bf16.msra.mxu0 %v7764_v5  ;;  %5994 = vmatprep.mubr.bf16.mxu0 %v12145_v0 }
 0x5e5   : > { %6053 = vmatprep.mubr.bf16.mxu1 %v12145_v0  ;;  %6130 = vmatpush1.bf16.msra.mxu1 %v7766_v36 }
 0x5e6   : > { %6072 = vmatprep.subr.bf16.mxu0 %v7829_v57  ;;  %6131 = vmatprep.subr.bf16.mxu1 %v7831_v53  ;;  %v3514_v57 = vld [vmem:[#allocation2 + $0x680] sm:$0xff] }
 0x5e7   : > { %v7833_v33 = vcombine.high %v3514_v57, %v3546_v27 }
 0x5e8   : > { %6073 = vmatpush1.bf16.msra.mxu0 %v7828_v48 }
 0x5e9   : > { %7998 = vmatprep.subr.msk.bf16.mxu0 %vm5047_vm7, %v7893_v41  ;;  %6132 = vmatpush1.bf16.msra.mxu1 %v7830_v62  ;;  %v3515_v41 = vld [vmem:[#allocation2 + $0x688] sm:$0xff] }
 0x5ea   : > { %8003 = vmatprep.subr.msk.bf16.mxu1 %vm5047_vm7, %v7895_v35  ;;  %v3547_v62 = vld [vmem:[#allocation2 + $0x788] sm:$0xff] }
 0x5eb   : > { %7991 = vmatmul.mubr.msk.bf16.gmra.mrb[172].mxu0 %vm5034_vm8, %v11481_v25  ;;  %7996 = vmatmul.mubr.msk.bf16.gmra.mrb[168].mxu1 %vm5034_vm8, %v11481_v25  ;;  %v7835_v31 = vcombine.high %v3515_v41, %v3547_v62 }
 0x5ec   : > { %6000 = vmatprep.mubr.bf16.mxu0 %v12145_v0  ;;  %6059 = vmatprep.mubr.bf16.mxu1 %v12145_v0 }
 0x5ed   : > { %6075 = vmatpush1.bf16.msra.mxu0 %v5133_v11  ;;  %6134 = vmatpush1.bf16.msra.mxu1 %v5139_v32  ;;  %v7832_v11 = vcombine.low %v3514_v57, %v3546_v27  ;;  %v7897_v32 = vcombine.high %v3578_v14, %v3578_v14 }
 0x5ee   : > { %v5274_v2 = vpop.f32.mrb[68].mxu0  ;;  %6184 = vmatprep.subr.bf16.mxu0 %v7641_v4  ;;  %v5333_v40 = vpop.f32.mrb[64].mxu1  ;;  %6243 = vmatprep.subr.bf16.mxu1 %v7643_v39  ;;  %v3579_v4 = vld [vmem:[#allocation2 + $0x888] sm:$0x77] }
 0x5ef   : > { %v5276_v44 = vpop.f32.mrb[69].mxu0  ;;  %v7133_v20 = vrot.slane %v5333_v40, 2  ;;  %v5335_v50 = vpop.f32.mrb[65].mxu1 }
 0x5f0   : > { %v7129_v26 = vrot.slane %v5276_v44, 1  ;;  %v5278_v23 = vpop.f32.mrb[70].mxu0  ;;  %v5337_v21 = vpop.f32.mrb[66].mxu1  ;;  %v7137_v10 = vrot.slane %v5335_v50, 3  ;;  %v7896_v44 = vcombine.low %v3578_v14, %v3578_v14  ;;  %v11687_v50 = vld [vmem:[#allocation2 + $0x90] sm:$0xff]  ;;  %v3453_v14 = vld [vmem:[#allocation2 + $0x498] sm:$0xff] }
 0x5f1   : > { %v5279_v45 = vpop.f32.mrb[71].mxu0  ;;  %v5338_v34 = vpop.f32.mrb[67].mxu1  ;;  %v7899_v23 = vcombine.high %v3579_v4, %v3579_v4 }
 0x5f2   : > { %v7131_v46 = vadd.f32 %v7129_v26, %v5274_v2  ;;  %v7834_v2 = vcombine.low %v3515_v41, %v3547_v62  ;;  %v11689_v45 = vld [vmem:[#allocation2 + $0x190] sm:$0xff]  ;;  %v11693_v34 = vld [vmem:[#allocation2 + $0x198] sm:$0xff] }
 0x5f3   : > { %7992 = vmatmul.mubr.msk.bf16.gmra.mrb[176].mxu0 %vm5034_vm8, %v11497_v15  ;;  %7997 = vmatmul.mubr.msk.bf16.gmra.mrb[172].mxu1 %vm5034_vm8, %v11497_v15  ;;  %v7645_v3 = vcombine.high %v11687_v50, %v11689_v45  ;;  %v7644_v27 = vcombine.low %v11687_v50, %v11689_v45 }
 0x5f4   : > { %v7135_v8 = vadd.f32 %v7133_v20, %v7131_v46  ;;  %6098 = vmatprep.mubr.bf16.mxu0 %v12145_v0  ;;  %6157 = vmatprep.mubr.bf16.mxu1 %v12145_v0  ;;  %v7898_v20 = vcombine.low %v3579_v4, %v3579_v4 }
 0x5f6   : > { %v11673_v60 = vadd.f32 %v7137_v10, %v7135_v8  ;;  %v5282_v38 = vpop.f32.mrb[72].mxu0  ;;  %v5341_v24 = vpop.f32.mrb[68].mxu1  ;;  %v11691_v10 = vld [vmem:[#allocation2 + $0x98] sm:$0xff]  ;;  %v5151_v49 = vsel %vm5047_vm7, %v7898_v20, 0 }
 0x5f7   : > { %v5283_v58 = vpop.f32.mrb[73].mxu0  ;;  %v5342_v51 = vpop.f32.mrb[69].mxu1  ;;  %v5145_v24 = vsel %vm5047_vm7, %v7896_v44, 0  ;;  %v7646_v62 = vcombine.low %v11691_v10, %v11693_v34 }
 0x5f8   : > { %v5284_v12 = vpop.f32.mrb[74].mxu0  ;;  %v5343_v19 = vpop.f32.mrb[70].mxu1 }
 0x5f9   : > { %v5285_v29 = vpop.f32.mrb[75].mxu0  ;;  %v5344_v16 = vpop.f32.mrb[71].mxu1  ;;  %v7647_v12 = vcombine.high %v11691_v10, %v11693_v34 }
 0x5fb   : > { %7999 = vmatmul.mubr.msk.bf16.vlgmr.msra.gmra.mrb[180].mxu0 %vm5034_vm8, %v11457_v54  ;;  %8004 = vmatmul.mubr.msk.bf16.vlgmr.msra.gmra.mrb[176].mxu1 %vm5034_vm8, %v11457_v54 }
 0x5fc   : > { %6185 = vmatpush1.bf16.msra.mxu0 %v7640_v1  ;;  %6244 = vmatpush1.bf16.msra.mxu1 %v7642_v61 }
 0x5fd   : > { %6104 = vmatprep.mubr.bf16.mxu0 %v12145_v0  ;;  %6186 = vmatprep.subr.bf16.mxu0 %v7705_v63 }
 0x5fe   : > { %v5288_v5 = vpop.f32.mrb[76].mxu0  ;;  %6163 = vmatprep.mubr.bf16.mxu1 %v12145_v0  ;;  %v5347_v36 = vpop.f32.mrb[72].mxu1  ;;  %6245 = vmatprep.subr.bf16.mxu1 %v7707_v18 }
 0x5ff   : > { %v5289_v47 = vpop.f32.mrb[77].mxu0  ;;  %v5348_v48 = vpop.f32.mrb[73].mxu1  ;;  %v3388_v5 = vld [vmem:[#allocation2 + $0x290] sm:$0xff] }
 0x600   : > { %v5290_v53 = vpop.f32.mrb[78].mxu0  ;;  %6187 = vmatpush1.bf16.msra.mxu0 %v7704_v7  ;;  %v5349_v35 = vpop.f32.mrb[74].mxu1  ;;  %6246 = vmatpush1.bf16.msra.mxu1 %v7706_v55  ;;  %v3421_v48 = vld [vmem:[#allocation2 + $0x398] sm:$0xff] }
 0x601   : > { %v5291_v13 = vpop.f32.mrb[79].mxu0  ;;  %6188 = vmatprep.subr.bf16.mxu0 %v7769_v17  ;;  %v5350_v52 = vpop.f32.mrb[75].mxu1  ;;  %6247 = vmatprep.subr.bf16.mxu1 %v7771_v42  ;;  %v3420_v42 = vld [vmem:[#allocation2 + $0x390] sm:$0xff]  ;;  %v3389_v53 = vld [vmem:[#allocation2 + $0x298] sm:$0xff] }
 0x602   : > { %v7709_v35 = vcombine.high %v3388_v5, %v3420_v42  ;;  %v3452_v52 = vld [vmem:[#allocation2 + $0x490] sm:$0xff]  ;;  %v7710_v4 = vcombine.low %v3389_v53, %v3421_v48 }
 0x603   : > { %8000 = vmatmul.mubr.msk.bf16.gmra.mrb[184].mxu0 %vm5034_vm8, %v11469_v56  ;;  %8005 = vmatmul.mubr.msk.bf16.gmra.mrb[180].mxu1 %vm5034_vm8, %v11469_v56 }
 0x604   : > { %6189 = vmatpush1.bf16.msra.mxu0 %v7768_v28  ;;  %6112 = vmatprep.mubr.bf16.mxu0 %v12145_v0 }
 0x605   : > { %6171 = vmatprep.mubr.bf16.mxu1 %v12145_v0  ;;  %6248 = vmatpush1.bf16.msra.mxu1 %v7770_v43  ;;  %v3484_v43 = vld [vmem:[#allocation2 + $0x590] sm:$0xff] }
 0x606   : > { %v5294_v39 = vpop.f32.mrb[80].mxu0  ;;  %6190 = vmatprep.subr.bf16.mxu0 %v7833_v33  ;;  %v5353_v26 = vpop.f32.mrb[76].mxu1  ;;  %6249 = vmatprep.subr.bf16.mxu1 %v7835_v31  ;;  %v7711_v33 = vcombine.high %v3389_v53, %v3421_v48  ;;  %v3485_v31 = vld [vmem:[#allocation2 + $0x598] sm:$0xff]  ;;  %v7772_v45 = vcombine.low %v3452_v52, %v3484_v43 }
 0x607   : > { %v5295_v40 = vpop.f32.mrb[81].mxu0  ;;  %v5354_v46 = vpop.f32.mrb[77].mxu1  ;;  %v3516_v26 = vld [vmem:[#allocation2 + $0x690] sm:$0xff] }
 0x608   : > { %v5296_v21 = vpop.f32.mrb[82].mxu0  ;;  %6191 = vmatpush1.bf16.msra.mxu0 %v7832_v11  ;;  %v5355_v38 = vpop.f32.mrb[78].mxu1  ;;  %v7708_v11 = vcombine.low %v3388_v5, %v3420_v42  ;;  %v3549_v46 = vld [vmem:[#allocation2 + $0x798] sm:$0xff] }
 0x609   : > { %v5297_v8 = vpop.f32.mrb[83].mxu0  ;;  %8008 = vmatprep.subr.msk.bf16.mxu0 %vm5047_vm7, %v7897_v32  ;;  %v5356_v58 = vpop.f32.mrb[79].mxu1  ;;  %6250 = vmatpush1.bf16.msra.mxu1 %v7834_v2  ;;  %v7773_v32 = vcombine.high %v3452_v52, %v3484_v43  ;;  %v7775_v2 = vcombine.high %v3453_v14, %v3485_v31  ;;  %v3517_v21 = vld [vmem:[#allocation2 + $0x698] sm:$0xff]  ;;  %v7774_v38 = vcombine.low %v3453_v14, %v3485_v31 }
 0x60a   : > { %8013 = vmatprep.subr.msk.bf16.mxu1 %vm5047_vm7, %v7899_v23  ;;  %v3548_v23 = vld [vmem:[#allocation2 + $0x790] sm:$0xff] }
 0x60b   : > { %8001 = vmatmul.mubr.msk.bf16.gmra.mrb[188].mxu0 %vm5034_vm8, %v11481_v25  ;;  %8006 = vmatmul.mubr.msk.bf16.gmra.mrb[184].mxu1 %vm5034_vm8, %v11481_v25  ;;  %v7837_v58 = vcombine.high %v3516_v26, %v3548_v23 }
 0x60c   : > { %6118 = vmatprep.mubr.bf16.mxu0 %v12145_v0  ;;  %6177 = vmatprep.mubr.bf16.mxu1 %v12145_v0 }
 0x60d   : > { %6193 = vmatpush1.bf16.msra.mxu0 %v5145_v24  ;;  %6252 = vmatpush1.bf16.msra.mxu1 %v5151_v49  ;;  %v3580_v24 = vld [vmem:[#allocation2 + $0x890] sm:$0x77]  ;;  %v7836_v49 = vcombine.low %v3516_v26, %v3548_v23  ;;  %v3391_v23 = vld [vmem:[#allocation2 + $0x2a8] sm:$0xff] }
 0x60e   : > { %v5392_v51 = vpop.f32.mrb[84].mxu0  ;;  %6302 = vmatprep.subr.bf16.mxu0 %v7645_v3  ;;  %v5451_v22 = vpop.f32.mrb[80].mxu1  ;;  %6361 = vmatprep.subr.bf16.mxu1 %v7647_v12  ;;  %v7839_v3 = vcombine.high %v3517_v21, %v3549_v46  ;;  %v3581_v12 = vld [vmem:[#allocation2 + $0x898] sm:$0x77] }
 0x60f   : > { %v7141_v1 = vrot.slane %v5392_v51, 4  ;;  %v5394_v30 = vpop.f32.mrb[85].mxu0  ;;  %v5453_v61 = vpop.f32.mrb[81].mxu1  ;;  %v7149_v63 = vrot.slane %v5451_v22, 6  ;;  %v7901_v51 = vcombine.high %v3580_v24, %v3580_v24  ;;  %v7900_v22 = vcombine.low %v3580_v24, %v3580_v24  ;;  %v3487_v24 = vld [vmem:[#allocation2 + $0x5a8] sm:$0xff] }
 0x610   : > { %v7145_v29 = vrot.slane %v5394_v30, 5  ;;  %v5396_v19 = vpop.f32.mrb[86].mxu0  ;;  %v5455_v6 = vpop.f32.mrb[82].mxu1  ;;  %v7153_v7 = vrot.slane %v5453_v61, 7  ;;  %v7838_v30 = vcombine.low %v3517_v21, %v3549_v46  ;;  %v7903_v61 = vcombine.high %v3581_v12, %v3581_v12 }
 0x611   : > { %v7143_v16 = vadd.f32 %v7141_v1, %v11673_v60  ;;  %v5397_v37 = vpop.f32.mrb[87].mxu0  ;;  %v5456_v18 = vpop.f32.mrb[83].mxu1 }
 0x612   : > { %v11736_v37 = vld [vmem:[#allocation2 + $0x1a0] sm:$0xff] }
 0x613   : > { %v7147_v9 = vadd.f32 %v7145_v29, %v7143_v16  ;;  %8002 = vmatmul.mubr.msk.bf16.gmra.mrb[192].mxu0 %vm5034_vm8, %v11497_v15  ;;  %8007 = vmatmul.mubr.msk.bf16.gmra.mrb[188].mxu1 %vm5034_vm8, %v11497_v15  ;;  %v7902_v16 = vcombine.low %v3581_v12, %v3581_v12 }
 0x614   : > { %6216 = vmatprep.mubr.bf16.mxu0 %v12145_v0  ;;  %6275 = vmatprep.mubr.bf16.mxu1 %v12145_v0 }
 0x615   : > { %v7151_v59 = vadd.f32 %v7149_v63, %v7147_v9  ;;  %v11734_v63 = vld [vmem:[#allocation2 + $0xa0] sm:$0xff]  ;;  %v11738_v9 = vld [vmem:[#allocation2 + $0xa8] sm:$0xff]  ;;  %v5163_v42 = vsel %vm5047_vm7, %v7902_v16, 0 }
 0x616   : > { %v5400_v55 = vpop.f32.mrb[88].mxu0  ;;  %v5459_v60 = vpop.f32.mrb[84].mxu1  ;;  %v7649_v5 = vcombine.high %v11734_v63, %v11736_v37  ;;  %v7648_v26 = vcombine.low %v11734_v63, %v11736_v37  ;;  %v3519_v37 = vld [vmem:[#allocation2 + $0x6a8] sm:$0xff] }
 0x617   : > { %v5401_v17 = vpop.f32.mrb[89].mxu0  ;;  %v11716_v47 = vadd.f32 %v7153_v7, %v7151_v59  ;;  %v5460_v57 = vpop.f32.mrb[85].mxu1  ;;  %v3359_v59 = vld [vmem:[#allocation2 + $0x1a8] sm:$0xff]  ;;  %v5157_v60 = vsel %vm5047_vm7, %v7900_v22, 0 }
 0x618   : > { %v5402_v36 = vpop.f32.mrb[90].mxu0  ;;  %v5461_v41 = vpop.f32.mrb[86].mxu1  ;;  %v7650_v21 = vcombine.low %v11738_v9, %v3359_v59 }
 0x619   : > { %v5403_v28 = vpop.f32.mrb[91].mxu0  ;;  %v5462_v13 = vpop.f32.mrb[87].mxu1  ;;  %v7651_v36 = vcombine.high %v11738_v9, %v3359_v59 }
 0x61b   : > { %8009 = vmatmul.mubr.msk.bf16.vlgmr.msra.gmra.mrb[196].mxu0 %vm5034_vm8, %v11457_v54  ;;  %8014 = vmatmul.mubr.msk.bf16.vlgmr.msra.gmra.mrb[192].mxu1 %vm5034_vm8, %v11457_v54 }
 0x61c   : > { %6303 = vmatpush1.bf16.msra.mxu0 %v7644_v27  ;;  %6362 = vmatpush1.bf16.msra.mxu1 %v7646_v62 }
 0x61d   : > { %6222 = vmatprep.mubr.bf16.mxu0 %v12145_v0  ;;  %6304 = vmatprep.subr.bf16.mxu0 %v7709_v35 }
 0x61e   : > { %v5406_v39 = vpop.f32.mrb[92].mxu0  ;;  %6281 = vmatprep.mubr.bf16.mxu1 %v12145_v0  ;;  %v5465_v40 = vpop.f32.mrb[88].mxu1  ;;  %6363 = vmatprep.subr.bf16.mxu1 %v7711_v33 }
 0x61f   : > { %v5407_v44 = vpop.f32.mrb[93].mxu0  ;;  %v5466_v50 = vpop.f32.mrb[89].mxu1  ;;  %v3422_v39 = vld [vmem:[#allocation2 + $0x3a0] sm:$0xff] }
 0x620   : > { %v5408_v20 = vpop.f32.mrb[94].mxu0  ;;  %6305 = vmatpush1.bf16.msra.mxu0 %v7708_v11  ;;  %v5467_v34 = vpop.f32.mrb[90].mxu1  ;;  %6364 = vmatpush1.bf16.msra.mxu1 %v7710_v4 }
 0x621   : > { %v5409_v10 = vpop.f32.mrb[95].mxu0  ;;  %6306 = vmatprep.subr.bf16.mxu0 %v7773_v32  ;;  %v5468_v8 = vpop.f32.mrb[91].mxu1  ;;  %6365 = vmatprep.subr.bf16.mxu1 %v7775_v2  ;;  %v3390_v32 = vld [vmem:[#allocation2 + $0x2a0] sm:$0xff]  ;;  %v3423_v20 = vld [vmem:[#allocation2 + $0x3a8] sm:$0xff] }
 0x622   : > { %v7713_v10 = vcombine.high %v3390_v32, %v3422_v39  ;;  %v3454_v34 = vld [vmem:[#allocation2 + $0x4a0] sm:$0xff] }
 0x623   : > { %8010 = vmatmul.mubr.msk.bf16.gmra.mrb[200].mxu0 %vm5034_vm8, %v11469_v56  ;;  %8015 = vmatmul.mubr.msk.bf16.gmra.mrb[196].mxu1 %vm5034_vm8, %v11469_v56  ;;  %v3486_v8 = vld [vmem:[#allocation2 + $0x5a0] sm:$0xff] }
 0x624   : > { %6307 = vmatpush1.bf16.msra.mxu0 %v7772_v45  ;;  %6228 = vmatprep.mubr.bf16.mxu0 %v12145_v0  ;;  %v7777_v12 = vcombine.high %v3454_v34, %v3486_v8  ;;  %v7776_v63 = vcombine.low %v3454_v34, %v3486_v8 }
 0x625   : > { %6287 = vmatprep.mubr.bf16.mxu1 %v12145_v0  ;;  %6366 = vmatpush1.bf16.msra.mxu1 %v7774_v38  ;;  %v7715_v38 = vcombine.high %v3391_v23, %v3423_v20 }
 0x626   : > { %v5412_v1 = vpop.f32.mrb[96].mxu0  ;;  %6308 = vmatprep.subr.bf16.mxu0 %v7837_v58  ;;  %v5471_v19 = vpop.f32.mrb[92].mxu1  ;;  %6367 = vmatprep.subr.bf16.mxu1 %v7839_v3  ;;  %v3455_v58 = vld [vmem:[#allocation2 + $0x4a8] sm:$0xff]  ;;  %v7712_v3 = vcombine.low %v3390_v32, %v3422_v39 }
 0x627   : > { %v5413_v29 = vpop.f32.mrb[97].mxu0  ;;  %v5472_v18 = vpop.f32.mrb[93].mxu1  ;;  %v7779_v1 = vcombine.high %v3455_v58, %v3487_v24  ;;  %v3550_v19 = vld [vmem:[#allocation2 + $0x7a0] sm:$0xff] }
 0x628   : > { %v5414_v6 = vpop.f32.mrb[98].mxu0  ;;  %6309 = vmatpush1.bf16.msra.mxu0 %v7836_v49  ;;  %v5473_v55 = vpop.f32.mrb[94].mxu1  ;;  %v7714_v49 = vcombine.low %v3391_v23, %v3423_v20  ;;  %v3518_v29 = vld [vmem:[#allocation2 + $0x6a0] sm:$0xff] }
 0x629   : > { %v5415_v7 = vpop.f32.mrb[99].mxu0  ;;  %8018 = vmatprep.subr.msk.bf16.mxu0 %vm5047_vm7, %v7901_v51  ;;  %v5474_v17 = vpop.f32.mrb[95].mxu1  ;;  %6368 = vmatpush1.bf16.msra.mxu1 %v7838_v30  ;;  %v3551_v6 = vld [vmem:[#allocation2 + $0x7a8] sm:$0xff]  ;;  %v7841_v55 = vcombine.high %v3518_v29, %v3550_v19 }
 0x62a   : > { %8023 = vmatprep.subr.msk.bf16.mxu1 %vm5047_vm7, %v7903_v61  ;;  %v7778_v7 = vcombine.low %v3455_v58, %v3487_v24  ;;  %v3582_v17 = vld [vmem:[#allocation2 + $0x8a0] sm:$0x77] }
 0x62b   : > { %8011 = vmatmul.mubr.msk.bf16.gmra.mrb[204].mxu0 %vm5034_vm8, %v11481_v25  ;;  %8016 = vmatmul.mubr.msk.bf16.gmra.mrb[200].mxu1 %vm5034_vm8, %v11481_v25 }
 0x62c   : > { %6236 = vmatprep.mubr.bf16.mxu0 %v12145_v0  ;;  %6295 = vmatprep.mubr.bf16.mxu1 %v12145_v0 }
 0x62d   : > { %6311 = vmatpush1.bf16.msra.mxu0 %v5157_v60  ;;  %6370 = vmatpush1.bf16.msra.mxu1 %v5163_v42  ;;  %v7843_v60 = vcombine.high %v3519_v37, %v3551_v6  ;;  %v3583_v42 = vld [vmem:[#allocation2 + $0x8a8] sm:$0x77] }
 0x62e   : > { %v5510_v57 = vpop.f32.mrb[100].mxu0  ;;  %6420 = vmatprep.subr.bf16.mxu0 %v7649_v5  ;;  %v5569_v53 = vpop.f32.mrb[96].mxu1  ;;  %6479 = vmatprep.subr.bf16.mxu1 %v7651_v36  ;;  %v7840_v5 = vcombine.low %v3518_v29, %v3550_v19  ;;  %v7905_v36 = vcombine.high %v3582_v17, %v3582_v17  ;;  %v3393_v19 = vld [vmem:[#allocation2 + $0x2b8] sm:$0xff] }
 0x62f   : > { %v5511_v27 = vpop.f32.mrb[101].mxu0  ;;  %v5570_v28 = vpop.f32.mrb[97].mxu1  ;;  %v7904_v53 = vcombine.low %v3582_v17, %v3582_v17  ;;  %v3457_v17 = vld [vmem:[#allocation2 + $0x4b8] sm:$0xff] }
 0x630   : > { %v5512_v48 = vpop.f32.mrb[102].mxu0  ;;  %v5571_v13 = vpop.f32.mrb[98].mxu1  ;;  %v7842_v27 = vcombine.low %v3519_v37, %v3551_v6 }
 0x631   : > { %v7156_v41 = vadd.f32 %v11716_v47, %v5512_v48  ;;  %v5514_v62 = vpop.f32.mrb[103].mxu0  ;;  %v7162_v52 = vrot.slane %v5571_v13, 2  ;;  %v5573_v43 = vpop.f32.mrb[99].mxu1  ;;  %v11777_v13 = vld [vmem:[#allocation2 + $0xb0] sm:$0xff] }
 0x632   : > { %v7158_v35 = vrot.slane %v5514_v62, 1  ;;  %v7166_v31 = vrot.slane %v5573_v43, 3  ;;  %v7906_v62 = vcombine.low %v3583_v42, %v3583_v42 }
 0x633   : > { %8012 = vmatmul.mubr.msk.bf16.gmra.mrb[208].mxu0 %vm5034_vm8, %v11497_v15  ;;  %8017 = vmatmul.mubr.msk.bf16.gmra.mrb[204].mxu1 %vm5034_vm8, %v11497_v15 }
 0x634   : > { %v7160_v33 = vadd.f32 %v7158_v35, %v7156_v41  ;;  %6334 = vmatprep.mubr.bf16.mxu0 %v12145_v0  ;;  %6393 = vmatprep.mubr.bf16.mxu1 %v12145_v0  ;;  %v7907_v41 = vcombine.high %v3583_v42, %v3583_v42  ;;  %v11779_v35 = vld [vmem:[#allocation2 + $0x1b0] sm:$0xff]  ;;  %v5175_v39 = vsel %vm5047_vm7, %v7906_v62, 0 }
 0x635   : > { %v7653_v32 = vcombine.high %v11777_v13, %v11779_v35  ;;  %v7652_v29 = vcombine.low %v11777_v13, %v11779_v35 }
 0x636   : > { %v7164_v14 = vadd.f32 %v7162_v52, %v7160_v33  ;;  %v5518_v11 = vpop.f32.mrb[104].mxu0  ;;  %v5577_v4 = vpop.f32.mrb[100].mxu1  ;;  %v11781_v33 = vld [vmem:[#allocation2 + $0xb8] sm:$0xff] }
 0x637   : > { %v5519_v47 = vpop.f32.mrb[105].mxu0  ;;  %v5578_v40 = vpop.f32.mrb[101].mxu1  ;;  %v5169_v4 = vsel %vm5047_vm7, %v7904_v53, 0 }
 0x638   : > { %v11760_v2 = vadd.f32 %v7166_v31, %v7164_v14  ;;  %v5520_v44 = vpop.f32.mrb[106].mxu0  ;;  %v5579_v45 = vpop.f32.mrb[102].mxu1  ;;  %v11783_v14 = vld [vmem:[#allocation2 + $0x1b8] sm:$0xff] }
 0x639   : > { %v5521_v50 = vpop.f32.mrb[107].mxu0  ;;  %v5580_v46 = vpop.f32.mrb[103].mxu1  ;;  %v7655_v44 = vcombine.high %v11781_v33, %v11783_v14  ;;  %v7654_v37 = vcombine.low %v11781_v33, %v11783_v14 }
 0x63b   : > { %8019 = vmatmul.mubr.msk.bf16.vlgmr.msra.gmra.mrb[212].mxu0 %vm5034_vm8, %v11457_v54  ;;  %8024 = vmatmul.mubr.msk.bf16.vlgmr.msra.gmra.mrb[208].mxu1 %vm5034_vm8, %v11457_v54 }
 0x63c   : > { %6421 = vmatpush1.bf16.msra.mxu0 %v7648_v26  ;;  %6480 = vmatpush1.bf16.msra.mxu1 %v7650_v21 }
 0x63d   : > { %6340 = vmatprep.mubr.bf16.mxu0 %v12145_v0  ;;  %6422 = vmatprep.subr.bf16.mxu0 %v7713_v10 }
 0x63e   : > { %v5524_v51 = vpop.f32.mrb[108].mxu0  ;;  %6399 = vmatprep.mubr.bf16.mxu1 %v12145_v0  ;;  %v5583_v22 = vpop.f32.mrb[104].mxu1  ;;  %6481 = vmatprep.subr.bf16.mxu1 %v7715_v38 }
 0x63f   : > { %v5525_v30 = vpop.f32.mrb[109].mxu0  ;;  %v5584_v16 = vpop.f32.mrb[105].mxu1 }
 0x640   : > { %v5526_v61 = vpop.f32.mrb[110].mxu0  ;;  %6423 = vmatpush1.bf16.msra.mxu0 %v7712_v3  ;;  %v5585_v9 = vpop.f32.mrb[106].mxu1  ;;  %6482 = vmatpush1.bf16.msra.mxu1 %v7714_v49  ;;  %v3424_v30 = vld [vmem:[#allocation2 + $0x3b0] sm:$0xff] }
 0x641   : > { %v5527_v18 = vpop.f32.mrb[111].mxu0  ;;  %6424 = vmatprep.subr.bf16.mxu0 %v7777_v12  ;;  %v5586_v59 = vpop.f32.mrb[107].mxu1  ;;  %6483 = vmatprep.subr.bf16.mxu1 %v7779_v1  ;;  %v3392_v1 = vld [vmem:[#allocation2 + $0x2b0] sm:$0xff]  ;;  %v3425_v61 = vld [vmem:[#allocation2 + $0x3b8] sm:$0xff] }
 0x642   : > { %v7717_v9 = vcombine.high %v3392_v1, %v3424_v30  ;;  %v3456_v59 = vld [vmem:[#allocation2 + $0x4b0] sm:$0xff]  ;;  %v7718_v42 = vcombine.low %v3393_v19, %v3425_v61 }
 0x643   : > { %8020 = vmatmul.mubr.msk.bf16.gmra.mrb[216].mxu0 %vm5034_vm8, %v11469_v56  ;;  %8025 = vmatmul.mubr.msk.bf16.gmra.mrb[212].mxu1 %vm5034_vm8, %v11469_v56 }
 0x644   : > { %6425 = vmatpush1.bf16.msra.mxu0 %v7776_v63  ;;  %6346 = vmatprep.mubr.bf16.mxu0 %v12145_v0 }
 0x645   : > { %6405 = vmatprep.mubr.bf16.mxu1 %v12145_v0  ;;  %6484 = vmatpush1.bf16.msra.mxu1 %v7778_v7  ;;  %v3488_v7 = vld [vmem:[#allocation2 + $0x5b0] sm:$0xff] }
 0x646   : > { %v5530_v57 = vpop.f32.mrb[112].mxu0  ;;  %6426 = vmatprep.subr.bf16.mxu0 %v7841_v55  ;;  %v5589_v28 = vpop.f32.mrb[108].mxu1  ;;  %6485 = vmatprep.subr.bf16.mxu1 %v7843_v60  ;;  %v7719_v55 = vcombine.high %v3393_v19, %v3425_v61  ;;  %v3489_v60 = vld [vmem:[#allocation2 + $0x5b8] sm:$0xff]  ;;  %v7780_v35 = vcombine.low %v3456_v59, %v3488_v7 }
 0x647   : > { %v5531_v48 = vpop.f32.mrb[113].mxu0  ;;  %v5590_v43 = vpop.f32.mrb[109].mxu1  ;;  %v3520_v28 = vld [vmem:[#allocation2 + $0x6b0] sm:$0xff] }
 0x648   : > { %v5532_v52 = vpop.f32.mrb[114].mxu0  ;;  %6427 = vmatpush1.bf16.msra.mxu0 %v7840_v5  ;;  %v5591_v11 = vpop.f32.mrb[110].mxu1  ;;  %v7716_v5 = vcombine.low %v3392_v1, %v3424_v30  ;;  %v3553_v43 = vld [vmem:[#allocation2 + $0x7b8] sm:$0xff] }
 0x649   : > { %v5533_v31 = vpop.f32.mrb[115].mxu0  ;;  %8028 = vmatprep.subr.msk.bf16.mxu0 %vm5047_vm7, %v7905_v36  ;;  %v5592_v47 = vpop.f32.mrb[111].mxu1  ;;  %6486 = vmatpush1.bf16.msra.mxu1 %v7842_v27  ;;  %v7781_v36 = vcombine.high %v3456_v59, %v3488_v7  ;;  %v7783_v27 = vcombine.high %v3457_v17, %v3489_v60  ;;  %v3521_v52 = vld [vmem:[#allocation2 + $0x6b8] sm:$0xff]  ;;  %v7782_v11 = vcombine.low %v3457_v17, %v3489_v60  ;;  %v3394_v17 = vld [vmem:[#allocation2 + $0x2c0] sm:$0xff] }
 0x64a   : > { %8033 = vmatprep.subr.msk.bf16.mxu1 %vm5047_vm7, %v7907_v41  ;;  %v3552_v41 = vld [vmem:[#allocation2 + $0x7b0] sm:$0xff]  ;;  %v3426_v60 = vld [vmem:[#allocation2 + $0x3c0] sm:$0xff] }
 0x64b   : > { %8021 = vmatmul.mubr.msk.bf16.gmra.mrb[220].mxu0 %vm5034_vm8, %v11481_v25  ;;  %8026 = vmatmul.mubr.msk.bf16.gmra.mrb[216].mxu1 %vm5034_vm8, %v11481_v25  ;;  %v7845_v47 = vcombine.high %v3520_v28, %v3552_v41 }
 0x64c   : > { %6354 = vmatprep.mubr.bf16.mxu0 %v12145_v0  ;;  %6413 = vmatprep.mubr.bf16.mxu1 %v12145_v0 }
 0x64d   : > { %6429 = vmatpush1.bf16.msra.mxu0 %v5169_v4  ;;  %6488 = vmatpush1.bf16.msra.mxu1 %v5175_v39  ;;  %v3584_v4 = vld [vmem:[#allocation2 + $0x8b0] sm:$0x77]  ;;  %v7844_v39 = vcombine.low %v3520_v28, %v3552_v41 }
 0x64e   : > { %v5628_v40 = vpop.f32.mrb[116].mxu0  ;;  %6538 = vmatprep.subr.bf16.mxu0 %v7653_v32  ;;  %v5687_v23 = vpop.f32.mrb[112].mxu1  ;;  %6597 = vmatprep.subr.bf16.mxu1 %v7655_v44  ;;  %v7847_v32 = vcombine.high %v3521_v52, %v3553_v43  ;;  %v3585_v44 = vld [vmem:[#allocation2 + $0x8b8] sm:$0x77] }
 0x64f   : > { %v5629_v26 = vpop.f32.mrb[117].mxu0  ;;  %v5688_v50 = vpop.f32.mrb[113].mxu1  ;;  %v7909_v40 = vcombine.high %v3584_v4, %v3584_v4  ;;  %v7846_v23 = vcombine.low %v3521_v52, %v3553_v43  ;;  %v3458_v43 = vld [vmem:[#allocation2 + $0x4c0] sm:$0xff] }
 0x650   : > { %v5630_v20 = vpop.f32.mrb[118].mxu0  ;;  %v5689_v46 = vpop.f32.mrb[114].mxu1 }
 0x651   : > { %v7170_v45 = vrot.slane %v5630_v20, 4  ;;  %v5632_v21 = vpop.f32.mrb[119].mxu0  ;;  %v5691_v34 = vpop.f32.mrb[115].mxu1  ;;  %v7178_v58 = vrot.slane %v5689_v46, 6  ;;  %v7908_v20 = vcombine.low %v3584_v4, %v3584_v4  ;;  %v7910_v46 = vcombine.low %v3585_v44, %v3585_v44 }
 0x652   : > { %v7174_v10 = vrot.slane %v5632_v21, 5  ;;  %v7182_v49 = vrot.slane %v5691_v34, 7  ;;  %v7911_v21 = vcombine.high %v3585_v44, %v3585_v44  ;;  %v11826_v34 = vld [vmem:[#allocation2 + $0x1c0] sm:$0xff]  ;;  %v7720_v4 = vcombine.low %v3394_v17, %v3426_v60 }
 0x653   : > { %v7172_v8 = vadd.f32 %v7170_v45, %v11760_v2  ;;  %8022 = vmatmul.mubr.msk.bf16.gmra.mrb[224].mxu0 %vm5034_vm8, %v11497_v15  ;;  %8027 = vmatmul.mubr.msk.bf16.gmra.mrb[220].mxu1 %vm5034_vm8, %v11497_v15  ;;  %v5187_v30 = vsel %vm5047_vm7, %v7910_v46, 0 }
 0x654   : > { %6452 = vmatprep.mubr.bf16.mxu0 %v12145_v0  ;;  %6511 = vmatprep.mubr.bf16.mxu1 %v12145_v0 }
 0x655   : > { %v7176_v38 = vadd.f32 %v7174_v10, %v7172_v8  ;;  %v11824_v10 = vld [vmem:[#allocation2 + $0xc0] sm:$0xff] }
 0x656   : > { %v5636_v24 = vpop.f32.mrb[120].mxu0  ;;  %v5695_v51 = vpop.f32.mrb[116].mxu1  ;;  %v7657_v1 = vcombine.high %v11824_v10, %v11826_v34 }
 0x657   : > { %v7180_v3 = vadd.f32 %v7178_v58, %v7176_v38  ;;  %v5637_v12 = vpop.f32.mrb[121].mxu0  ;;  %v5696_v22 = vpop.f32.mrb[117].mxu1  ;;  %v3331_v58 = vld [vmem:[#allocation2 + $0xc8] sm:$0xff]  ;;  %v5181_v51 = vsel %vm5047_vm7, %v7908_v20, 0 }
 0x658   : > { %v5638_v2 = vpop.f32.mrb[122].mxu0  ;;  %v5697_v63 = vpop.f32.mrb[118].mxu1  ;;  %v3363_v24 = vld [vmem:[#allocation2 + $0x1c8] sm:$0xff] }
 0x659   : > { %v5639_v16 = vpop.f32.mrb[123].mxu0  ;;  %v11810_v6 = vadd.f32 %v7182_v49, %v7180_v3  ;;  %v5698_v18 = vpop.f32.mrb[119].mxu1  ;;  %v7659_v2 = vcombine.high %v3331_v58, %v3363_v24 }
 0x65b   : > { %8029 = vmatmul.mubr.msk.bf16.vlgmr.msra.gmra.mrb[228].mxu0 %vm5034_vm8, %v11457_v54  ;;  %8034 = vmatmul.mubr.msk.bf16.vlgmr.msra.gmra.mrb[224].mxu1 %vm5034_vm8, %v11457_v54 }
 0x65c   : > { %6539 = vmatpush1.bf16.msra.mxu0 %v7652_v29  ;;  %6598 = vmatpush1.bf16.msra.mxu1 %v7654_v37 }
 0x65d   : > { %6458 = vmatprep.mubr.bf16.mxu0 %v12145_v0  ;;  %6540 = vmatprep.subr.bf16.mxu0 %v7717_v9 }
 0x65e   : > { %v5642_v57 = vpop.f32.mrb[124].mxu0  ;;  %6517 = vmatprep.mubr.bf16.mxu1 %v12145_v0  ;;  %v5701_v48 = vpop.f32.mrb[120].mxu1  ;;  %6599 = vmatprep.subr.bf16.mxu1 %v7719_v55 }
 0x65f   : > { %v5643_v53 = vpop.f32.mrb[125].mxu0  ;;  %v5702_v13 = vpop.f32.mrb[121].mxu1  ;;  %v3427_v48 = vld [vmem:[#allocation2 + $0x3c8] sm:$0xff] }
 0x660   : > { %v5644_v62 = vpop.f32.mrb[126].mxu0  ;;  %6541 = vmatpush1.bf16.msra.mxu0 %v7716_v5  ;;  %v5703_v14 = vpop.f32.mrb[122].mxu1  ;;  %6600 = vmatpush1.bf16.msra.mxu1 %v7718_v42  ;;  %v3395_v53 = vld [vmem:[#allocation2 + $0x2c8] sm:$0xff] }
 0x661   : > { %v5645_v33 = vpop.f32.mrb[127].mxu0  ;;  %6542 = vmatprep.subr.bf16.mxu0 %v7781_v36  ;;  %v5704_v31 = vpop.f32.mrb[123].mxu1  ;;  %6601 = vmatprep.subr.bf16.mxu1 %v7783_v27  ;;  %v7656_v27 = vcombine.low %v11824_v10, %v11826_v34  ;;  %v7658_v62 = vcombine.low %v3331_v58, %v3363_v24  ;;  %v7723_v14 = vcombine.high %v3395_v53, %v3427_v48  ;;  %v3523_v34 = vld [vmem:[#allocation2 + $0x6c8] sm:$0xff] }
 0x662   : > { %v3490_v33 = vld [vmem:[#allocation2 + $0x5c0] sm:$0xff]  ;;  %v3459_v31 = vld [vmem:[#allocation2 + $0x4c8] sm:$0xff] }
 0x663   : > { %8030 = vmatmul.mubr.msk.bf16.gmra.mrb[232].mxu0 %vm5034_vm8, %v11469_v56  ;;  %8035 = vmatmul.mubr.msk.bf16.gmra.mrb[228].mxu1 %vm5034_vm8, %v11469_v56  ;;  %v7784_v10 = vcombine.low %v3458_v43, %v3490_v33 }
 0x664   : > { %6543 = vmatpush1.bf16.msra.mxu0 %v7780_v35  ;;  %6464 = vmatprep.mubr.bf16.mxu0 %v12145_v0 }
 0x665   : > { %6523 = vmatprep.mubr.bf16.mxu1 %v12145_v0  ;;  %6602 = vmatpush1.bf16.msra.mxu1 %v7782_v11  ;;  %v3491_v11 = vld [vmem:[#allocation2 + $0x5c8] sm:$0xff] }
 0x666   : > { %v5648_v26 = vpop.f32.mrb[128].mxu0  ;;  %6544 = vmatprep.subr.bf16.mxu0 %v7845_v47  ;;  %v5707_v45 = vpop.f32.mrb[124].mxu1  ;;  %6603 = vmatprep.subr.bf16.mxu1 %v7847_v32  ;;  %v7722_v32 = vcombine.low %v3395_v53, %v3427_v48 }
 0x667   : > { %v5649_v50 = vpop.f32.mrb[129].mxu0  ;;  %v5708_v38 = vpop.f32.mrb[125].mxu1  ;;  %v7787_v26 = vcombine.high %v3459_v31, %v3491_v11  ;;  %v3554_v45 = vld [vmem:[#allocation2 + $0x7c0] sm:$0xff] }
 0x668   : > { %v5650_v8 = vpop.f32.mrb[130].mxu0  ;;  %6545 = vmatpush1.bf16.msra.mxu0 %v7844_v39  ;;  %v5709_v49 = vpop.f32.mrb[126].mxu1  ;;  %v7785_v39 = vcombine.high %v3458_v43, %v3490_v33  ;;  %v3522_v50 = vld [vmem:[#allocation2 + $0x6c0] sm:$0xff] }
 0x669   : > { %v5651_v3 = vpop.f32.mrb[131].mxu0  ;;  %8038 = vmatprep.subr.msk.bf16.mxu0 %vm5047_vm7, %v7909_v40  ;;  %v5710_v12 = vpop.f32.mrb[127].mxu1  ;;  %6604 = vmatpush1.bf16.msra.mxu1 %v7846_v23  ;;  %v3555_v8 = vld [vmem:[#allocation2 + $0x7c8] sm:$0xff]  ;;  %v7849_v49 = vcombine.high %v3522_v50, %v3554_v45 }
 0x66a   : > { %8043 = vmatprep.subr.msk.bf16.mxu1 %vm5047_vm7, %v7911_v21  ;;  %v7786_v3 = vcombine.low %v3459_v31, %v3491_v11  ;;  %v3586_v12 = vld [vmem:[#allocation2 + $0x8c0] sm:$0x77]  ;;  %v3396_v11 = vld [vmem:[#allocation2 + $0x2d0] sm:$0xff] }
 0x66b   : > { %8031 = vmatmul.mubr.msk.bf16.gmra.mrb[236].mxu0 %vm5034_vm8, %v11481_v25  ;;  %8036 = vmatmul.mubr.msk.bf16.gmra.mrb[232].mxu1 %vm5034_vm8, %v11481_v25 }
 0x66c   : > { %6472 = vmatprep.mubr.bf16.mxu0 %v12145_v0  ;;  %6531 = vmatprep.mubr.bf16.mxu1 %v12145_v0 }
 0x66d   : > { %6547 = vmatpush1.bf16.msra.mxu0 %v5181_v51  ;;  %6606 = vmatpush1.bf16.msra.mxu1 %v5187_v30  ;;  %v7851_v51 = vcombine.high %v3523_v34, %v3555_v8  ;;  %v3587_v30 = vld [vmem:[#allocation2 + $0x8c8] sm:$0x77] }
 0x66e   : > { %v5746_v22 = vpop.f32.mrb[132].mxu0  ;;  %6656 = vmatprep.subr.bf16.mxu0 %v7657_v1  ;;  %v5805_v19 = vpop.f32.mrb[128].mxu1  ;;  %6715 = vmatprep.subr.bf16.mxu1 %v7659_v2  ;;  %v7848_v1 = vcombine.low %v3522_v50, %v3554_v45  ;;  %v7913_v2 = vcombine.high %v3586_v12, %v3586_v12 }
 0x66f   : > { %v5747_v29 = vpop.f32.mrb[133].mxu0  ;;  %v5806_v16 = vpop.f32.mrb[129].mxu1  ;;  %v7912_v19 = vcombine.low %v3586_v12, %v3586_v12 }
 0x670   : > { %v5748_v61 = vpop.f32.mrb[134].mxu0  ;;  %v5807_v37 = vpop.f32.mrb[130].mxu1  ;;  %v7850_v29 = vcombine.low %v3523_v34, %v3555_v8  ;;  %v3460_v8 = vld [vmem:[#allocation2 + $0x4d0] sm:$0xff] }
 0x671   : > { %v5749_v63 = vpop.f32.mrb[135].mxu0  ;;  %v5808_v18 = vpop.f32.mrb[131].mxu1  ;;  %v7914_v37 = vcombine.low %v3587_v30, %v3587_v30 }
 0x672   : > { %v7915_v63 = vcombine.high %v3587_v30, %v3587_v30  ;;  %v11863_v18 = vld [vmem:[#allocation2 + $0xd0] sm:$0xff] }
 0x673   : > { %8032 = vmatmul.mubr.msk.bf16.gmra.mrb[240].mxu0 %vm5034_vm8, %v11497_v15  ;;  %8037 = vmatmul.mubr.msk.bf16.gmra.mrb[236].mxu1 %vm5034_vm8, %v11497_v15 }
 0x674   : > { %6570 = vmatprep.mubr.bf16.mxu0 %v12145_v0  ;;  %6629 = vmatprep.mubr.bf16.mxu1 %v12145_v0 }
 0x676   : > { %v5752_v9 = vpop.f32.mrb[136].mxu0  ;;  %v5811_v55 = vpop.f32.mrb[132].mxu1 }
 0x677   : > { %v7185_v59 = vadd.f32 %v11810_v6, %v5752_v9  ;;  %v5754_v7 = vpop.f32.mrb[137].mxu0  ;;  %v7191_v36 = vrot.slane %v5811_v55, 2  ;;  %v5813_v57 = vpop.f32.mrb[133].mxu1  ;;  %v7721_v6 = vcombine.high %v3394_v17, %v3426_v60  ;;  %v3364_v9 = vld [vmem:[#allocation2 + $0x1d0] sm:$0xff]  ;;  %v11865_v55 = vld [vmem:[#allocation2 + $0xd8] sm:$0xff] }
 0x678   : > { %v7187_v5 = vrot.slane %v5754_v7, 1  ;;  %v5756_v42 = vpop.f32.mrb[138].mxu0  ;;  %v5815_v41 = vpop.f32.mrb[134].mxu1  ;;  %v7195_v35 = vrot.slane %v5813_v57, 3  ;;  %v3365_v17 = vld [vmem:[#allocation2 + $0x1d8] sm:$0xff]  ;;  %v7661_v57 = vcombine.high %v11863_v18, %v3364_v9 }
 0x679   : > { %v5757_v28 = vpop.f32.mrb[139].mxu0  ;;  %v5816_v52 = vpop.f32.mrb[135].mxu1  ;;  %v7663_v53 = vcombine.high %v11865_v55, %v3365_v17 }
 0x67a   : > { %v7189_v13 = vadd.f32 %v7187_v5, %v7185_v59 }
 0x67b   : > { %8039 = vmatmul.mubr.msk.bf16.vlgmr.msra.gmra.mrb[244].mxu0 %vm5034_vm8, %v11457_v54  ;;  %8044 = vmatmul.mubr.msk.bf16.vlgmr.msra.gmra.mrb[240].mxu1 %vm5034_vm8, %v11457_v54 }
 0x67c   : > { %v7193_v47 = vadd.f32 %v7191_v36, %v7189_v13  ;;  %6657 = vmatpush1.bf16.msra.mxu0 %v7656_v27  ;;  %6716 = vmatpush1.bf16.msra.mxu1 %v7658_v62  ;;  %v5193_v36 = vsel %vm5047_vm7, %v7912_v19, 0  ;;  %v5199_v27 = vsel %vm5047_vm7, %v7914_v37, 0 }
 0x67d   : > { %6576 = vmatprep.mubr.bf16.mxu0 %v12145_v0  ;;  %6658 = vmatprep.subr.bf16.mxu0 %v7721_v6 }
 0x67e   : > { %v11854_v44 = vadd.f32 %v7195_v35, %v7193_v47  ;;  %v5760_v40 = vpop.f32.mrb[140].mxu0  ;;  %6635 = vmatprep.mubr.bf16.mxu1 %v12145_v0  ;;  %v5819_v20 = vpop.f32.mrb[136].mxu1  ;;  %6717 = vmatprep.subr.bf16.mxu1 %v7723_v14  ;;  %v3428_v47 = vld [vmem:[#allocation2 + $0x3d0] sm:$0xff] }
 0x67f   : > { %v5761_v23 = vpop.f32.mrb[141].mxu0  ;;  %v5820_v46 = vpop.f32.mrb[137].mxu1  ;;  %v7660_v40 = vcombine.low %v11863_v18, %v3364_v9  ;;  %v7725_v34 = vcombine.high %v3396_v11, %v3428_v47 }
 0x680   : > { %v5762_v21 = vpop.f32.mrb[142].mxu0  ;;  %6659 = vmatpush1.bf16.msra.mxu0 %v7720_v4  ;;  %v5821_v58 = vpop.f32.mrb[138].mxu1  ;;  %6718 = vmatpush1.bf16.msra.mxu1 %v7722_v32  ;;  %v3429_v23 = vld [vmem:[#allocation2 + $0x3d8] sm:$0xff]  ;;  %v7662_v46 = vcombine.low %v11865_v55, %v3365_v17 }
 0x681   : > { %v5763_v38 = vpop.f32.mrb[143].mxu0  ;;  %6660 = vmatprep.subr.bf16.mxu0 %v7785_v39  ;;  %v5822_v24 = vpop.f32.mrb[139].mxu1  ;;  %6719 = vmatprep.subr.bf16.mxu1 %v7787_v26  ;;  %v3397_v26 = vld [vmem:[#allocation2 + $0x2d8] sm:$0xff] }
 0x682   : > { %v3492_v38 = vld [vmem:[#allocation2 + $0x5d0] sm:$0xff]  ;;  %v7727_v24 = vcombine.high %v3397_v26, %v3429_v23 }
 0x683   : > { %8040 = vmatmul.mubr.msk.bf16.gmra.mrb[248].mxu0 %vm5034_vm8, %v11469_v56  ;;  %8045 = vmatmul.mubr.msk.bf16.gmra.mrb[244].mxu1 %vm5034_vm8, %v11469_v56  ;;  %v7789_v30 = vcombine.high %v3460_v8, %v3492_v38  ;;  %v7788_v9 = vcombine.low %v3460_v8, %v3492_v38 }
 0x684   : > { %6661 = vmatpush1.bf16.msra.mxu0 %v7784_v10  ;;  %6582 = vmatprep.mubr.bf16.mxu0 %v12145_v0 }
 0x685   : > { %6641 = vmatprep.mubr.bf16.mxu1 %v12145_v0  ;;  %6720 = vmatpush1.bf16.msra.mxu1 %v7786_v3  ;;  %v3461_v3 = vld [vmem:[#allocation2 + $0x4d8] sm:$0xff] }
 0x686   : > { %v5766_v22 = vpop.f32.mrb[144].mxu0  ;;  %6662 = vmatprep.subr.bf16.mxu0 %v7849_v49  ;;  %v5825_v16 = vpop.f32.mrb[140].mxu1  ;;  %6721 = vmatprep.subr.bf16.mxu1 %v7851_v51  ;;  %v3493_v49 = vld [vmem:[#allocation2 + $0x5d8] sm:$0xff] }
 0x687   : > { %v5767_v61 = vpop.f32.mrb[145].mxu0  ;;  %v5826_v7 = vpop.f32.mrb[141].mxu1  ;;  %v7791_v22 = vcombine.high %v3461_v3, %v3493_v49  ;;  %v3556_v16 = vld [vmem:[#allocation2 + $0x7d0] sm:$0xff] }
 0x688   : > { %v5768_v59 = vpop.f32.mrb[146].mxu0  ;;  %6663 = vmatpush1.bf16.msra.mxu0 %v7848_v1  ;;  %v5827_v5 = vpop.f32.mrb[142].mxu1  ;;  %v7726_v1 = vcombine.low %v3397_v26, %v3429_v23  ;;  %v3524_v61 = vld [vmem:[#allocation2 + $0x6d0] sm:$0xff]  ;;  %v3557_v7 = vld [vmem:[#allocation2 + $0x7d8] sm:$0xff] }
 0x689   : > { %v5769_v60 = vpop.f32.mrb[147].mxu0  ;;  %8048 = vmatprep.subr.msk.bf16.mxu0 %vm5047_vm7, %v7913_v2  ;;  %v5828_v42 = vpop.f32.mrb[143].mxu1  ;;  %6722 = vmatpush1.bf16.msra.mxu1 %v7850_v29  ;;  %v3525_v59 = vld [vmem:[#allocation2 + $0x6d8] sm:$0xff]  ;;  %v7790_v5 = vcombine.low %v3461_v3, %v3493_v49  ;;  %v3398_v49 = vld [vmem:[#allocation2 + $0x2e0] sm:$0xff] }
 0x68a   : > { %8053 = vmatprep.subr.msk.bf16.mxu1 %vm5047_vm7, %v7915_v63  ;;  %v7853_v42 = vcombine.high %v3524_v61, %v3556_v16 }
 0x68b   : > { %8041 = vmatmul.mubr.msk.bf16.gmra.mrb[252].mxu0 %vm5034_vm8, %v11481_v25  ;;  %8046 = vmatmul.mubr.msk.bf16.gmra.mrb[248].mxu1 %vm5034_vm8, %v11481_v25 }
 0x68c   : > { %6590 = vmatprep.mubr.bf16.mxu0 %v12145_v0  ;;  %6649 = vmatprep.mubr.bf16.mxu1 %v12145_v0 }
 0x68d   : > { %6665 = vmatpush1.bf16.msra.mxu0 %v5193_v36  ;;  %6724 = vmatpush1.bf16.msra.mxu1 %v5199_v27  ;;  %v3588_v36 = vld [vmem:[#allocation2 + $0x8d0] sm:$0x77]  ;;  %v7852_v27 = vcombine.low %v3524_v61, %v3556_v16 }
 0x68e   : > { %v5864_v48 = vpop.f32.mrb[148].mxu0  ;;  %6774 = vmatprep.subr.bf16.mxu0 %v7661_v57  ;;  %v5923_v41 = vpop.f32.mrb[144].mxu1  ;;  %6833 = vmatprep.subr.bf16.mxu1 %v7663_v53  ;;  %v7855_v57 = vcombine.high %v3525_v59, %v3557_v7  ;;  %v3589_v53 = vld [vmem:[#allocation2 + $0x8d8] sm:$0x77] }
 0x68f   : > { %v5865_v28 = vpop.f32.mrb[149].mxu0  ;;  %v5924_v13 = vpop.f32.mrb[145].mxu1  ;;  %v7917_v48 = vcombine.high %v3588_v36, %v3588_v36  ;;  %v7854_v41 = vcombine.low %v3525_v59, %v3557_v7  ;;  %v3462_v59 = vld [vmem:[#allocation2 + $0x4e0] sm:$0xff] }
 0x690   : > { %v5866_v62 = vpop.f32.mrb[150].mxu0  ;;  %v5925_v52 = vpop.f32.mrb[146].mxu1  ;;  %v3494_v7 = vld [vmem:[#allocation2 + $0x5e0] sm:$0xff] }
 0x691   : > { %v5867_v35 = vpop.f32.mrb[151].mxu0  ;;  %v5926_v6 = vpop.f32.mrb[147].mxu1  ;;  %v7916_v62 = vcombine.low %v3588_v36, %v3588_v36  ;;  %v7919_v52 = vcombine.high %v3589_v53, %v3589_v53  ;;  %v7793_v36 = vcombine.high %v3462_v59, %v3494_v7 }
 0x692   : > { %v7918_v6 = vcombine.low %v3589_v53, %v3589_v53 }
 0x693   : > { %8042 = vmatmul.mubr.msk.bf16.gmra.mrb[0].mxu0 %vm5034_vm8, %v11497_v15  ;;  %8047 = vmatmul.mubr.msk.bf16.gmra.mrb[252].mxu1 %vm5034_vm8, %v11497_v15 }
 0x694   : > { %6688 = vmatprep.mubr.bf16.mxu0 %v12145_v0  ;;  %6747 = vmatprep.mubr.bf16.mxu1 %v12145_v0  ;;  %v5211_v23 = vsel %vm5047_vm7, %v7918_v6, 0 }
 0x696   : > { %v5870_v43 = vpop.f32.mrb[152].mxu0  ;;  %v5929_v31 = vpop.f32.mrb[148].mxu1 }
 0x697   : > { %v7199_v33 = vrot.slane %v5870_v43, 4  ;;  %v5872_v14 = vpop.f32.mrb[153].mxu0  ;;  %v5931_v39 = vpop.f32.mrb[149].mxu1  ;;  %v7207_v50 = vrot.slane %v5929_v31, 6  ;;  %v3334_v43 = vld [vmem:[#allocation2 + $0xe0] sm:$0xff] }
 0x698   : > { %v7203_v4 = vrot.slane %v5872_v14, 5  ;;  %v5874_v32 = vpop.f32.mrb[154].mxu0  ;;  %v5933_v21 = vpop.f32.mrb[150].mxu1  ;;  %v7211_v51 = vrot.slane %v5931_v39, 7 }
 0x699   : > { %v7201_v20 = vadd.f32 %v7199_v33, %v11854_v44  ;;  %v5875_v45 = vpop.f32.mrb[155].mxu0  ;;  %v5934_v10 = vpop.f32.mrb[151].mxu1  ;;  %v7724_v44 = vcombine.low %v3396_v11, %v3428_v47  ;;  %v3366_v33 = vld [vmem:[#allocation2 + $0x1e0] sm:$0xff]  ;;  %v3335_v11 = vld [vmem:[#allocation2 + $0xe8] sm:$0xff] }
 0x69a   : > { %v3367_v47 = vld [vmem:[#allocation2 + $0x1e8] sm:$0xff]  ;;  %v7665_v26 = vcombine.high %v3334_v43, %v3366_v33 }
 0x69b   : > { %v7205_v58 = vadd.f32 %v7203_v4, %v7201_v20  ;;  %8049 = vmatmul.mubr.msk.bf16.vlgmr.msra.gmra.mrb[4].mxu0 %vm5034_vm8, %v11457_v54  ;;  %8054 = vmatmul.mubr.msk.bf16.vlgmr.msra.gmra.mrb[0].mxu1 %vm5034_vm8, %v11457_v54  ;;  %v7667_v20 = vcombine.high %v3335_v11, %v3367_v47  ;;  %v7666_v61 = vcombine.low %v3335_v11, %v3367_v47 }
 0x69c   : > { %6775 = vmatpush1.bf16.msra.mxu0 %v7660_v40  ;;  %6834 = vmatpush1.bf16.msra.mxu1 %v7662_v46  ;;  %v5205_v40 = vsel %vm5047_vm7, %v7916_v62, 0  ;;  %v3526_v62 = vld [vmem:[#allocation2 + $0x6e0] sm:$0xff] }
 0x69d   : > { %v7209_v12 = vadd.f32 %v7207_v50, %v7205_v58  ;;  %6694 = vmatprep.mubr.bf16.mxu0 %v12145_v0  ;;  %6776 = vmatprep.subr.bf16.mxu0 %v7725_v34 }
 0x69e   : > { %v5878_v2 = vpop.f32.mrb[156].mxu0  ;;  %6753 = vmatprep.mubr.bf16.mxu1 %v12145_v0  ;;  %v5937_v19 = vpop.f32.mrb[152].mxu1  ;;  %6835 = vmatprep.subr.bf16.mxu1 %v7727_v24 }
 0x69f   : > { %v5879_v29 = vpop.f32.mrb[157].mxu0  ;;  %v11894_v63 = vadd.f32 %v7211_v51, %v7209_v12  ;;  %v5938_v18 = vpop.f32.mrb[153].mxu1  ;;  %v3431_v2 = vld [vmem:[#allocation2 + $0x3e8] sm:$0xff] }
 0x6a0   : > { %v5880_v37 = vpop.f32.mrb[158].mxu0  ;;  %6777 = vmatpush1.bf16.msra.mxu0 %v7724_v44  ;;  %v5939_v17 = vpop.f32.mrb[154].mxu1  ;;  %6836 = vmatpush1.bf16.msra.mxu1 %v7726_v1  ;;  %v3430_v44 = vld [vmem:[#allocation2 + $0x3e0] sm:$0xff]  ;;  %v7664_v1 = vcombine.low %v3334_v43, %v3366_v33  ;;  %v7792_v43 = vcombine.low %v3462_v59, %v3494_v7  ;;  %v3527_v33 = vld [vmem:[#allocation2 + $0x6e8] sm:$0xff] }
 0x6a1   : > { %v5881_v55 = vpop.f32.mrb[159].mxu0  ;;  %6778 = vmatprep.subr.bf16.mxu0 %v7789_v30  ;;  %v5940_v60 = vpop.f32.mrb[155].mxu1  ;;  %6837 = vmatprep.subr.bf16.mxu1 %v7791_v22  ;;  %v3399_v30 = vld [vmem:[#allocation2 + $0x2e8] sm:$0xff] }
 0x6a2   : > { %v7731_v55 = vcombine.high %v3399_v30, %v3431_v2  ;;  %v3463_v17 = vld [vmem:[#allocation2 + $0x4e8] sm:$0xff] }
 0x6a3   : > { %8050 = vmatmul.mubr.msk.bf16.gmra.mrb[8].mxu0 %vm5034_vm8, %v11469_v56  ;;  %8055 = vmatmul.mubr.msk.bf16.gmra.mrb[4].mxu1 %vm5034_vm8, %v11469_v56  ;;  %v3495_v60 = vld [vmem:[#allocation2 + $0x5e8] sm:$0xff] }
 0x6a4   : > { %6779 = vmatpush1.bf16.msra.mxu0 %v7788_v9  ;;  %6700 = vmatprep.mubr.bf16.mxu0 %v12145_v0  ;;  %v7729_v9 = vcombine.high %v3398_v49, %v3430_v44 }
 0x6a5   : > { %6759 = vmatprep.mubr.bf16.mxu1 %v12145_v0  ;;  %6838 = vmatpush1.bf16.msra.mxu1 %v7790_v5 }
 0x6a6   : > { %v5884_v28 = vpop.f32.mrb[160].mxu0  ;;  %6780 = vmatprep.subr.bf16.mxu0 %v7853_v42  ;;  %v5943_v35 = vpop.f32.mrb[156].mxu1  ;;  %6839 = vmatprep.subr.bf16.mxu1 %v7855_v57  ;;  %v7730_v42 = vcombine.low %v3399_v30, %v3431_v2 }
 0x6a7   : > { %v5885_v13 = vpop.f32.mrb[161].mxu0  ;;  %v5944_v31 = vpop.f32.mrb[157].mxu1 }
 0x6a8   : > { %v5886_v14 = vpop.f32.mrb[162].mxu0  ;;  %6781 = vmatpush1.bf16.msra.mxu0 %v7852_v27  ;;  %v5945_v32 = vpop.f32.mrb[158].mxu1  ;;  %v3558_v13 = vld [vmem:[#allocation2 + $0x7e0] sm:$0xff] }
 0x6a9   : > { %v5887_v4 = vpop.f32.mrb[163].mxu0  ;;  %8058 = vmatprep.subr.msk.bf16.mxu0 %vm5047_vm7, %v7917_v48  ;;  %v5946_v39 = vpop.f32.mrb[159].mxu1  ;;  %6840 = vmatpush1.bf16.msra.mxu1 %v7854_v41  ;;  %v7795_v48 = vcombine.high %v3463_v17, %v3495_v60  ;;  %v3559_v14 = vld [vmem:[#allocation2 + $0x7e8] sm:$0xff]  ;;  %v7857_v32 = vcombine.high %v3526_v62, %v3558_v13 }
 0x6aa   : > { %8063 = vmatprep.subr.msk.bf16.mxu1 %vm5047_vm7, %v7919_v52  ;;  %v7794_v4 = vcombine.low %v3463_v17, %v3495_v60  ;;  %v3590_v39 = vld [vmem:[#allocation2 + $0x8e0] sm:$0x77] }
 0x6ab   : > { %8051 = vmatmul.mubr.msk.bf16.gmra.mrb[12].mxu0 %vm5034_vm8, %v11481_v25  ;;  %8056 = vmatmul.mubr.msk.bf16.gmra.mrb[8].mxu1 %vm5034_vm8, %v11481_v25 }
 0x6ac   : > { %6706 = vmatprep.mubr.bf16.mxu0 %v12145_v0  ;;  %6765 = vmatprep.mubr.bf16.mxu1 %v12145_v0 }
 0x6ad   : > { %6783 = vmatpush1.bf16.msra.mxu0 %v5205_v40  ;;  %6842 = vmatpush1.bf16.msra.mxu1 %v5211_v23  ;;  %v7859_v40 = vcombine.high %v3527_v33, %v3559_v14  ;;  %v3591_v23 = vld [vmem:[#allocation2 + $0x8e8] sm:$0x77] }
 0x6ae   : > { %v5982_v50 = vpop.f32.mrb[164].mxu0  ;;  %6892 = vmatprep.subr.bf16.mxu0 %v7665_v26  ;;  %v6041_v21 = vpop.f32.mrb[160].mxu1  ;;  %6951 = vmatprep.subr.bf16.mxu1 %v7667_v20  ;;  %v7856_v26 = vcombine.low %v3526_v62, %v3558_v13  ;;  %v7921_v20 = vcombine.high %v3590_v39, %v3590_v39 }
 0x6af   : > { %v5983_v45 = vpop.f32.mrb[165].mxu0  ;;  %v6042_v10 = vpop.f32.mrb[161].mxu1  ;;  %v7920_v21 = vcombine.low %v3590_v39, %v3590_v39 }
 0x6b0   : > { %v5984_v46 = vpop.f32.mrb[166].mxu0  ;;  %v6043_v8 = vpop.f32.mrb[162].mxu1  ;;  %v7858_v45 = vcombine.low %v3527_v33, %v3559_v14  ;;  %v3496_v33 = vld [vmem:[#allocation2 + $0x5f0] sm:$0xff] }
 0x6b1   : > { %v5985_v34 = vpop.f32.mrb[167].mxu0  ;;  %v6044_v38 = vpop.f32.mrb[163].mxu1  ;;  %v7922_v8 = vcombine.low %v3591_v23, %v3591_v23  ;;  %v5217_v30 = vsel %vm5047_vm7, %v7920_v21, 0 }
 0x6b2   : > { %v7923_v34 = vcombine.high %v3591_v23, %v3591_v23  ;;  %v3336_v38 = vld [vmem:[#allocation2 + $0xf0] sm:$0xff] }
 0x6b3   : > { %8052 = vmatmul.mubr.msk.bf16.gmra.mrb[16].mxu0 %vm5034_vm8, %v11497_v15  ;;  %8057 = vmatmul.mubr.msk.bf16.gmra.mrb[12].mxu1 %vm5034_vm8, %v11497_v15 }
 0x6b4   : > { %6806 = vmatprep.mubr.bf16.mxu0 %v12145_v0  ;;  %6865 = vmatprep.mubr.bf16.mxu1 %v12145_v0 }
 0x6b6   : > { %v5988_v58 = vpop.f32.mrb[168].mxu0  ;;  %v6047_v3 = vpop.f32.mrb[164].mxu1 }
 0x6b7   : > { %v5989_v24 = vpop.f32.mrb[169].mxu0  ;;  %v6048_v51 = vpop.f32.mrb[165].mxu1  ;;  %v3368_v58 = vld [vmem:[#allocation2 + $0x1f0] sm:$0xff] }
 0x6b8   : > { %v5990_v12 = vpop.f32.mrb[170].mxu0  ;;  %v6049_v19 = vpop.f32.mrb[166].mxu1  ;;  %v7669_v2 = vcombine.high %v3336_v38, %v3368_v58 }
 0x6b9   : > { %v7214_v22 = vadd.f32 %v11894_v63, %v5990_v12  ;;  %v5992_v29 = vpop.f32.mrb[171].mxu0  ;;  %v7220_v37 = vrot.slane %v6049_v19, 2  ;;  %v6051_v18 = vpop.f32.mrb[167].mxu1  ;;  %v7728_v63 = vcombine.low %v3398_v49, %v3430_v44  ;;  %v3337_v49 = vld [vmem:[#allocation2 + $0xf8] sm:$0xff] }
 0x6ba   : > { %v7216_v16 = vrot.slane %v5992_v29, 1  ;;  %v7224_v27 = vrot.slane %v6051_v18, 3  ;;  %v3369_v44 = vld [vmem:[#allocation2 + $0x1f8] sm:$0xff] }
 0x6bb   : > { %8059 = vmatmul.mubr.msk.bf16.vlgmr.msra.gmra.mrb[20].mxu0 %vm5034_vm8, %v11457_v54  ;;  %8064 = vmatmul.mubr.msk.bf16.vlgmr.msra.gmra.mrb[16].mxu1 %vm5034_vm8, %v11457_v54  ;;  %v7671_v29 = vcombine.high %v3337_v49, %v3369_v44  ;;  %v7670_v62 = vcombine.low %v3337_v49, %v3369_v44 }
 0x6bc   : > { %v7218_v5 = vadd.f32 %v7216_v16, %v7214_v22  ;;  %6893 = vmatpush1.bf16.msra.mxu0 %v7664_v1  ;;  %6952 = vmatpush1.bf16.msra.mxu1 %v7666_v61  ;;  %v5223_v22 = vsel %vm5047_vm7, %v7922_v8, 0 }
 0x6bd   : > { %6812 = vmatprep.mubr.bf16.mxu0 %v12145_v0  ;;  %6894 = vmatprep.subr.bf16.mxu0 %v7729_v9 }
 0x6be   : > { %v7222_v57 = vadd.f32 %v7220_v37, %v7218_v5  ;;  %v5996_v53 = vpop.f32.mrb[172].mxu0  ;;  %6871 = vmatprep.mubr.bf16.mxu1 %v12145_v0  ;;  %v6055_v41 = vpop.f32.mrb[168].mxu1  ;;  %6953 = vmatprep.subr.bf16.mxu1 %v7731_v55  ;;  %v3400_v5 = vld [vmem:[#allocation2 + $0x2f0] sm:$0xff] }
 0x6bf   : > { %v5997_v28 = vpop.f32.mrb[173].mxu0  ;;  %v6056_v6 = vpop.f32.mrb[169].mxu1  ;;  %v3433_v53 = vld [vmem:[#allocation2 + $0x3f8] sm:$0xff] }
 0x6c0   : > { %v11925_v35 = vadd.f32 %v7224_v27, %v7222_v57  ;;  %v5998_v52 = vpop.f32.mrb[174].mxu0  ;;  %6895 = vmatpush1.bf16.msra.mxu0 %v7728_v63  ;;  %v6057_v11 = vpop.f32.mrb[170].mxu1  ;;  %6954 = vmatpush1.bf16.msra.mxu1 %v7730_v42  ;;  %v3432_v63 = vld [vmem:[#allocation2 + $0x3f0] sm:$0xff]  ;;  %v7668_v57 = vcombine.low %v3336_v38, %v3368_v58  ;;  %v3401_v27 = vld [vmem:[#allocation2 + $0x2f8] sm:$0xff] }
 0x6c1   : > { %v5999_v31 = vpop.f32.mrb[175].mxu0  ;;  %6896 = vmatprep.subr.bf16.mxu0 %v7793_v36  ;;  %v6058_v47 = vpop.f32.mrb[171].mxu1  ;;  %6955 = vmatprep.subr.bf16.mxu1 %v7795_v48  ;;  %v7733_v6 = vcombine.high %v3400_v5, %v3432_v63  ;;  %v3465_v11 = vld [vmem:[#allocation2 + $0x4f8] sm:$0xff] }
 0x6c2   : > { %v7735_v31 = vcombine.high %v3401_v27, %v3433_v53  ;;  %v3497_v47 = vld [vmem:[#allocation2 + $0x5f8] sm:$0xff] }
 0x6c3   : > { %8060 = vmatmul.mubr.msk.bf16.gmra.mrb[24].mxu0 %vm5034_vm8, %v11469_v56  ;;  %8065 = vmatmul.mubr.msk.bf16.gmra.mrb[20].mxu1 %vm5034_vm8, %v11469_v56  ;;  %v3529_v58 = vld [vmem:[#allocation2 + $0x6f8] sm:$0xff] }
 0x6c4   : > { %6897 = vmatpush1.bf16.msra.mxu0 %v7792_v43  ;;  %6818 = vmatprep.mubr.bf16.mxu0 %v12145_v0  ;;  %v3464_v43 = vld [vmem:[#allocation2 + $0x4f0] sm:$0xff] }
 0x6c5   : > { %6877 = vmatprep.mubr.bf16.mxu1 %v12145_v0  ;;  %6956 = vmatpush1.bf16.msra.mxu1 %v7794_v4  ;;  %v7732_v4 = vcombine.low %v3400_v5, %v3432_v63  ;;  %v7796_v38 = vcombine.low %v3464_v43, %v3496_v33 }
 0x6c6   : > { %v6002_v50 = vpop.f32.mrb[176].mxu0  ;;  %6898 = vmatprep.subr.bf16.mxu0 %v7857_v32  ;;  %v6061_v10 = vpop.f32.mrb[172].mxu1  ;;  %6957 = vmatprep.subr.bf16.mxu1 %v7859_v40  ;;  %v7734_v40 = vcombine.low %v3401_v27, %v3433_v53 }
 0x6c7   : > { %v6003_v46 = vpop.f32.mrb[177].mxu0  ;;  %v6062_v3 = vpop.f32.mrb[173].mxu1  ;;  %v3560_v10 = vld [vmem:[#allocation2 + $0x7f0] sm:$0xff] }
 0x6c8   : > { %v6004_v24 = vpop.f32.mrb[178].mxu0  ;;  %6899 = vmatpush1.bf16.msra.mxu0 %v7856_v26  ;;  %v6063_v51 = vpop.f32.mrb[174].mxu1  ;;  %v7797_v26 = vcombine.high %v3464_v43, %v3496_v33  ;;  %v3528_v46 = vld [vmem:[#allocation2 + $0x6f0] sm:$0xff] }
 0x6c9   : > { %v6005_v12 = vpop.f32.mrb[179].mxu0  ;;  %8068 = vmatprep.subr.msk.bf16.mxu0 %vm5047_vm7, %v7921_v20  ;;  %v6064_v1 = vpop.f32.mrb[175].mxu1  ;;  %6958 = vmatpush1.bf16.msra.mxu1 %v7858_v45  ;;  %v3561_v24 = vld [vmem:[#allocation2 + $0x7f8] sm:$0xff]  ;;  %v7798_v51 = vcombine.low %v3465_v11, %v3497_v47 }
 0x6ca   : > { %8073 = vmatprep.subr.msk.bf16.mxu1 %vm5047_vm7, %v7923_v34  ;;  %v7861_v1 = vcombine.high %v3528_v46, %v3560_v10 }
 0x6cb   : > { %8061 = vmatmul.mubr.msk.bf16.gmra.mrb[28].mxu0 %vm5034_vm8, %v11481_v25  ;;  %8066 = vmatmul.mubr.msk.bf16.gmra.mrb[24].mxu1 %vm5034_vm8, %v11481_v25 }
 0x6cc   : > { %6824 = vmatprep.mubr.bf16.mxu0 %v12145_v0  ;;  %6883 = vmatprep.mubr.bf16.mxu1 %v12145_v0 }
 0x6cd   : > { %6901 = vmatpush1.bf16.msra.mxu0 %v5217_v30  ;;  %6960 = vmatpush1.bf16.msra.mxu1 %v5223_v22  ;;  %v3592_v30 = vld [vmem:[#allocation2 + $0x8f0] sm:$0x77]  ;;  %v7860_v22 = vcombine.low %v3528_v46, %v3560_v10 }
 0x6ce   : > { %v6100_v19 = vpop.f32.mrb[180].mxu0  ;;  %7010 = vmatprep.subr.bf16.mxu0 %v7669_v2  ;;  %v6159_v16 = vpop.f32.mrb[176].mxu1  ;;  %7069 = vmatprep.subr.bf16.mxu1 %v7671_v29  ;;  %v7863_v2 = vcombine.high %v3529_v58, %v3561_v24  ;;  %v3593_v29 = vld [vmem:[#allocation2 + $0x8f8] sm:$0x77] }
 0x6cf   : > { %v6101_v61 = vpop.f32.mrb[181].mxu0  ;;  %v6160_v18 = vpop.f32.mrb[177].mxu1  ;;  %v7925_v19 = vcombine.high %v3592_v30, %v3592_v30  ;;  %v7862_v16 = vcombine.low %v3529_v58, %v3561_v24 }
 0x6d0   : > { %v6102_v37 = vpop.f32.mrb[182].mxu0  ;;  %v6161_v59 = vpop.f32.mrb[178].mxu1 }
 0x6d1   : > { %v6103_v9 = vpop.f32.mrb[183].mxu0  ;;  %v6162_v7 = vpop.f32.mrb[179].mxu1  ;;  %v7924_v37 = vcombine.low %v3592_v30, %v3592_v30  ;;  %v7927_v59 = vcombine.high %v3593_v29, %v3593_v29 }
 0x6d2   : > { %v7926_v7 = vcombine.low %v3593_v29, %v3593_v29 }
 0x6d3   : > { %8062 = vmatmul.mubr.msk.bf16.gmra.mrb[32].mxu0 %vm5034_vm8, %v11497_v15  ;;  %8067 = vmatmul.mubr.msk.bf16.gmra.mrb[28].mxu1 %vm5034_vm8, %v11497_v15 }
 0x6d4   : > { %6924 = vmatprep.mubr.bf16.mxu0 %v12145_v0  ;;  %6983 = vmatprep.mubr.bf16.mxu1 %v12145_v0 }
 0x6d6   : > { %v6106_v55 = vpop.f32.mrb[184].mxu0  ;;  %v6165_v60 = vpop.f32.mrb[180].mxu1 }
 0x6d7   : > { %v6107_v17 = vpop.f32.mrb[185].mxu0  ;;  %v6166_v36 = vpop.f32.mrb[181].mxu1 }
 0x6d8   : > { %v6108_v42 = vpop.f32.mrb[186].mxu0  ;;  %v6167_v41 = vpop.f32.mrb[182].mxu1  ;;  %v5235_v36 = vsel %vm5047_vm7, %v7926_v7, 0 }
 0x6d9   : > { %v7228_v48 = vrot.slane %v6108_v42, 4  ;;  %v6110_v28 = vpop.f32.mrb[187].mxu0  ;;  %v6169_v52 = vpop.f32.mrb[183].mxu1  ;;  %v7236_v39 = vrot.slane %v6167_v41, 6  ;;  %v5229_v42 = vsel %vm5047_vm7, %v7924_v37, 0 }
 0x6da   : > { %v7232_v13 = vrot.slane %v6110_v28, 5  ;;  %v7240_v50 = vrot.slane %v6169_v52, 7 }
 0x6db   : > { %v7230_v14 = vadd.f32 %v7228_v48, %v11925_v35  ;;  %8069 = vmatmul.mubr.msk.bf16.vlgmr.msra.gmra.mrb[36].mxu0 %vm5034_vm8, %v11457_v54  ;;  %8074 = vmatmul.mubr.msk.bf16.vlgmr.msra.gmra.mrb[32].mxu1 %vm5034_vm8, %v11457_v54  ;;  %v7799_v35 = vcombine.high %v3465_v11, %v3497_v47 }
 0x6dc   : > { %7011 = vmatpush1.bf16.msra.mxu0 %v7668_v57  ;;  %7070 = vmatpush1.bf16.msra.mxu1 %v7670_v62 }
 0x6dd   : > { %v7234_v32 = vadd.f32 %v7232_v13, %v7230_v14  ;;  %6930 = vmatprep.mubr.bf16.mxu0 %v12145_v0  ;;  %7012 = vmatprep.subr.bf16.mxu0 %v7733_v6 }
 0x6de   : > { %v6114_v23 = vpop.f32.mrb[188].mxu0  ;;  %6989 = vmatprep.mubr.bf16.mxu1 %v12145_v0  ;;  %v6173_v21 = vpop.f32.mrb[184].mxu1  ;;  %7071 = vmatprep.subr.bf16.mxu1 %v7735_v31 }
 0x6df   : > { %v7238_v20 = vadd.f32 %v7236_v39, %v7234_v32  ;;  %v6115_v45 = vpop.f32.mrb[189].mxu0  ;;  %v6174_v8 = vpop.f32.mrb[185].mxu1 }
 0x6e0   : > { %v6116_v34 = vpop.f32.mrb[190].mxu0  ;;  %7013 = vmatpush1.bf16.msra.mxu0 %v7732_v4  ;;  %v6175_v49 = vpop.f32.mrb[186].mxu1  ;;  %7072 = vmatpush1.bf16.msra.mxu1 %v7734_v40 }
 0x6e1   : > { %v6117_v3 = vpop.f32.mrb[191].mxu0  ;;  %7014 = vmatprep.subr.bf16.mxu0 %v7797_v26  ;;  %v11956_v44 = vadd.f32 %v7240_v50, %v7238_v20  ;;  %v6176_v12 = vpop.f32.mrb[187].mxu1  ;;  %7073 = vmatprep.subr.bf16.mxu1 %v7799_v35 }
 0x6e3   : > { %8070 = vmatmul.mubr.msk.bf16.gmra.mrb[40].mxu0 %vm5034_vm8, %v11469_v56  ;;  %8075 = vmatmul.mubr.msk.bf16.gmra.mrb[36].mxu1 %vm5034_vm8, %v11469_v56 }
 0x6e4   : > { %7015 = vmatpush1.bf16.msra.mxu0 %v7796_v38  ;;  %6936 = vmatprep.mubr.bf16.mxu0 %v12145_v0 }
 0x6e5   : > { %6995 = vmatprep.mubr.bf16.mxu1 %v12145_v0  ;;  %7074 = vmatpush1.bf16.msra.mxu1 %v7798_v51 }
 0x6e6   : > { %v6120_v61 = vpop.f32.mrb[192].mxu0  ;;  %7016 = vmatprep.subr.bf16.mxu0 %v7861_v1  ;;  %v6179_v9 = vpop.f32.mrb[188].mxu1  ;;  %7075 = vmatprep.subr.bf16.mxu1 %v7863_v2 }
 0x6e7   : > { %v6121_v18 = vpop.f32.mrb[193].mxu0  ;;  %v6180_v17 = vpop.f32.mrb[189].mxu1 }
 0x6e8   : > { %v6122_v55 = vpop.f32.mrb[194].mxu0  ;;  %7017 = vmatpush1.bf16.msra.mxu0 %v7860_v22  ;;  %v6181_v5 = vpop.f32.mrb[190].mxu1 }
 0x6e9   : > { %v6123_v60 = vpop.f32.mrb[195].mxu0  ;;  %8078 = vmatprep.subr.msk.bf16.mxu0 %vm5047_vm7, %v7925_v19  ;;  %v6182_v63 = vpop.f32.mrb[191].mxu1  ;;  %7076 = vmatpush1.bf16.msra.mxu1 %v7862_v16 }
 0x6ea   : > { %8083 = vmatprep.subr.msk.bf16.mxu1 %vm5047_vm7, %v7927_v59 }
 0x6eb   : > { %8071 = vmatmul.mubr.msk.bf16.gmra.mrb[44].mxu0 %vm5034_vm8, %v11481_v25  ;;  %8076 = vmatmul.mubr.msk.bf16.gmra.mrb[40].mxu1 %vm5034_vm8, %v11481_v25 }
 0x6ec   : > { %6942 = vmatprep.mubr.bf16.mxu0 %v12145_v0  ;;  %7001 = vmatprep.mubr.bf16.mxu1 %v12145_v0 }
 0x6ed   : > { %7019 = vmatpush1.bf16.msra.mxu0 %v5229_v42  ;;  %7078 = vmatpush1.bf16.msra.mxu1 %v5235_v36 }
 0x6ee   : > { %v6218_v57 = vpop.f32.mrb[196].mxu0  ;;  %v6277_v53 = vpop.f32.mrb[192].mxu1 }
 0x6ef   : > { %v6219_v27 = vpop.f32.mrb[197].mxu0  ;;  %v6278_v28 = vpop.f32.mrb[193].mxu1 }
 0x6f0   : > { %v6220_v48 = vpop.f32.mrb[198].mxu0  ;;  %v6279_v62 = vpop.f32.mrb[194].mxu1 }
 0x6f1   : > { %v6221_v41 = vpop.f32.mrb[199].mxu0  ;;  %v6280_v13 = vpop.f32.mrb[195].mxu1 }
 0x6f3   : > { %8072 = vmatmul.mubr.msk.bf16.gmra.mrb[48].mxu0 %vm5034_vm8, %v11497_v15  ;;  %8077 = vmatmul.mubr.msk.bf16.gmra.mrb[44].mxu1 %vm5034_vm8, %v11497_v15 }
 0x6f4   : > { %7042 = vmatprep.mubr.bf16.mxu0 %v12145_v0  ;;  %7101 = vmatprep.mubr.bf16.mxu1 %v12145_v0 }
 0x6f6   : > { %v6224_v52 = vpop.f32.mrb[200].mxu0  ;;  %v6283_v43 = vpop.f32.mrb[196].mxu1 }
 0x6f7   : > { %v6225_v6 = vpop.f32.mrb[201].mxu0  ;;  %v6284_v14 = vpop.f32.mrb[197].mxu1 }
 0x6f8   : > { %v6226_v33 = vpop.f32.mrb[202].mxu0  ;;  %v6285_v11 = vpop.f32.mrb[198].mxu1 }
 0x6f9   : > { %v6227_v31 = vpop.f32.mrb[203].mxu0  ;;  %v6286_v47 = vpop.f32.mrb[199].mxu1 }
 0x6fb   : > { %8079 = vmatmul.mubr.msk.bf16.vlgmr.msra.gmra.mrb[52].mxu0 %vm5034_vm8, %v11457_v54  ;;  %8084 = vmatmul.mubr.msk.bf16.vlgmr.msra.gmra.mrb[48].mxu1 %vm5034_vm8, %v11457_v54 }
 0x6fc   : > { %7048 = vmatprep.mubr.bf16.mxu0 %v12145_v0  ;;  %7107 = vmatprep.mubr.bf16.mxu1 %v12145_v0 }
 0x6fe   : > { %v6230_v4 = vpop.f32.mrb[204].mxu0  ;;  %v6289_v40 = vpop.f32.mrb[200].mxu1 }
 0x6ff   : > { %v7243_v32 = vadd.f32 %v11956_v44, %v6230_v4  ;;  %v6232_v39 = vpop.f32.mrb[205].mxu0  ;;  %v7249_v35 = vrot.slane %v6289_v40, 2  ;;  %v6291_v20 = vpop.f32.mrb[201].mxu1 }
 0x700   : > { %v7245_v26 = vrot.slane %v6232_v39, 1  ;;  %v6234_v23 = vpop.f32.mrb[206].mxu0  ;;  %v6293_v45 = vpop.f32.mrb[202].mxu1  ;;  %v7253_v46 = vrot.slane %v6291_v20, 3 }
 0x701   : > { %v6235_v50 = vpop.f32.mrb[207].mxu0  ;;  %v6294_v10 = vpop.f32.mrb[203].mxu1 }
 0x702   : > { %v7247_v21 = vadd.f32 %v7245_v26, %v7243_v32 }
 0x703   : > { %8080 = vmatmul.mubr.msk.bf16.gmra.mrb[56].mxu0 %vm5034_vm8, %v11469_v56  ;;  %8085 = vmatmul.mubr.msk.bf16.gmra.mrb[52].mxu1 %vm5034_vm8, %v11469_v56 }
 0x704   : > { %v7251_v54 = vadd.f32 %v7249_v35, %v7247_v21  ;;  %7054 = vmatprep.mubr.bf16.mxu0 %v12145_v0  ;;  %7113 = vmatprep.mubr.bf16.mxu1 %v12145_v0 }
 0x706   : > { %v7255_v34 = vadd.f32 %v7253_v46, %v7251_v54  ;;  %v6238_v8 = vpop.f32.mrb[208].mxu0  ;;  %v6297_v58 = vpop.f32.mrb[204].mxu1 }
 0x707   : > { %v6239_v38 = vpop.f32.mrb[209].mxu0  ;;  %v6298_v3 = vpop.f32.mrb[205].mxu1 }
 0x708   : > { %v6240_v24 = vpop.f32.mrb[210].mxu0  ;;  %v6299_v44 = vpop.f32.mrb[206].mxu1 }
 0x709   : > { %v6241_v49 = vpop.f32.mrb[211].mxu0  ;;  %v6300_v12 = vpop.f32.mrb[207].mxu1 }
 0x70b   : > { %8081 = vmatmul.mubr.msk.bf16.gmra.mrb[60].mxu0 %vm5034_vm8, %v11481_v25  ;;  %8086 = vmatmul.mubr.msk.bf16.gmra.mrb[56].mxu1 %vm5034_vm8, %v11481_v25 }
 0x70c   : > { %7060 = vmatprep.mubr.bf16.mxu0 %v12145_v0  ;;  %7119 = vmatprep.mubr.bf16.mxu1 %v12145_v0 }
 0x70e   : > { %v6336_v56 = vpop.f32.mrb[212].mxu0  ;;  %v6395_v1 = vpop.f32.mrb[208].mxu1 }
 0x70f   : > { %v6337_v51 = vpop.f32.mrb[213].mxu0  ;;  %v6396_v2 = vpop.f32.mrb[209].mxu1 }
 0x710   : > { %v6338_v30 = vpop.f32.mrb[214].mxu0  ;;  %v6397_v29 = vpop.f32.mrb[210].mxu1 }
 0x711   : > { %v6339_v22 = vpop.f32.mrb[215].mxu0  ;;  %v6398_v19 = vpop.f32.mrb[211].mxu1 }
 0x713   : > { %8082 = vmatmul.mubr.msk.bf16.gmra.mrb[64].mxu0 %vm5034_vm8, %v11497_v15  ;;  %8087 = vmatmul.mubr.msk.bf16.gmra.mrb[60].mxu1 %vm5034_vm8, %v11497_v15 }
 0x716   : > { %v6342_v61 = vpop.f32.mrb[216].mxu0  ;;  %v6401_v16 = vpop.f32.mrb[212].mxu1 }
 0x717   : > { %v6343_v25 = vpop.f32.mrb[217].mxu0  ;;  %v6402_v18 = vpop.f32.mrb[213].mxu1 }
 0x718   : > { %v6344_v37 = vpop.f32.mrb[218].mxu0  ;;  %v6403_v9 = vpop.f32.mrb[214].mxu1 }
 0x719   : > { %v6345_v0 = vpop.f32.mrb[219].mxu0  ;;  %v6404_v59 = vpop.f32.mrb[215].mxu1 }
 0x71e   : > { %v6348_v7 = vpop.f32.mrb[220].mxu0  ;;  %v6407_v60 = vpop.f32.mrb[216].mxu1 }
 0x71f   : > { %v7257_v55 = vrot.slane %v6348_v7, 4  ;;  %v6350_v17 = vpop.f32.mrb[221].mxu0  ;;  %v6409_v42 = vpop.f32.mrb[217].mxu1  ;;  %v7265_v57 = vrot.slane %v6407_v60, 6 }
 0x720   : > { %v7261_v5 = vrot.slane %v6350_v17, 5  ;;  %v6352_v63 = vpop.f32.mrb[222].mxu0  ;;  %v6411_v53 = vpop.f32.mrb[218].mxu1  ;;  %v7269_v41 = vrot.slane %v6409_v42, 7 }
 0x721   : > { %v7259_v36 = vadd.f32 %v7257_v55, %v7255_v34  ;;  %v6353_v27 = vpop.f32.mrb[223].mxu0  ;;  %v6412_v15 = vpop.f32.mrb[219].mxu1 }
 0x723   : > { %v7263_v48 = vadd.f32 %v7261_v5, %v7259_v36  ;;  %v7362_v36 = vld [vmem:[%s12123_s7] sm:$0xff] }
 0x725   : > { %v7267_v28 = vadd.f32 %v7265_v57, %v7263_v48  ;;  %v7363_v57 = vld [vmem:[%s12123_s7 + $0x8] sm:$0xff] }
 0x726   : > { %v6356_v62 = vpop.f32.mrb[224].mxu0  ;;  %v6415_v52 = vpop.f32.mrb[220].mxu1  ;;  %v8703_v53 = vpack.c.bf16 %v7363_v57, %v7362_v36 }
 0x727   : > { %v6357_v13 = vpop.f32.mrb[225].mxu0  ;;  %v7271_v6 = vadd.f32 %v7269_v41, %v7267_v28  ;;  %v6416_v33 = vpop.f32.mrb[221].mxu1  ;;  %v9013_v28 = vmov 0.0|0.0  }
 0x728   : > { %v6358_v43 = vpop.f32.mrb[226].mxu0  ;;  %v6417_v31 = vpop.f32.mrb[222].mxu1  ;;  %8702 = vmatprep.subr.bf16.mxu0 %v9013_v28 }
 0x729   : > { %v6359_v14 = vpop.f32.mrb[227].mxu0  ;;  %v6418_v11 = vpop.f32.mrb[223].mxu1  ;;  %8704 = vmatpush3.bf16.msra.mxu0 %v8703_v53  ;;  %v7365_v43 = vld [vmem:[%s12123_s7 + $0x18] sm:$0xff]  ;;  %v7366_v31 = vld [vmem:[%s12123_s7 + $0x20] sm:$0xff] }
 0x72a   : > { %8705 = vmatprep.subr.bf16.mxu0 %v9013_v28  ;;  %v7367_v11 = vld [vmem:[%s12123_s7 + $0x28] sm:$0xff] }
 0x72e   : > { %v6454_v47 = vpop.f32.mrb[228].mxu0  ;;  %v6513_v32 = vpop.f32.mrb[224].mxu1 }
 0x72f   : > { %v6455_v4 = vpop.f32.mrb[229].mxu0  ;;  %v6514_v40 = vpop.f32.mrb[225].mxu1 }
 0x730   : > { %v6456_v39 = vpop.f32.mrb[230].mxu0  ;;  %v6515_v23 = vpop.f32.mrb[226].mxu1  ;;  %v8709_v4 = vpack.c.bf16 %v7367_v11, %v7366_v31 }
 0x731   : > { %v6457_v26 = vpop.f32.mrb[231].mxu0  ;;  %v6516_v35 = vpop.f32.mrb[227].mxu1 }
 0x736   : > { %v6460_v20 = vpop.f32.mrb[232].mxu0  ;;  %v6519_v45 = vpop.f32.mrb[228].mxu1 }
 0x737   : > { %v6461_v50 = vpop.f32.mrb[233].mxu0  ;;  %v6520_v46 = vpop.f32.mrb[229].mxu1  ;;  %v7369_v45 = vld [vmem:[%s12123_s7 + $0x38] sm:$0xff] }
 0x738   : > { %v6462_v21 = vpop.f32.mrb[234].mxu0  ;;  %v6521_v54 = vpop.f32.mrb[230].mxu1  ;;  %v7368_v50 = vld [vmem:[%s12123_s7 + $0x30] sm:$0xff] }
 0x739   : > { %v6463_v10 = vpop.f32.mrb[235].mxu0  ;;  %v6522_v34 = vpop.f32.mrb[231].mxu1 }
 0x73a   : > { %v8712_v10 = vpack.c.bf16 %v7369_v45, %v7368_v50 }
 0x73e   : > { %v6466_v8 = vpop.f32.mrb[236].mxu0  ;;  %v6525_v58 = vpop.f32.mrb[232].mxu1 }
 0x73f   : > { %v6467_v38 = vpop.f32.mrb[237].mxu0  ;;  %v6526_v3 = vpop.f32.mrb[233].mxu1  ;;  %v7371_v58 = vld [vmem:[%s12123_s7 + $0x48] sm:$0xff] }
 0x740   : > { %v6468_v24 = vpop.f32.mrb[238].mxu0  ;;  %v6527_v12 = vpop.f32.mrb[234].mxu1  ;;  %v7370_v38 = vld [vmem:[%s12123_s7 + $0x40] sm:$0xff] }
 0x741   : > { %v7272_v49 = vadd.f32 %v7271_v6, %v6468_v24  ;;  %v6470_v44 = vpop.f32.mrb[239].mxu0  ;;  %v7278_v51 = vrot.slane %v6527_v12, 2  ;;  %v6529_v1 = vpop.f32.mrb[235].mxu1  ;;  %v7364_v6 = vld [vmem:[%s12123_s7 + $0x10] sm:$0xff]  ;;  %v8715_v3 = vpack.c.bf16 %v7371_v58, %v7370_v38 }
 0x742   : > { %v7274_v56 = vrot.slane %v6470_v44, 1  ;;  %v7282_v22 = vrot.slane %v6529_v1, 3  ;;  %v8706_v14 = vpack.c.bf16 %v7365_v43, %v7364_v6 }
 0x744   : > { %v7276_v30 = vadd.f32 %v7274_v56, %v7272_v49  ;;  %8707 = vmatpush3.bf16.msra.mxu0 %v8706_v14 }
 0x745   : > { %8708 = vmatprep.subr.bf16.mxu0 %v9013_v28 }
 0x746   : > { %v7280_v2 = vadd.f32 %v7278_v51, %v7276_v30  ;;  %v6474_v29 = vpop.f32.mrb[240].mxu0  ;;  %v6533_v61 = vpop.f32.mrb[236].mxu1 }
 0x747   : > { %v6475_v19 = vpop.f32.mrb[241].mxu0  ;;  %v6534_v37 = vpop.f32.mrb[237].mxu1  ;;  %v7372_v29 = vld [vmem:[%s12123_s7 + $0x50] sm:$0xff] }
 0x748   : > { %v7284_v25 = vadd.f32 %v7282_v22, %v7280_v2  ;;  %v6476_v16 = vpop.f32.mrb[242].mxu0  ;;  %v6535_v0 = vpop.f32.mrb[238].mxu1  ;;  %8710 = vmatpush3.bf16.msra.mxu0 %v8709_v4  ;;  %v7373_v19 = vld [vmem:[%s12123_s7 + $0x58] sm:$0xff]  ;;  %v7375_v37 = vld [vmem:[%s12123_s7 + $0x68] sm:$0xff] }
 0x749   : > { %v6477_v18 = vpop.f32.mrb[243].mxu0  ;;  %v6536_v9 = vpop.f32.mrb[239].mxu1  ;;  %8711 = vmatprep.subr.bf16.mxu0 %v9013_v28  ;;  %v7374_v16 = vld [vmem:[%s12123_s7 + $0x60] sm:$0xff] }
 0x74a   : > { %v8721_v0 = vpack.c.bf16 %v7375_v37, %v7374_v16 }
 0x74c   : > { %8713 = vmatpush3.bf16.msra.mxu0 %v8712_v10 }
 0x74d   : > { %8714 = vmatprep.subr.bf16.mxu0 %v9013_v28 }
 0x74e   : > { %v6572_v59 = vpop.f32.mrb[244].mxu0  ;;  %v6631_v55 = vpop.f32.mrb[240].mxu1 }
 0x74f   : > { %v6573_v7 = vpop.f32.mrb[245].mxu0  ;;  %v6632_v60 = vpop.f32.mrb[241].mxu1 }
 0x750   : > { %v6574_v17 = vpop.f32.mrb[246].mxu0  ;;  %v6633_v63 = vpop.f32.mrb[242].mxu1  ;;  %8716 = vmatpush3.bf16.msra.mxu0 %v8715_v3 }
 0x751   : > { %v6575_v5 = vpop.f32.mrb[247].mxu0  ;;  %v6634_v42 = vpop.f32.mrb[243].mxu1  ;;  %8717 = vmatprep.subr.bf16.mxu0 %v9013_v28  ;;  %v7377_v63 = vld [vmem:[%s12123_s7 + $0x78] sm:$0xff] }
 0x752   : > { %v7376_v5 = vld [vmem:[%s12123_s7 + $0x70] sm:$0xff] }
 0x753   : > { %v8724_v36 = vpack.c.bf16 %v7377_v63, %v7376_v5 }
 0x756   : > { %v6578_v27 = vpop.f32.mrb[248].mxu0  ;;  %v6637_v48 = vpop.f32.mrb[244].mxu1 }
 0x757   : > { %v6579_v15 = vpop.f32.mrb[249].mxu0  ;;  %v6638_v62 = vpop.f32.mrb[245].mxu1  ;;  %v12146_v27 = vmov 0.0  }
 0x758   : > { %v6580_v41 = vpop.f32.mrb[250].mxu0  ;;  %v6639_v52 = vpop.f32.mrb[246].mxu1  ;;  %8509 = vmatprep.mubr.msk.f32.mxu0 %vm9014_vm9, %v12146_v27 }
 0x759   : > { %v6581_v13 = vpop.f32.mrb[251].mxu0  ;;  %v6640_v33 = vpop.f32.mrb[247].mxu1 }
 0x75e   : > { %v6584_v47 = vpop.f32.mrb[252].mxu0  ;;  %v6643_v39 = vpop.f32.mrb[248].mxu1 }
 0x75f   : > { %v6585_v32 = vpop.f32.mrb[253].mxu0  ;;  %v6644_v26 = vpop.f32.mrb[249].mxu1 }
 0x760   : > { %v6586_v40 = vpop.f32.mrb[254].mxu0  ;;  %v6645_v20 = vpop.f32.mrb[250].mxu1 }
 0x761   : > { %v7286_v23 = vrot.slane %v6586_v40, 4  ;;  %v6588_v35 = vpop.f32.mrb[255].mxu0  ;;  %v6647_v46 = vpop.f32.mrb[251].mxu1  ;;  %v7294_v8 = vrot.slane %v6645_v20, 6 }
 0x762   : > { %v7290_v21 = vrot.slane %v6588_v35, 5  ;;  %v7298_v44 = vrot.slane %v6647_v46, 7 }
 0x763   : > { %v7288_v54 = vadd.f32 %v7286_v23, %v7284_v25  ;;  %v8718_v25 = vpack.c.bf16 %v7373_v19, %v7372_v29 }
 0x765   : > { %v7292_v34 = vadd.f32 %v7290_v21, %v7288_v54  ;;  %8719 = vmatpush3.bf16.msra.mxu0 %v8718_v25 }
 0x766   : > { %v6592_v24 = vpop.f32.mrb[0].mxu0  ;;  %v6651_v56 = vpop.f32.mrb[252].mxu1  ;;  %8720 = vmatprep.subr.bf16.mxu0 %v9013_v28 }
 0x767   : > { %v7296_v49 = vadd.f32 %v7294_v8, %v7292_v34  ;;  %v6593_v12 = vpop.f32.mrb[1].mxu0  ;;  %v6652_v1 = vpop.f32.mrb[253].mxu1 }
 0x768   : > { %v6594_v51 = vpop.f32.mrb[2].mxu0  ;;  %v6653_v2 = vpop.f32.mrb[254].mxu1 }
 0x769   : > { %v6595_v30 = vpop.f32.mrb[3].mxu0  ;;  %v7300_v22 = vadd.f32 %v7298_v44, %v7296_v49  ;;  %v6654_v61 = vpop.f32.mrb[255].mxu1  ;;  %8722 = vmatpush3.bf16.msra.mxu0 %v8721_v0 }
 0x76a   : > { %8723 = vmatprep.subr.bf16.mxu0 %v9013_v28 }
 0x76d   : > { %8725 = vmatpush3.bf16.msra.mxu0 %v8724_v36 }
 0x76e   : > { %v6690_v18 = vpop.f32.mrb[4].mxu0  ;;  %v6749_v59 = vpop.f32.mrb[0].mxu1 }
 0x76f   : > { %v6691_v9 = vpop.f32.mrb[5].mxu0  ;;  %v6750_v55 = vpop.f32.mrb[1].mxu1 }
 0x770   : > { %v6692_v7 = vpop.f32.mrb[6].mxu0  ;;  %v6751_v60 = vpop.f32.mrb[2].mxu1 }
 0x771   : > { %v6693_v17 = vpop.f32.mrb[7].mxu0  ;;  %v6752_v42 = vpop.f32.mrb[3].mxu1 }
 0x776   : > { %v6696_v57 = vpop.f32.mrb[8].mxu0  ;;  %v6755_v15 = vpop.f32.mrb[4].mxu1 }
 0x777   : > { %v6697_v53 = vpop.f32.mrb[9].mxu0  ;;  %v6756_v41 = vpop.f32.mrb[5].mxu1 }
 0x778   : > { %v6698_v48 = vpop.f32.mrb[10].mxu0  ;;  %v6757_v62 = vpop.f32.mrb[6].mxu1 }
 0x779   : > { %v6699_v28 = vpop.f32.mrb[11].mxu0  ;;  %v6758_v13 = vpop.f32.mrb[7].mxu1 }
 0x77e   : > { %v6702_v52 = vpop.f32.mrb[12].mxu0  ;;  %v6761_v43 = vpop.f32.mrb[8].mxu1 }
 0x77f   : > { %v6703_v6 = vpop.f32.mrb[13].mxu0  ;;  %v6762_v14 = vpop.f32.mrb[9].mxu1 }
 0x780   : > { %v6704_v33 = vpop.f32.mrb[14].mxu0  ;;  %v6763_v11 = vpop.f32.mrb[10].mxu1 }
 0x781   : > { %v6705_v31 = vpop.f32.mrb[15].mxu0  ;;  %v6764_v47 = vpop.f32.mrb[11].mxu1 }
 0x786   : > { %v6708_v4 = vpop.f32.mrb[16].mxu0  ;;  %v6767_v40 = vpop.f32.mrb[12].mxu1 }
 0x787   : > { %v7301_v32 = vadd.f32 %v7300_v22, %v6708_v4  ;;  %v6710_v39 = vpop.f32.mrb[17].mxu0  ;;  %v7307_v35 = vrot.slane %v6767_v40, 2  ;;  %v6769_v20 = vpop.f32.mrb[13].mxu1 }
 0x788   : > { %v7303_v26 = vrot.slane %v6710_v39, 1  ;;  %v6712_v23 = vpop.f32.mrb[18].mxu0  ;;  %v6771_v45 = vpop.f32.mrb[14].mxu1  ;;  %v7311_v46 = vrot.slane %v6769_v20, 3 }
 0x789   : > { %v6713_v50 = vpop.f32.mrb[19].mxu0  ;;  %v6772_v10 = vpop.f32.mrb[15].mxu1 }
 0x78a   : > { %v7305_v21 = vadd.f32 %v7303_v26, %v7301_v32 }
 0x78c   : > { %v7309_v54 = vadd.f32 %v7307_v35, %v7305_v21 }
 0x78e   : > { %v7313_v34 = vadd.f32 %v7311_v46, %v7309_v54  ;;  %v6808_v8 = vpop.f32.mrb[20].mxu0  ;;  %v6867_v58 = vpop.f32.mrb[16].mxu1 }
 0x78f   : > { %v6809_v38 = vpop.f32.mrb[21].mxu0  ;;  %v6868_v3 = vpop.f32.mrb[17].mxu1 }
 0x790   : > { %v6810_v24 = vpop.f32.mrb[22].mxu0  ;;  %v6869_v44 = vpop.f32.mrb[18].mxu1 }
 0x791   : > { %v6811_v49 = vpop.f32.mrb[23].mxu0  ;;  %v6870_v12 = vpop.f32.mrb[19].mxu1 }
 0x796   : > { %v6814_v56 = vpop.f32.mrb[24].mxu0  ;;  %v6873_v1 = vpop.f32.mrb[20].mxu1 }
 0x797   : > { %v6815_v51 = vpop.f32.mrb[25].mxu0  ;;  %v6874_v2 = vpop.f32.mrb[21].mxu1 }
 0x798   : > { %v6816_v30 = vpop.f32.mrb[26].mxu0  ;;  %v6875_v29 = vpop.f32.mrb[22].mxu1 }
 0x799   : > { %v6817_v22 = vpop.f32.mrb[27].mxu0  ;;  %v6876_v19 = vpop.f32.mrb[23].mxu1 }
 0x79e   : > { %v6820_v61 = vpop.f32.mrb[28].mxu0  ;;  %v6879_v16 = vpop.f32.mrb[24].mxu1 }
 0x79f   : > { %v6821_v25 = vpop.f32.mrb[29].mxu0  ;;  %v6880_v18 = vpop.f32.mrb[25].mxu1 }
 0x7a0   : > { %v6822_v37 = vpop.f32.mrb[30].mxu0  ;;  %v6881_v9 = vpop.f32.mrb[26].mxu1 }
 0x7a1   : > { %v6823_v0 = vpop.f32.mrb[31].mxu0  ;;  %v6882_v59 = vpop.f32.mrb[27].mxu1 }
 0x7a6   : > { %v6826_v7 = vpop.f32.mrb[32].mxu0  ;;  %v6885_v60 = vpop.f32.mrb[28].mxu1 }
 0x7a7   : > { %v7315_v55 = vrot.slane %v6826_v7, 4  ;;  %v6828_v17 = vpop.f32.mrb[33].mxu0  ;;  %v6887_v42 = vpop.f32.mrb[29].mxu1  ;;  %v7323_v57 = vrot.slane %v6885_v60, 6 }
 0x7a8   : > { %v7319_v5 = vrot.slane %v6828_v17, 5  ;;  %v6830_v63 = vpop.f32.mrb[34].mxu0  ;;  %v6889_v53 = vpop.f32.mrb[30].mxu1  ;;  %v7327_v28 = vrot.slane %v6887_v42, 7 }
 0x7a9   : > { %v7317_v36 = vadd.f32 %v7315_v55, %v7313_v34  ;;  %v6831_v27 = vpop.f32.mrb[35].mxu0  ;;  %v6890_v15 = vpop.f32.mrb[31].mxu1 }
 0x7ab   : > { %v7321_v48 = vadd.f32 %v7319_v5, %v7317_v36 }
 0x7ad   : > { %v7325_v41 = vadd.f32 %v7323_v57, %v7321_v48 }
 0x7ae   : > { %v6926_v62 = vpop.f32.mrb[36].mxu0  ;;  %v6985_v52 = vpop.f32.mrb[32].mxu1 }
 0x7af   : > { %v6927_v13 = vpop.f32.mrb[37].mxu0  ;;  %v7329_v6 = vadd.f32 %v7327_v28, %v7325_v41  ;;  %v6986_v33 = vpop.f32.mrb[33].mxu1 }
 0x7b0   : > { %v6928_v43 = vpop.f32.mrb[38].mxu0  ;;  %v6987_v31 = vpop.f32.mrb[34].mxu1 }
 0x7b1   : > { %v6929_v14 = vpop.f32.mrb[39].mxu0  ;;  %v6988_v11 = vpop.f32.mrb[35].mxu1 }
 0x7b6   : > { %v6932_v47 = vpop.f32.mrb[40].mxu0  ;;  %v6991_v32 = vpop.f32.mrb[36].mxu1 }
 0x7b7   : > { %v6933_v4 = vpop.f32.mrb[41].mxu0  ;;  %v6992_v40 = vpop.f32.mrb[37].mxu1 }
 0x7b8   : > { %v6934_v39 = vpop.f32.mrb[42].mxu0  ;;  %v6993_v23 = vpop.f32.mrb[38].mxu1 }
 0x7b9   : > { %v6935_v26 = vpop.f32.mrb[43].mxu0  ;;  %v6994_v35 = vpop.f32.mrb[39].mxu1  ;;  %v7359_v23 = vld [vmem:[%s12122_s6] sm:$0x1] }
 0x7be   : > { %v6938_v20 = vpop.f32.mrb[44].mxu0  ;;  %v6997_v45 = vpop.f32.mrb[40].mxu1 }
 0x7bf   : > { %v6939_v50 = vpop.f32.mrb[45].mxu0  ;;  %v6998_v46 = vpop.f32.mrb[41].mxu1  ;;  %v7378_v45 = vld [vmem:[%s12124_s8] sm:$0x1] }
 0x7c0   : > { %v6940_v21 = vpop.f32.mrb[46].mxu0  ;;  %v6999_v54 = vpop.f32.mrb[42].mxu1 }
 0x7c1   : > { %v6941_v10 = vpop.f32.mrb[47].mxu0  ;;  %v7000_v34 = vpop.f32.mrb[43].mxu1 }
 0x7c6   : > { %v6944_v8 = vpop.f32.mrb[48].mxu0  ;;  %v7003_v58 = vpop.f32.mrb[44].mxu1 }
 0x7c7   : > { %v6945_v38 = vpop.f32.mrb[49].mxu0  ;;  %v7004_v3 = vpop.f32.mrb[45].mxu1 }
 0x7c8   : > { %v6946_v24 = vpop.f32.mrb[50].mxu0  ;;  %v7005_v12 = vpop.f32.mrb[46].mxu1 }
 0x7c9   : > { %v7330_v49 = vadd.f32 %v7329_v6, %v6946_v24  ;;  %v6948_v44 = vpop.f32.mrb[51].mxu0  ;;  %v7336_v51 = vrot.slane %v7005_v12, 2  ;;  %v7007_v1 = vpop.f32.mrb[47].mxu1 }
 0x7ca   : > { %v7332_v56 = vrot.slane %v6948_v44, 1  ;;  %v7340_v22 = vrot.slane %v7007_v1, 3 }
 0x7cc   : > { %v7334_v30 = vadd.f32 %v7332_v56, %v7330_v49 }
 0x7ce   : > { %v7338_v2 = vadd.f32 %v7336_v51, %v7334_v30  ;;  %v7044_v29 = vpop.f32.mrb[52].mxu0  ;;  %v7103_v61 = vpop.f32.mrb[48].mxu1 }
 0x7cf   : > { %v7045_v19 = vpop.f32.mrb[53].mxu0  ;;  %v7104_v37 = vpop.f32.mrb[49].mxu1 }
 0x7d0   : > { %v7342_v25 = vadd.f32 %v7340_v22, %v7338_v2  ;;  %v7046_v16 = vpop.f32.mrb[54].mxu0  ;;  %v7105_v0 = vpop.f32.mrb[50].mxu1 }
 0x7d1   : > { %v7047_v18 = vpop.f32.mrb[55].mxu0  ;;  %v7106_v9 = vpop.f32.mrb[51].mxu1 }
 0x7d6   : > { %v7050_v59 = vpop.f32.mrb[56].mxu0  ;;  %v7109_v55 = vpop.f32.mrb[52].mxu1 }
 0x7d7   : > { %v7051_v7 = vpop.f32.mrb[57].mxu0  ;;  %v7110_v60 = vpop.f32.mrb[53].mxu1 }
 0x7d8   : > { %v7052_v17 = vpop.f32.mrb[58].mxu0  ;;  %v7111_v63 = vpop.f32.mrb[54].mxu1 }
 0x7d9   : > { %v7053_v5 = vpop.f32.mrb[59].mxu0  ;;  %v7112_v42 = vpop.f32.mrb[55].mxu1 }
 0x7de   : > { %v7056_v36 = vpop.f32.mrb[60].mxu0  ;;  %v7115_v27 = vpop.f32.mrb[56].mxu1 }
 0x7df   : > { %v7057_v57 = vpop.f32.mrb[61].mxu0  ;;  %v7116_v15 = vpop.f32.mrb[57].mxu1 }
 0x7e0   : > { %v7058_v53 = vpop.f32.mrb[62].mxu0  ;;  %v7117_v41 = vpop.f32.mrb[58].mxu1 }
 0x7e1   : > { %v7059_v48 = vpop.f32.mrb[63].mxu0  ;;  %v7118_v28 = vpop.f32.mrb[59].mxu1 }
 0x7e6   : > { %v7062_v62 = vpop.f32.mrb[64].mxu0  ;;  %v7121_v52 = vpop.f32.mrb[60].mxu1 }
 0x7e7   : > { %v7063_v13 = vpop.f32.mrb[65].mxu0  ;;  %v7122_v43 = vpop.f32.mrb[61].mxu1 }
 0x7e8   : > { %v7064_v6 = vpop.f32.mrb[66].mxu0  ;;  %v7123_v31 = vpop.f32.mrb[62].mxu1 }
 0x7e9   : > { %v7344_v33 = vrot.slane %v7064_v6, 4  ;;  %v7066_v14 = vpop.f32.mrb[67].mxu0  ;;  %v7125_v47 = vpop.f32.mrb[63].mxu1  ;;  %v7352_v39 = vrot.slane %v7123_v31, 6 }
 0x7ea   : > { %v7348_v11 = vrot.slane %v7066_v14, 5  ;;  %v7356_v26 = vrot.slane %v7125_v47, 7 }
 0x7eb   : > { %v7346_v4 = vadd.f32 %v7344_v33, %v7342_v25 }
 0x7ed   : > { %v7350_v32 = vadd.f32 %v7348_v11, %v7346_v4 }
 0x7ef   : > { %v7354_v40 = vadd.f32 %v7352_v39, %v7350_v32 }
 0x7f1   : > { %v7358_v35 = vadd.f32 %v7356_v26, %v7354_v40 }
 0x7f3   : > { %v7360_v20 = vadd.f32 %v7359_v23, %v7358_v35 }
 0x7f5   : > { %v7361_v50 = vmax.f32 %v7360_v20, 0.0 }
 0x7f7   : > { %8510 = vmatmul.mubr.f32.vlgmr.msra.gmra.mrb[68].mxu0 %v7361_v50 }
 0x8ca   : > { %v7445_v21 = vpop.f32.mrb[68].mxu0 }
 0x8cb   : > { %v7446_v46 = vadd.f32 %v7445_v21, %v7378_v45  ;;  %v8511_v10 = vpop.f32.mrb[69].mxu0 }
 0x8cd   : > { %7450 = vst.msk [vmem:[%s9993_s26] sm:$0x1] %vm7449_vm10, %v7446_v46 }
 0x8ce   : > { %8929 = shalt.err (!%p8926_p3)
}
 0x8cf   : > { %s8930_s26 = scalar_lea.hbm %s12071_s28, 16  ;;  %s8934_s29 = scalar_lea.hbm %s12126_s10, 32 }
 0x8d0   : > { %p8931_p4 = scmp.ne.s32.totalorder %s12071_s28, %s8930_s26  ;;  %p8935_p9 = scmp.lt.u32.totalorder %s12071_s28, %s12126_s10 }
 0x8d1   : > { %p8936_p10 = scmp.lt.u32.totalorder %s8934_s29, %s8930_s26  ;;  %p8938_p12 = scmp.lt.u32.totalorder %s8930_s26, %s12071_s28 }
 0x8d2   : > { %p8932_p7 = pnand %p8931_p4, %p9109_p5 }
 0x8d3   : > { %p8937_p11 = por %p8936_p10, %p8935_p9 }
 0x8d4   : > { %p8933_p8 = pneg %p8932_p7 }
 0x8d5   : > { %p8939_p13 = por %p8938_p12, %p8937_p11 }
 0x8d7   : > { %p8940_p0 = pnand %p8939_p13, %p8933_p8 }
 0x8d9   : > { %8943 = shalt.err (!%p8940_p0)
}
 0x8da   : > { %8727 = dma.vmem_to_hbm [thread:$0]  (%p9109_p5), %s12073_s11, 16, %s12071_s28, %s7452_s22  }
 0x8db PF: > { %p8733_p1 = scmp.ge.s32.totalorder %s8980_s16, 2  ;;  %s7476_s27 = sand.u32 1, %s8968_s13  }
 0x8dc   : > { %s7477_s17 = scalar_lea.sflag [#allocation5], %s7476_s27 }
 0x8dd   : > { %p8730_p2 = pnand %p8733_p1, %p9113_p6 }
 0x8df   : > { %8963 = dma.done.wait (!%p8730_p2), %s7477_s17, 16  }
 0x8e0   : > { %8965 = vsyncadd (!%p8730_p2), %s7477_s17, 4294967280  ;;  %s12148_s25 = sld [smem:[#allocation9_spill]]  ;;  %p20_p3 = scmp.ge.s32.totalorder %s9096_s19, 4  }
 0x8e1   : > { %s12149_s13 = smov %s8972_s14  ;;  %s12150_s14 = smov %s8976_s15 }
 0x8e2   : > { %s12152_s16 = smov %s9096_s19  ;;  %22 = sbr.rel (!%p20_p3) target bundleno = 3 (0x3), region = 133 }
 0x8e6   : > { %s12151_s15 = smov %s12148_s25 }
 0x8e9   :  { %7481 = vsyncpa [#allocation5], 1 }
 0x8ea   :  { %7483 = vsyncpa [#allocation5 + $0x1], 1 }
 0x8eb   :  { %7484 = vsyncmov [#allocation3] }
 0x8ee   :  { %s7485_s16 = vpop.sfrf %7484 }
 0x8ef   :  { %p8091_p5 = scmp.ne.s32.totalorder %s7485_s16, 0 }
 0x8f1   :  { %7489 = shalt.err (%p8091_p5)  }

</bundles_post_ra>
